<compile_context>
chip_gen: v7x
topology: tpu7x:2x2x1
jax: 0.10.0
libtpu: 0.0.40
codegen_flags: <defaults>
</compile_context>

<pallas_src>
import functools

import jax
import jax.numpy as jnp
from jax import lax
from jax.experimental import pallas as pl
from jax.experimental.pallas import tpu as pltpu


# -----------------------------------------------------------------------------
# Fused GEMM + bias (+ optional ReLU) kernel — single full-K block, no scratch.
# Used for the im2col'd convolutions.
# -----------------------------------------------------------------------------
def _linear_kernel(x_ref, w_ref, b_ref, o_ref, *, relu):
    acc = jnp.dot(x_ref[...], w_ref[...], preferred_element_type=jnp.float32)
    acc = acc + b_ref[...]
    if relu:
        acc = jnp.maximum(acc, 0.0)
    o_ref[...] = acc.astype(o_ref.dtype)


def pallas_linear(x, w, b, *, relu, block_m=None, block_n=None,
                  out_dtype=jnp.float32):
    """y = x @ w + b (optionally ReLU).  K is never tiled.

    Block dims that are not multiples of (8, 128) always equal the full
    array dims, so the (8,128) BlockSpec constraint is satisfied.
    """
    M, K = x.shape
    Kw, N = w.shape
    assert K == Kw, (K, Kw)
    bm = M if block_m is None else block_m
    bn = N if block_n is None else block_n
    assert M % bm == 0 and N % bn == 0, (M, bm, N, bn)
    grid = (M // bm, N // bn)

    flops = 2 * M * K * N
    bytes_accessed = (x.size * x.dtype.itemsize + w.size * w.dtype.itemsize
                      + b.size * b.dtype.itemsize
                      + M * N * jnp.dtype(out_dtype).itemsize)

    return pl.pallas_call(
        functools.partial(_linear_kernel, relu=relu),
        out_shape=jax.ShapeDtypeStruct((M, N), out_dtype),
        grid_spec=pltpu.PrefetchScalarGridSpec(
            num_scalar_prefetch=0,
            grid=grid,
            in_specs=[
                pl.BlockSpec((bm, K), lambda i, j: (i, 0)),
                pl.BlockSpec((K, bn), lambda i, j: (0, j)),
                pl.BlockSpec((1, bn), lambda i, j: (0, j)),
            ],
            out_specs=pl.BlockSpec((bm, bn), lambda i, j: (i, j)),
        ),
        compiler_params=pltpu.CompilerParams(
            dimension_semantics=("parallel", "parallel")),
        cost_estimate=pl.CostEstimate(flops=flops, transcendentals=0,
                                      bytes_accessed=bytes_accessed),
    )(x, w, b)


def _pick_block_m(M, target=1024):
    """Largest multiple-of-8 divisor of M that is <= target (or M itself)."""
    if M <= target:
        return M
    best = 8 if M % 8 == 0 else M
    for d in range(8, target + 1, 8):
        if M % d == 0:
            best = d
    return best


# -----------------------------------------------------------------------------
# Fused FC head: fc1 -> ReLU -> fc1b -> ReLU -> fc2 -> ReLU -> fc3.
# One pallas_call; all (padded, bf16) weights resident in VMEM.
# -----------------------------------------------------------------------------
def _fc_head_kernel(x_ref, w1_ref, b1_ref, w2_ref, b2_ref, w3_ref, b3_ref,
                    w4_ref, b4_ref, o_ref):
    def lin(h, w_ref, b_ref, relu):
        y = jnp.dot(h, w_ref[...], preferred_element_type=jnp.float32)
        y = y + b_ref[...]
        if relu:
            y = jnp.maximum(y, 0.0)
        return y

    h = lin(x_ref[...], w1_ref, b1_ref, True).astype(jnp.bfloat16)   # (M, 1024)
    h = lin(h, w2_ref, b2_ref, True).astype(jnp.bfloat16)            # (M, 128)
    h = lin(h, w3_ref, b3_ref, True).astype(jnp.bfloat16)            # (M, 128)
    o_ref[...] = lin(h, w4_ref, b4_ref, False).astype(o_ref.dtype)   # (M, 128)


def pallas_fc_head(x, prep):
    """x: (M, 3136) bf16 -> (M, 1) f32.  Padded columns are zero by prep."""
    M = x.shape[0]
    args = (x,
            prep["fc1_w"], prep["fc1_b"],
            prep["fc1b_w"], prep["fc1b_b"],
            prep["fc2_w"], prep["fc2_b"],
            prep["fc3_w"], prep["fc3_b"])

    def full_spec(a):                       # whole (2-D) array as one block
        return pl.BlockSpec(a.shape, lambda i: (0, 0))

    flops = 2 * M * (3136 * 1024 + 1024 * 128 + 128 * 128 + 128 * 128)
    bytes_accessed = sum(int(a.size) * a.dtype.itemsize for a in args) + M * 128 * 4

    out = pl.pallas_call(
        _fc_head_kernel,
        out_shape=jax.ShapeDtypeStruct((M, 128), jnp.float32),
        grid_spec=pltpu.PrefetchScalarGridSpec(
            num_scalar_prefetch=0,
            grid=(1,),
            in_specs=[full_spec(a) for a in args],
            out_specs=pl.BlockSpec((M, 128), lambda i: (0, 0)),
        ),
        compiler_params=pltpu.CompilerParams(
            dimension_semantics=("arbitrary",),
            vmem_limit_bytes=32 * 1024 * 1024),
        cost_estimate=pl.CostEstimate(flops=flops, transcendentals=0,
                                      bytes_accessed=bytes_accessed),
    )(*args)
    return out[:, :1]                        # real fc3 output lives in column 0


# -----------------------------------------------------------------------------
# Conv2d (stride 1) + ReLU via NHWC im2col + Pallas GEMM; MaxPool in plain jnp.
# -----------------------------------------------------------------------------
def _im2col_nhwc(x, kh, kw):
    """x: (N, H, W, C) -> patches (N*Ho*Wo, kh*kw*C), columns ordered (kh,kw,C)."""
    N, H, W, C = x.shape
    Ho, Wo = H - kh + 1, W - kw + 1
    cols = [x[:, i:i + Ho, j:j + Wo, :] for i in range(kh) for j in range(kw)]
    p = jnp.concatenate(cols, axis=-1)            # (N, Ho, Wo, kh*kw*C)
    return p.reshape(N * Ho * Wo, kh * kw * C), Ho, Wo


def conv2d_relu_nhwc(x, wm, bm, *, ksize, padding):
    """x: (N,H,W,C) f32; wm: (kh*kw*C, O) f32; bm: (1, O) f32."""
    if padding:
        x = jnp.pad(x, ((0, 0), (padding, padding), (padding, padding), (0, 0)))
    patches, Ho, Wo = _im2col_nhwc(x, ksize, ksize)
    blk_m = _pick_block_m(patches.shape[0])
    y = pallas_linear(patches, wm, bm, relu=True, block_m=blk_m,
                      out_dtype=jnp.float32)
    return y.reshape(x.shape[0], Ho, Wo, wm.shape[1])


def maxpool_2x2_nhwc(x):
    N, H, W, C = x.shape
    return x.reshape(N, H // 2, 2, W // 2, 2, C).max(axis=(2, 4))


# -----------------------------------------------------------------------------
# One-time parameter preparation (outside the jitted forward).
# -----------------------------------------------------------------------------
def prepare_params(p):
    f32, bf16 = jnp.float32, jnp.bfloat16

    def conv_wm(w):              # (O, C, kh, kw) -> (kh*kw*C, O), NHWC im2col order
        O = w.shape[0]
        return jnp.transpose(w, (0, 2, 3, 1)).reshape(O, -1).T.astype(f32)

    def pad_to(a, shape):
        out = jnp.zeros(shape, a.dtype)
        return out.at[tuple(slice(0, s) for s in a.shape)].set(a)

    def fc_wm(w, k_pad, n_pad):  # torch (N, K) -> padded (Kp, Np) bf16
        return pad_to(w.T.astype(f32), (k_pad, n_pad)).astype(bf16)

    def fc_b(b, n_pad):
        return pad_to(b.reshape(1, -1).astype(f32), (1, n_pad))

    # Re-permute fc1 rows from torch (C,H,W) flatten order to NHWC flatten order.
    fc1_w = p["fc1_w"].reshape(1000, 16, 14, 14).transpose(0, 2, 3, 1)
    fc1_w = fc1_w.reshape(1000, 3136)

    return {
        "conv1_w": conv_wm(p["conv1_w"]),                       # (25, 6)   f32
        "conv1_b": p["conv1_b"].reshape(1, -1).astype(f32),     # (1, 6)
        "conv2_w": conv_wm(p["conv2_w"]),                       # (150, 16) f32
        "conv2_b": p["conv2_b"].reshape(1, -1).astype(f32),     # (1, 16)
        "fc1_w": fc_wm(fc1_w, 3136, 1024),                      # (3136, 1024) bf16
        "fc1_b": fc_b(p["fc1_b"], 1024),
        "fc1b_w": fc_wm(p["fc1b_w"], 1024, 128),                # (1024, 128) bf16
        "fc1b_b": fc_b(p["fc1b_b"], 128),
        "fc2_w": fc_wm(p["fc2_w"], 128, 128),                   # (128, 128) bf16
        "fc2_b": fc_b(p["fc2_b"], 128),
        "fc3_w": fc_wm(p["fc3_w"], 128, 128),                   # (128, 128) bf16
        "fc3_b": fc_b(p["fc3_b"], 128),
    }


# -----------------------------------------------------------------------------
# LeNet forward (matches the PyTorch module; activations NHWC inside).
# -----------------------------------------------------------------------------
def lenet_forward(prep, x):
    n = x.shape[0]
    assert x.shape[1] == 1
    x = jnp.transpose(x, (0, 2, 3, 1))                          # NCHW (C=1) -> NHWC
    x = conv2d_relu_nhwc(x, prep["conv1_w"], prep["conv1_b"],
                         ksize=5, padding=2)                    # (N, 64, 64, 6)
    x = maxpool_2x2_nhwc(x)                                     # (N, 32, 32, 6)
    x = conv2d_relu_nhwc(x, prep["conv2_w"], prep["conv2_b"],
                         ksize=5, padding=0)                    # (N, 28, 28, 16)
    x = maxpool_2x2_nhwc(x)                                     # (N, 14, 14, 16)
    x = x.reshape(n, 14 * 14 * 16).astype(jnp.bfloat16)         # NHWC flatten
    return pallas_fc_head(x, prep)                              # (N, 1)


# -----------------------------------------------------------------------------
# Pure-JAX f32 reference (PyTorch semantics, NCHW) for validation.
# -----------------------------------------------------------------------------
def lenet_reference(params, x):
    def conv(x, w, b, pad):
        dn = lax.conv_dimension_numbers(x.shape, w.shape, ("NCHW", "OIHW", "NCHW"))
        y = lax.conv_general_dilated(x, w, (1, 1), [(pad, pad), (pad, pad)],
                                     dimension_numbers=dn)
        return jnp.maximum(y + b[None, :, None, None], 0.0)

    def pool(x):
        n, c, h, w = x.shape
        return x.reshape(n, c, h // 2, 2, w // 2, 2).max(axis=(3, 5))

    x = pool(conv(x, params["conv1_w"], params["conv1_b"], 2))
    x = pool(conv(x, params["conv2_w"], params["conv2_b"], 0))
    x = x.reshape(x.shape[0], -1)
    x = jnp.maximum(x @ params["fc1_w"].T + params["fc1_b"], 0.0)
    x = jnp.maximum(x @ params["fc1b_w"].T + params["fc1b_b"], 0.0)
    x = jnp.maximum(x @ params["fc2_w"].T + params["fc2_b"], 0.0)
    return x @ params["fc3_w"].T + params["fc3_b"]


def init_params(key):
    """Deterministic PyTorch-default-style (uniform +-1/sqrt(fan_in)) init."""
    def uni(k, shape, fan_in):
        bound = 1.0 / float(fan_in) ** 0.5
        return jax.random.uniform(k, shape, jnp.float32, -bound, bound)

    ks = jax.random.split(key, 12)
    return {
        "conv1_w": uni(ks[0], (6, 1, 5, 5), 1 * 5 * 5),
        "conv1_b": uni(ks[1], (6,), 1 * 5 * 5),
        "conv2_w": uni(ks[2], (16, 6, 5, 5), 6 * 5 * 5),
        "conv2_b": uni(ks[3], (16,), 6 * 5 * 5),
        "fc1_w":  uni(ks[4], (1000, 3136), 3136),
        "fc1_b":  uni(ks[5], (1000,), 3136),
        "fc1b_w": uni(ks[6], (120, 1000), 1000),
        "fc1b_b": uni(ks[7], (120,), 1000),
        "fc2_w":  uni(ks[8], (84, 120), 120),
        "fc2_b":  uni(ks[9], (84,), 120),
        "fc3_w":  uni(ks[10], (1, 84), 84),
        "fc3_b":  uni(ks[11], (1,), 84),
    }


if __name__ == "__main__":
    key = jax.random.PRNGKey(0)
    pkey, xkey = jax.random.split(key)
    params = init_params(pkey)
    prep = prepare_params(params)        # one-time layout/dtype prep (outside jit'd fwd)

    # fc1 expects 3136 = 16*14*14 features => input spatial size must be 64x64.
    x = jax.random.normal(xkey, (2, 1, 64, 64), jnp.float32)

    y = jax.block_until_ready(jax.jit(lenet_forward)(prep, x))
    assert y.shape == (2, 1), y.shape
    assert bool(jnp.all(jnp.isfinite(y)))

    # Validate against the f32 reference (loose tolerance: bf16 FC operands).
    y_ref = jax.block_until_ready(jax.jit(lenet_reference)(params, x))
    err = float(jnp.max(jnp.abs(y - y_ref)))
    scale = float(jnp.max(jnp.abs(y_ref)))
    assert err <= 5e-2 * scale + 5e-2, (err, scale)

    print("KERNEL_OK")
</pallas_src>

<mosaic_0001>
module attributes {stable_mosaic.version = 11 : i64} {
  func.func @_linear_kernel(%arg0: i32, %arg1: i32, %arg2: memref<1024x25xf32, #tpu.memory_space<vmem>>, %arg3: memref<25x6xf32, #tpu.memory_space<vmem>>, %arg4: memref<1x6xf32, #tpu.memory_space<vmem>>, %arg5: memref<1024x6xf32, #tpu.memory_space<vmem>>) attributes {dimension_semantics = [#tpu.dimension_semantics<parallel>, #tpu.dimension_semantics<parallel>], iteration_bounds = array<i64: 8, 1>, scalar_prefetch = 0 : i64, scratch_operands = 0 : i64, tpu.core_type = #tpu.core_type<tc>, window_params = [{transform_indices = @transform_0, window_bounds = array<i64: 1024, 25>}, {transform_indices = @transform_1, window_bounds = array<i64: 25, 6>}, {transform_indices = @transform_2, window_bounds = array<i64: 1, 6>}, {transform_indices = @transform_3, window_bounds = array<i64: 1024, 6>}]} {
    %c0 = arith.constant 0 : index
    %c0_0 = arith.constant 0 : index
    %0 = vector.load %arg2[%c0, %c0_0] : memref<1024x25xf32, #tpu.memory_space<vmem>>, vector<1024x25xf32>
    %c0_1 = arith.constant 0 : index
    %c0_2 = arith.constant 0 : index
    %1 = vector.load %arg3[%c0_1, %c0_2] : memref<25x6xf32, #tpu.memory_space<vmem>>, vector<25x6xf32>
    %cst = arith.constant dense<0.000000e+00> : vector<1024x6xf32>
    %2 = tpu.matmul %0, %1, %cst {dimension_numbers = #tpu.dot_dimension_numbers<[1], [0], [0], [1], [0, 0, 1, 1], [], []>} : vector<1024x25xf32>, vector<25x6xf32>, vector<1024x6xf32> -> vector<1024x6xf32>
    %c0_3 = arith.constant 0 : index
    %c0_4 = arith.constant 0 : index
    %3 = vector.load %arg4[%c0_3, %c0_4] : memref<1x6xf32, #tpu.memory_space<vmem>>, vector<1x6xf32>
    %4 = vector.broadcast %3 : vector<1x6xf32> to vector<1024x6xf32>
    %5 = arith.addf %2, %4 : vector<1024x6xf32>
    %cst_5 = arith.constant 0.000000e+00 : f32
    %6 = vector.broadcast %cst_5 : f32 to vector<1024x6xf32>
    %7 = arith.maximumf %5, %6 : vector<1024x6xf32>
    %c0_6 = arith.constant 0 : index
    %c0_7 = arith.constant 0 : index
    %8 = vector.load %arg5[%c0_6, %c0_7] : memref<1024x6xf32, #tpu.memory_space<vmem>>, vector<1024x6xf32>
    tpu.vector_store %arg5[%c0_6, %c0_7], %7 {strides = array<i32>} : memref<1024x6xf32, #tpu.memory_space<vmem>>, vector<1024x6xf32>,
    return
  }
  func.func @transform_0(%arg0: i32, %arg1: i32) -> (i32, i32) {
    %c0_i32 = arith.constant 0 : i32
    %c0_i32_0 = arith.constant 0 : i32
    return %arg0, %c0_i32 : i32, i32
  }
  func.func @transform_1(%arg0: i32, %arg1: i32) -> (i32, i32) {
    %c0_i32 = arith.constant 0 : i32
    %c0_i32_0 = arith.constant 0 : i32
    return %c0_i32, %arg1 : i32, i32
  }
  func.func @transform_2(%arg0: i32, %arg1: i32) -> (i32, i32) {
    %c0_i32 = arith.constant 0 : i32
    %c0_i32_0 = arith.constant 0 : i32
    return %c0_i32, %arg1 : i32, i32
  }
  func.func @transform_3(%arg0: i32, %arg1: i32) -> (i32, i32) {
    %c0_i32 = arith.constant 0 : i32
    return %arg0, %arg1 : i32, i32
  }
}

module attributes {stable_mosaic.version = 11 : i64} {
  func.func @_linear_kernel(%arg0: i32, %arg1: i32, %arg2: memref<784x150xf32, #tpu.memory_space<vmem>>, %arg3: memref<150x16xf32, #tpu.memory_space<vmem>>, %arg4: memref<1x16xf32, #tpu.memory_space<vmem>>, %arg5: memref<784x16xf32, #tpu.memory_space<vmem>>) attributes {dimension_semantics = [#tpu.dimension_semantics<parallel>, #tpu.dimension_semantics<parallel>], iteration_bounds = array<i64: 2, 1>, scalar_prefetch = 0 : i64, scratch_operands = 0 : i64, tpu.core_type = #tpu.core_type<tc>, window_params = [{transform_indices = @transform_0, window_bounds = array<i64: 784, 150>}, {transform_indices = @transform_1, window_bounds = array<i64: 150, 16>}, {transform_indices = @transform_2, window_bounds = array<i64: 1, 16>}, {transform_indices = @transform_3, window_bounds = array<i64: 784, 16>}]} {
    %c0 = arith.constant 0 : index
    %c0_0 = arith.constant 0 : index
    %0 = vector.load %arg2[%c0, %c0_0] : memref<784x150xf32, #tpu.memory_space<vmem>>, vector<784x150xf32>
    %c0_1 = arith.constant 0 : index
    %c0_2 = arith.constant 0 : index
    %1 = vector.load %arg3[%c0_1, %c0_2] : memref<150x16xf32, #tpu.memory_space<vmem>>, vector<150x16xf32>
    %cst = arith.constant dense<0.000000e+00> : vector<784x16xf32>
    %2 = tpu.matmul %0, %1, %cst {dimension_numbers = #tpu.dot_dimension_numbers<[1], [0], [0], [1], [0, 0, 1, 1], [], []>} : vector<784x150xf32>, vector<150x16xf32>, vector<784x16xf32> -> vector<784x16xf32>
    %c0_3 = arith.constant 0 : index
    %c0_4 = arith.constant 0 : index
    %3 = vector.load %arg4[%c0_3, %c0_4] : memref<1x16xf32, #tpu.memory_space<vmem>>, vector<1x16xf32>
    %4 = vector.broadcast %3 : vector<1x16xf32> to vector<784x16xf32>
    %5 = arith.addf %2, %4 : vector<784x16xf32>
    %cst_5 = arith.constant 0.000000e+00 : f32
    %6 = vector.broadcast %cst_5 : f32 to vector<784x16xf32>
    %7 = arith.maximumf %5, %6 : vector<784x16xf32>
    %c0_6 = arith.constant 0 : index
    %c0_7 = arith.constant 0 : index
    %8 = vector.load %arg5[%c0_6, %c0_7] : memref<784x16xf32, #tpu.memory_space<vmem>>, vector<784x16xf32>
    tpu.vector_store %arg5[%c0_6, %c0_7], %7 {strides = array<i32>} : memref<784x16xf32, #tpu.memory_space<vmem>>, vector<784x16xf32>,
    return
  }
  func.func @transform_0(%arg0: i32, %arg1: i32) -> (i32, i32) {
    %c0_i32 = arith.constant 0 : i32
    %c0_i32_0 = arith.constant 0 : i32
    return %arg0, %c0_i32 : i32, i32
  }
  func.func @transform_1(%arg0: i32, %arg1: i32) -> (i32, i32) {
    %c0_i32 = arith.constant 0 : i32
    %c0_i32_0 = arith.constant 0 : i32
    return %c0_i32, %arg1 : i32, i32
  }
  func.func @transform_2(%arg0: i32, %arg1: i32) -> (i32, i32) {
    %c0_i32 = arith.constant 0 : i32
    %c0_i32_0 = arith.constant 0 : i32
    return %c0_i32, %arg1 : i32, i32
  }
  func.func @transform_3(%arg0: i32, %arg1: i32) -> (i32, i32) {
    %c0_i32 = arith.constant 0 : i32
    return %arg0, %arg1 : i32, i32
  }
}

module attributes {stable_mosaic.version = 11 : i64} {
  func.func @_fc_head_kernel(%arg0: i32, %arg1: memref<2x3136xbf16, #tpu.memory_space<vmem>>, %arg2: memref<3136x1024xbf16, #tpu.memory_space<vmem>>, %arg3: memref<1x1024xf32, #tpu.memory_space<vmem>>, %arg4: memref<1024x128xbf16, #tpu.memory_space<vmem>>, %arg5: memref<1x128xf32, #tpu.memory_space<vmem>>, %arg6: memref<128x128xbf16, #tpu.memory_space<vmem>>, %arg7: memref<1x128xf32, #tpu.memory_space<vmem>>, %arg8: memref<128x128xbf16, #tpu.memory_space<vmem>>, %arg9: memref<1x128xf32, #tpu.memory_space<vmem>>, %arg10: memref<2x128xf32, #tpu.memory_space<vmem>>) attributes {dimension_semantics = [#tpu.dimension_semantics<arbitrary>], iteration_bounds = array<i64: 1>, scalar_prefetch = 0 : i64, scratch_operands = 0 : i64, tpu.core_type = #tpu.core_type<tc>, window_params = [{pipeline_mode = #tpu.pipeline_mode<synchronous>, transform_indices = @transform_0, window_bounds = array<i64: 2, 3136>}, {pipeline_mode = #tpu.pipeline_mode<synchronous>, transform_indices = @transform_1, window_bounds = array<i64: 3136, 1024>}, {pipeline_mode = #tpu.pipeline_mode<synchronous>, transform_indices = @transform_2, window_bounds = array<i64: 1, 1024>}, {pipeline_mode = #tpu.pipeline_mode<synchronous>, transform_indices = @transform_3, window_bounds = array<i64: 1024, 128>}, {pipeline_mode = #tpu.pipeline_mode<synchronous>, transform_indices = @transform_4, window_bounds = array<i64: 1, 128>}, {pipeline_mode = #tpu.pipeline_mode<synchronous>, transform_indices = @transform_5, window_bounds = array<i64: 128, 128>}, {pipeline_mode = #tpu.pipeline_mode<synchronous>, transform_indices = @transform_6, window_bounds = array<i64: 1, 128>}, {pipeline_mode = #tpu.pipeline_mode<synchronous>, transform_indices = @transform_7, window_bounds = array<i64: 128, 128>}, {pipeline_mode = #tpu.pipeline_mode<synchronous>, transform_indices = @transform_8, window_bounds = array<i64: 1, 128>}, {pipeline_mode = #tpu.pipeline_mode<synchronous>, transform_indices = @transform_9, window_bounds = array<i64: 2, 128>}]} {
    %c0 = arith.constant 0 : index
    %c0_0 = arith.constant 0 : index
    %0 = vector.load %arg1[%c0, %c0_0] : memref<2x3136xbf16, #tpu.memory_space<vmem>>, vector<2x3136xbf16>
    %c0_1 = arith.constant 0 : index
    %c0_2 = arith.constant 0 : index
    %1 = vector.load %arg2[%c0_1, %c0_2] : memref<3136x1024xbf16, #tpu.memory_space<vmem>>, vector<3136x1024xbf16>
    %cst = arith.constant dense<0.000000e+00> : vector<2x1024xf32>
    %2 = tpu.matmul %0, %1, %cst {dimension_numbers = #tpu.dot_dimension_numbers<[1], [0], [0], [1], [0, 0, 1, 1], [], []>} : vector<2x3136xbf16>, vector<3136x1024xbf16>, vector<2x1024xf32> -> vector<2x1024xf32>
    %c0_3 = arith.constant 0 : index
    %c0_4 = arith.constant 0 : index
    %3 = vector.load %arg3[%c0_3, %c0_4] : memref<1x1024xf32, #tpu.memory_space<vmem>>, vector<1x1024xf32>
    %4 = vector.broadcast %3 : vector<1x1024xf32> to vector<2x1024xf32>
    %5 = arith.addf %2, %4 : vector<2x1024xf32>
    %cst_5 = arith.constant 0.000000e+00 : f32
    %6 = vector.broadcast %cst_5 : f32 to vector<2x1024xf32>
    %7 = arith.maximumf %5, %6 : vector<2x1024xf32>
    %8 = arith.truncf %7 : vector<2x1024xf32> to vector<2x1024xbf16>
    %c0_6 = arith.constant 0 : index
    %c0_7 = arith.constant 0 : index
    %9 = vector.load %arg4[%c0_6, %c0_7] : memref<1024x128xbf16, #tpu.memory_space<vmem>>, vector<1024x128xbf16>
    %cst_8 = arith.constant dense<0.000000e+00> : vector<2x128xf32>
    %10 = tpu.matmul %8, %9, %cst_8 {dimension_numbers = #tpu.dot_dimension_numbers<[1], [0], [0], [1], [0, 0, 1, 1], [], []>} : vector<2x1024xbf16>, vector<1024x128xbf16>, vector<2x128xf32> -> vector<2x128xf32>
    %c0_9 = arith.constant 0 : index
    %c0_10 = arith.constant 0 : index
    %11 = vector.load %arg5[%c0_9, %c0_10] : memref<1x128xf32, #tpu.memory_space<vmem>>, vector<1x128xf32>
    %12 = vector.broadcast %11 : vector<1x128xf32> to vector<2x128xf32>
    %13 = arith.addf %10, %12 : vector<2x128xf32>
    %cst_11 = arith.constant 0.000000e+00 : f32
    %14 = vector.broadcast %cst_11 : f32 to vector<2x128xf32>
    %15 = arith.maximumf %13, %14 : vector<2x128xf32>
    %16 = arith.truncf %15 : vector<2x128xf32> to vector<2x128xbf16>
    %c0_12 = arith.constant 0 : index
    %c0_13 = arith.constant 0 : index
    %17 = vector.load %arg6[%c0_12, %c0_13] : memref<128x128xbf16, #tpu.memory_space<vmem>>, vector<128x128xbf16>
    %cst_14 = arith.constant dense<0.000000e+00> : vector<2x128xf32>
    %18 = tpu.matmul %16, %17, %cst_14 {dimension_numbers = #tpu.dot_dimension_numbers<[1], [0], [0], [1], [0, 0, 1, 1], [], []>} : vector<2x128xbf16>, vector<128x128xbf16>, vector<2x128xf32> -> vector<2x128xf32>
    %c0_15 = arith.constant 0 : index
    %c0_16 = arith.constant 0 : index
    %19 = vector.load %arg7[%c0_15, %c0_16] : memref<1x128xf32, #tpu.memory_space<vmem>>, vector<1x128xf32>
    %20 = vector.broadcast %19 : vector<1x128xf32> to vector<2x128xf32>
    %21 = arith.addf %18, %20 : vector<2x128xf32>
    %cst_17 = arith.constant 0.000000e+00 : f32
    %22 = vector.broadcast %cst_17 : f32 to vector<2x128xf32>
    %23 = arith.maximumf %21, %22 : vector<2x128xf32>
    %24 = arith.truncf %23 : vector<2x128xf32> to vector<2x128xbf16>
    %c0_18 = arith.constant 0 : index
    %c0_19 = arith.constant 0 : index
    %25 = vector.load %arg8[%c0_18, %c0_19] : memref<128x128xbf16, #tpu.memory_space<vmem>>, vector<128x128xbf16>
    %cst_20 = arith.constant dense<0.000000e+00> : vector<2x128xf32>
    %26 = tpu.matmul %24, %25, %cst_20 {dimension_numbers = #tpu.dot_dimension_numbers<[1], [0], [0], [1], [0, 0, 1, 1], [], []>} : vector<2x128xbf16>, vector<128x128xbf16>, vector<2x128xf32> -> vector<2x128xf32>
    %c0_21 = arith.constant 0 : index
    %c0_22 = arith.constant 0 : index
    %27 = vector.load %arg9[%c0_21, %c0_22] : memref<1x128xf32, #tpu.memory_space<vmem>>, vector<1x128xf32>
    %28 = vector.broadcast %27 : vector<1x128xf32> to vector<2x128xf32>
    %29 = arith.addf %26, %28 : vector<2x128xf32>
    %c0_23 = arith.constant 0 : index
    %c0_24 = arith.constant 0 : index
    %30 = vector.load %arg10[%c0_23, %c0_24] : memref<2x128xf32, #tpu.memory_space<vmem>>, vector<2x128xf32>
    tpu.vector_store %arg10[%c0_23, %c0_24], %29 {strides = array<i32>} : memref<2x128xf32, #tpu.memory_space<vmem>>, vector<2x128xf32>,
    return
  }
  func.func @transform_0(%arg0: i32) -> (i32, i32) {
    %c0_i32 = arith.constant 0 : i32
    %c0_i32_0 = arith.constant 0 : i32
    %c0_i32_1 = arith.constant 0 : i32
    return %c0_i32, %c0_i32_0 : i32, i32
  }
  func.func @transform_1(%arg0: i32) -> (i32, i32) {
    %c0_i32 = arith.constant 0 : i32
    %c0_i32_0 = arith.constant 0 : i32
    %c0_i32_1 = arith.constant 0 : i32
    return %c0_i32, %c0_i32_0 : i32, i32
  }
  func.func @transform_2(%arg0: i32) -> (i32, i32) {
    %c0_i32 = arith.constant 0 : i32
    %c0_i32_0 = arith.constant 0 : i32
    %c0_i32_1 = arith.constant 0 : i32
    return %c0_i32, %c0_i32_0 : i32, i32
  }
  func.func @transform_3(%arg0: i32) -> (i32, i32) {
    %c0_i32 = arith.constant 0 : i32
    %c0_i32_0 = arith.constant 0 : i32
    %c0_i32_1 = arith.constant 0 : i32
    return %c0_i32, %c0_i32_0 : i32, i32
  }
  func.func @transform_4(%arg0: i32) -> (i32, i32) {
    %c0_i32 = arith.constant 0 : i32
    %c0_i32_0 = arith.constant 0 : i32
    %c0_i32_1 = arith.constant 0 : i32
    return %c0_i32, %c0_i32_0 : i32, i32
  }
  func.func @transform_5(%arg0: i32) -> (i32, i32) {
    %c0_i32 = arith.constant 0 : i32
    %c0_i32_0 = arith.constant 0 : i32
    %c0_i32_1 = arith.constant 0 : i32
    return %c0_i32, %c0_i32_0 : i32, i32
  }
  func.func @transform_6(%arg0: i32) -> (i32, i32) {
    %c0_i32 = arith.constant 0 : i32
    %c0_i32_0 = arith.constant 0 : i32
    %c0_i32_1 = arith.constant 0 : i32
    return %c0_i32, %c0_i32_0 : i32, i32
  }
  func.func @transform_7(%arg0: i32) -> (i32, i32) {
    %c0_i32 = arith.constant 0 : i32
    %c0_i32_0 = arith.constant 0 : i32
    %c0_i32_1 = arith.constant 0 : i32
    return %c0_i32, %c0_i32_0 : i32, i32
  }
  func.func @transform_8(%arg0: i32) -> (i32, i32) {
    %c0_i32 = arith.constant 0 : i32
    %c0_i32_0 = arith.constant 0 : i32
    %c0_i32_1 = arith.constant 0 : i32
    return %c0_i32, %c0_i32_0 : i32, i32
  }
  func.func @transform_9(%arg0: i32) -> (i32, i32) {
    %c0_i32 = arith.constant 0 : i32
    %c0_i32_0 = arith.constant 0 : i32
    %c0_i32_1 = arith.constant 0 : i32
    return %c0_i32, %c0_i32_0 : i32, i32
  }
}

</mosaic_0001>

<bundles_post_ra>
// kernel: lenet_forward.3
= control target key start
LH: loop header
LB: loop body
LE: loop exit
PB: predicated region body
PF: predicated region fallthrough
CT: control target
= control target key end

     0   :  { %s2376_s12 = smov 0   ;;  %s2378_s13 = smov 0   ;;  %s3077_s0 = inlined_call_operand.vmem [shape: f32[8192,25], index: 0, kind: input, shape index: {}]   ;;  %s3078_s1 = inlined_call_operand.vmem [shape: f32[25,6], index: 1, kind: input, shape index: {}]   ;;  %s3079_s2 = inlined_call_operand.vmem [shape: f32[1,6], index: 2, kind: input, shape index: {}]   ;;  %s3080_s3 = inlined_call_operand.vmem [shape: f32[8192,6], index: 3, kind: output, shape index: {}]  }
   0x1   :  { %s2380_s14 = smov 0  }
   0x2 LB: > { %s25_s15 = sadd.s32 1, %s2349_s13  ;;  %p1823_p0 = scmp.ge.s32.totalorder %s2353_s14, 1  ;;  %s2353_s14 = sphi %s2380_s14, %s13_s14   ;;  %s2349_s13 = sphi %s2378_s13, %s3082_s13   ;;  %s2345_s12 = sphi %s2376_s12, %s3081_s12  }
   0x3   : > { %p27_p1 = scmp.ge.s32.totalorder %s25_s15, 8  ;;  %p169_p2 = scmp.lt.s32.totalorder %s2353_s14, 9 }
   0x5   : > { %s3084_s15 = smov (%p27_p1, %s25_s15), 0  ;;  %p170_p3 = pnand %p1823_p0, %p169_p2 }
   0x6   : > { %v353_v0 = vld [vmem:[%s3078_s1] sm:$0xff] (!%p170_p3)  ;;  %v354_v1 = vld [vmem:[%s3078_s1 + $0x8] sm:$0xff] (!%p170_p3)  ;;  %v355_v2 = vld [vmem:[%s3078_s1 + $0x10] sm:$0xff] (!%p170_p3)  ;;  %vm749_vm0 = vcmask (!%p170_p3), 1040384   ;;  %s1824_s22 = sshll.u32 (!%p170_p3), %s2345_s12, 7  ;;  %vm2355_vm1 = vmmov (!%p170_p3), 1  }
   0x7   : > { %173 = sbr.rel (%p170_p3) target bundleno = 362 (0x16a), region = 32  ;;  %v2292_v3 = vpack.c.bf16 (!%p170_p3), %v354_v1, %v353_v0  ;;  %v356_v4 = vld [vmem:[%s3078_s1 + $0x18] sm:$0x1] (!%p170_p3)  ;;  %p204_p4 = scmp.lt.s32.totalorder (!%p170_p3), %s1824_s22, 1023  ;;  %vm2297_vm2 = vmpackc.low (!%p170_p3), %vm749_vm0, %vm2355_vm1  ;;  %vm364_vm3 = vcmask (!%p170_p3), 203776   ;;  %vm1586_vm4 = vcmask (!%p170_p3), 48128  }
   0x8   : > { %v2296_v5 = vpack.c.bf16 (!%p170_p3), %v356_v4, %v355_v2 }
   0x9   : > { %2293 = vmatprep.subr.bf16.mxu0 (!%p170_p3), %v2292_v3  ;;  %2302 = vmatprep.subr.bf16.mxu1 (!%p170_p3), %v2292_v3 }
   0xa   : > { %2295 = vmatpush3.bf16.msra.mxu0 (!%p170_p3), %v2292_v3  ;;  %2304 = vmatpush3.bf16.msra.mxu1 (!%p170_p3), %v2292_v3 }
   0xb   : > { %2298 = vmatprep.subr.msk.bf16.mxu0 (!%p170_p3), %vm2297_vm2, %v2296_v5  ;;  %2303 = vmatprep.subr.msk.bf16.mxu1 (!%p170_p3), %vm2297_vm2, %v2296_v5 }
   0xe   : > { %s3086_s22 = smov (!%p204_p4, %s1824_s22), 1023  ;;  %2301 = vmatpush3.bf16.msk.msra.mxu0 %vm2297_vm2, %v2296_v5  ;;  %2305 = vmatpush3.bf16.msk.msra.mxu1 %vm2297_vm2, %v2296_v5 }
   0xf   : > { %s1825_s25 = sshll.u32 %s3086_s22, 3 }
  0x10   : > { %s2414_s28 = scalar_lea.vmem %s3077_s0, %s1825_s25  ;;  %s2684_s6 = scalar_lea.vmem %s3080_s3, %s1825_s25 }
  0x11   : > { %v225_v6 = vld [vmem:[%s2414_s28] sm:$0xff]  ;;  %v226_v8 = vld [vmem:[%s2414_s28 + $0x8] sm:$0xff]  ;;  %v227_v10 = vld [vmem:[%s2414_s28 + $0x10] sm:$0xff] }
  0x12   : > { %v289_v7 = vld [vmem:[%s2414_s28 + $0x200] sm:$0xff]  ;;  %v290_v9 = vld [vmem:[%s2414_s28 + $0x208] sm:$0xff]  ;;  %2100 = vmatprep.mubr.msk.f32.mxu0 %vm364_vm3, %v225_v6  ;;  %v291_v11 = vld [vmem:[%s2414_s28 + $0x210] sm:$0xff] }
  0x13   : > { %2196 = vmatprep.mubr.msk.f32.mxu1 %vm364_vm3, %v289_v7  ;;  %2101 = vmatmul.mubr.msk.f32.vlgmr.msra.gmra.mrb[0].mxu0 %vm364_vm3, %v226_v8  ;;  %v228_v12 = vld [vmem:[%s2414_s28 + $0x18] sm:$0xff]  ;;  %v229_v14 = vld [vmem:[%s2414_s28 + $0x20] sm:$0xff]  ;;  %v230_v16 = vld [vmem:[%s2414_s28 + $0x28] sm:$0xff] }
  0x14   : > { %2197 = vmatmul.mubr.msk.f32.vlgmr.msra.gmra.mrb[0].mxu1 %vm364_vm3, %v290_v9  ;;  %2103 = vmatprep.mubr.msk.f32.mxu0 %vm364_vm3, %v227_v10  ;;  %v292_v13 = vld [vmem:[%s2414_s28 + $0x218] sm:$0xff]  ;;  %v293_v15 = vld [vmem:[%s2414_s28 + $0x220] sm:$0xff]  ;;  %v294_v17 = vld [vmem:[%s2414_s28 + $0x228] sm:$0xff] }
  0x15   : > { %2199 = vmatprep.mubr.msk.f32.mxu1 %vm364_vm3, %v291_v11  ;;  %v231_v18 = vld [vmem:[%s2414_s28 + $0x30] sm:$0xff]  ;;  %v232_v20 = vld [vmem:[%s2414_s28 + $0x38] sm:$0xff]  ;;  %v233_v22 = vld [vmem:[%s2414_s28 + $0x40] sm:$0xff] }
  0x16   : > { %v295_v19 = vld [vmem:[%s2414_s28 + $0x230] sm:$0xff]  ;;  %v296_v21 = vld [vmem:[%s2414_s28 + $0x238] sm:$0xff]  ;;  %v297_v23 = vld [vmem:[%s2414_s28 + $0x240] sm:$0xff] }
  0x17   : > { %2104 = vmatmul.mubr.msk.f32.gmra.mrb[2].mxu0 %vm364_vm3, %v228_v12  ;;  %v234_v24 = vld [vmem:[%s2414_s28 + $0x48] sm:$0xff]  ;;  %v235_v26 = vld [vmem:[%s2414_s28 + $0x50] sm:$0xff]  ;;  %v236_v28 = vld [vmem:[%s2414_s28 + $0x58] sm:$0xff] }
  0x18   : > { %2200 = vmatmul.mubr.msk.f32.gmra.mrb[2].mxu1 %vm364_vm3, %v292_v13  ;;  %2106 = vmatprep.mubr.msk.f32.mxu0 %vm364_vm3, %v229_v14  ;;  %v298_v25 = vld [vmem:[%s2414_s28 + $0x248] sm:$0xff]  ;;  %v299_v27 = vld [vmem:[%s2414_s28 + $0x250] sm:$0xff]  ;;  %v300_v29 = vld [vmem:[%s2414_s28 + $0x258] sm:$0xff] }
  0x19   : > { %2202 = vmatprep.mubr.msk.f32.mxu1 %vm364_vm3, %v293_v15  ;;  %v237_v30 = vld [vmem:[%s2414_s28 + $0x60] sm:$0xff]  ;;  %v238_v32 = vld [vmem:[%s2414_s28 + $0x68] sm:$0xff]  ;;  %v239_v34 = vld [vmem:[%s2414_s28 + $0x70] sm:$0xff] }
  0x1a   : > { %v301_v31 = vld [vmem:[%s2414_s28 + $0x260] sm:$0xff]  ;;  %v302_v33 = vld [vmem:[%s2414_s28 + $0x268] sm:$0xff]  ;;  %v303_v35 = vld [vmem:[%s2414_s28 + $0x270] sm:$0xff] }
  0x1b   : > { %2107 = vmatmul.mubr.msk.f32.gmra.mrb[4].mxu0 %vm364_vm3, %v230_v16  ;;  %v240_v36 = vld [vmem:[%s2414_s28 + $0x78] sm:$0xff]  ;;  %v241_v38 = vld [vmem:[%s2414_s28 + $0x80] sm:$0xff]  ;;  %v242_v40 = vld [vmem:[%s2414_s28 + $0x88] sm:$0xff] }
  0x1c   : > { %2203 = vmatmul.mubr.msk.f32.gmra.mrb[4].mxu1 %vm364_vm3, %v294_v17  ;;  %2109 = vmatprep.mubr.msk.f32.mxu0 %vm364_vm3, %v231_v18  ;;  %v304_v37 = vld [vmem:[%s2414_s28 + $0x278] sm:$0xff]  ;;  %v305_v39 = vld [vmem:[%s2414_s28 + $0x280] sm:$0xff]  ;;  %v306_v41 = vld [vmem:[%s2414_s28 + $0x288] sm:$0xff] }
  0x1d   : > { %2205 = vmatprep.mubr.msk.f32.mxu1 %vm364_vm3, %v295_v19  ;;  %v243_v42 = vld [vmem:[%s2414_s28 + $0x90] sm:$0xff]  ;;  %v244_v44 = vld [vmem:[%s2414_s28 + $0x98] sm:$0xff]  ;;  %v245_v46 = vld [vmem:[%s2414_s28 + $0xa0] sm:$0xff] }
  0x1e   : > { %v307_v43 = vld [vmem:[%s2414_s28 + $0x290] sm:$0xff]  ;;  %v308_v45 = vld [vmem:[%s2414_s28 + $0x298] sm:$0xff]  ;;  %v309_v47 = vld [vmem:[%s2414_s28 + $0x2a0] sm:$0xff] }
  0x1f   : > { %2110 = vmatmul.mubr.msk.f32.gmra.mrb[6].mxu0 %vm364_vm3, %v232_v20  ;;  %v246_v48 = vld [vmem:[%s2414_s28 + $0xa8] sm:$0xff]  ;;  %v247_v50 = vld [vmem:[%s2414_s28 + $0xb0] sm:$0xff]  ;;  %v248_v52 = vld [vmem:[%s2414_s28 + $0xb8] sm:$0xff] }
  0x20   : > { %2206 = vmatmul.mubr.msk.f32.gmra.mrb[6].mxu1 %vm364_vm3, %v296_v21  ;;  %2112 = vmatprep.mubr.msk.f32.mxu0 %vm364_vm3, %v233_v22  ;;  %v310_v49 = vld [vmem:[%s2414_s28 + $0x2a8] sm:$0xff]  ;;  %v311_v51 = vld [vmem:[%s2414_s28 + $0x2b0] sm:$0xff]  ;;  %v312_v53 = vld [vmem:[%s2414_s28 + $0x2b8] sm:$0xff] }
  0x21   : > { %2208 = vmatprep.mubr.msk.f32.mxu1 %vm364_vm3, %v297_v23  ;;  %v249_v54 = vld [vmem:[%s2414_s28 + $0xc0] sm:$0xff]  ;;  %v250_v56 = vld [vmem:[%s2414_s28 + $0xc8] sm:$0xff]  ;;  %v251_v58 = vld [vmem:[%s2414_s28 + $0xd0] sm:$0xff] }
  0x22   : > { %v313_v55 = vld [vmem:[%s2414_s28 + $0x2c0] sm:$0xff]  ;;  %v314_v57 = vld [vmem:[%s2414_s28 + $0x2c8] sm:$0xff]  ;;  %v315_v59 = vld [vmem:[%s2414_s28 + $0x2d0] sm:$0xff] }
  0x23   : > { %2113 = vmatmul.mubr.msk.f32.gmra.mrb[8].mxu0 %vm364_vm3, %v234_v24  ;;  %v252_v60 = vld [vmem:[%s2414_s28 + $0xd8] sm:$0xff]  ;;  %v253_v62 = vld [vmem:[%s2414_s28 + $0xe0] sm:$0xff]  ;;  %v254_v0 = vld [vmem:[%s2414_s28 + $0xe8] sm:$0xff] }
  0x24   : > { %2209 = vmatmul.mubr.msk.f32.gmra.mrb[8].mxu1 %vm364_vm3, %v298_v25  ;;  %2115 = vmatprep.mubr.msk.f32.mxu0 %vm364_vm3, %v235_v26  ;;  %v316_v61 = vld [vmem:[%s2414_s28 + $0x2d8] sm:$0xff]  ;;  %v317_v63 = vld [vmem:[%s2414_s28 + $0x2e0] sm:$0xff]  ;;  %v318_v1 = vld [vmem:[%s2414_s28 + $0x2e8] sm:$0xff] }
  0x25   : > { %2211 = vmatprep.mubr.msk.f32.mxu1 %vm364_vm3, %v299_v27  ;;  %v255_v2 = vld [vmem:[%s2414_s28 + $0xf0] sm:$0xff]  ;;  %v256_v4 = vld [vmem:[%s2414_s28 + $0xf8] sm:$0xff]  ;;  %v257_v6 = vld [vmem:[%s2414_s28 + $0x100] sm:$0xff] }
  0x26   : > { %v319_v3 = vld [vmem:[%s2414_s28 + $0x2f0] sm:$0xff]  ;;  %v320_v5 = vld [vmem:[%s2414_s28 + $0x2f8] sm:$0xff]  ;;  %v321_v7 = vld [vmem:[%s2414_s28 + $0x300] sm:$0xff] }
  0x27   : > { %2116 = vmatmul.mubr.msk.f32.gmra.mrb[10].mxu0 %vm364_vm3, %v236_v28  ;;  %v258_v8 = vld [vmem:[%s2414_s28 + $0x108] sm:$0xff]  ;;  %v259_v10 = vld [vmem:[%s2414_s28 + $0x110] sm:$0xff]  ;;  %v260_v12 = vld [vmem:[%s2414_s28 + $0x118] sm:$0xff] }
  0x28   : > { %2212 = vmatmul.mubr.msk.f32.gmra.mrb[10].mxu1 %vm364_vm3, %v300_v29  ;;  %2118 = vmatprep.mubr.msk.f32.mxu0 %vm364_vm3, %v237_v30  ;;  %v322_v9 = vld [vmem:[%s2414_s28 + $0x308] sm:$0xff]  ;;  %v323_v11 = vld [vmem:[%s2414_s28 + $0x310] sm:$0xff]  ;;  %v324_v13 = vld [vmem:[%s2414_s28 + $0x318] sm:$0xff] }
  0x29   : > { %2214 = vmatprep.mubr.msk.f32.mxu1 %vm364_vm3, %v301_v31  ;;  %v261_v14 = vld [vmem:[%s2414_s28 + $0x120] sm:$0xff]  ;;  %v262_v16 = vld [vmem:[%s2414_s28 + $0x128] sm:$0xff]  ;;  %v263_v18 = vld [vmem:[%s2414_s28 + $0x130] sm:$0xff] }
  0x2a   : > { %v325_v15 = vld [vmem:[%s2414_s28 + $0x320] sm:$0xff]  ;;  %v326_v17 = vld [vmem:[%s2414_s28 + $0x328] sm:$0xff]  ;;  %v327_v19 = vld [vmem:[%s2414_s28 + $0x330] sm:$0xff] }
  0x2b   : > { %2119 = vmatmul.mubr.msk.f32.gmra.mrb[12].mxu0 %vm364_vm3, %v238_v32  ;;  %v264_v20 = vld [vmem:[%s2414_s28 + $0x138] sm:$0xff]  ;;  %v265_v22 = vld [vmem:[%s2414_s28 + $0x140] sm:$0xff]  ;;  %v266_v24 = vld [vmem:[%s2414_s28 + $0x148] sm:$0xff] }
  0x2c   : > { %2215 = vmatmul.mubr.msk.f32.gmra.mrb[12].mxu1 %vm364_vm3, %v302_v33  ;;  %2121 = vmatprep.mubr.msk.f32.mxu0 %vm364_vm3, %v239_v34  ;;  %v328_v21 = vld [vmem:[%s2414_s28 + $0x338] sm:$0xff]  ;;  %v329_v23 = vld [vmem:[%s2414_s28 + $0x340] sm:$0xff]  ;;  %v330_v25 = vld [vmem:[%s2414_s28 + $0x348] sm:$0xff] }
  0x2d   : > { %2217 = vmatprep.mubr.msk.f32.mxu1 %vm364_vm3, %v303_v35  ;;  %v267_v26 = vld [vmem:[%s2414_s28 + $0x150] sm:$0xff]  ;;  %v268_v28 = vld [vmem:[%s2414_s28 + $0x158] sm:$0xff]  ;;  %v269_v30 = vld [vmem:[%s2414_s28 + $0x160] sm:$0xff] }
  0x2e   : > { %v331_v27 = vld [vmem:[%s2414_s28 + $0x350] sm:$0xff]  ;;  %v332_v29 = vld [vmem:[%s2414_s28 + $0x358] sm:$0xff]  ;;  %v333_v31 = vld [vmem:[%s2414_s28 + $0x360] sm:$0xff] }
  0x2f   : > { %2122 = vmatmul.mubr.msk.f32.gmra.mrb[14].mxu0 %vm364_vm3, %v240_v36  ;;  %v270_v32 = vld [vmem:[%s2414_s28 + $0x168] sm:$0xff]  ;;  %v271_v34 = vld [vmem:[%s2414_s28 + $0x170] sm:$0xff]  ;;  %v272_v36 = vld [vmem:[%s2414_s28 + $0x178] sm:$0xff] }
  0x30   : > { %2218 = vmatmul.mubr.msk.f32.gmra.mrb[14].mxu1 %vm364_vm3, %v304_v37  ;;  %2124 = vmatprep.mubr.msk.f32.mxu0 %vm364_vm3, %v241_v38  ;;  %v334_v33 = vld [vmem:[%s2414_s28 + $0x368] sm:$0xff]  ;;  %v335_v35 = vld [vmem:[%s2414_s28 + $0x370] sm:$0xff]  ;;  %v336_v37 = vld [vmem:[%s2414_s28 + $0x378] sm:$0xff] }
  0x31   : > { %2220 = vmatprep.mubr.msk.f32.mxu1 %vm364_vm3, %v305_v39  ;;  %v273_v38 = vld [vmem:[%s2414_s28 + $0x180] sm:$0xff] }
  0x32   : > { %v337_v39 = vld [vmem:[%s2414_s28 + $0x380] sm:$0xff] }
  0x33   : > { %2125 = vmatmul.mubr.msk.f32.gmra.mrb[16].mxu0 %vm364_vm3, %v242_v40  ;;  %v274_v40 = vld [vmem:[%s2414_s28 + $0x188] sm:$0xff] }
  0x34   : > { %2221 = vmatmul.mubr.msk.f32.gmra.mrb[16].mxu1 %vm364_vm3, %v306_v41  ;;  %2127 = vmatprep.mubr.msk.f32.mxu0 %vm364_vm3, %v243_v42  ;;  %v338_v41 = vld [vmem:[%s2414_s28 + $0x388] sm:$0xff]  ;;  %v275_v42 = vld [vmem:[%s2414_s28 + $0x190] sm:$0xff] }
  0x35   : > { %2223 = vmatprep.mubr.msk.f32.mxu1 %vm364_vm3, %v307_v43  ;;  %v339_v43 = vld [vmem:[%s2414_s28 + $0x390] sm:$0xff] }
  0x37   : > { %2128 = vmatmul.mubr.msk.f32.gmra.mrb[18].mxu0 %vm364_vm3, %v244_v44  ;;  %v276_v44 = vld [vmem:[%s2414_s28 + $0x198] sm:$0xff] }
  0x38   : > { %2224 = vmatmul.mubr.msk.f32.gmra.mrb[18].mxu1 %vm364_vm3, %v308_v45  ;;  %2130 = vmatprep.mubr.msk.f32.mxu0 %vm364_vm3, %v245_v46  ;;  %v340_v45 = vld [vmem:[%s2414_s28 + $0x398] sm:$0xff]  ;;  %v277_v46 = vld [vmem:[%s2414_s28 + $0x1a0] sm:$0xff] }
  0x39   : > { %2226 = vmatprep.mubr.msk.f32.mxu1 %vm364_vm3, %v309_v47  ;;  %v341_v47 = vld [vmem:[%s2414_s28 + $0x3a0] sm:$0xff] }
  0x3b   : > { %2131 = vmatmul.mubr.msk.f32.gmra.mrb[20].mxu0 %vm364_vm3, %v246_v48  ;;  %v278_v48 = vld [vmem:[%s2414_s28 + $0x1a8] sm:$0xff] }
  0x3c   : > { %2227 = vmatmul.mubr.msk.f32.gmra.mrb[20].mxu1 %vm364_vm3, %v310_v49  ;;  %2133 = vmatprep.mubr.msk.f32.mxu0 %vm364_vm3, %v247_v50  ;;  %v342_v49 = vld [vmem:[%s2414_s28 + $0x3a8] sm:$0xff]  ;;  %v279_v50 = vld [vmem:[%s2414_s28 + $0x1b0] sm:$0xff] }
  0x3d   : > { %2229 = vmatprep.mubr.msk.f32.mxu1 %vm364_vm3, %v311_v51  ;;  %v343_v51 = vld [vmem:[%s2414_s28 + $0x3b0] sm:$0xff] }
  0x3f   : > { %2134 = vmatmul.mubr.msk.f32.gmra.mrb[22].mxu0 %vm364_vm3, %v248_v52  ;;  %v280_v52 = vld [vmem:[%s2414_s28 + $0x1b8] sm:$0xff] }
  0x40   : > { %2230 = vmatmul.mubr.msk.f32.gmra.mrb[22].mxu1 %vm364_vm3, %v312_v53  ;;  %2136 = vmatprep.mubr.msk.f32.mxu0 %vm364_vm3, %v249_v54  ;;  %v344_v53 = vld [vmem:[%s2414_s28 + $0x3b8] sm:$0xff]  ;;  %v281_v54 = vld [vmem:[%s2414_s28 + $0x1c0] sm:$0xff] }
  0x41   : > { %2232 = vmatprep.mubr.msk.f32.mxu1 %vm364_vm3, %v313_v55  ;;  %v345_v55 = vld [vmem:[%s2414_s28 + $0x3c0] sm:$0xff] }
  0x43   : > { %2137 = vmatmul.mubr.msk.f32.gmra.mrb[24].mxu0 %vm364_vm3, %v250_v56  ;;  %v282_v56 = vld [vmem:[%s2414_s28 + $0x1c8] sm:$0xff] }
  0x44   : > { %2233 = vmatmul.mubr.msk.f32.gmra.mrb[24].mxu1 %vm364_vm3, %v314_v57  ;;  %2139 = vmatprep.mubr.msk.f32.mxu0 %vm364_vm3, %v251_v58  ;;  %v346_v57 = vld [vmem:[%s2414_s28 + $0x3c8] sm:$0xff]  ;;  %v283_v58 = vld [vmem:[%s2414_s28 + $0x1d0] sm:$0xff] }
  0x45   : > { %2235 = vmatprep.mubr.msk.f32.mxu1 %vm364_vm3, %v315_v59  ;;  %v347_v59 = vld [vmem:[%s2414_s28 + $0x3d0] sm:$0xff] }
  0x47   : > { %2140 = vmatmul.mubr.msk.f32.gmra.mrb[26].mxu0 %vm364_vm3, %v252_v60  ;;  %v284_v60 = vld [vmem:[%s2414_s28 + $0x1d8] sm:$0xff] }
  0x48   : > { %2236 = vmatmul.mubr.msk.f32.gmra.mrb[26].mxu1 %vm364_vm3, %v316_v61  ;;  %2142 = vmatprep.mubr.msk.f32.mxu0 %vm364_vm3, %v253_v62  ;;  %v348_v61 = vld [vmem:[%s2414_s28 + $0x3d8] sm:$0xff]  ;;  %v285_v62 = vld [vmem:[%s2414_s28 + $0x1e0] sm:$0xff] }
  0x49   : > { %2238 = vmatprep.mubr.msk.f32.mxu1 %vm364_vm3, %v317_v63  ;;  %v349_v63 = vld [vmem:[%s2414_s28 + $0x3e0] sm:$0xff] }
  0x4b   : > { %2143 = vmatmul.mubr.msk.f32.gmra.mrb[28].mxu0 %vm364_vm3, %v254_v0  ;;  %v286_v0 = vld [vmem:[%s2414_s28 + $0x1e8] sm:$0xff] }
  0x4c   : > { %2239 = vmatmul.mubr.msk.f32.gmra.mrb[28].mxu1 %vm364_vm3, %v318_v1  ;;  %2145 = vmatprep.mubr.msk.f32.mxu0 %vm364_vm3, %v255_v2  ;;  %v350_v1 = vld [vmem:[%s2414_s28 + $0x3e8] sm:$0xff]  ;;  %v287_v2 = vld [vmem:[%s2414_s28 + $0x1f0] sm:$0xff] }
  0x4d   : > { %2241 = vmatprep.mubr.msk.f32.mxu1 %vm364_vm3, %v319_v3  ;;  %v351_v3 = vld [vmem:[%s2414_s28 + $0x3f0] sm:$0xff] }
  0x4f   : > { %2146 = vmatmul.mubr.msk.f32.gmra.mrb[30].mxu0 %vm364_vm3, %v256_v4  ;;  %v288_v4 = vld [vmem:[%s2414_s28 + $0x1f8] sm:$0xff] }
  0x50   : > { %2242 = vmatmul.mubr.msk.f32.gmra.mrb[30].mxu1 %vm364_vm3, %v320_v5  ;;  %2148 = vmatprep.mubr.msk.f32.mxu0 %vm364_vm3, %v257_v6  ;;  %v352_v5 = vld [vmem:[%s2414_s28 + $0x3f8] sm:$0xff]  ;;  %v2675_v6 = vld [vmem:[%s3079_s2] ss:$0 sm:$0xff] }
  0x51   : > { %2244 = vmatprep.mubr.msk.f32.mxu1 %vm364_vm3, %v321_v7 }
  0x53   : > { %2149 = vmatmul.mubr.msk.f32.gmra.mrb[32].mxu0 %vm364_vm3, %v258_v8 }
  0x54   : > { %2245 = vmatmul.mubr.msk.f32.gmra.mrb[32].mxu1 %vm364_vm3, %v322_v9  ;;  %2151 = vmatprep.mubr.msk.f32.mxu0 %vm364_vm3, %v259_v10 }
  0x55   : > { %2247 = vmatprep.mubr.msk.f32.mxu1 %vm364_vm3, %v323_v11 }
  0x57   : > { %2152 = vmatmul.mubr.msk.f32.gmra.mrb[34].mxu0 %vm364_vm3, %v260_v12 }
  0x58   : > { %2248 = vmatmul.mubr.msk.f32.gmra.mrb[34].mxu1 %vm364_vm3, %v324_v13  ;;  %2154 = vmatprep.mubr.msk.f32.mxu0 %vm364_vm3, %v261_v14 }
  0x59   : > { %2250 = vmatprep.mubr.msk.f32.mxu1 %vm364_vm3, %v325_v15 }
  0x5b   : > { %2155 = vmatmul.mubr.msk.f32.gmra.mrb[36].mxu0 %vm364_vm3, %v262_v16 }
  0x5c   : > { %2251 = vmatmul.mubr.msk.f32.gmra.mrb[36].mxu1 %vm364_vm3, %v326_v17  ;;  %2157 = vmatprep.mubr.msk.f32.mxu0 %vm364_vm3, %v263_v18 }
  0x5d   : > { %2253 = vmatprep.mubr.msk.f32.mxu1 %vm364_vm3, %v327_v19 }
  0x5f   : > { %2158 = vmatmul.mubr.msk.f32.gmra.mrb[38].mxu0 %vm364_vm3, %v264_v20 }
  0x60   : > { %2254 = vmatmul.mubr.msk.f32.gmra.mrb[38].mxu1 %vm364_vm3, %v328_v21  ;;  %2160 = vmatprep.mubr.msk.f32.mxu0 %vm364_vm3, %v265_v22 }
  0x61   : > { %2256 = vmatprep.mubr.msk.f32.mxu1 %vm364_vm3, %v329_v23 }
  0x63   : > { %2161 = vmatmul.mubr.msk.f32.gmra.mrb[40].mxu0 %vm364_vm3, %v266_v24 }
  0x64   : > { %2257 = vmatmul.mubr.msk.f32.gmra.mrb[40].mxu1 %vm364_vm3, %v330_v25  ;;  %2163 = vmatprep.mubr.msk.f32.mxu0 %vm364_vm3, %v267_v26 }
  0x65   : > { %2259 = vmatprep.mubr.msk.f32.mxu1 %vm364_vm3, %v331_v27 }
  0x67   : > { %2164 = vmatmul.mubr.msk.f32.gmra.mrb[42].mxu0 %vm364_vm3, %v268_v28 }
  0x68   : > { %2260 = vmatmul.mubr.msk.f32.gmra.mrb[42].mxu1 %vm364_vm3, %v332_v29  ;;  %2166 = vmatprep.mubr.msk.f32.mxu0 %vm364_vm3, %v269_v30 }
  0x69   : > { %2262 = vmatprep.mubr.msk.f32.mxu1 %vm364_vm3, %v333_v31 }
  0x6b   : > { %2167 = vmatmul.mubr.msk.f32.gmra.mrb[44].mxu0 %vm364_vm3, %v270_v32 }
  0x6c   : > { %2263 = vmatmul.mubr.msk.f32.gmra.mrb[44].mxu1 %vm364_vm3, %v334_v33  ;;  %2169 = vmatprep.mubr.msk.f32.mxu0 %vm364_vm3, %v271_v34 }
  0x6d   : > { %2265 = vmatprep.mubr.msk.f32.mxu1 %vm364_vm3, %v335_v35 }
  0x6f   : > { %2170 = vmatmul.mubr.msk.f32.gmra.mrb[46].mxu0 %vm364_vm3, %v272_v36 }
  0x70   : > { %2266 = vmatmul.mubr.msk.f32.gmra.mrb[46].mxu1 %vm364_vm3, %v336_v37  ;;  %2172 = vmatprep.mubr.msk.f32.mxu0 %vm364_vm3, %v273_v38 }
  0x71   : > { %2268 = vmatprep.mubr.msk.f32.mxu1 %vm364_vm3, %v337_v39 }
  0x73   : > { %2173 = vmatmul.mubr.msk.f32.gmra.mrb[48].mxu0 %vm364_vm3, %v274_v40 }
  0x74   : > { %2269 = vmatmul.mubr.msk.f32.gmra.mrb[48].mxu1 %vm364_vm3, %v338_v41  ;;  %2175 = vmatprep.mubr.msk.f32.mxu0 %vm364_vm3, %v275_v42 }
  0x75   : > { %2271 = vmatprep.mubr.msk.f32.mxu1 %vm364_vm3, %v339_v43 }
  0x77   : > { %2176 = vmatmul.mubr.msk.f32.gmra.mrb[50].mxu0 %vm364_vm3, %v276_v44 }
  0x78   : > { %2272 = vmatmul.mubr.msk.f32.gmra.mrb[50].mxu1 %vm364_vm3, %v340_v45  ;;  %2178 = vmatprep.mubr.msk.f32.mxu0 %vm364_vm3, %v277_v46 }
  0x79   : > { %2274 = vmatprep.mubr.msk.f32.mxu1 %vm364_vm3, %v341_v47 }
  0x7b   : > { %2179 = vmatmul.mubr.msk.f32.gmra.mrb[52].mxu0 %vm364_vm3, %v278_v48 }
  0x7c   : > { %2275 = vmatmul.mubr.msk.f32.gmra.mrb[52].mxu1 %vm364_vm3, %v342_v49  ;;  %2181 = vmatprep.mubr.msk.f32.mxu0 %vm364_vm3, %v279_v50 }
  0x7d   : > { %2277 = vmatprep.mubr.msk.f32.mxu1 %vm364_vm3, %v343_v51 }
  0x7f   : > { %2182 = vmatmul.mubr.msk.f32.gmra.mrb[54].mxu0 %vm364_vm3, %v280_v52 }
  0x80   : > { %2278 = vmatmul.mubr.msk.f32.gmra.mrb[54].mxu1 %vm364_vm3, %v344_v53  ;;  %2184 = vmatprep.mubr.msk.f32.mxu0 %vm364_vm3, %v281_v54 }
  0x81   : > { %2280 = vmatprep.mubr.msk.f32.mxu1 %vm364_vm3, %v345_v55 }
  0x83   : > { %2185 = vmatmul.mubr.msk.f32.gmra.mrb[56].mxu0 %vm364_vm3, %v282_v56 }
  0x84   : > { %2281 = vmatmul.mubr.msk.f32.gmra.mrb[56].mxu1 %vm364_vm3, %v346_v57  ;;  %2187 = vmatprep.mubr.msk.f32.mxu0 %vm364_vm3, %v283_v58 }
  0x85   : > { %2283 = vmatprep.mubr.msk.f32.mxu1 %vm364_vm3, %v347_v59 }
  0x87   : > { %2188 = vmatmul.mubr.msk.f32.gmra.mrb[58].mxu0 %vm364_vm3, %v284_v60 }
  0x88   : > { %2284 = vmatmul.mubr.msk.f32.gmra.mrb[58].mxu1 %vm364_vm3, %v348_v61  ;;  %2190 = vmatprep.mubr.msk.f32.mxu0 %vm364_vm3, %v285_v62 }
  0x89   : > { %2286 = vmatprep.mubr.msk.f32.mxu1 %vm364_vm3, %v349_v63 }
  0x8b   : > { %2191 = vmatmul.mubr.msk.f32.gmra.mrb[60].mxu0 %vm364_vm3, %v286_v0 }
  0x8c   : > { %2287 = vmatmul.mubr.msk.f32.gmra.mrb[60].mxu1 %vm364_vm3, %v350_v1  ;;  %2193 = vmatprep.mubr.msk.f32.mxu0 %vm364_vm3, %v287_v2 }
  0x8d   : > { %2289 = vmatprep.mubr.msk.f32.mxu1 %vm364_vm3, %v351_v3 }
  0x8f   : > { %2194 = vmatmul.mubr.msk.f32.gmra.mrb[62].mxu0 %vm364_vm3, %v288_v4 }
  0x90   : > { %2290 = vmatmul.mubr.msk.f32.gmra.mrb[62].mxu1 %vm364_vm3, %v352_v5 }
  0xe6   : > { %v2102_v7 = vpop.f32.mrb[0].mxu0 }
  0xe7   : > { %v2198_v8 = vpop.f32.mrb[0].mxu1  ;;  %v825_v9 = vadd.f32 %v2102_v7, %v2675_v6  ;;  %v819_v11 = vpop.f32.mrb[1].mxu0 }
  0xe8   : > { %v1145_v10 = vadd.f32 %v2198_v8, %v2675_v6  ;;  %v1139_v12 = vpop.f32.mrb[1].mxu1  ;;  %v820_v13 = vadd.f32 %v2675_v6, %v819_v11 }
  0xe9   : > { %v1140_v14 = vadd.f32 %v2675_v6, %v1139_v12  ;;  %v1459_v15 = vmax.f32 %v825_v9, 0.0 }
  0xea   : > { %v1523_v16 = vmax.f32 %v1145_v10, 0.0  ;;  %v1458_v17 = vmax.f32 %v820_v13, 0.0  ;;  %v2105_v19 = vpop.f32.mrb[2].mxu0 }
  0xeb   : > { %v1522_v18 = vmax.f32 %v1140_v14, 0.0  ;;  %v2201_v20 = vpop.f32.mrb[2].mxu1  ;;  %1588 = vst.msk [vmem:[%s2684_s6 + $0x8] sm:$0xff] %vm1586_vm4, %v1459_v15  ;;  %v835_v21 = vadd.f32 %v2105_v19, %v2675_v6  ;;  %v829_v23 = vpop.f32.mrb[3].mxu0 }
  0xec   : > { %1652 = vst.msk [vmem:[%s2684_s6 + $0x208] sm:$0xff] %vm1586_vm4, %v1523_v16  ;;  %v1155_v22 = vadd.f32 %v2201_v20, %v2675_v6  ;;  %v1149_v24 = vpop.f32.mrb[3].mxu1  ;;  %1587 = vst.msk [vmem:[%s2684_s6] sm:$0xff] %vm1586_vm4, %v1458_v17  ;;  %v830_v25 = vadd.f32 %v2675_v6, %v829_v23 }
  0xed   : > { %1651 = vst.msk [vmem:[%s2684_s6 + $0x200] sm:$0xff] %vm1586_vm4, %v1522_v18  ;;  %v1150_v26 = vadd.f32 %v2675_v6, %v1149_v24  ;;  %v1461_v27 = vmax.f32 %v835_v21, 0.0 }
  0xee   : > { %v1525_v28 = vmax.f32 %v1155_v22, 0.0  ;;  %v1460_v29 = vmax.f32 %v830_v25, 0.0  ;;  %v2108_v31 = vpop.f32.mrb[4].mxu0 }
  0xef   : > { %v1524_v30 = vmax.f32 %v1150_v26, 0.0  ;;  %v2204_v32 = vpop.f32.mrb[4].mxu1  ;;  %1590 = vst.msk [vmem:[%s2684_s6 + $0x18] sm:$0xff] %vm1586_vm4, %v1461_v27  ;;  %v845_v33 = vadd.f32 %v2108_v31, %v2675_v6  ;;  %v839_v35 = vpop.f32.mrb[5].mxu0 }
  0xf0   : > { %1654 = vst.msk [vmem:[%s2684_s6 + $0x218] sm:$0xff] %vm1586_vm4, %v1525_v28  ;;  %v1165_v34 = vadd.f32 %v2204_v32, %v2675_v6  ;;  %v1159_v36 = vpop.f32.mrb[5].mxu1  ;;  %1589 = vst.msk [vmem:[%s2684_s6 + $0x10] sm:$0xff] %vm1586_vm4, %v1460_v29  ;;  %v840_v37 = vadd.f32 %v2675_v6, %v839_v35 }
  0xf1   : > { %1653 = vst.msk [vmem:[%s2684_s6 + $0x210] sm:$0xff] %vm1586_vm4, %v1524_v30  ;;  %v1160_v38 = vadd.f32 %v2675_v6, %v1159_v36  ;;  %v1463_v39 = vmax.f32 %v845_v33, 0.0 }
  0xf2   : > { %v1527_v40 = vmax.f32 %v1165_v34, 0.0  ;;  %v1462_v41 = vmax.f32 %v840_v37, 0.0  ;;  %v2111_v43 = vpop.f32.mrb[6].mxu0 }
  0xf3   : > { %v1526_v42 = vmax.f32 %v1160_v38, 0.0  ;;  %v2207_v44 = vpop.f32.mrb[6].mxu1  ;;  %1592 = vst.msk [vmem:[%s2684_s6 + $0x28] sm:$0xff] %vm1586_vm4, %v1463_v39  ;;  %v855_v45 = vadd.f32 %v2111_v43, %v2675_v6  ;;  %v849_v47 = vpop.f32.mrb[7].mxu0 }
  0xf4   : > { %1656 = vst.msk [vmem:[%s2684_s6 + $0x228] sm:$0xff] %vm1586_vm4, %v1527_v40  ;;  %v1175_v46 = vadd.f32 %v2207_v44, %v2675_v6  ;;  %v1169_v48 = vpop.f32.mrb[7].mxu1  ;;  %1591 = vst.msk [vmem:[%s2684_s6 + $0x20] sm:$0xff] %vm1586_vm4, %v1462_v41  ;;  %v850_v49 = vadd.f32 %v2675_v6, %v849_v47 }
  0xf5   : > { %1655 = vst.msk [vmem:[%s2684_s6 + $0x220] sm:$0xff] %vm1586_vm4, %v1526_v42  ;;  %v1170_v50 = vadd.f32 %v2675_v6, %v1169_v48  ;;  %v1465_v51 = vmax.f32 %v855_v45, 0.0 }
  0xf6   : > { %v1529_v52 = vmax.f32 %v1175_v46, 0.0  ;;  %v1464_v53 = vmax.f32 %v850_v49, 0.0  ;;  %v2114_v55 = vpop.f32.mrb[8].mxu0 }
  0xf7   : > { %v1528_v54 = vmax.f32 %v1170_v50, 0.0  ;;  %v2210_v56 = vpop.f32.mrb[8].mxu1  ;;  %1594 = vst.msk [vmem:[%s2684_s6 + $0x38] sm:$0xff] %vm1586_vm4, %v1465_v51  ;;  %v865_v57 = vadd.f32 %v2114_v55, %v2675_v6  ;;  %v859_v59 = vpop.f32.mrb[9].mxu0 }
  0xf8   : > { %1658 = vst.msk [vmem:[%s2684_s6 + $0x238] sm:$0xff] %vm1586_vm4, %v1529_v52  ;;  %v1185_v58 = vadd.f32 %v2210_v56, %v2675_v6  ;;  %v1179_v60 = vpop.f32.mrb[9].mxu1  ;;  %1593 = vst.msk [vmem:[%s2684_s6 + $0x30] sm:$0xff] %vm1586_vm4, %v1464_v53  ;;  %v860_v61 = vadd.f32 %v2675_v6, %v859_v59 }
  0xf9   : > { %1657 = vst.msk [vmem:[%s2684_s6 + $0x230] sm:$0xff] %vm1586_vm4, %v1528_v54  ;;  %v1180_v62 = vadd.f32 %v2675_v6, %v1179_v60  ;;  %v1467_v63 = vmax.f32 %v865_v57, 0.0 }
  0xfa   : > { %v1531_v0 = vmax.f32 %v1185_v58, 0.0  ;;  %v1466_v1 = vmax.f32 %v860_v61, 0.0  ;;  %v2117_v3 = vpop.f32.mrb[10].mxu0 }
  0xfb   : > { %v1530_v2 = vmax.f32 %v1180_v62, 0.0  ;;  %v2213_v4 = vpop.f32.mrb[10].mxu1  ;;  %1596 = vst.msk [vmem:[%s2684_s6 + $0x48] sm:$0xff] %vm1586_vm4, %v1467_v63  ;;  %v875_v5 = vadd.f32 %v2117_v3, %v2675_v6  ;;  %v869_v8 = vpop.f32.mrb[11].mxu0 }
  0xfc   : > { %1660 = vst.msk [vmem:[%s2684_s6 + $0x248] sm:$0xff] %vm1586_vm4, %v1531_v0  ;;  %v1195_v7 = vadd.f32 %v2213_v4, %v2675_v6  ;;  %v1189_v9 = vpop.f32.mrb[11].mxu1  ;;  %1595 = vst.msk [vmem:[%s2684_s6 + $0x40] sm:$0xff] %vm1586_vm4, %v1466_v1  ;;  %v870_v10 = vadd.f32 %v2675_v6, %v869_v8 }
  0xfd   : > { %1659 = vst.msk [vmem:[%s2684_s6 + $0x240] sm:$0xff] %vm1586_vm4, %v1530_v2  ;;  %v1190_v11 = vadd.f32 %v2675_v6, %v1189_v9  ;;  %v1469_v12 = vmax.f32 %v875_v5, 0.0 }
  0xfe   : > { %v1533_v13 = vmax.f32 %v1195_v7, 0.0  ;;  %v1468_v14 = vmax.f32 %v870_v10, 0.0  ;;  %v2120_v16 = vpop.f32.mrb[12].mxu0 }
  0xff   : > { %v1532_v15 = vmax.f32 %v1190_v11, 0.0  ;;  %v2216_v17 = vpop.f32.mrb[12].mxu1  ;;  %1598 = vst.msk [vmem:[%s2684_s6 + $0x58] sm:$0xff] %vm1586_vm4, %v1469_v12  ;;  %v885_v18 = vadd.f32 %v2120_v16, %v2675_v6  ;;  %v879_v20 = vpop.f32.mrb[13].mxu0 }
 0x100   : > { %1662 = vst.msk [vmem:[%s2684_s6 + $0x258] sm:$0xff] %vm1586_vm4, %v1533_v13  ;;  %v1205_v19 = vadd.f32 %v2216_v17, %v2675_v6  ;;  %v1199_v21 = vpop.f32.mrb[13].mxu1  ;;  %1597 = vst.msk [vmem:[%s2684_s6 + $0x50] sm:$0xff] %vm1586_vm4, %v1468_v14  ;;  %v880_v22 = vadd.f32 %v2675_v6, %v879_v20 }
 0x101   : > { %1661 = vst.msk [vmem:[%s2684_s6 + $0x250] sm:$0xff] %vm1586_vm4, %v1532_v15  ;;  %v1200_v23 = vadd.f32 %v2675_v6, %v1199_v21  ;;  %v1471_v24 = vmax.f32 %v885_v18, 0.0 }
 0x102   : > { %v1535_v25 = vmax.f32 %v1205_v19, 0.0  ;;  %v1470_v26 = vmax.f32 %v880_v22, 0.0  ;;  %v2123_v28 = vpop.f32.mrb[14].mxu0 }
 0x103   : > { %v1534_v27 = vmax.f32 %v1200_v23, 0.0  ;;  %v2219_v29 = vpop.f32.mrb[14].mxu1  ;;  %1600 = vst.msk [vmem:[%s2684_s6 + $0x68] sm:$0xff] %vm1586_vm4, %v1471_v24  ;;  %v895_v30 = vadd.f32 %v2123_v28, %v2675_v6  ;;  %v889_v32 = vpop.f32.mrb[15].mxu0 }
 0x104   : > { %1664 = vst.msk [vmem:[%s2684_s6 + $0x268] sm:$0xff] %vm1586_vm4, %v1535_v25  ;;  %v1215_v31 = vadd.f32 %v2219_v29, %v2675_v6  ;;  %v1209_v33 = vpop.f32.mrb[15].mxu1  ;;  %1599 = vst.msk [vmem:[%s2684_s6 + $0x60] sm:$0xff] %vm1586_vm4, %v1470_v26  ;;  %v890_v34 = vadd.f32 %v2675_v6, %v889_v32 }
 0x105   : > { %1663 = vst.msk [vmem:[%s2684_s6 + $0x260] sm:$0xff] %vm1586_vm4, %v1534_v27  ;;  %v1210_v35 = vadd.f32 %v2675_v6, %v1209_v33  ;;  %v1473_v36 = vmax.f32 %v895_v30, 0.0 }
 0x106   : > { %v1537_v37 = vmax.f32 %v1215_v31, 0.0  ;;  %v1472_v38 = vmax.f32 %v890_v34, 0.0  ;;  %v2126_v40 = vpop.f32.mrb[16].mxu0 }
 0x107   : > { %v1536_v39 = vmax.f32 %v1210_v35, 0.0  ;;  %v2222_v41 = vpop.f32.mrb[16].mxu1  ;;  %1602 = vst.msk [vmem:[%s2684_s6 + $0x78] sm:$0xff] %vm1586_vm4, %v1473_v36  ;;  %v905_v42 = vadd.f32 %v2126_v40, %v2675_v6  ;;  %v899_v44 = vpop.f32.mrb[17].mxu0 }
 0x108   : > { %1666 = vst.msk [vmem:[%s2684_s6 + $0x278] sm:$0xff] %vm1586_vm4, %v1537_v37  ;;  %v1225_v43 = vadd.f32 %v2222_v41, %v2675_v6  ;;  %v1219_v45 = vpop.f32.mrb[17].mxu1  ;;  %1601 = vst.msk [vmem:[%s2684_s6 + $0x70] sm:$0xff] %vm1586_vm4, %v1472_v38  ;;  %v900_v46 = vadd.f32 %v2675_v6, %v899_v44 }
 0x109   : > { %1665 = vst.msk [vmem:[%s2684_s6 + $0x270] sm:$0xff] %vm1586_vm4, %v1536_v39  ;;  %v1220_v47 = vadd.f32 %v2675_v6, %v1219_v45  ;;  %v1475_v48 = vmax.f32 %v905_v42, 0.0 }
 0x10a   : > { %v1539_v49 = vmax.f32 %v1225_v43, 0.0  ;;  %v1474_v50 = vmax.f32 %v900_v46, 0.0  ;;  %v2129_v52 = vpop.f32.mrb[18].mxu0 }
 0x10b   : > { %v1538_v51 = vmax.f32 %v1220_v47, 0.0  ;;  %v2225_v53 = vpop.f32.mrb[18].mxu1  ;;  %1604 = vst.msk [vmem:[%s2684_s6 + $0x88] sm:$0xff] %vm1586_vm4, %v1475_v48  ;;  %v915_v54 = vadd.f32 %v2129_v52, %v2675_v6  ;;  %v909_v56 = vpop.f32.mrb[19].mxu0 }
 0x10c   : > { %1668 = vst.msk [vmem:[%s2684_s6 + $0x288] sm:$0xff] %vm1586_vm4, %v1539_v49  ;;  %v1235_v55 = vadd.f32 %v2225_v53, %v2675_v6  ;;  %v1229_v57 = vpop.f32.mrb[19].mxu1  ;;  %1603 = vst.msk [vmem:[%s2684_s6 + $0x80] sm:$0xff] %vm1586_vm4, %v1474_v50  ;;  %v910_v58 = vadd.f32 %v2675_v6, %v909_v56 }
 0x10d   : > { %1667 = vst.msk [vmem:[%s2684_s6 + $0x280] sm:$0xff] %vm1586_vm4, %v1538_v51  ;;  %v1230_v59 = vadd.f32 %v2675_v6, %v1229_v57  ;;  %v1477_v60 = vmax.f32 %v915_v54, 0.0 }
 0x10e   : > { %v1541_v61 = vmax.f32 %v1235_v55, 0.0  ;;  %v1476_v62 = vmax.f32 %v910_v58, 0.0  ;;  %v2132_v0 = vpop.f32.mrb[20].mxu0 }
 0x10f   : > { %v1540_v63 = vmax.f32 %v1230_v59, 0.0  ;;  %v2228_v1 = vpop.f32.mrb[20].mxu1  ;;  %1606 = vst.msk [vmem:[%s2684_s6 + $0x98] sm:$0xff] %vm1586_vm4, %v1477_v60  ;;  %v925_v2 = vadd.f32 %v2132_v0, %v2675_v6  ;;  %v919_v4 = vpop.f32.mrb[21].mxu0 }
 0x110   : > { %1670 = vst.msk [vmem:[%s2684_s6 + $0x298] sm:$0xff] %vm1586_vm4, %v1541_v61  ;;  %v1245_v3 = vadd.f32 %v2228_v1, %v2675_v6  ;;  %v1239_v5 = vpop.f32.mrb[21].mxu1  ;;  %1605 = vst.msk [vmem:[%s2684_s6 + $0x90] sm:$0xff] %vm1586_vm4, %v1476_v62  ;;  %v920_v7 = vadd.f32 %v2675_v6, %v919_v4 }
 0x111   : > { %1669 = vst.msk [vmem:[%s2684_s6 + $0x290] sm:$0xff] %vm1586_vm4, %v1540_v63  ;;  %v1240_v8 = vadd.f32 %v2675_v6, %v1239_v5  ;;  %v1479_v9 = vmax.f32 %v925_v2, 0.0 }
 0x112   : > { %v1543_v10 = vmax.f32 %v1245_v3, 0.0  ;;  %v1478_v11 = vmax.f32 %v920_v7, 0.0  ;;  %v2135_v13 = vpop.f32.mrb[22].mxu0 }
 0x113   : > { %v1542_v12 = vmax.f32 %v1240_v8, 0.0  ;;  %v2231_v14 = vpop.f32.mrb[22].mxu1  ;;  %1608 = vst.msk [vmem:[%s2684_s6 + $0xa8] sm:$0xff] %vm1586_vm4, %v1479_v9  ;;  %v935_v15 = vadd.f32 %v2135_v13, %v2675_v6  ;;  %v929_v17 = vpop.f32.mrb[23].mxu0 }
 0x114   : > { %1672 = vst.msk [vmem:[%s2684_s6 + $0x2a8] sm:$0xff] %vm1586_vm4, %v1543_v10  ;;  %v1255_v16 = vadd.f32 %v2231_v14, %v2675_v6  ;;  %v1249_v18 = vpop.f32.mrb[23].mxu1  ;;  %1607 = vst.msk [vmem:[%s2684_s6 + $0xa0] sm:$0xff] %vm1586_vm4, %v1478_v11  ;;  %v930_v19 = vadd.f32 %v2675_v6, %v929_v17 }
 0x115   : > { %1671 = vst.msk [vmem:[%s2684_s6 + $0x2a0] sm:$0xff] %vm1586_vm4, %v1542_v12  ;;  %v1250_v20 = vadd.f32 %v2675_v6, %v1249_v18  ;;  %v1481_v21 = vmax.f32 %v935_v15, 0.0 }
 0x116   : > { %v1545_v22 = vmax.f32 %v1255_v16, 0.0  ;;  %v1480_v23 = vmax.f32 %v930_v19, 0.0  ;;  %v2138_v25 = vpop.f32.mrb[24].mxu0 }
 0x117   : > { %v1544_v24 = vmax.f32 %v1250_v20, 0.0  ;;  %v2234_v26 = vpop.f32.mrb[24].mxu1  ;;  %1610 = vst.msk [vmem:[%s2684_s6 + $0xb8] sm:$0xff] %vm1586_vm4, %v1481_v21  ;;  %v945_v27 = vadd.f32 %v2138_v25, %v2675_v6  ;;  %v939_v29 = vpop.f32.mrb[25].mxu0 }
 0x118   : > { %1674 = vst.msk [vmem:[%s2684_s6 + $0x2b8] sm:$0xff] %vm1586_vm4, %v1545_v22  ;;  %v1265_v28 = vadd.f32 %v2234_v26, %v2675_v6  ;;  %v1259_v30 = vpop.f32.mrb[25].mxu1  ;;  %1609 = vst.msk [vmem:[%s2684_s6 + $0xb0] sm:$0xff] %vm1586_vm4, %v1480_v23  ;;  %v940_v31 = vadd.f32 %v2675_v6, %v939_v29 }
 0x119   : > { %1673 = vst.msk [vmem:[%s2684_s6 + $0x2b0] sm:$0xff] %vm1586_vm4, %v1544_v24  ;;  %v1260_v32 = vadd.f32 %v2675_v6, %v1259_v30  ;;  %v1483_v33 = vmax.f32 %v945_v27, 0.0 }
 0x11a   : > { %v1547_v34 = vmax.f32 %v1265_v28, 0.0  ;;  %v1482_v35 = vmax.f32 %v940_v31, 0.0  ;;  %v2141_v37 = vpop.f32.mrb[26].mxu0 }
 0x11b   : > { %v1546_v36 = vmax.f32 %v1260_v32, 0.0  ;;  %v2237_v38 = vpop.f32.mrb[26].mxu1  ;;  %1612 = vst.msk [vmem:[%s2684_s6 + $0xc8] sm:$0xff] %vm1586_vm4, %v1483_v33  ;;  %v955_v39 = vadd.f32 %v2141_v37, %v2675_v6  ;;  %v949_v41 = vpop.f32.mrb[27].mxu0 }
 0x11c   : > { %1676 = vst.msk [vmem:[%s2684_s6 + $0x2c8] sm:$0xff] %vm1586_vm4, %v1547_v34  ;;  %v1275_v40 = vadd.f32 %v2237_v38, %v2675_v6  ;;  %v1269_v42 = vpop.f32.mrb[27].mxu1  ;;  %1611 = vst.msk [vmem:[%s2684_s6 + $0xc0] sm:$0xff] %vm1586_vm4, %v1482_v35  ;;  %v950_v43 = vadd.f32 %v2675_v6, %v949_v41 }
 0x11d   : > { %1675 = vst.msk [vmem:[%s2684_s6 + $0x2c0] sm:$0xff] %vm1586_vm4, %v1546_v36  ;;  %v1270_v44 = vadd.f32 %v2675_v6, %v1269_v42  ;;  %v1485_v45 = vmax.f32 %v955_v39, 0.0 }
 0x11e   : > { %v1549_v46 = vmax.f32 %v1275_v40, 0.0  ;;  %v1484_v47 = vmax.f32 %v950_v43, 0.0  ;;  %v2144_v49 = vpop.f32.mrb[28].mxu0 }
 0x11f   : > { %v1548_v48 = vmax.f32 %v1270_v44, 0.0  ;;  %v2240_v50 = vpop.f32.mrb[28].mxu1  ;;  %1614 = vst.msk [vmem:[%s2684_s6 + $0xd8] sm:$0xff] %vm1586_vm4, %v1485_v45  ;;  %v965_v51 = vadd.f32 %v2144_v49, %v2675_v6  ;;  %v959_v53 = vpop.f32.mrb[29].mxu0 }
 0x120   : > { %1678 = vst.msk [vmem:[%s2684_s6 + $0x2d8] sm:$0xff] %vm1586_vm4, %v1549_v46  ;;  %v1285_v52 = vadd.f32 %v2240_v50, %v2675_v6  ;;  %v1279_v54 = vpop.f32.mrb[29].mxu1  ;;  %1613 = vst.msk [vmem:[%s2684_s6 + $0xd0] sm:$0xff] %vm1586_vm4, %v1484_v47  ;;  %v960_v55 = vadd.f32 %v2675_v6, %v959_v53 }
 0x121   : > { %1677 = vst.msk [vmem:[%s2684_s6 + $0x2d0] sm:$0xff] %vm1586_vm4, %v1548_v48  ;;  %v1280_v56 = vadd.f32 %v2675_v6, %v1279_v54  ;;  %v1487_v57 = vmax.f32 %v965_v51, 0.0 }
 0x122   : > { %v1551_v58 = vmax.f32 %v1285_v52, 0.0  ;;  %v1486_v59 = vmax.f32 %v960_v55, 0.0  ;;  %v2147_v61 = vpop.f32.mrb[30].mxu0 }
 0x123   : > { %v1550_v60 = vmax.f32 %v1280_v56, 0.0  ;;  %v2243_v62 = vpop.f32.mrb[30].mxu1  ;;  %1616 = vst.msk [vmem:[%s2684_s6 + $0xe8] sm:$0xff] %vm1586_vm4, %v1487_v57  ;;  %v975_v63 = vadd.f32 %v2147_v61, %v2675_v6  ;;  %v969_v1 = vpop.f32.mrb[31].mxu0 }
 0x124   : > { %1680 = vst.msk [vmem:[%s2684_s6 + $0x2e8] sm:$0xff] %vm1586_vm4, %v1551_v58  ;;  %v1295_v0 = vadd.f32 %v2243_v62, %v2675_v6  ;;  %v1289_v2 = vpop.f32.mrb[31].mxu1  ;;  %1615 = vst.msk [vmem:[%s2684_s6 + $0xe0] sm:$0xff] %vm1586_vm4, %v1486_v59  ;;  %v970_v3 = vadd.f32 %v2675_v6, %v969_v1 }
 0x125   : > { %1679 = vst.msk [vmem:[%s2684_s6 + $0x2e0] sm:$0xff] %vm1586_vm4, %v1550_v60  ;;  %v1290_v4 = vadd.f32 %v2675_v6, %v1289_v2  ;;  %v1489_v5 = vmax.f32 %v975_v63, 0.0 }
 0x126   : > { %v1553_v7 = vmax.f32 %v1295_v0, 0.0  ;;  %v1488_v8 = vmax.f32 %v970_v3, 0.0  ;;  %v2150_v10 = vpop.f32.mrb[32].mxu0 }
 0x127   : > { %v1552_v9 = vmax.f32 %v1290_v4, 0.0  ;;  %v2246_v11 = vpop.f32.mrb[32].mxu1  ;;  %1618 = vst.msk [vmem:[%s2684_s6 + $0xf8] sm:$0xff] %vm1586_vm4, %v1489_v5  ;;  %v985_v12 = vadd.f32 %v2150_v10, %v2675_v6  ;;  %v979_v14 = vpop.f32.mrb[33].mxu0 }
 0x128   : > { %1682 = vst.msk [vmem:[%s2684_s6 + $0x2f8] sm:$0xff] %vm1586_vm4, %v1553_v7  ;;  %v1305_v13 = vadd.f32 %v2246_v11, %v2675_v6  ;;  %v1299_v15 = vpop.f32.mrb[33].mxu1  ;;  %1617 = vst.msk [vmem:[%s2684_s6 + $0xf0] sm:$0xff] %vm1586_vm4, %v1488_v8  ;;  %v980_v16 = vadd.f32 %v2675_v6, %v979_v14 }
 0x129   : > { %1681 = vst.msk [vmem:[%s2684_s6 + $0x2f0] sm:$0xff] %vm1586_vm4, %v1552_v9  ;;  %v1300_v17 = vadd.f32 %v2675_v6, %v1299_v15  ;;  %v1491_v18 = vmax.f32 %v985_v12, 0.0 }
 0x12a   : > { %v1555_v19 = vmax.f32 %v1305_v13, 0.0  ;;  %v1490_v20 = vmax.f32 %v980_v16, 0.0  ;;  %v2153_v22 = vpop.f32.mrb[34].mxu0 }
 0x12b   : > { %v1554_v21 = vmax.f32 %v1300_v17, 0.0  ;;  %v2249_v23 = vpop.f32.mrb[34].mxu1  ;;  %1620 = vst.msk [vmem:[%s2684_s6 + $0x108] sm:$0xff] %vm1586_vm4, %v1491_v18  ;;  %v995_v24 = vadd.f32 %v2153_v22, %v2675_v6  ;;  %v989_v26 = vpop.f32.mrb[35].mxu0 }
 0x12c   : > { %1684 = vst.msk [vmem:[%s2684_s6 + $0x308] sm:$0xff] %vm1586_vm4, %v1555_v19  ;;  %v1315_v25 = vadd.f32 %v2249_v23, %v2675_v6  ;;  %v1309_v27 = vpop.f32.mrb[35].mxu1  ;;  %1619 = vst.msk [vmem:[%s2684_s6 + $0x100] sm:$0xff] %vm1586_vm4, %v1490_v20  ;;  %v990_v28 = vadd.f32 %v2675_v6, %v989_v26 }
 0x12d   : > { %1683 = vst.msk [vmem:[%s2684_s6 + $0x300] sm:$0xff] %vm1586_vm4, %v1554_v21  ;;  %v1310_v29 = vadd.f32 %v2675_v6, %v1309_v27  ;;  %v1493_v30 = vmax.f32 %v995_v24, 0.0 }
 0x12e   : > { %v1557_v31 = vmax.f32 %v1315_v25, 0.0  ;;  %v1492_v32 = vmax.f32 %v990_v28, 0.0  ;;  %v2156_v34 = vpop.f32.mrb[36].mxu0 }
 0x12f   : > { %v1556_v33 = vmax.f32 %v1310_v29, 0.0  ;;  %v2252_v35 = vpop.f32.mrb[36].mxu1  ;;  %1622 = vst.msk [vmem:[%s2684_s6 + $0x118] sm:$0xff] %vm1586_vm4, %v1493_v30  ;;  %v1005_v36 = vadd.f32 %v2156_v34, %v2675_v6  ;;  %v999_v38 = vpop.f32.mrb[37].mxu0 }
 0x130   : > { %1686 = vst.msk [vmem:[%s2684_s6 + $0x318] sm:$0xff] %vm1586_vm4, %v1557_v31  ;;  %v1325_v37 = vadd.f32 %v2252_v35, %v2675_v6  ;;  %v1319_v39 = vpop.f32.mrb[37].mxu1  ;;  %1621 = vst.msk [vmem:[%s2684_s6 + $0x110] sm:$0xff] %vm1586_vm4, %v1492_v32  ;;  %v1000_v40 = vadd.f32 %v2675_v6, %v999_v38 }
 0x131   : > { %1685 = vst.msk [vmem:[%s2684_s6 + $0x310] sm:$0xff] %vm1586_vm4, %v1556_v33  ;;  %v1320_v41 = vadd.f32 %v2675_v6, %v1319_v39  ;;  %v1495_v42 = vmax.f32 %v1005_v36, 0.0 }
 0x132   : > { %v1559_v43 = vmax.f32 %v1325_v37, 0.0  ;;  %v1494_v44 = vmax.f32 %v1000_v40, 0.0  ;;  %v2159_v46 = vpop.f32.mrb[38].mxu0 }
 0x133   : > { %v1558_v45 = vmax.f32 %v1320_v41, 0.0  ;;  %v2255_v47 = vpop.f32.mrb[38].mxu1  ;;  %1624 = vst.msk [vmem:[%s2684_s6 + $0x128] sm:$0xff] %vm1586_vm4, %v1495_v42  ;;  %v1015_v48 = vadd.f32 %v2159_v46, %v2675_v6  ;;  %v1009_v50 = vpop.f32.mrb[39].mxu0 }
 0x134   : > { %1688 = vst.msk [vmem:[%s2684_s6 + $0x328] sm:$0xff] %vm1586_vm4, %v1559_v43  ;;  %v1335_v49 = vadd.f32 %v2255_v47, %v2675_v6  ;;  %v1329_v51 = vpop.f32.mrb[39].mxu1  ;;  %1623 = vst.msk [vmem:[%s2684_s6 + $0x120] sm:$0xff] %vm1586_vm4, %v1494_v44  ;;  %v1010_v52 = vadd.f32 %v2675_v6, %v1009_v50 }
 0x135   : > { %1687 = vst.msk [vmem:[%s2684_s6 + $0x320] sm:$0xff] %vm1586_vm4, %v1558_v45  ;;  %v1330_v53 = vadd.f32 %v2675_v6, %v1329_v51  ;;  %v1497_v54 = vmax.f32 %v1015_v48, 0.0 }
 0x136   : > { %v1561_v55 = vmax.f32 %v1335_v49, 0.0  ;;  %v1496_v56 = vmax.f32 %v1010_v52, 0.0  ;;  %v2162_v58 = vpop.f32.mrb[40].mxu0 }
 0x137   : > { %v1560_v57 = vmax.f32 %v1330_v53, 0.0  ;;  %v2258_v59 = vpop.f32.mrb[40].mxu1  ;;  %1626 = vst.msk [vmem:[%s2684_s6 + $0x138] sm:$0xff] %vm1586_vm4, %v1497_v54  ;;  %v1025_v60 = vadd.f32 %v2162_v58, %v2675_v6  ;;  %v1019_v62 = vpop.f32.mrb[41].mxu0 }
 0x138   : > { %1690 = vst.msk [vmem:[%s2684_s6 + $0x338] sm:$0xff] %vm1586_vm4, %v1561_v55  ;;  %v1345_v61 = vadd.f32 %v2258_v59, %v2675_v6  ;;  %v1339_v63 = vpop.f32.mrb[41].mxu1  ;;  %1625 = vst.msk [vmem:[%s2684_s6 + $0x130] sm:$0xff] %vm1586_vm4, %v1496_v56  ;;  %v1020_v0 = vadd.f32 %v2675_v6, %v1019_v62 }
 0x139   : > { %1689 = vst.msk [vmem:[%s2684_s6 + $0x330] sm:$0xff] %vm1586_vm4, %v1560_v57  ;;  %v1340_v1 = vadd.f32 %v2675_v6, %v1339_v63  ;;  %v1499_v2 = vmax.f32 %v1025_v60, 0.0 }
 0x13a   : > { %v1563_v3 = vmax.f32 %v1345_v61, 0.0  ;;  %v1498_v4 = vmax.f32 %v1020_v0, 0.0  ;;  %v2165_v7 = vpop.f32.mrb[42].mxu0 }
 0x13b   : > { %v1562_v5 = vmax.f32 %v1340_v1, 0.0  ;;  %v2261_v8 = vpop.f32.mrb[42].mxu1  ;;  %1628 = vst.msk [vmem:[%s2684_s6 + $0x148] sm:$0xff] %vm1586_vm4, %v1499_v2  ;;  %v1035_v9 = vadd.f32 %v2165_v7, %v2675_v6  ;;  %v1029_v11 = vpop.f32.mrb[43].mxu0 }
 0x13c   : > { %1692 = vst.msk [vmem:[%s2684_s6 + $0x348] sm:$0xff] %vm1586_vm4, %v1563_v3  ;;  %v1355_v10 = vadd.f32 %v2261_v8, %v2675_v6  ;;  %v1349_v12 = vpop.f32.mrb[43].mxu1  ;;  %1627 = vst.msk [vmem:[%s2684_s6 + $0x140] sm:$0xff] %vm1586_vm4, %v1498_v4  ;;  %v1030_v13 = vadd.f32 %v2675_v6, %v1029_v11 }
 0x13d   : > { %1691 = vst.msk [vmem:[%s2684_s6 + $0x340] sm:$0xff] %vm1586_vm4, %v1562_v5  ;;  %v1350_v14 = vadd.f32 %v2675_v6, %v1349_v12  ;;  %v1501_v15 = vmax.f32 %v1035_v9, 0.0 }
 0x13e   : > { %v1565_v16 = vmax.f32 %v1355_v10, 0.0  ;;  %v1500_v17 = vmax.f32 %v1030_v13, 0.0  ;;  %v2168_v19 = vpop.f32.mrb[44].mxu0 }
 0x13f   : > { %v1564_v18 = vmax.f32 %v1350_v14, 0.0  ;;  %v2264_v20 = vpop.f32.mrb[44].mxu1  ;;  %1630 = vst.msk [vmem:[%s2684_s6 + $0x158] sm:$0xff] %vm1586_vm4, %v1501_v15  ;;  %v1045_v21 = vadd.f32 %v2168_v19, %v2675_v6  ;;  %v1039_v23 = vpop.f32.mrb[45].mxu0 }
 0x140   : > { %1694 = vst.msk [vmem:[%s2684_s6 + $0x358] sm:$0xff] %vm1586_vm4, %v1565_v16  ;;  %v1365_v22 = vadd.f32 %v2264_v20, %v2675_v6  ;;  %v1359_v24 = vpop.f32.mrb[45].mxu1  ;;  %1629 = vst.msk [vmem:[%s2684_s6 + $0x150] sm:$0xff] %vm1586_vm4, %v1500_v17  ;;  %v1040_v25 = vadd.f32 %v2675_v6, %v1039_v23 }
 0x141   : > { %1693 = vst.msk [vmem:[%s2684_s6 + $0x350] sm:$0xff] %vm1586_vm4, %v1564_v18  ;;  %v1360_v26 = vadd.f32 %v2675_v6, %v1359_v24  ;;  %v1503_v27 = vmax.f32 %v1045_v21, 0.0 }
 0x142   : > { %v1567_v28 = vmax.f32 %v1365_v22, 0.0  ;;  %v1502_v29 = vmax.f32 %v1040_v25, 0.0  ;;  %v2171_v31 = vpop.f32.mrb[46].mxu0 }
 0x143   : > { %v1566_v30 = vmax.f32 %v1360_v26, 0.0  ;;  %v2267_v32 = vpop.f32.mrb[46].mxu1  ;;  %1632 = vst.msk [vmem:[%s2684_s6 + $0x168] sm:$0xff] %vm1586_vm4, %v1503_v27  ;;  %v1055_v33 = vadd.f32 %v2171_v31, %v2675_v6  ;;  %v1049_v35 = vpop.f32.mrb[47].mxu0 }
 0x144   : > { %1696 = vst.msk [vmem:[%s2684_s6 + $0x368] sm:$0xff] %vm1586_vm4, %v1567_v28  ;;  %v1375_v34 = vadd.f32 %v2267_v32, %v2675_v6  ;;  %v1369_v36 = vpop.f32.mrb[47].mxu1  ;;  %1631 = vst.msk [vmem:[%s2684_s6 + $0x160] sm:$0xff] %vm1586_vm4, %v1502_v29  ;;  %v1050_v37 = vadd.f32 %v2675_v6, %v1049_v35 }
 0x145   : > { %1695 = vst.msk [vmem:[%s2684_s6 + $0x360] sm:$0xff] %vm1586_vm4, %v1566_v30  ;;  %v1370_v38 = vadd.f32 %v2675_v6, %v1369_v36  ;;  %v1505_v39 = vmax.f32 %v1055_v33, 0.0 }
 0x146   : > { %v1569_v40 = vmax.f32 %v1375_v34, 0.0  ;;  %v1504_v41 = vmax.f32 %v1050_v37, 0.0  ;;  %v2174_v43 = vpop.f32.mrb[48].mxu0 }
 0x147   : > { %v1568_v42 = vmax.f32 %v1370_v38, 0.0  ;;  %v2270_v44 = vpop.f32.mrb[48].mxu1  ;;  %1634 = vst.msk [vmem:[%s2684_s6 + $0x178] sm:$0xff] %vm1586_vm4, %v1505_v39  ;;  %v1065_v45 = vadd.f32 %v2174_v43, %v2675_v6  ;;  %v1059_v47 = vpop.f32.mrb[49].mxu0 }
 0x148   : > { %1698 = vst.msk [vmem:[%s2684_s6 + $0x378] sm:$0xff] %vm1586_vm4, %v1569_v40  ;;  %v1385_v46 = vadd.f32 %v2270_v44, %v2675_v6  ;;  %v1379_v48 = vpop.f32.mrb[49].mxu1  ;;  %1633 = vst.msk [vmem:[%s2684_s6 + $0x170] sm:$0xff] %vm1586_vm4, %v1504_v41  ;;  %v1060_v49 = vadd.f32 %v2675_v6, %v1059_v47 }
 0x149   : > { %1697 = vst.msk [vmem:[%s2684_s6 + $0x370] sm:$0xff] %vm1586_vm4, %v1568_v42  ;;  %v1380_v50 = vadd.f32 %v2675_v6, %v1379_v48  ;;  %v1507_v51 = vmax.f32 %v1065_v45, 0.0 }
 0x14a   : > { %v1571_v52 = vmax.f32 %v1385_v46, 0.0  ;;  %v1506_v53 = vmax.f32 %v1060_v49, 0.0  ;;  %v2177_v55 = vpop.f32.mrb[50].mxu0 }
 0x14b   : > { %v1570_v54 = vmax.f32 %v1380_v50, 0.0  ;;  %v2273_v56 = vpop.f32.mrb[50].mxu1  ;;  %1636 = vst.msk [vmem:[%s2684_s6 + $0x188] sm:$0xff] %vm1586_vm4, %v1507_v51  ;;  %v1075_v57 = vadd.f32 %v2177_v55, %v2675_v6  ;;  %v1069_v59 = vpop.f32.mrb[51].mxu0 }
 0x14c   : > { %1700 = vst.msk [vmem:[%s2684_s6 + $0x388] sm:$0xff] %vm1586_vm4, %v1571_v52  ;;  %v1395_v58 = vadd.f32 %v2273_v56, %v2675_v6  ;;  %v1389_v60 = vpop.f32.mrb[51].mxu1  ;;  %1635 = vst.msk [vmem:[%s2684_s6 + $0x180] sm:$0xff] %vm1586_vm4, %v1506_v53  ;;  %v1070_v61 = vadd.f32 %v2675_v6, %v1069_v59 }
 0x14d   : > { %1699 = vst.msk [vmem:[%s2684_s6 + $0x380] sm:$0xff] %vm1586_vm4, %v1570_v54  ;;  %v1390_v62 = vadd.f32 %v2675_v6, %v1389_v60  ;;  %v1509_v63 = vmax.f32 %v1075_v57, 0.0 }
 0x14e   : > { %v1573_v0 = vmax.f32 %v1395_v58, 0.0  ;;  %v1508_v1 = vmax.f32 %v1070_v61, 0.0  ;;  %v2180_v3 = vpop.f32.mrb[52].mxu0 }
 0x14f   : > { %v1572_v2 = vmax.f32 %v1390_v62, 0.0  ;;  %v2276_v4 = vpop.f32.mrb[52].mxu1  ;;  %1638 = vst.msk [vmem:[%s2684_s6 + $0x198] sm:$0xff] %vm1586_vm4, %v1509_v63  ;;  %v1085_v5 = vadd.f32 %v2180_v3, %v2675_v6  ;;  %v1079_v8 = vpop.f32.mrb[53].mxu0 }
 0x150   : > { %1702 = vst.msk [vmem:[%s2684_s6 + $0x398] sm:$0xff] %vm1586_vm4, %v1573_v0  ;;  %v1405_v7 = vadd.f32 %v2276_v4, %v2675_v6  ;;  %v1399_v9 = vpop.f32.mrb[53].mxu1  ;;  %1637 = vst.msk [vmem:[%s2684_s6 + $0x190] sm:$0xff] %vm1586_vm4, %v1508_v1  ;;  %v1080_v10 = vadd.f32 %v2675_v6, %v1079_v8 }
 0x151   : > { %1701 = vst.msk [vmem:[%s2684_s6 + $0x390] sm:$0xff] %vm1586_vm4, %v1572_v2  ;;  %v1400_v11 = vadd.f32 %v2675_v6, %v1399_v9  ;;  %v1511_v12 = vmax.f32 %v1085_v5, 0.0 }
 0x152   : > { %v1575_v13 = vmax.f32 %v1405_v7, 0.0  ;;  %v1510_v14 = vmax.f32 %v1080_v10, 0.0  ;;  %v2183_v16 = vpop.f32.mrb[54].mxu0 }
 0x153   : > { %v1574_v15 = vmax.f32 %v1400_v11, 0.0  ;;  %v2279_v17 = vpop.f32.mrb[54].mxu1  ;;  %1640 = vst.msk [vmem:[%s2684_s6 + $0x1a8] sm:$0xff] %vm1586_vm4, %v1511_v12  ;;  %v1095_v18 = vadd.f32 %v2183_v16, %v2675_v6  ;;  %v1089_v20 = vpop.f32.mrb[55].mxu0 }
 0x154   : > { %1704 = vst.msk [vmem:[%s2684_s6 + $0x3a8] sm:$0xff] %vm1586_vm4, %v1575_v13  ;;  %v1415_v19 = vadd.f32 %v2279_v17, %v2675_v6  ;;  %v1409_v21 = vpop.f32.mrb[55].mxu1  ;;  %1639 = vst.msk [vmem:[%s2684_s6 + $0x1a0] sm:$0xff] %vm1586_vm4, %v1510_v14  ;;  %v1090_v22 = vadd.f32 %v2675_v6, %v1089_v20 }
 0x155   : > { %1703 = vst.msk [vmem:[%s2684_s6 + $0x3a0] sm:$0xff] %vm1586_vm4, %v1574_v15  ;;  %v1410_v23 = vadd.f32 %v2675_v6, %v1409_v21  ;;  %v1513_v24 = vmax.f32 %v1095_v18, 0.0 }
 0x156   : > { %v1577_v25 = vmax.f32 %v1415_v19, 0.0  ;;  %v1512_v26 = vmax.f32 %v1090_v22, 0.0  ;;  %v2186_v28 = vpop.f32.mrb[56].mxu0 }
 0x157   : > { %v1576_v27 = vmax.f32 %v1410_v23, 0.0  ;;  %v2282_v29 = vpop.f32.mrb[56].mxu1  ;;  %1642 = vst.msk [vmem:[%s2684_s6 + $0x1b8] sm:$0xff] %vm1586_vm4, %v1513_v24  ;;  %v1105_v30 = vadd.f32 %v2186_v28, %v2675_v6  ;;  %v1099_v32 = vpop.f32.mrb[57].mxu0 }
 0x158   : > { %1706 = vst.msk [vmem:[%s2684_s6 + $0x3b8] sm:$0xff] %vm1586_vm4, %v1577_v25  ;;  %v1425_v31 = vadd.f32 %v2282_v29, %v2675_v6  ;;  %v1419_v33 = vpop.f32.mrb[57].mxu1  ;;  %1641 = vst.msk [vmem:[%s2684_s6 + $0x1b0] sm:$0xff] %vm1586_vm4, %v1512_v26  ;;  %v1100_v34 = vadd.f32 %v2675_v6, %v1099_v32 }
 0x159   : > { %1705 = vst.msk [vmem:[%s2684_s6 + $0x3b0] sm:$0xff] %vm1586_vm4, %v1576_v27  ;;  %v1420_v35 = vadd.f32 %v2675_v6, %v1419_v33  ;;  %v1515_v36 = vmax.f32 %v1105_v30, 0.0 }
 0x15a   : > { %v1579_v37 = vmax.f32 %v1425_v31, 0.0  ;;  %v1514_v38 = vmax.f32 %v1100_v34, 0.0  ;;  %v2189_v40 = vpop.f32.mrb[58].mxu0 }
 0x15b   : > { %v1578_v39 = vmax.f32 %v1420_v35, 0.0  ;;  %v2285_v41 = vpop.f32.mrb[58].mxu1  ;;  %1644 = vst.msk [vmem:[%s2684_s6 + $0x1c8] sm:$0xff] %vm1586_vm4, %v1515_v36  ;;  %v1115_v42 = vadd.f32 %v2189_v40, %v2675_v6  ;;  %v1109_v44 = vpop.f32.mrb[59].mxu0 }
 0x15c   : > { %1708 = vst.msk [vmem:[%s2684_s6 + $0x3c8] sm:$0xff] %vm1586_vm4, %v1579_v37  ;;  %v1435_v43 = vadd.f32 %v2285_v41, %v2675_v6  ;;  %v1429_v45 = vpop.f32.mrb[59].mxu1  ;;  %1643 = vst.msk [vmem:[%s2684_s6 + $0x1c0] sm:$0xff] %vm1586_vm4, %v1514_v38  ;;  %v1110_v46 = vadd.f32 %v2675_v6, %v1109_v44 }
 0x15d   : > { %1707 = vst.msk [vmem:[%s2684_s6 + $0x3c0] sm:$0xff] %vm1586_vm4, %v1578_v39  ;;  %v1430_v47 = vadd.f32 %v2675_v6, %v1429_v45  ;;  %v1517_v48 = vmax.f32 %v1115_v42, 0.0 }
 0x15e   : > { %v1581_v49 = vmax.f32 %v1435_v43, 0.0  ;;  %v1516_v50 = vmax.f32 %v1110_v46, 0.0  ;;  %v2192_v52 = vpop.f32.mrb[60].mxu0 }
 0x15f   : > { %v1580_v51 = vmax.f32 %v1430_v47, 0.0  ;;  %v2288_v53 = vpop.f32.mrb[60].mxu1  ;;  %1646 = vst.msk [vmem:[%s2684_s6 + $0x1d8] sm:$0xff] %vm1586_vm4, %v1517_v48  ;;  %v1125_v54 = vadd.f32 %v2192_v52, %v2675_v6  ;;  %v1119_v56 = vpop.f32.mrb[61].mxu0 }
 0x160   : > { %1710 = vst.msk [vmem:[%s2684_s6 + $0x3d8] sm:$0xff] %vm1586_vm4, %v1581_v49  ;;  %v1445_v55 = vadd.f32 %v2288_v53, %v2675_v6  ;;  %v1439_v57 = vpop.f32.mrb[61].mxu1  ;;  %1645 = vst.msk [vmem:[%s2684_s6 + $0x1d0] sm:$0xff] %vm1586_vm4, %v1516_v50  ;;  %v1120_v58 = vadd.f32 %v2675_v6, %v1119_v56 }
 0x161   : > { %1709 = vst.msk [vmem:[%s2684_s6 + $0x3d0] sm:$0xff] %vm1586_vm4, %v1580_v51  ;;  %v1440_v59 = vadd.f32 %v2675_v6, %v1439_v57  ;;  %v1519_v60 = vmax.f32 %v1125_v54, 0.0 }
 0x162   : > { %v1583_v61 = vmax.f32 %v1445_v55, 0.0  ;;  %v1518_v62 = vmax.f32 %v1120_v58, 0.0  ;;  %v2195_v0 = vpop.f32.mrb[62].mxu0 }
 0x163   : > { %v1582_v63 = vmax.f32 %v1440_v59, 0.0  ;;  %v2291_v1 = vpop.f32.mrb[62].mxu1  ;;  %1648 = vst.msk [vmem:[%s2684_s6 + $0x1e8] sm:$0xff] %vm1586_vm4, %v1519_v60  ;;  %v1135_v2 = vadd.f32 %v2195_v0, %v2675_v6  ;;  %v1129_v4 = vpop.f32.mrb[63].mxu0 }
 0x164   : > { %1712 = vst.msk [vmem:[%s2684_s6 + $0x3e8] sm:$0xff] %vm1586_vm4, %v1583_v61  ;;  %v1455_v3 = vadd.f32 %v2291_v1, %v2675_v6  ;;  %v1449_v5 = vpop.f32.mrb[63].mxu1  ;;  %1647 = vst.msk [vmem:[%s2684_s6 + $0x1e0] sm:$0xff] %vm1586_vm4, %v1518_v62  ;;  %v1130_v7 = vadd.f32 %v2675_v6, %v1129_v4 }
 0x165   : > { %1711 = vst.msk [vmem:[%s2684_s6 + $0x3e0] sm:$0xff] %vm1586_vm4, %v1582_v63  ;;  %v1450_v8 = vadd.f32 %v2675_v6, %v1449_v5  ;;  %v1521_v9 = vmax.f32 %v1135_v2, 0.0 }
 0x166   : > { %v1585_v10 = vmax.f32 %v1455_v3, 0.0  ;;  %v1520_v11 = vmax.f32 %v1130_v7, 0.0 }
 0x167   : > { %v1584_v12 = vmax.f32 %v1450_v8, 0.0  ;;  %1650 = vst.msk [vmem:[%s2684_s6 + $0x1f8] sm:$0xff] %vm1586_vm4, %v1521_v9 }
 0x168   : > { %1714 = vst.msk [vmem:[%s2684_s6 + $0x3f8] sm:$0xff] %vm1586_vm4, %v1585_v10  ;;  %1649 = vst.msk [vmem:[%s2684_s6 + $0x1f0] sm:$0xff] %vm1586_vm4, %v1520_v11 }
 0x169   : > { %1713 = vst.msk [vmem:[%s2684_s6 + $0x3f0] sm:$0xff] %vm1586_vm4, %v1584_v12 }
 0x16a PF: > { %s13_s14 = sadd.s32 1, %s2353_s14   ;;  %s3081_s12 = smov %s2349_s13 }
 0x16b   : > { %p10_p5 = scmp.ge.s32.totalorder %s13_s14, 10   ;;  %s3082_s13 = smov %s3084_s15 }
 0x16d   :  { %12 = sbr.rel (!%p10_p5) target bundleno = 2 (0x2), region = 68 }

// kernel: lenet_forward.4
= control target key start
LH: loop header
LB: loop body
LE: loop exit
PB: predicated region body
PF: predicated region fallthrough
CT: control target
= control target key end

     0   :  { %s1835_s12 = smov 0   ;;  %s1837_s13 = smov 0   ;;  %s2544_s0 = inlined_call_operand.vmem [shape: f32[1568,150], index: 0, kind: input, shape index: {}]   ;;  %s2545_s1 = inlined_call_operand.vmem [shape: f32[150,16], index: 1, kind: input, shape index: {}]   ;;  %s2546_s2 = inlined_call_operand.vmem [shape: f32[1,16], index: 2, kind: input, shape index: {}]   ;;  %s2547_s3 = inlined_call_operand.vmem [shape: f32[1568,16], index: 3, kind: output, shape index: {}]  }
   0x1   :  { %s1839_s14 = smov 0  }
   0x2 LB: > { %s25_s15 = sadd.s32 1, %s1807_s13  ;;  %p1609_p0 = scmp.ge.s32.totalorder %s1811_s14, 1  ;;  %s1811_s14 = sphi %s1839_s14, %s13_s14   ;;  %s1807_s13 = sphi %s1837_s13, %s2549_s13   ;;  %s1803_s12 = sphi %s1835_s12, %s2548_s12  }
   0x3   : > { %p27_p1 = scmp.ge.s32.totalorder %s25_s15, 2  ;;  %p170_p2 = scmp.lt.s32.totalorder %s1811_s14, 3 }
   0x5   : > { %s2551_s15 = smov (%p27_p1, %s25_s15), 0  ;;  %p171_p3 = pnand %p1609_p0, %p170_p2 }
   0x6   : > { %v424_v0 = vld [vmem:[%s2545_s1] sm:$0xff] (!%p171_p3)  ;;  %v425_v1 = vld [vmem:[%s2545_s1 + $0x8] sm:$0xff] (!%p171_p3)  ;;  %v426_v2 = vld [vmem:[%s2545_s1 + $0x10] sm:$0xff] (!%p171_p3)  ;;  %v1813_v3 = vmov (!%p171_p3), 0.0|0.0   ;;  %s205_s24 = smul.u32 (!%p171_p3), 98, %s1803_s12  ;;  %vm450_vm0 = vcmask (!%p171_p3), 179200  }
   0x7   : > { %174 = sbr.rel (%p171_p3) target bundleno = 455 (0x1c7), region = 32  ;;  %1716 = vmatprep.subr.bf16.mxu0 (!%p171_p3), %v1813_v3  ;;  %1743 = vmatprep.subr.bf16.mxu1 (!%p171_p3), %v1813_v3  ;;  %v1717_v4 = vpack.c.bf16 (!%p171_p3), %v425_v1, %v424_v0  ;;  %v427_v5 = vld [vmem:[%s2545_s1 + $0x18] sm:$0xff] (!%p171_p3)  ;;  %v428_v7 = vld [vmem:[%s2545_s1 + $0x20] sm:$0xff] (!%p171_p3)  ;;  %v429_v8 = vld [vmem:[%s2545_s1 + $0x28] sm:$0xff] (!%p171_p3)  ;;  %v1814_v30 = vmov (!%p171_p3), 0.0   ;;  %vm745_vm1 = vcmask (!%p171_p3), 1045504  }
   0x8   : > { %v1720_v6 = vpack.c.bf16 (!%p171_p3), %v427_v5, %v426_v2  ;;  %p206_p4 = scmp.lt.s32.totalorder (!%p171_p3), %s205_s24, 195  ;;  %v1723_v9 = vpack.c.bf16 (!%p171_p3), %v429_v8, %v428_v7  ;;  %v430_v10 = vld [vmem:[%s2545_s1 + $0x30] sm:$0xff] (!%p171_p3)  ;;  %v431_v11 = vld [vmem:[%s2545_s1 + $0x38] sm:$0xff] (!%p171_p3)  ;;  %v432_v15 = vld [vmem:[%s2545_s1 + $0x40] sm:$0xff] (!%p171_p3)  ;;  %vm1402_vm2 = vcmask (!%p171_p3), 130048  }
   0x9   : > { %1718 = vmatpush1.bf16.msra.mxu0 (!%p171_p3), %v1717_v4  ;;  %1753 = vmatpush1.bf16.msra.mxu1 (!%p171_p3), %v1717_v4  ;;  %v1726_v14 = vpack.c.bf16 (!%p171_p3), %v431_v11, %v430_v10  ;;  %v433_v16 = vld [vmem:[%s2545_s1 + $0x48] sm:$0xff] (!%p171_p3)  ;;  %v434_v18 = vld [vmem:[%s2545_s1 + $0x50] sm:$0xff] (!%p171_p3)  ;;  %v435_v19 = vld [vmem:[%s2545_s1 + $0x58] sm:$0xff] (!%p171_p3) }
   0xa   : > { %1719 = vmatprep.subr.bf16.mxu0 (!%p171_p3), %v1813_v3  ;;  %1744 = vmatprep.subr.bf16.mxu1 (!%p171_p3), %v1813_v3  ;;  %v1729_v17 = vpack.c.bf16 (!%p171_p3), %v433_v16, %v432_v15  ;;  %v1732_v20 = vpack.c.bf16 (!%p171_p3), %v435_v19, %v434_v18  ;;  %v436_v21 = vld [vmem:[%s2545_s1 + $0x60] sm:$0xff] (!%p171_p3)  ;;  %v437_v22 = vld [vmem:[%s2545_s1 + $0x68] sm:$0xff] (!%p171_p3)  ;;  %v438_v24 = vld [vmem:[%s2545_s1 + $0x70] sm:$0xff] (!%p171_p3) }
   0xb   : > { %v1735_v23 = vpack.c.bf16 (!%p171_p3), %v437_v22, %v436_v21  ;;  %v439_v25 = vld [vmem:[%s2545_s1 + $0x78] sm:$0xff] (!%p171_p3)  ;;  %v440_v27 = vld [vmem:[%s2545_s1 + $0x80] sm:$0xff] (!%p171_p3)  ;;  %v441_v28 = vld [vmem:[%s2545_s1 + $0x88] sm:$0xff] (!%p171_p3) }
   0xc   : > { %v1738_v26 = vpack.c.bf16 (!%p171_p3), %v439_v25, %v438_v24  ;;  %v1741_v29 = vpack.c.bf16 (!%p171_p3), %v441_v28, %v440_v27  ;;  %v442_v31 = vld [vmem:[%s2545_s1 + $0x90] sm:$0x3f] (!%p171_p3) }
   0xd   : > { %1721 = vmatpush1.bf16.msra.mxu0 (!%p171_p3), %v1720_v6  ;;  %1754 = vmatpush1.bf16.msra.mxu1 (!%p171_p3), %v1720_v6 }
   0xe   : > { %s2553_s24 = smov (!%p206_p4, %s205_s24), 195  ;;  %1722 = vmatprep.subr.bf16.mxu0 %v1813_v3  ;;  %1745 = vmatprep.subr.bf16.mxu1 %v1813_v3 }
   0xf   : > { %s1715_s29 = sshll.u32 %s2553_s24, 4  ;;  %s1612_s12 = sshll.u32 %s2553_s24, 3 }
  0x10   : > { %s1889_s9 = scalar_lea.vmem %s2544_s0, %s1715_s29 }
  0x11   : > { %v229_v12 = vld [vmem:[%s1889_s9 + $0x8] sm:$0xff]  ;;  %v327_v13 = vld [vmem:[%s1889_s9 + $0x318] sm:$0xff]  ;;  %1724 = vmatpush1.bf16.msra.mxu0 %v1723_v9  ;;  %1755 = vmatpush1.bf16.msra.mxu1 %v1723_v9  ;;  %v228_v32 = vld [vmem:[%s1889_s9] sm:$0xff] }
  0x12   : > { %1615 = vmatprep.mubr.msk.f32.mxu0 %vm450_vm0, %v229_v12  ;;  %1664 = vmatprep.mubr.msk.f32.mxu1 %vm450_vm0, %v327_v13  ;;  %v326_v33 = vld [vmem:[%s1889_s9 + $0x310] sm:$0xff]  ;;  %v231_v34 = vld [vmem:[%s1889_s9 + $0x18] sm:$0xff]  ;;  %v329_v35 = vld [vmem:[%s1889_s9 + $0x328] sm:$0xff] }
  0x13   : > { %1725 = vmatprep.subr.bf16.mxu0 %v1813_v3  ;;  %1746 = vmatprep.subr.bf16.mxu1 %v1813_v3  ;;  %v230_v36 = vld [vmem:[%s1889_s9 + $0x10] sm:$0xff]  ;;  %v328_v37 = vld [vmem:[%s1889_s9 + $0x320] sm:$0xff]  ;;  %v233_v38 = vld [vmem:[%s1889_s9 + $0x28] sm:$0xff] }
  0x14   : > { %v331_v39 = vld [vmem:[%s1889_s9 + $0x338] sm:$0xff]  ;;  %v232_v40 = vld [vmem:[%s1889_s9 + $0x20] sm:$0xff]  ;;  %v330_v41 = vld [vmem:[%s1889_s9 + $0x330] sm:$0xff] }
  0x15   : > { %1727 = vmatpush1.bf16.msra.mxu0 %v1726_v14  ;;  %1756 = vmatpush1.bf16.msra.mxu1 %v1726_v14  ;;  %v235_v42 = vld [vmem:[%s1889_s9 + $0x38] sm:$0xff]  ;;  %v333_v43 = vld [vmem:[%s1889_s9 + $0x348] sm:$0xff]  ;;  %v234_v44 = vld [vmem:[%s1889_s9 + $0x30] sm:$0xff] }
  0x16   : > { %1728 = vmatprep.subr.bf16.mxu0 %v1813_v3  ;;  %1747 = vmatprep.subr.bf16.mxu1 %v1813_v3  ;;  %v332_v45 = vld [vmem:[%s1889_s9 + $0x340] sm:$0xff]  ;;  %v237_v46 = vld [vmem:[%s1889_s9 + $0x48] sm:$0xff]  ;;  %v335_v47 = vld [vmem:[%s1889_s9 + $0x358] sm:$0xff] }
  0x17   : > { %v236_v48 = vld [vmem:[%s1889_s9 + $0x40] sm:$0xff]  ;;  %v334_v49 = vld [vmem:[%s1889_s9 + $0x350] sm:$0xff]  ;;  %v239_v50 = vld [vmem:[%s1889_s9 + $0x58] sm:$0xff] }
  0x18   : > { %v337_v51 = vld [vmem:[%s1889_s9 + $0x368] sm:$0xff]  ;;  %v238_v52 = vld [vmem:[%s1889_s9 + $0x50] sm:$0xff]  ;;  %v336_v53 = vld [vmem:[%s1889_s9 + $0x360] sm:$0xff] }
  0x19   : > { %1730 = vmatpush1.bf16.msra.mxu0 %v1729_v17  ;;  %1757 = vmatpush1.bf16.msra.mxu1 %v1729_v17  ;;  %v241_v54 = vld [vmem:[%s1889_s9 + $0x68] sm:$0xff]  ;;  %v339_v55 = vld [vmem:[%s1889_s9 + $0x378] sm:$0xff]  ;;  %v240_v56 = vld [vmem:[%s1889_s9 + $0x60] sm:$0xff] }
  0x1a   : > { %1731 = vmatprep.subr.bf16.mxu0 %v1813_v3  ;;  %1748 = vmatprep.subr.bf16.mxu1 %v1813_v3  ;;  %v338_v57 = vld [vmem:[%s1889_s9 + $0x370] sm:$0xff]  ;;  %v243_v58 = vld [vmem:[%s1889_s9 + $0x78] sm:$0xff]  ;;  %v341_v59 = vld [vmem:[%s1889_s9 + $0x388] sm:$0xff] }
  0x1b   : > { %v242_v60 = vld [vmem:[%s1889_s9 + $0x70] sm:$0xff]  ;;  %v340_v61 = vld [vmem:[%s1889_s9 + $0x380] sm:$0xff]  ;;  %v245_v62 = vld [vmem:[%s1889_s9 + $0x88] sm:$0xff] }
  0x1c   : > { %v343_v63 = vld [vmem:[%s1889_s9 + $0x398] sm:$0xff]  ;;  %v244_v0 = vld [vmem:[%s1889_s9 + $0x80] sm:$0xff]  ;;  %v342_v1 = vld [vmem:[%s1889_s9 + $0x390] sm:$0xff] }
  0x1d   : > { %1733 = vmatpush1.bf16.msra.mxu0 %v1732_v20  ;;  %1758 = vmatpush1.bf16.msra.mxu1 %v1732_v20  ;;  %v247_v2 = vld [vmem:[%s1889_s9 + $0x98] sm:$0xff]  ;;  %v246_v4 = vld [vmem:[%s1889_s9 + $0x90] sm:$0xff]  ;;  %v344_v5 = vld [vmem:[%s1889_s9 + $0x3a0] sm:$0xff] }
  0x1e   : > { %1734 = vmatprep.subr.bf16.mxu0 %v1813_v3  ;;  %1749 = vmatprep.subr.bf16.mxu1 %v1813_v3  ;;  %v249_v6 = vld [vmem:[%s1889_s9 + $0xa8] sm:$0xff]  ;;  %v347_v7 = vld [vmem:[%s1889_s9 + $0x3b8] sm:$0xff]  ;;  %v248_v8 = vld [vmem:[%s1889_s9 + $0xa0] sm:$0xff] }
  0x1f   : > { %v346_v9 = vld [vmem:[%s1889_s9 + $0x3b0] sm:$0xff]  ;;  %v251_v10 = vld [vmem:[%s1889_s9 + $0xb8] sm:$0xff]  ;;  %v349_v11 = vld [vmem:[%s1889_s9 + $0x3c8] sm:$0xff] }
  0x20   : > { %v250_v12 = vld [vmem:[%s1889_s9 + $0xb0] sm:$0xff]  ;;  %v348_v13 = vld [vmem:[%s1889_s9 + $0x3c0] sm:$0xff]  ;;  %v253_v14 = vld [vmem:[%s1889_s9 + $0xc8] sm:$0xff] }
  0x21   : > { %1736 = vmatpush1.bf16.msra.mxu0 %v1735_v23  ;;  %1759 = vmatpush1.bf16.msra.mxu1 %v1735_v23  ;;  %v351_v15 = vld [vmem:[%s1889_s9 + $0x3d8] sm:$0xff]  ;;  %v252_v16 = vld [vmem:[%s1889_s9 + $0xc0] sm:$0xff]  ;;  %v350_v17 = vld [vmem:[%s1889_s9 + $0x3d0] sm:$0xff] }
  0x22   : > { %1737 = vmatprep.subr.bf16.mxu0 %v1813_v3  ;;  %1750 = vmatprep.subr.bf16.mxu1 %v1813_v3  ;;  %v255_v18 = vld [vmem:[%s1889_s9 + $0xd8] sm:$0xff]  ;;  %v353_v19 = vld [vmem:[%s1889_s9 + $0x3e8] sm:$0xff]  ;;  %v254_v20 = vld [vmem:[%s1889_s9 + $0xd0] sm:$0xff] }
  0x23   : > { %v352_v21 = vld [vmem:[%s1889_s9 + $0x3e0] sm:$0xff]  ;;  %v257_v22 = vld [vmem:[%s1889_s9 + $0xe8] sm:$0xff]  ;;  %v355_v23 = vld [vmem:[%s1889_s9 + $0x3f8] sm:$0xff] }
  0x24   : > { %v256_v24 = vld [vmem:[%s1889_s9 + $0xe0] sm:$0xff]  ;;  %v354_v25 = vld [vmem:[%s1889_s9 + $0x3f0] sm:$0xff]  ;;  %v357_v27 = vld [vmem:[%s1889_s9 + $0x408] sm:$0xff] }
  0x25   : > { %1739 = vmatpush1.bf16.msra.mxu0 %v1738_v26  ;;  %1760 = vmatpush1.bf16.msra.mxu1 %v1738_v26  ;;  %v259_v26 = vld [vmem:[%s1889_s9 + $0xf8] sm:$0xff]  ;;  %v258_v28 = vld [vmem:[%s1889_s9 + $0xf0] sm:$0xff] }
  0x26   : > { %1740 = vmatprep.subr.bf16.mxu0 %v1813_v3  ;;  %1751 = vmatprep.subr.bf16.mxu1 %v1813_v3  ;;  %v345_v3 = vld [vmem:[%s1889_s9 + $0x3a8] sm:$0xff] }
  0x29   : > { %1742 = vmatpush1.bf16.msra.mxu0 %v1741_v29  ;;  %1761 = vmatpush1.bf16.msra.mxu1 %v1741_v29  ;;  %v356_v29 = vld [vmem:[%s1889_s9 + $0x400] sm:$0xff] }
  0x2a   : > { %785 = vmatprep.subr.mxu0 %v1814_v30  ;;  %1752 = vmatprep.subr.mxu1 %v1814_v30  ;;  %v261_v30 = vld [vmem:[%s1889_s9 + $0x108] sm:$0xff] }
  0x2d   : > { %1614 = vmatpush1.msk.msra.mxu0 %vm745_vm1, %v442_v31  ;;  %1762 = vmatpush1.msk.msra.mxu1 %vm745_vm1, %v442_v31  ;;  %v359_v31 = vld [vmem:[%s1889_s9 + $0x418] sm:$0xff] }
  0x2e   : > { %814 = vmatmul.mubr.f32.vlgmr.msra.gmra.mrb[0].mxu0 %v228_v32  ;;  %1059 = vmatmul.mubr.f32.vlgmr.msra.gmra.mrb[0].mxu1 %v326_v33  ;;  %v260_v32 = vld [vmem:[%s1889_s9 + $0x100] sm:$0xff]  ;;  %v358_v33 = vld [vmem:[%s1889_s9 + $0x410] sm:$0xff] }
  0x2f   : > { %1616 = vmatprep.mubr.msk.f32.mxu0 %vm450_vm0, %v231_v34  ;;  %1665 = vmatprep.mubr.msk.f32.mxu1 %vm450_vm0, %v329_v35  ;;  %v263_v34 = vld [vmem:[%s1889_s9 + $0x118] sm:$0xff]  ;;  %v361_v35 = vld [vmem:[%s1889_s9 + $0x428] sm:$0xff] }
  0x32   : > { %819 = vmatmul.mubr.f32.gmra.mrb[2].mxu0 %v230_v36  ;;  %1064 = vmatmul.mubr.f32.gmra.mrb[2].mxu1 %v328_v37  ;;  %v262_v36 = vld [vmem:[%s1889_s9 + $0x110] sm:$0xff]  ;;  %v360_v37 = vld [vmem:[%s1889_s9 + $0x420] sm:$0xff] }
  0x33   : > { %1617 = vmatprep.mubr.msk.f32.mxu0 %vm450_vm0, %v233_v38  ;;  %1666 = vmatprep.mubr.msk.f32.mxu1 %vm450_vm0, %v331_v39  ;;  %v265_v38 = vld [vmem:[%s1889_s9 + $0x128] sm:$0xff]  ;;  %v363_v39 = vld [vmem:[%s1889_s9 + $0x438] sm:$0xff] }
  0x36   : > { %824 = vmatmul.mubr.f32.gmra.mrb[4].mxu0 %v232_v40  ;;  %1069 = vmatmul.mubr.f32.gmra.mrb[4].mxu1 %v330_v41  ;;  %v264_v40 = vld [vmem:[%s1889_s9 + $0x120] sm:$0xff]  ;;  %v362_v41 = vld [vmem:[%s1889_s9 + $0x430] sm:$0xff] }
  0x37   : > { %1618 = vmatprep.mubr.msk.f32.mxu0 %vm450_vm0, %v235_v42  ;;  %1667 = vmatprep.mubr.msk.f32.mxu1 %vm450_vm0, %v333_v43  ;;  %v267_v42 = vld [vmem:[%s1889_s9 + $0x138] sm:$0xff]  ;;  %v365_v43 = vld [vmem:[%s1889_s9 + $0x448] sm:$0xff] }
  0x3a   : > { %829 = vmatmul.mubr.f32.gmra.mrb[6].mxu0 %v234_v44  ;;  %1074 = vmatmul.mubr.f32.gmra.mrb[6].mxu1 %v332_v45  ;;  %v266_v44 = vld [vmem:[%s1889_s9 + $0x130] sm:$0xff]  ;;  %v364_v45 = vld [vmem:[%s1889_s9 + $0x440] sm:$0xff] }
  0x3b   : > { %1619 = vmatprep.mubr.msk.f32.mxu0 %vm450_vm0, %v237_v46  ;;  %1668 = vmatprep.mubr.msk.f32.mxu1 %vm450_vm0, %v335_v47  ;;  %v269_v46 = vld [vmem:[%s1889_s9 + $0x148] sm:$0xff]  ;;  %v367_v47 = vld [vmem:[%s1889_s9 + $0x458] sm:$0xff] }
  0x3e   : > { %834 = vmatmul.mubr.f32.gmra.mrb[8].mxu0 %v236_v48  ;;  %1079 = vmatmul.mubr.f32.gmra.mrb[8].mxu1 %v334_v49  ;;  %v268_v48 = vld [vmem:[%s1889_s9 + $0x140] sm:$0xff]  ;;  %v366_v49 = vld [vmem:[%s1889_s9 + $0x450] sm:$0xff] }
  0x3f   : > { %1620 = vmatprep.mubr.msk.f32.mxu0 %vm450_vm0, %v239_v50  ;;  %1669 = vmatprep.mubr.msk.f32.mxu1 %vm450_vm0, %v337_v51  ;;  %v271_v50 = vld [vmem:[%s1889_s9 + $0x158] sm:$0xff]  ;;  %v369_v51 = vld [vmem:[%s1889_s9 + $0x468] sm:$0xff] }
  0x42   : > { %839 = vmatmul.mubr.f32.gmra.mrb[10].mxu0 %v238_v52  ;;  %1084 = vmatmul.mubr.f32.gmra.mrb[10].mxu1 %v336_v53  ;;  %v270_v52 = vld [vmem:[%s1889_s9 + $0x150] sm:$0xff]  ;;  %v368_v53 = vld [vmem:[%s1889_s9 + $0x460] sm:$0xff] }
  0x43   : > { %1621 = vmatprep.mubr.msk.f32.mxu0 %vm450_vm0, %v241_v54  ;;  %1670 = vmatprep.mubr.msk.f32.mxu1 %vm450_vm0, %v339_v55  ;;  %v273_v54 = vld [vmem:[%s1889_s9 + $0x168] sm:$0xff]  ;;  %v371_v55 = vld [vmem:[%s1889_s9 + $0x478] sm:$0xff] }
  0x46   : > { %844 = vmatmul.mubr.f32.gmra.mrb[12].mxu0 %v240_v56  ;;  %1089 = vmatmul.mubr.f32.gmra.mrb[12].mxu1 %v338_v57  ;;  %v272_v56 = vld [vmem:[%s1889_s9 + $0x160] sm:$0xff]  ;;  %v370_v57 = vld [vmem:[%s1889_s9 + $0x470] sm:$0xff] }
  0x47   : > { %1622 = vmatprep.mubr.msk.f32.mxu0 %vm450_vm0, %v243_v58  ;;  %1671 = vmatprep.mubr.msk.f32.mxu1 %vm450_vm0, %v341_v59  ;;  %v275_v58 = vld [vmem:[%s1889_s9 + $0x178] sm:$0xff]  ;;  %v373_v59 = vld [vmem:[%s1889_s9 + $0x488] sm:$0xff] }
  0x4a   : > { %849 = vmatmul.mubr.f32.gmra.mrb[14].mxu0 %v242_v60  ;;  %1094 = vmatmul.mubr.f32.gmra.mrb[14].mxu1 %v340_v61  ;;  %v274_v60 = vld [vmem:[%s1889_s9 + $0x170] sm:$0xff]  ;;  %v372_v61 = vld [vmem:[%s1889_s9 + $0x480] sm:$0xff] }
  0x4b   : > { %1623 = vmatprep.mubr.msk.f32.mxu0 %vm450_vm0, %v245_v62  ;;  %1672 = vmatprep.mubr.msk.f32.mxu1 %vm450_vm0, %v343_v63  ;;  %v277_v62 = vld [vmem:[%s1889_s9 + $0x188] sm:$0xff]  ;;  %v375_v63 = vld [vmem:[%s1889_s9 + $0x498] sm:$0xff] }
  0x4e   : > { %854 = vmatmul.mubr.f32.gmra.mrb[16].mxu0 %v244_v0  ;;  %1099 = vmatmul.mubr.f32.gmra.mrb[16].mxu1 %v342_v1  ;;  %v276_v0 = vld [vmem:[%s1889_s9 + $0x180] sm:$0xff]  ;;  %v374_v1 = vld [vmem:[%s1889_s9 + $0x490] sm:$0xff] }
  0x4f   : > { %1624 = vmatprep.mubr.msk.f32.mxu0 %vm450_vm0, %v247_v2  ;;  %1673 = vmatprep.mubr.msk.f32.mxu1 %vm450_vm0, %v345_v3  ;;  %v279_v2 = vld [vmem:[%s1889_s9 + $0x198] sm:$0xff]  ;;  %v377_v3 = vld [vmem:[%s1889_s9 + $0x4a8] sm:$0xff] }
  0x52   : > { %859 = vmatmul.mubr.f32.gmra.mrb[18].mxu0 %v246_v4  ;;  %1104 = vmatmul.mubr.f32.gmra.mrb[18].mxu1 %v344_v5  ;;  %v278_v4 = vld [vmem:[%s1889_s9 + $0x190] sm:$0xff]  ;;  %v376_v5 = vld [vmem:[%s1889_s9 + $0x4a0] sm:$0xff] }
  0x53   : > { %1625 = vmatprep.mubr.msk.f32.mxu0 %vm450_vm0, %v249_v6  ;;  %1674 = vmatprep.mubr.msk.f32.mxu1 %vm450_vm0, %v347_v7  ;;  %v281_v6 = vld [vmem:[%s1889_s9 + $0x1a8] sm:$0xff]  ;;  %v379_v7 = vld [vmem:[%s1889_s9 + $0x4b8] sm:$0xff] }
  0x56   : > { %864 = vmatmul.mubr.f32.gmra.mrb[20].mxu0 %v248_v8  ;;  %1109 = vmatmul.mubr.f32.gmra.mrb[20].mxu1 %v346_v9  ;;  %v280_v8 = vld [vmem:[%s1889_s9 + $0x1a0] sm:$0xff]  ;;  %v378_v9 = vld [vmem:[%s1889_s9 + $0x4b0] sm:$0xff] }
  0x57   : > { %1626 = vmatprep.mubr.msk.f32.mxu0 %vm450_vm0, %v251_v10  ;;  %1675 = vmatprep.mubr.msk.f32.mxu1 %vm450_vm0, %v349_v11  ;;  %v283_v10 = vld [vmem:[%s1889_s9 + $0x1b8] sm:$0xff]  ;;  %v381_v11 = vld [vmem:[%s1889_s9 + $0x4c8] sm:$0xff] }
  0x5a   : > { %869 = vmatmul.mubr.f32.gmra.mrb[22].mxu0 %v250_v12  ;;  %1114 = vmatmul.mubr.f32.gmra.mrb[22].mxu1 %v348_v13  ;;  %v282_v12 = vld [vmem:[%s1889_s9 + $0x1b0] sm:$0xff]  ;;  %v380_v13 = vld [vmem:[%s1889_s9 + $0x4c0] sm:$0xff] }
  0x5b   : > { %1627 = vmatprep.mubr.msk.f32.mxu0 %vm450_vm0, %v253_v14  ;;  %1676 = vmatprep.mubr.msk.f32.mxu1 %vm450_vm0, %v351_v15  ;;  %v285_v14 = vld [vmem:[%s1889_s9 + $0x1c8] sm:$0xff]  ;;  %v383_v15 = vld [vmem:[%s1889_s9 + $0x4d8] sm:$0xff] }
  0x5e   : > { %874 = vmatmul.mubr.f32.gmra.mrb[24].mxu0 %v252_v16  ;;  %1119 = vmatmul.mubr.f32.gmra.mrb[24].mxu1 %v350_v17  ;;  %v284_v16 = vld [vmem:[%s1889_s9 + $0x1c0] sm:$0xff]  ;;  %v382_v17 = vld [vmem:[%s1889_s9 + $0x4d0] sm:$0xff] }
  0x5f   : > { %1628 = vmatprep.mubr.msk.f32.mxu0 %vm450_vm0, %v255_v18  ;;  %1677 = vmatprep.mubr.msk.f32.mxu1 %vm450_vm0, %v353_v19  ;;  %v287_v18 = vld [vmem:[%s1889_s9 + $0x1d8] sm:$0xff]  ;;  %v385_v19 = vld [vmem:[%s1889_s9 + $0x4e8] sm:$0xff] }
  0x62   : > { %879 = vmatmul.mubr.f32.gmra.mrb[26].mxu0 %v254_v20  ;;  %1124 = vmatmul.mubr.f32.gmra.mrb[26].mxu1 %v352_v21  ;;  %v286_v20 = vld [vmem:[%s1889_s9 + $0x1d0] sm:$0xff]  ;;  %v384_v21 = vld [vmem:[%s1889_s9 + $0x4e0] sm:$0xff] }
  0x63   : > { %1629 = vmatprep.mubr.msk.f32.mxu0 %vm450_vm0, %v257_v22  ;;  %1678 = vmatprep.mubr.msk.f32.mxu1 %vm450_vm0, %v355_v23  ;;  %v289_v22 = vld [vmem:[%s1889_s9 + $0x1e8] sm:$0xff]  ;;  %v387_v23 = vld [vmem:[%s1889_s9 + $0x4f8] sm:$0xff] }
  0x66   : > { %884 = vmatmul.mubr.f32.gmra.mrb[28].mxu0 %v256_v24  ;;  %1129 = vmatmul.mubr.f32.gmra.mrb[28].mxu1 %v354_v25  ;;  %v288_v24 = vld [vmem:[%s1889_s9 + $0x1e0] sm:$0xff]  ;;  %v386_v25 = vld [vmem:[%s1889_s9 + $0x4f0] sm:$0xff] }
  0x67   : > { %1630 = vmatprep.mubr.msk.f32.mxu0 %vm450_vm0, %v259_v26  ;;  %1679 = vmatprep.mubr.msk.f32.mxu1 %vm450_vm0, %v357_v27  ;;  %v291_v26 = vld [vmem:[%s1889_s9 + $0x1f8] sm:$0xff]  ;;  %v389_v27 = vld [vmem:[%s1889_s9 + $0x508] sm:$0xff] }
  0x6a   : > { %889 = vmatmul.mubr.f32.gmra.mrb[30].mxu0 %v258_v28  ;;  %1134 = vmatmul.mubr.f32.gmra.mrb[30].mxu1 %v356_v29  ;;  %v290_v28 = vld [vmem:[%s1889_s9 + $0x1f0] sm:$0xff]  ;;  %v388_v29 = vld [vmem:[%s1889_s9 + $0x500] sm:$0xff] }
  0x6b   : > { %1631 = vmatprep.mubr.msk.f32.mxu0 %vm450_vm0, %v261_v30  ;;  %1680 = vmatprep.mubr.msk.f32.mxu1 %vm450_vm0, %v359_v31  ;;  %v293_v30 = vld [vmem:[%s1889_s9 + $0x208] sm:$0xff]  ;;  %v391_v31 = vld [vmem:[%s1889_s9 + $0x518] sm:$0xff] }
  0x6e   : > { %894 = vmatmul.mubr.f32.gmra.mrb[32].mxu0 %v260_v32  ;;  %1139 = vmatmul.mubr.f32.gmra.mrb[32].mxu1 %v358_v33  ;;  %v292_v32 = vld [vmem:[%s1889_s9 + $0x200] sm:$0xff]  ;;  %v390_v33 = vld [vmem:[%s1889_s9 + $0x510] sm:$0xff] }
  0x6f   : > { %1632 = vmatprep.mubr.msk.f32.mxu0 %vm450_vm0, %v263_v34  ;;  %1681 = vmatprep.mubr.msk.f32.mxu1 %vm450_vm0, %v361_v35  ;;  %v295_v34 = vld [vmem:[%s1889_s9 + $0x218] sm:$0xff]  ;;  %v393_v35 = vld [vmem:[%s1889_s9 + $0x528] sm:$0xff] }
  0x72   : > { %899 = vmatmul.mubr.f32.gmra.mrb[34].mxu0 %v262_v36  ;;  %1144 = vmatmul.mubr.f32.gmra.mrb[34].mxu1 %v360_v37  ;;  %v294_v36 = vld [vmem:[%s1889_s9 + $0x210] sm:$0xff]  ;;  %v392_v37 = vld [vmem:[%s1889_s9 + $0x520] sm:$0xff] }
  0x73   : > { %1633 = vmatprep.mubr.msk.f32.mxu0 %vm450_vm0, %v265_v38  ;;  %1682 = vmatprep.mubr.msk.f32.mxu1 %vm450_vm0, %v363_v39  ;;  %v297_v38 = vld [vmem:[%s1889_s9 + $0x228] sm:$0xff]  ;;  %v395_v39 = vld [vmem:[%s1889_s9 + $0x538] sm:$0xff] }
  0x76   : > { %904 = vmatmul.mubr.f32.gmra.mrb[36].mxu0 %v264_v40  ;;  %1149 = vmatmul.mubr.f32.gmra.mrb[36].mxu1 %v362_v41  ;;  %v296_v40 = vld [vmem:[%s1889_s9 + $0x220] sm:$0xff]  ;;  %v394_v41 = vld [vmem:[%s1889_s9 + $0x530] sm:$0xff] }
  0x77   : > { %1634 = vmatprep.mubr.msk.f32.mxu0 %vm450_vm0, %v267_v42  ;;  %1683 = vmatprep.mubr.msk.f32.mxu1 %vm450_vm0, %v365_v43  ;;  %v299_v42 = vld [vmem:[%s1889_s9 + $0x238] sm:$0xff]  ;;  %v397_v43 = vld [vmem:[%s1889_s9 + $0x548] sm:$0xff] }
  0x7a   : > { %909 = vmatmul.mubr.f32.gmra.mrb[38].mxu0 %v266_v44  ;;  %1154 = vmatmul.mubr.f32.gmra.mrb[38].mxu1 %v364_v45  ;;  %v298_v44 = vld [vmem:[%s1889_s9 + $0x230] sm:$0xff]  ;;  %v396_v45 = vld [vmem:[%s1889_s9 + $0x540] sm:$0xff] }
  0x7b   : > { %1635 = vmatprep.mubr.msk.f32.mxu0 %vm450_vm0, %v269_v46  ;;  %1684 = vmatprep.mubr.msk.f32.mxu1 %vm450_vm0, %v367_v47  ;;  %v301_v46 = vld [vmem:[%s1889_s9 + $0x248] sm:$0xff]  ;;  %v399_v47 = vld [vmem:[%s1889_s9 + $0x558] sm:$0xff] }
  0x7e   : > { %914 = vmatmul.mubr.f32.gmra.mrb[40].mxu0 %v268_v48  ;;  %1159 = vmatmul.mubr.f32.gmra.mrb[40].mxu1 %v366_v49  ;;  %v300_v48 = vld [vmem:[%s1889_s9 + $0x240] sm:$0xff]  ;;  %v398_v49 = vld [vmem:[%s1889_s9 + $0x550] sm:$0xff] }
  0x7f   : > { %1636 = vmatprep.mubr.msk.f32.mxu0 %vm450_vm0, %v271_v50  ;;  %1685 = vmatprep.mubr.msk.f32.mxu1 %vm450_vm0, %v369_v51  ;;  %v303_v50 = vld [vmem:[%s1889_s9 + $0x258] sm:$0xff]  ;;  %v401_v51 = vld [vmem:[%s1889_s9 + $0x568] sm:$0xff] }
  0x82   : > { %919 = vmatmul.mubr.f32.gmra.mrb[42].mxu0 %v270_v52  ;;  %1164 = vmatmul.mubr.f32.gmra.mrb[42].mxu1 %v368_v53  ;;  %v302_v52 = vld [vmem:[%s1889_s9 + $0x250] sm:$0xff]  ;;  %v400_v53 = vld [vmem:[%s1889_s9 + $0x560] sm:$0xff] }
  0x83   : > { %1637 = vmatprep.mubr.msk.f32.mxu0 %vm450_vm0, %v273_v54  ;;  %1686 = vmatprep.mubr.msk.f32.mxu1 %vm450_vm0, %v371_v55  ;;  %v305_v54 = vld [vmem:[%s1889_s9 + $0x268] sm:$0xff]  ;;  %v403_v55 = vld [vmem:[%s1889_s9 + $0x578] sm:$0xff] }
  0x86   : > { %924 = vmatmul.mubr.f32.gmra.mrb[44].mxu0 %v272_v56  ;;  %1169 = vmatmul.mubr.f32.gmra.mrb[44].mxu1 %v370_v57  ;;  %v304_v56 = vld [vmem:[%s1889_s9 + $0x260] sm:$0xff]  ;;  %v402_v57 = vld [vmem:[%s1889_s9 + $0x570] sm:$0xff] }
  0x87   : > { %1638 = vmatprep.mubr.msk.f32.mxu0 %vm450_vm0, %v275_v58  ;;  %1687 = vmatprep.mubr.msk.f32.mxu1 %vm450_vm0, %v373_v59  ;;  %v307_v58 = vld [vmem:[%s1889_s9 + $0x278] sm:$0xff]  ;;  %v405_v59 = vld [vmem:[%s1889_s9 + $0x588] sm:$0xff] }
  0x8a   : > { %929 = vmatmul.mubr.f32.gmra.mrb[46].mxu0 %v274_v60  ;;  %1174 = vmatmul.mubr.f32.gmra.mrb[46].mxu1 %v372_v61  ;;  %v306_v60 = vld [vmem:[%s1889_s9 + $0x270] sm:$0xff]  ;;  %v404_v61 = vld [vmem:[%s1889_s9 + $0x580] sm:$0xff] }
  0x8b   : > { %1639 = vmatprep.mubr.msk.f32.mxu0 %vm450_vm0, %v277_v62  ;;  %1688 = vmatprep.mubr.msk.f32.mxu1 %vm450_vm0, %v375_v63  ;;  %v309_v62 = vld [vmem:[%s1889_s9 + $0x288] sm:$0xff]  ;;  %v407_v63 = vld [vmem:[%s1889_s9 + $0x598] sm:$0xff] }
  0x8e   : > { %934 = vmatmul.mubr.f32.gmra.mrb[48].mxu0 %v276_v0  ;;  %1179 = vmatmul.mubr.f32.gmra.mrb[48].mxu1 %v374_v1  ;;  %v308_v0 = vld [vmem:[%s1889_s9 + $0x280] sm:$0xff]  ;;  %v406_v1 = vld [vmem:[%s1889_s9 + $0x590] sm:$0xff] }
  0x8f   : > { %1640 = vmatprep.mubr.msk.f32.mxu0 %vm450_vm0, %v279_v2  ;;  %1689 = vmatprep.mubr.msk.f32.mxu1 %vm450_vm0, %v377_v3  ;;  %v311_v2 = vld [vmem:[%s1889_s9 + $0x298] sm:$0xff]  ;;  %v409_v3 = vld [vmem:[%s1889_s9 + $0x5a8] sm:$0xff] }
  0x92   : > { %939 = vmatmul.mubr.f32.gmra.mrb[50].mxu0 %v278_v4  ;;  %1184 = vmatmul.mubr.f32.gmra.mrb[50].mxu1 %v376_v5  ;;  %v310_v4 = vld [vmem:[%s1889_s9 + $0x290] sm:$0xff]  ;;  %v408_v5 = vld [vmem:[%s1889_s9 + $0x5a0] sm:$0xff] }
  0x93   : > { %1641 = vmatprep.mubr.msk.f32.mxu0 %vm450_vm0, %v281_v6  ;;  %1690 = vmatprep.mubr.msk.f32.mxu1 %vm450_vm0, %v379_v7  ;;  %v313_v6 = vld [vmem:[%s1889_s9 + $0x2a8] sm:$0xff]  ;;  %v411_v7 = vld [vmem:[%s1889_s9 + $0x5b8] sm:$0xff] }
  0x96   : > { %944 = vmatmul.mubr.f32.gmra.mrb[52].mxu0 %v280_v8  ;;  %1189 = vmatmul.mubr.f32.gmra.mrb[52].mxu1 %v378_v9  ;;  %v312_v8 = vld [vmem:[%s1889_s9 + $0x2a0] sm:$0xff]  ;;  %v410_v9 = vld [vmem:[%s1889_s9 + $0x5b0] sm:$0xff] }
  0x97   : > { %1642 = vmatprep.mubr.msk.f32.mxu0 %vm450_vm0, %v283_v10  ;;  %1691 = vmatprep.mubr.msk.f32.mxu1 %vm450_vm0, %v381_v11  ;;  %v315_v10 = vld [vmem:[%s1889_s9 + $0x2b8] sm:$0xff]  ;;  %v413_v11 = vld [vmem:[%s1889_s9 + $0x5c8] sm:$0xff] }
  0x9a   : > { %949 = vmatmul.mubr.f32.gmra.mrb[54].mxu0 %v282_v12  ;;  %1194 = vmatmul.mubr.f32.gmra.mrb[54].mxu1 %v380_v13  ;;  %v314_v12 = vld [vmem:[%s1889_s9 + $0x2b0] sm:$0xff]  ;;  %v412_v13 = vld [vmem:[%s1889_s9 + $0x5c0] sm:$0xff] }
  0x9b   : > { %1643 = vmatprep.mubr.msk.f32.mxu0 %vm450_vm0, %v285_v14  ;;  %1692 = vmatprep.mubr.msk.f32.mxu1 %vm450_vm0, %v383_v15  ;;  %v317_v14 = vld [vmem:[%s1889_s9 + $0x2c8] sm:$0xff]  ;;  %v415_v15 = vld [vmem:[%s1889_s9 + $0x5d8] sm:$0xff] }
  0x9e   : > { %954 = vmatmul.mubr.f32.gmra.mrb[56].mxu0 %v284_v16  ;;  %1199 = vmatmul.mubr.f32.gmra.mrb[56].mxu1 %v382_v17  ;;  %v316_v16 = vld [vmem:[%s1889_s9 + $0x2c0] sm:$0xff]  ;;  %v414_v17 = vld [vmem:[%s1889_s9 + $0x5d0] sm:$0xff] }
  0x9f   : > { %1644 = vmatprep.mubr.msk.f32.mxu0 %vm450_vm0, %v287_v18  ;;  %1693 = vmatprep.mubr.msk.f32.mxu1 %vm450_vm0, %v385_v19  ;;  %v319_v18 = vld [vmem:[%s1889_s9 + $0x2d8] sm:$0xff]  ;;  %v417_v19 = vld [vmem:[%s1889_s9 + $0x5e8] sm:$0xff] }
  0xa2   : > { %959 = vmatmul.mubr.f32.gmra.mrb[58].mxu0 %v286_v20  ;;  %1204 = vmatmul.mubr.f32.gmra.mrb[58].mxu1 %v384_v21  ;;  %v318_v20 = vld [vmem:[%s1889_s9 + $0x2d0] sm:$0xff]  ;;  %v416_v21 = vld [vmem:[%s1889_s9 + $0x5e0] sm:$0xff] }
  0xa3   : > { %1645 = vmatprep.mubr.msk.f32.mxu0 %vm450_vm0, %v289_v22  ;;  %1694 = vmatprep.mubr.msk.f32.mxu1 %vm450_vm0, %v387_v23  ;;  %v321_v22 = vld [vmem:[%s1889_s9 + $0x2e8] sm:$0xff]  ;;  %v419_v23 = vld [vmem:[%s1889_s9 + $0x5f8] sm:$0xff] }
  0xa6   : > { %964 = vmatmul.mubr.f32.gmra.mrb[60].mxu0 %v288_v24  ;;  %1209 = vmatmul.mubr.f32.gmra.mrb[60].mxu1 %v386_v25  ;;  %v320_v24 = vld [vmem:[%s1889_s9 + $0x2e0] sm:$0xff]  ;;  %v418_v25 = vld [vmem:[%s1889_s9 + $0x5f0] sm:$0xff] }
  0xa7   : > { %1646 = vmatprep.mubr.msk.f32.mxu0 %vm450_vm0, %v291_v26  ;;  %1695 = vmatprep.mubr.msk.f32.mxu1 %vm450_vm0, %v389_v27  ;;  %v323_v26 = vld [vmem:[%s1889_s9 + $0x2f8] sm:$0xff]  ;;  %v421_v27 = vld [vmem:[%s1889_s9 + $0x608] sm:$0xff] }
  0xaa   : > { %969 = vmatmul.mubr.f32.gmra.mrb[62].mxu0 %v290_v28  ;;  %1214 = vmatmul.mubr.f32.gmra.mrb[62].mxu1 %v388_v29  ;;  %v322_v28 = vld [vmem:[%s1889_s9 + $0x2f0] sm:$0xff]  ;;  %v420_v29 = vld [vmem:[%s1889_s9 + $0x600] sm:$0xff] }
  0xab   : > { %1647 = vmatprep.mubr.msk.f32.mxu0 %vm450_vm0, %v293_v30  ;;  %1696 = vmatprep.mubr.msk.f32.mxu1 %vm450_vm0, %v391_v31  ;;  %v325_v30 = vld [vmem:[%s1889_s9 + $0x308] sm:$0xff]  ;;  %v423_v31 = vld [vmem:[%s1889_s9 + $0x618] sm:$0xff] }
  0xae   : > { %974 = vmatmul.mubr.f32.gmra.mrb[64].mxu0 %v292_v32  ;;  %1219 = vmatmul.mubr.f32.gmra.mrb[64].mxu1 %v390_v33  ;;  %v324_v32 = vld [vmem:[%s1889_s9 + $0x300] sm:$0xff]  ;;  %v422_v33 = vld [vmem:[%s1889_s9 + $0x610] sm:$0xff]  ;;  %s2241_s9 = scalar_lea.vmem %s2547_s3, %s1612_s12 }
  0xaf   : > { %1648 = vmatprep.mubr.msk.f32.mxu0 %vm450_vm0, %v295_v34  ;;  %1697 = vmatprep.mubr.msk.f32.mxu1 %vm450_vm0, %v393_v35  ;;  %v2233_v34 = vld [vmem:[%s2546_s2] ss:$0 sm:$0xff] }
  0xb2   : > { %979 = vmatmul.mubr.f32.gmra.mrb[66].mxu0 %v294_v36  ;;  %1224 = vmatmul.mubr.f32.gmra.mrb[66].mxu1 %v392_v37 }
  0xb3   : > { %1649 = vmatprep.mubr.msk.f32.mxu0 %vm450_vm0, %v297_v38  ;;  %1698 = vmatprep.mubr.msk.f32.mxu1 %vm450_vm0, %v395_v39 }
  0xb6   : > { %984 = vmatmul.mubr.f32.gmra.mrb[68].mxu0 %v296_v40  ;;  %1229 = vmatmul.mubr.f32.gmra.mrb[68].mxu1 %v394_v41 }
  0xb7   : > { %1650 = vmatprep.mubr.msk.f32.mxu0 %vm450_vm0, %v299_v42  ;;  %1699 = vmatprep.mubr.msk.f32.mxu1 %vm450_vm0, %v397_v43 }
  0xba   : > { %989 = vmatmul.mubr.f32.gmra.mrb[70].mxu0 %v298_v44  ;;  %1234 = vmatmul.mubr.f32.gmra.mrb[70].mxu1 %v396_v45 }
  0xbb   : > { %1651 = vmatprep.mubr.msk.f32.mxu0 %vm450_vm0, %v301_v46  ;;  %1700 = vmatprep.mubr.msk.f32.mxu1 %vm450_vm0, %v399_v47 }
  0xbe   : > { %994 = vmatmul.mubr.f32.gmra.mrb[72].mxu0 %v300_v48  ;;  %1239 = vmatmul.mubr.f32.gmra.mrb[72].mxu1 %v398_v49 }
  0xbf   : > { %1652 = vmatprep.mubr.msk.f32.mxu0 %vm450_vm0, %v303_v50  ;;  %1701 = vmatprep.mubr.msk.f32.mxu1 %vm450_vm0, %v401_v51 }
  0xc2   : > { %999 = vmatmul.mubr.f32.gmra.mrb[74].mxu0 %v302_v52  ;;  %1244 = vmatmul.mubr.f32.gmra.mrb[74].mxu1 %v400_v53 }
  0xc3   : > { %1653 = vmatprep.mubr.msk.f32.mxu0 %vm450_vm0, %v305_v54  ;;  %1702 = vmatprep.mubr.msk.f32.mxu1 %vm450_vm0, %v403_v55 }
  0xc6   : > { %1004 = vmatmul.mubr.f32.gmra.mrb[76].mxu0 %v304_v56  ;;  %1249 = vmatmul.mubr.f32.gmra.mrb[76].mxu1 %v402_v57 }
  0xc7   : > { %1654 = vmatprep.mubr.msk.f32.mxu0 %vm450_vm0, %v307_v58  ;;  %1703 = vmatprep.mubr.msk.f32.mxu1 %vm450_vm0, %v405_v59 }
  0xca   : > { %1009 = vmatmul.mubr.f32.gmra.mrb[78].mxu0 %v306_v60  ;;  %1254 = vmatmul.mubr.f32.gmra.mrb[78].mxu1 %v404_v61 }
  0xcb   : > { %1655 = vmatprep.mubr.msk.f32.mxu0 %vm450_vm0, %v309_v62  ;;  %1704 = vmatprep.mubr.msk.f32.mxu1 %vm450_vm0, %v407_v63 }
  0xce   : > { %1014 = vmatmul.mubr.f32.gmra.mrb[80].mxu0 %v308_v0  ;;  %1259 = vmatmul.mubr.f32.gmra.mrb[80].mxu1 %v406_v1 }
  0xcf   : > { %1656 = vmatprep.mubr.msk.f32.mxu0 %vm450_vm0, %v311_v2  ;;  %1705 = vmatprep.mubr.msk.f32.mxu1 %vm450_vm0, %v409_v3 }
  0xd2   : > { %1019 = vmatmul.mubr.f32.gmra.mrb[82].mxu0 %v310_v4  ;;  %1264 = vmatmul.mubr.f32.gmra.mrb[82].mxu1 %v408_v5 }
  0xd3   : > { %1657 = vmatprep.mubr.msk.f32.mxu0 %vm450_vm0, %v313_v6  ;;  %1706 = vmatprep.mubr.msk.f32.mxu1 %vm450_vm0, %v411_v7 }
  0xd6   : > { %1024 = vmatmul.mubr.f32.gmra.mrb[84].mxu0 %v312_v8  ;;  %1269 = vmatmul.mubr.f32.gmra.mrb[84].mxu1 %v410_v9 }
  0xd7   : > { %1658 = vmatprep.mubr.msk.f32.mxu0 %vm450_vm0, %v315_v10  ;;  %1707 = vmatprep.mubr.msk.f32.mxu1 %vm450_vm0, %v413_v11 }
  0xda   : > { %1029 = vmatmul.mubr.f32.gmra.mrb[86].mxu0 %v314_v12  ;;  %1274 = vmatmul.mubr.f32.gmra.mrb[86].mxu1 %v412_v13 }
  0xdb   : > { %1659 = vmatprep.mubr.msk.f32.mxu0 %vm450_vm0, %v317_v14  ;;  %1708 = vmatprep.mubr.msk.f32.mxu1 %vm450_vm0, %v415_v15 }
  0xde   : > { %1034 = vmatmul.mubr.f32.gmra.mrb[88].mxu0 %v316_v16  ;;  %1279 = vmatmul.mubr.f32.gmra.mrb[88].mxu1 %v414_v17 }
  0xdf   : > { %1660 = vmatprep.mubr.msk.f32.mxu0 %vm450_vm0, %v319_v18  ;;  %1709 = vmatprep.mubr.msk.f32.mxu1 %vm450_vm0, %v417_v19 }
  0xe2   : > { %1039 = vmatmul.mubr.f32.gmra.mrb[90].mxu0 %v318_v20  ;;  %1284 = vmatmul.mubr.f32.gmra.mrb[90].mxu1 %v416_v21 }
  0xe3   : > { %1661 = vmatprep.mubr.msk.f32.mxu0 %vm450_vm0, %v321_v22  ;;  %1710 = vmatprep.mubr.msk.f32.mxu1 %vm450_vm0, %v419_v23 }
  0xe6   : > { %1044 = vmatmul.mubr.f32.gmra.mrb[92].mxu0 %v320_v24  ;;  %1289 = vmatmul.mubr.f32.gmra.mrb[92].mxu1 %v418_v25 }
  0xe7   : > { %1662 = vmatprep.mubr.msk.f32.mxu0 %vm450_vm0, %v323_v26  ;;  %1711 = vmatprep.mubr.msk.f32.mxu1 %vm450_vm0, %v421_v27 }
  0xea   : > { %1049 = vmatmul.mubr.f32.gmra.mrb[94].mxu0 %v322_v28  ;;  %1294 = vmatmul.mubr.f32.gmra.mrb[94].mxu1 %v420_v29 }
  0xeb   : > { %1663 = vmatprep.mubr.msk.f32.mxu0 %vm450_vm0, %v325_v30  ;;  %1712 = vmatprep.mubr.msk.f32.mxu1 %vm450_vm0, %v423_v31 }
  0xee   : > { %1054 = vmatmul.mubr.f32.gmra.mrb[96].mxu0 %v324_v32  ;;  %1299 = vmatmul.mubr.f32.gmra.mrb[96].mxu1 %v422_v33 }
 0x101   : > { %v815_v35 = vpop.f32.mrb[0].mxu0  ;;  %v1060_v36 = vpop.f32.mrb[0].mxu1 }
 0x102   : > { %v816_v37 = vadd.f32 %v2233_v34, %v815_v35  ;;  %v1061_v38 = vadd.f32 %v2233_v34, %v1060_v36  ;;  %v817_v39 = vpop.f32.mrb[1].mxu0  ;;  %v1062_v40 = vpop.f32.mrb[1].mxu1 }
 0x104   : > { %v1304_v41 = vmax.f32 %v816_v37, 0.0  ;;  %v1353_v42 = vmax.f32 %v1061_v38, 0.0 }
 0x105   : > { %v820_v43 = vpop.f32.mrb[2].mxu0  ;;  %v1065_v44 = vpop.f32.mrb[2].mxu1 }
 0x106   : > { %1403 = vst.msk [vmem:[%s2241_s9] sm:$0xff] %vm1402_vm2, %v1304_v41  ;;  %1452 = vst.msk [vmem:[%s2241_s9 + $0x188] sm:$0xff] %vm1402_vm2, %v1353_v42  ;;  %v821_v45 = vadd.f32 %v2233_v34, %v820_v43  ;;  %v1066_v46 = vadd.f32 %v2233_v34, %v1065_v44  ;;  %v822_v47 = vpop.f32.mrb[3].mxu0  ;;  %v1067_v48 = vpop.f32.mrb[3].mxu1 }
 0x108   : > { %v1305_v49 = vmax.f32 %v821_v45, 0.0  ;;  %v1354_v50 = vmax.f32 %v1066_v46, 0.0 }
 0x109   : > { %v825_v51 = vpop.f32.mrb[4].mxu0  ;;  %v1070_v52 = vpop.f32.mrb[4].mxu1 }
 0x10a   : > { %1404 = vst.msk [vmem:[%s2241_s9 + $0x8] sm:$0xff] %vm1402_vm2, %v1305_v49  ;;  %1453 = vst.msk [vmem:[%s2241_s9 + $0x190] sm:$0xff] %vm1402_vm2, %v1354_v50  ;;  %v826_v53 = vadd.f32 %v2233_v34, %v825_v51  ;;  %v1071_v54 = vadd.f32 %v2233_v34, %v1070_v52  ;;  %v827_v55 = vpop.f32.mrb[5].mxu0  ;;  %v1072_v56 = vpop.f32.mrb[5].mxu1 }
 0x10c   : > { %v1306_v57 = vmax.f32 %v826_v53, 0.0  ;;  %v1355_v58 = vmax.f32 %v1071_v54, 0.0 }
 0x10d   : > { %v830_v59 = vpop.f32.mrb[6].mxu0  ;;  %v1075_v60 = vpop.f32.mrb[6].mxu1 }
 0x10e   : > { %1405 = vst.msk [vmem:[%s2241_s9 + $0x10] sm:$0xff] %vm1402_vm2, %v1306_v57  ;;  %1454 = vst.msk [vmem:[%s2241_s9 + $0x198] sm:$0xff] %vm1402_vm2, %v1355_v58  ;;  %v831_v61 = vadd.f32 %v2233_v34, %v830_v59  ;;  %v1076_v62 = vadd.f32 %v2233_v34, %v1075_v60  ;;  %v832_v63 = vpop.f32.mrb[7].mxu0  ;;  %v1077_v0 = vpop.f32.mrb[7].mxu1 }
 0x110   : > { %v1307_v1 = vmax.f32 %v831_v61, 0.0  ;;  %v1356_v2 = vmax.f32 %v1076_v62, 0.0 }
 0x111   : > { %v835_v3 = vpop.f32.mrb[8].mxu0  ;;  %v1080_v4 = vpop.f32.mrb[8].mxu1 }
 0x112   : > { %1406 = vst.msk [vmem:[%s2241_s9 + $0x18] sm:$0xff] %vm1402_vm2, %v1307_v1  ;;  %1455 = vst.msk [vmem:[%s2241_s9 + $0x1a0] sm:$0xff] %vm1402_vm2, %v1356_v2  ;;  %v836_v5 = vadd.f32 %v2233_v34, %v835_v3  ;;  %v1081_v6 = vadd.f32 %v2233_v34, %v1080_v4  ;;  %v837_v7 = vpop.f32.mrb[9].mxu0  ;;  %v1082_v8 = vpop.f32.mrb[9].mxu1 }
 0x114   : > { %v1308_v9 = vmax.f32 %v836_v5, 0.0  ;;  %v1357_v10 = vmax.f32 %v1081_v6, 0.0 }
 0x115   : > { %v840_v11 = vpop.f32.mrb[10].mxu0  ;;  %v1085_v12 = vpop.f32.mrb[10].mxu1 }
 0x116   : > { %1407 = vst.msk [vmem:[%s2241_s9 + $0x20] sm:$0xff] %vm1402_vm2, %v1308_v9  ;;  %1456 = vst.msk [vmem:[%s2241_s9 + $0x1a8] sm:$0xff] %vm1402_vm2, %v1357_v10  ;;  %v841_v13 = vadd.f32 %v2233_v34, %v840_v11  ;;  %v1086_v14 = vadd.f32 %v2233_v34, %v1085_v12  ;;  %v842_v15 = vpop.f32.mrb[11].mxu0  ;;  %v1087_v16 = vpop.f32.mrb[11].mxu1 }
 0x118   : > { %v1309_v17 = vmax.f32 %v841_v13, 0.0  ;;  %v1358_v18 = vmax.f32 %v1086_v14, 0.0 }
 0x119   : > { %v845_v19 = vpop.f32.mrb[12].mxu0  ;;  %v1090_v20 = vpop.f32.mrb[12].mxu1 }
 0x11a   : > { %1408 = vst.msk [vmem:[%s2241_s9 + $0x28] sm:$0xff] %vm1402_vm2, %v1309_v17  ;;  %1457 = vst.msk [vmem:[%s2241_s9 + $0x1b0] sm:$0xff] %vm1402_vm2, %v1358_v18  ;;  %v846_v21 = vadd.f32 %v2233_v34, %v845_v19  ;;  %v1091_v22 = vadd.f32 %v2233_v34, %v1090_v20  ;;  %v847_v23 = vpop.f32.mrb[13].mxu0  ;;  %v1092_v24 = vpop.f32.mrb[13].mxu1 }
 0x11c   : > { %v1310_v25 = vmax.f32 %v846_v21, 0.0  ;;  %v1359_v26 = vmax.f32 %v1091_v22, 0.0 }
 0x11d   : > { %v850_v27 = vpop.f32.mrb[14].mxu0  ;;  %v1095_v28 = vpop.f32.mrb[14].mxu1 }
 0x11e   : > { %1409 = vst.msk [vmem:[%s2241_s9 + $0x30] sm:$0xff] %vm1402_vm2, %v1310_v25  ;;  %1458 = vst.msk [vmem:[%s2241_s9 + $0x1b8] sm:$0xff] %vm1402_vm2, %v1359_v26  ;;  %v851_v29 = vadd.f32 %v2233_v34, %v850_v27  ;;  %v1096_v30 = vadd.f32 %v2233_v34, %v1095_v28  ;;  %v852_v31 = vpop.f32.mrb[15].mxu0  ;;  %v1097_v32 = vpop.f32.mrb[15].mxu1 }
 0x120   : > { %v1311_v33 = vmax.f32 %v851_v29, 0.0  ;;  %v1360_v35 = vmax.f32 %v1096_v30, 0.0 }
 0x121   : > { %v855_v36 = vpop.f32.mrb[16].mxu0  ;;  %v1100_v37 = vpop.f32.mrb[16].mxu1 }
 0x122   : > { %1410 = vst.msk [vmem:[%s2241_s9 + $0x38] sm:$0xff] %vm1402_vm2, %v1311_v33  ;;  %1459 = vst.msk [vmem:[%s2241_s9 + $0x1c0] sm:$0xff] %vm1402_vm2, %v1360_v35  ;;  %v856_v38 = vadd.f32 %v2233_v34, %v855_v36  ;;  %v1101_v39 = vadd.f32 %v2233_v34, %v1100_v37  ;;  %v857_v40 = vpop.f32.mrb[17].mxu0  ;;  %v1102_v41 = vpop.f32.mrb[17].mxu1 }
 0x124   : > { %v1312_v42 = vmax.f32 %v856_v38, 0.0  ;;  %v1361_v43 = vmax.f32 %v1101_v39, 0.0 }
 0x125   : > { %v860_v44 = vpop.f32.mrb[18].mxu0  ;;  %v1105_v45 = vpop.f32.mrb[18].mxu1 }
 0x126   : > { %1411 = vst.msk [vmem:[%s2241_s9 + $0x40] sm:$0xff] %vm1402_vm2, %v1312_v42  ;;  %1460 = vst.msk [vmem:[%s2241_s9 + $0x1c8] sm:$0xff] %vm1402_vm2, %v1361_v43  ;;  %v861_v46 = vadd.f32 %v2233_v34, %v860_v44  ;;  %v1106_v47 = vadd.f32 %v2233_v34, %v1105_v45  ;;  %v862_v48 = vpop.f32.mrb[19].mxu0  ;;  %v1107_v49 = vpop.f32.mrb[19].mxu1 }
 0x128   : > { %v1313_v50 = vmax.f32 %v861_v46, 0.0  ;;  %v1362_v51 = vmax.f32 %v1106_v47, 0.0 }
 0x129   : > { %v865_v52 = vpop.f32.mrb[20].mxu0  ;;  %v1110_v53 = vpop.f32.mrb[20].mxu1 }
 0x12a   : > { %1412 = vst.msk [vmem:[%s2241_s9 + $0x48] sm:$0xff] %vm1402_vm2, %v1313_v50  ;;  %1461 = vst.msk [vmem:[%s2241_s9 + $0x1d0] sm:$0xff] %vm1402_vm2, %v1362_v51  ;;  %v866_v54 = vadd.f32 %v2233_v34, %v865_v52  ;;  %v1111_v55 = vadd.f32 %v2233_v34, %v1110_v53  ;;  %v867_v56 = vpop.f32.mrb[21].mxu0  ;;  %v1112_v57 = vpop.f32.mrb[21].mxu1 }
 0x12c   : > { %v1314_v58 = vmax.f32 %v866_v54, 0.0  ;;  %v1363_v59 = vmax.f32 %v1111_v55, 0.0 }
 0x12d   : > { %v870_v60 = vpop.f32.mrb[22].mxu0  ;;  %v1115_v61 = vpop.f32.mrb[22].mxu1 }
 0x12e   : > { %1413 = vst.msk [vmem:[%s2241_s9 + $0x50] sm:$0xff] %vm1402_vm2, %v1314_v58  ;;  %1462 = vst.msk [vmem:[%s2241_s9 + $0x1d8] sm:$0xff] %vm1402_vm2, %v1363_v59  ;;  %v871_v62 = vadd.f32 %v2233_v34, %v870_v60  ;;  %v1116_v63 = vadd.f32 %v2233_v34, %v1115_v61  ;;  %v872_v0 = vpop.f32.mrb[23].mxu0  ;;  %v1117_v1 = vpop.f32.mrb[23].mxu1 }
 0x130   : > { %v1315_v2 = vmax.f32 %v871_v62, 0.0  ;;  %v1364_v3 = vmax.f32 %v1116_v63, 0.0 }
 0x131   : > { %v875_v4 = vpop.f32.mrb[24].mxu0  ;;  %v1120_v5 = vpop.f32.mrb[24].mxu1 }
 0x132   : > { %1414 = vst.msk [vmem:[%s2241_s9 + $0x58] sm:$0xff] %vm1402_vm2, %v1315_v2  ;;  %1463 = vst.msk [vmem:[%s2241_s9 + $0x1e0] sm:$0xff] %vm1402_vm2, %v1364_v3  ;;  %v876_v6 = vadd.f32 %v2233_v34, %v875_v4  ;;  %v1121_v7 = vadd.f32 %v2233_v34, %v1120_v5  ;;  %v877_v8 = vpop.f32.mrb[25].mxu0  ;;  %v1122_v9 = vpop.f32.mrb[25].mxu1 }
 0x134   : > { %v1316_v10 = vmax.f32 %v876_v6, 0.0  ;;  %v1365_v11 = vmax.f32 %v1121_v7, 0.0 }
 0x135   : > { %v880_v12 = vpop.f32.mrb[26].mxu0  ;;  %v1125_v13 = vpop.f32.mrb[26].mxu1 }
 0x136   : > { %1415 = vst.msk [vmem:[%s2241_s9 + $0x60] sm:$0xff] %vm1402_vm2, %v1316_v10  ;;  %1464 = vst.msk [vmem:[%s2241_s9 + $0x1e8] sm:$0xff] %vm1402_vm2, %v1365_v11  ;;  %v881_v14 = vadd.f32 %v2233_v34, %v880_v12  ;;  %v1126_v15 = vadd.f32 %v2233_v34, %v1125_v13  ;;  %v882_v16 = vpop.f32.mrb[27].mxu0  ;;  %v1127_v17 = vpop.f32.mrb[27].mxu1 }
 0x138   : > { %v1317_v18 = vmax.f32 %v881_v14, 0.0  ;;  %v1366_v19 = vmax.f32 %v1126_v15, 0.0 }
 0x139   : > { %v885_v20 = vpop.f32.mrb[28].mxu0  ;;  %v1130_v21 = vpop.f32.mrb[28].mxu1 }
 0x13a   : > { %1416 = vst.msk [vmem:[%s2241_s9 + $0x68] sm:$0xff] %vm1402_vm2, %v1317_v18  ;;  %1465 = vst.msk [vmem:[%s2241_s9 + $0x1f0] sm:$0xff] %vm1402_vm2, %v1366_v19  ;;  %v886_v22 = vadd.f32 %v2233_v34, %v885_v20  ;;  %v1131_v23 = vadd.f32 %v2233_v34, %v1130_v21  ;;  %v887_v24 = vpop.f32.mrb[29].mxu0  ;;  %v1132_v25 = vpop.f32.mrb[29].mxu1 }
 0x13c   : > { %v1318_v26 = vmax.f32 %v886_v22, 0.0  ;;  %v1367_v27 = vmax.f32 %v1131_v23, 0.0 }
 0x13d   : > { %v890_v28 = vpop.f32.mrb[30].mxu0  ;;  %v1135_v29 = vpop.f32.mrb[30].mxu1 }
 0x13e   : > { %1417 = vst.msk [vmem:[%s2241_s9 + $0x70] sm:$0xff] %vm1402_vm2, %v1318_v26  ;;  %1466 = vst.msk [vmem:[%s2241_s9 + $0x1f8] sm:$0xff] %vm1402_vm2, %v1367_v27  ;;  %v891_v30 = vadd.f32 %v2233_v34, %v890_v28  ;;  %v1136_v31 = vadd.f32 %v2233_v34, %v1135_v29  ;;  %v892_v32 = vpop.f32.mrb[31].mxu0  ;;  %v1137_v33 = vpop.f32.mrb[31].mxu1 }
 0x140   : > { %v1319_v35 = vmax.f32 %v891_v30, 0.0  ;;  %v1368_v36 = vmax.f32 %v1136_v31, 0.0 }
 0x141   : > { %v895_v37 = vpop.f32.mrb[32].mxu0  ;;  %v1140_v38 = vpop.f32.mrb[32].mxu1 }
 0x142   : > { %1418 = vst.msk [vmem:[%s2241_s9 + $0x78] sm:$0xff] %vm1402_vm2, %v1319_v35  ;;  %1467 = vst.msk [vmem:[%s2241_s9 + $0x200] sm:$0xff] %vm1402_vm2, %v1368_v36  ;;  %v896_v39 = vadd.f32 %v2233_v34, %v895_v37  ;;  %v1141_v40 = vadd.f32 %v2233_v34, %v1140_v38  ;;  %v897_v41 = vpop.f32.mrb[33].mxu0  ;;  %v1142_v42 = vpop.f32.mrb[33].mxu1 }
 0x144   : > { %v1320_v43 = vmax.f32 %v896_v39, 0.0  ;;  %v1369_v44 = vmax.f32 %v1141_v40, 0.0 }
 0x145   : > { %v900_v45 = vpop.f32.mrb[34].mxu0  ;;  %v1145_v46 = vpop.f32.mrb[34].mxu1 }
 0x146   : > { %1419 = vst.msk [vmem:[%s2241_s9 + $0x80] sm:$0xff] %vm1402_vm2, %v1320_v43  ;;  %1468 = vst.msk [vmem:[%s2241_s9 + $0x208] sm:$0xff] %vm1402_vm2, %v1369_v44  ;;  %v901_v47 = vadd.f32 %v2233_v34, %v900_v45  ;;  %v1146_v48 = vadd.f32 %v2233_v34, %v1145_v46  ;;  %v902_v49 = vpop.f32.mrb[35].mxu0  ;;  %v1147_v50 = vpop.f32.mrb[35].mxu1 }
 0x148   : > { %v1321_v51 = vmax.f32 %v901_v47, 0.0  ;;  %v1370_v52 = vmax.f32 %v1146_v48, 0.0 }
 0x149   : > { %v905_v53 = vpop.f32.mrb[36].mxu0  ;;  %v1150_v54 = vpop.f32.mrb[36].mxu1 }
 0x14a   : > { %1420 = vst.msk [vmem:[%s2241_s9 + $0x88] sm:$0xff] %vm1402_vm2, %v1321_v51  ;;  %1469 = vst.msk [vmem:[%s2241_s9 + $0x210] sm:$0xff] %vm1402_vm2, %v1370_v52  ;;  %v906_v55 = vadd.f32 %v2233_v34, %v905_v53  ;;  %v1151_v56 = vadd.f32 %v2233_v34, %v1150_v54  ;;  %v907_v57 = vpop.f32.mrb[37].mxu0  ;;  %v1152_v58 = vpop.f32.mrb[37].mxu1 }
 0x14c   : > { %v1322_v59 = vmax.f32 %v906_v55, 0.0  ;;  %v1371_v60 = vmax.f32 %v1151_v56, 0.0 }
 0x14d   : > { %v910_v61 = vpop.f32.mrb[38].mxu0  ;;  %v1155_v62 = vpop.f32.mrb[38].mxu1 }
 0x14e   : > { %1421 = vst.msk [vmem:[%s2241_s9 + $0x90] sm:$0xff] %vm1402_vm2, %v1322_v59  ;;  %1470 = vst.msk [vmem:[%s2241_s9 + $0x218] sm:$0xff] %vm1402_vm2, %v1371_v60  ;;  %v911_v63 = vadd.f32 %v2233_v34, %v910_v61  ;;  %v1156_v0 = vadd.f32 %v2233_v34, %v1155_v62  ;;  %v912_v1 = vpop.f32.mrb[39].mxu0  ;;  %v1157_v2 = vpop.f32.mrb[39].mxu1 }
 0x150   : > { %v1323_v3 = vmax.f32 %v911_v63, 0.0  ;;  %v1372_v4 = vmax.f32 %v1156_v0, 0.0 }
 0x151   : > { %v915_v5 = vpop.f32.mrb[40].mxu0  ;;  %v1160_v6 = vpop.f32.mrb[40].mxu1 }
 0x152   : > { %1422 = vst.msk [vmem:[%s2241_s9 + $0x98] sm:$0xff] %vm1402_vm2, %v1323_v3  ;;  %1471 = vst.msk [vmem:[%s2241_s9 + $0x220] sm:$0xff] %vm1402_vm2, %v1372_v4  ;;  %v916_v7 = vadd.f32 %v2233_v34, %v915_v5  ;;  %v1161_v8 = vadd.f32 %v2233_v34, %v1160_v6  ;;  %v917_v9 = vpop.f32.mrb[41].mxu0  ;;  %v1162_v10 = vpop.f32.mrb[41].mxu1 }
 0x154   : > { %v1324_v11 = vmax.f32 %v916_v7, 0.0  ;;  %v1373_v12 = vmax.f32 %v1161_v8, 0.0 }
 0x155   : > { %v920_v13 = vpop.f32.mrb[42].mxu0  ;;  %v1165_v14 = vpop.f32.mrb[42].mxu1 }
 0x156   : > { %1423 = vst.msk [vmem:[%s2241_s9 + $0xa0] sm:$0xff] %vm1402_vm2, %v1324_v11  ;;  %1472 = vst.msk [vmem:[%s2241_s9 + $0x228] sm:$0xff] %vm1402_vm2, %v1373_v12  ;;  %v921_v15 = vadd.f32 %v2233_v34, %v920_v13  ;;  %v1166_v16 = vadd.f32 %v2233_v34, %v1165_v14  ;;  %v922_v17 = vpop.f32.mrb[43].mxu0  ;;  %v1167_v18 = vpop.f32.mrb[43].mxu1 }
 0x158   : > { %v1325_v19 = vmax.f32 %v921_v15, 0.0  ;;  %v1374_v20 = vmax.f32 %v1166_v16, 0.0 }
 0x159   : > { %v925_v21 = vpop.f32.mrb[44].mxu0  ;;  %v1170_v22 = vpop.f32.mrb[44].mxu1 }
 0x15a   : > { %1424 = vst.msk [vmem:[%s2241_s9 + $0xa8] sm:$0xff] %vm1402_vm2, %v1325_v19  ;;  %1473 = vst.msk [vmem:[%s2241_s9 + $0x230] sm:$0xff] %vm1402_vm2, %v1374_v20  ;;  %v926_v23 = vadd.f32 %v2233_v34, %v925_v21  ;;  %v1171_v24 = vadd.f32 %v2233_v34, %v1170_v22  ;;  %v927_v25 = vpop.f32.mrb[45].mxu0  ;;  %v1172_v26 = vpop.f32.mrb[45].mxu1 }
 0x15c   : > { %v1326_v27 = vmax.f32 %v926_v23, 0.0  ;;  %v1375_v28 = vmax.f32 %v1171_v24, 0.0 }
 0x15d   : > { %v930_v29 = vpop.f32.mrb[46].mxu0  ;;  %v1175_v30 = vpop.f32.mrb[46].mxu1 }
 0x15e   : > { %1425 = vst.msk [vmem:[%s2241_s9 + $0xb0] sm:$0xff] %vm1402_vm2, %v1326_v27  ;;  %1474 = vst.msk [vmem:[%s2241_s9 + $0x238] sm:$0xff] %vm1402_vm2, %v1375_v28  ;;  %v931_v31 = vadd.f32 %v2233_v34, %v930_v29  ;;  %v1176_v32 = vadd.f32 %v2233_v34, %v1175_v30  ;;  %v932_v33 = vpop.f32.mrb[47].mxu0  ;;  %v1177_v35 = vpop.f32.mrb[47].mxu1 }
 0x160   : > { %v1327_v36 = vmax.f32 %v931_v31, 0.0  ;;  %v1376_v37 = vmax.f32 %v1176_v32, 0.0 }
 0x161   : > { %v935_v38 = vpop.f32.mrb[48].mxu0  ;;  %v1180_v39 = vpop.f32.mrb[48].mxu1 }
 0x162   : > { %1426 = vst.msk [vmem:[%s2241_s9 + $0xb8] sm:$0xff] %vm1402_vm2, %v1327_v36  ;;  %1475 = vst.msk [vmem:[%s2241_s9 + $0x240] sm:$0xff] %vm1402_vm2, %v1376_v37  ;;  %v936_v40 = vadd.f32 %v2233_v34, %v935_v38  ;;  %v1181_v41 = vadd.f32 %v2233_v34, %v1180_v39  ;;  %v937_v42 = vpop.f32.mrb[49].mxu0  ;;  %v1182_v43 = vpop.f32.mrb[49].mxu1 }
 0x164   : > { %v1328_v44 = vmax.f32 %v936_v40, 0.0  ;;  %v1377_v45 = vmax.f32 %v1181_v41, 0.0 }
 0x165   : > { %v940_v46 = vpop.f32.mrb[50].mxu0  ;;  %v1185_v47 = vpop.f32.mrb[50].mxu1 }
 0x166   : > { %1427 = vst.msk [vmem:[%s2241_s9 + $0xc0] sm:$0xff] %vm1402_vm2, %v1328_v44  ;;  %1476 = vst.msk [vmem:[%s2241_s9 + $0x248] sm:$0xff] %vm1402_vm2, %v1377_v45  ;;  %v941_v48 = vadd.f32 %v2233_v34, %v940_v46  ;;  %v1186_v49 = vadd.f32 %v2233_v34, %v1185_v47  ;;  %v942_v50 = vpop.f32.mrb[51].mxu0  ;;  %v1187_v51 = vpop.f32.mrb[51].mxu1 }
 0x168   : > { %v1329_v52 = vmax.f32 %v941_v48, 0.0  ;;  %v1378_v53 = vmax.f32 %v1186_v49, 0.0 }
 0x169   : > { %v945_v54 = vpop.f32.mrb[52].mxu0  ;;  %v1190_v55 = vpop.f32.mrb[52].mxu1 }
 0x16a   : > { %1428 = vst.msk [vmem:[%s2241_s9 + $0xc8] sm:$0xff] %vm1402_vm2, %v1329_v52  ;;  %1477 = vst.msk [vmem:[%s2241_s9 + $0x250] sm:$0xff] %vm1402_vm2, %v1378_v53  ;;  %v946_v56 = vadd.f32 %v2233_v34, %v945_v54  ;;  %v1191_v57 = vadd.f32 %v2233_v34, %v1190_v55  ;;  %v947_v58 = vpop.f32.mrb[53].mxu0  ;;  %v1192_v59 = vpop.f32.mrb[53].mxu1 }
 0x16c   : > { %v1330_v60 = vmax.f32 %v946_v56, 0.0  ;;  %v1379_v61 = vmax.f32 %v1191_v57, 0.0 }
 0x16d   : > { %v950_v62 = vpop.f32.mrb[54].mxu0  ;;  %v1195_v63 = vpop.f32.mrb[54].mxu1 }
 0x16e   : > { %1429 = vst.msk [vmem:[%s2241_s9 + $0xd0] sm:$0xff] %vm1402_vm2, %v1330_v60  ;;  %1478 = vst.msk [vmem:[%s2241_s9 + $0x258] sm:$0xff] %vm1402_vm2, %v1379_v61  ;;  %v951_v0 = vadd.f32 %v2233_v34, %v950_v62  ;;  %v1196_v1 = vadd.f32 %v2233_v34, %v1195_v63  ;;  %v952_v2 = vpop.f32.mrb[55].mxu0  ;;  %v1197_v3 = vpop.f32.mrb[55].mxu1 }
 0x170   : > { %v1331_v4 = vmax.f32 %v951_v0, 0.0  ;;  %v1380_v5 = vmax.f32 %v1196_v1, 0.0 }
 0x171   : > { %v955_v6 = vpop.f32.mrb[56].mxu0  ;;  %v1200_v7 = vpop.f32.mrb[56].mxu1 }
 0x172   : > { %1430 = vst.msk [vmem:[%s2241_s9 + $0xd8] sm:$0xff] %vm1402_vm2, %v1331_v4  ;;  %1479 = vst.msk [vmem:[%s2241_s9 + $0x260] sm:$0xff] %vm1402_vm2, %v1380_v5  ;;  %v956_v8 = vadd.f32 %v2233_v34, %v955_v6  ;;  %v1201_v9 = vadd.f32 %v2233_v34, %v1200_v7  ;;  %v957_v10 = vpop.f32.mrb[57].mxu0  ;;  %v1202_v11 = vpop.f32.mrb[57].mxu1 }
 0x174   : > { %v1332_v12 = vmax.f32 %v956_v8, 0.0  ;;  %v1381_v13 = vmax.f32 %v1201_v9, 0.0 }
 0x175   : > { %v960_v14 = vpop.f32.mrb[58].mxu0  ;;  %v1205_v15 = vpop.f32.mrb[58].mxu1 }
 0x176   : > { %1431 = vst.msk [vmem:[%s2241_s9 + $0xe0] sm:$0xff] %vm1402_vm2, %v1332_v12  ;;  %1480 = vst.msk [vmem:[%s2241_s9 + $0x268] sm:$0xff] %vm1402_vm2, %v1381_v13  ;;  %v961_v16 = vadd.f32 %v2233_v34, %v960_v14  ;;  %v1206_v17 = vadd.f32 %v2233_v34, %v1205_v15  ;;  %v962_v18 = vpop.f32.mrb[59].mxu0  ;;  %v1207_v19 = vpop.f32.mrb[59].mxu1 }
 0x178   : > { %v1333_v20 = vmax.f32 %v961_v16, 0.0  ;;  %v1382_v21 = vmax.f32 %v1206_v17, 0.0 }
 0x179   : > { %v965_v22 = vpop.f32.mrb[60].mxu0  ;;  %v1210_v23 = vpop.f32.mrb[60].mxu1 }
 0x17a   : > { %1432 = vst.msk [vmem:[%s2241_s9 + $0xe8] sm:$0xff] %vm1402_vm2, %v1333_v20  ;;  %1481 = vst.msk [vmem:[%s2241_s9 + $0x270] sm:$0xff] %vm1402_vm2, %v1382_v21  ;;  %v966_v24 = vadd.f32 %v2233_v34, %v965_v22  ;;  %v1211_v25 = vadd.f32 %v2233_v34, %v1210_v23  ;;  %v967_v26 = vpop.f32.mrb[61].mxu0  ;;  %v1212_v27 = vpop.f32.mrb[61].mxu1 }
 0x17c   : > { %v1334_v28 = vmax.f32 %v966_v24, 0.0  ;;  %v1383_v29 = vmax.f32 %v1211_v25, 0.0 }
 0x17d   : > { %v970_v30 = vpop.f32.mrb[62].mxu0  ;;  %v1215_v31 = vpop.f32.mrb[62].mxu1 }
 0x17e   : > { %1433 = vst.msk [vmem:[%s2241_s9 + $0xf0] sm:$0xff] %vm1402_vm2, %v1334_v28  ;;  %1482 = vst.msk [vmem:[%s2241_s9 + $0x278] sm:$0xff] %vm1402_vm2, %v1383_v29  ;;  %v971_v32 = vadd.f32 %v2233_v34, %v970_v30  ;;  %v1216_v33 = vadd.f32 %v2233_v34, %v1215_v31  ;;  %v972_v35 = vpop.f32.mrb[63].mxu0  ;;  %v1217_v36 = vpop.f32.mrb[63].mxu1 }
 0x180   : > { %v1335_v37 = vmax.f32 %v971_v32, 0.0  ;;  %v1384_v38 = vmax.f32 %v1216_v33, 0.0 }
 0x181   : > { %v975_v39 = vpop.f32.mrb[64].mxu0  ;;  %v1220_v40 = vpop.f32.mrb[64].mxu1 }
 0x182   : > { %1434 = vst.msk [vmem:[%s2241_s9 + $0xf8] sm:$0xff] %vm1402_vm2, %v1335_v37  ;;  %1483 = vst.msk [vmem:[%s2241_s9 + $0x280] sm:$0xff] %vm1402_vm2, %v1384_v38  ;;  %v976_v41 = vadd.f32 %v2233_v34, %v975_v39  ;;  %v1221_v42 = vadd.f32 %v2233_v34, %v1220_v40  ;;  %v977_v43 = vpop.f32.mrb[65].mxu0  ;;  %v1222_v44 = vpop.f32.mrb[65].mxu1 }
 0x184   : > { %v1336_v45 = vmax.f32 %v976_v41, 0.0  ;;  %v1385_v46 = vmax.f32 %v1221_v42, 0.0 }
 0x185   : > { %v980_v47 = vpop.f32.mrb[66].mxu0  ;;  %v1225_v48 = vpop.f32.mrb[66].mxu1 }
 0x186   : > { %1435 = vst.msk [vmem:[%s2241_s9 + $0x100] sm:$0xff] %vm1402_vm2, %v1336_v45  ;;  %1484 = vst.msk [vmem:[%s2241_s9 + $0x288] sm:$0xff] %vm1402_vm2, %v1385_v46  ;;  %v981_v49 = vadd.f32 %v2233_v34, %v980_v47  ;;  %v1226_v50 = vadd.f32 %v2233_v34, %v1225_v48  ;;  %v982_v51 = vpop.f32.mrb[67].mxu0  ;;  %v1227_v52 = vpop.f32.mrb[67].mxu1 }
 0x188   : > { %v1337_v53 = vmax.f32 %v981_v49, 0.0  ;;  %v1386_v54 = vmax.f32 %v1226_v50, 0.0 }
 0x189   : > { %v985_v55 = vpop.f32.mrb[68].mxu0  ;;  %v1230_v56 = vpop.f32.mrb[68].mxu1 }
 0x18a   : > { %1436 = vst.msk [vmem:[%s2241_s9 + $0x108] sm:$0xff] %vm1402_vm2, %v1337_v53  ;;  %1485 = vst.msk [vmem:[%s2241_s9 + $0x290] sm:$0xff] %vm1402_vm2, %v1386_v54  ;;  %v986_v57 = vadd.f32 %v2233_v34, %v985_v55  ;;  %v1231_v58 = vadd.f32 %v2233_v34, %v1230_v56  ;;  %v987_v59 = vpop.f32.mrb[69].mxu0  ;;  %v1232_v60 = vpop.f32.mrb[69].mxu1 }
 0x18c   : > { %v1338_v61 = vmax.f32 %v986_v57, 0.0  ;;  %v1387_v62 = vmax.f32 %v1231_v58, 0.0 }
 0x18d   : > { %v990_v63 = vpop.f32.mrb[70].mxu0  ;;  %v1235_v0 = vpop.f32.mrb[70].mxu1 }
 0x18e   : > { %1437 = vst.msk [vmem:[%s2241_s9 + $0x110] sm:$0xff] %vm1402_vm2, %v1338_v61  ;;  %1486 = vst.msk [vmem:[%s2241_s9 + $0x298] sm:$0xff] %vm1402_vm2, %v1387_v62  ;;  %v991_v1 = vadd.f32 %v2233_v34, %v990_v63  ;;  %v1236_v2 = vadd.f32 %v2233_v34, %v1235_v0  ;;  %v992_v3 = vpop.f32.mrb[71].mxu0  ;;  %v1237_v4 = vpop.f32.mrb[71].mxu1 }
 0x190   : > { %v1339_v5 = vmax.f32 %v991_v1, 0.0  ;;  %v1388_v6 = vmax.f32 %v1236_v2, 0.0 }
 0x191   : > { %v995_v7 = vpop.f32.mrb[72].mxu0  ;;  %v1240_v8 = vpop.f32.mrb[72].mxu1 }
 0x192   : > { %1438 = vst.msk [vmem:[%s2241_s9 + $0x118] sm:$0xff] %vm1402_vm2, %v1339_v5  ;;  %1487 = vst.msk [vmem:[%s2241_s9 + $0x2a0] sm:$0xff] %vm1402_vm2, %v1388_v6  ;;  %v996_v9 = vadd.f32 %v2233_v34, %v995_v7  ;;  %v1241_v10 = vadd.f32 %v2233_v34, %v1240_v8  ;;  %v997_v11 = vpop.f32.mrb[73].mxu0  ;;  %v1242_v12 = vpop.f32.mrb[73].mxu1 }
 0x194   : > { %v1340_v13 = vmax.f32 %v996_v9, 0.0  ;;  %v1389_v14 = vmax.f32 %v1241_v10, 0.0 }
 0x195   : > { %v1000_v15 = vpop.f32.mrb[74].mxu0  ;;  %v1245_v16 = vpop.f32.mrb[74].mxu1 }
 0x196   : > { %1439 = vst.msk [vmem:[%s2241_s9 + $0x120] sm:$0xff] %vm1402_vm2, %v1340_v13  ;;  %1488 = vst.msk [vmem:[%s2241_s9 + $0x2a8] sm:$0xff] %vm1402_vm2, %v1389_v14  ;;  %v1001_v17 = vadd.f32 %v2233_v34, %v1000_v15  ;;  %v1246_v18 = vadd.f32 %v2233_v34, %v1245_v16  ;;  %v1002_v19 = vpop.f32.mrb[75].mxu0  ;;  %v1247_v20 = vpop.f32.mrb[75].mxu1 }
 0x198   : > { %v1341_v21 = vmax.f32 %v1001_v17, 0.0  ;;  %v1390_v22 = vmax.f32 %v1246_v18, 0.0 }
 0x199   : > { %v1005_v23 = vpop.f32.mrb[76].mxu0  ;;  %v1250_v24 = vpop.f32.mrb[76].mxu1 }
 0x19a   : > { %1440 = vst.msk [vmem:[%s2241_s9 + $0x128] sm:$0xff] %vm1402_vm2, %v1341_v21  ;;  %1489 = vst.msk [vmem:[%s2241_s9 + $0x2b0] sm:$0xff] %vm1402_vm2, %v1390_v22  ;;  %v1006_v25 = vadd.f32 %v2233_v34, %v1005_v23  ;;  %v1251_v26 = vadd.f32 %v2233_v34, %v1250_v24  ;;  %v1007_v27 = vpop.f32.mrb[77].mxu0  ;;  %v1252_v28 = vpop.f32.mrb[77].mxu1 }
 0x19c   : > { %v1342_v29 = vmax.f32 %v1006_v25, 0.0  ;;  %v1391_v30 = vmax.f32 %v1251_v26, 0.0 }
 0x19d   : > { %v1010_v31 = vpop.f32.mrb[78].mxu0  ;;  %v1255_v32 = vpop.f32.mrb[78].mxu1 }
 0x19e   : > { %1441 = vst.msk [vmem:[%s2241_s9 + $0x130] sm:$0xff] %vm1402_vm2, %v1342_v29  ;;  %1490 = vst.msk [vmem:[%s2241_s9 + $0x2b8] sm:$0xff] %vm1402_vm2, %v1391_v30  ;;  %v1011_v33 = vadd.f32 %v2233_v34, %v1010_v31  ;;  %v1256_v35 = vadd.f32 %v2233_v34, %v1255_v32  ;;  %v1012_v36 = vpop.f32.mrb[79].mxu0  ;;  %v1257_v37 = vpop.f32.mrb[79].mxu1 }
 0x1a0   : > { %v1343_v38 = vmax.f32 %v1011_v33, 0.0  ;;  %v1392_v39 = vmax.f32 %v1256_v35, 0.0 }
 0x1a1   : > { %v1015_v40 = vpop.f32.mrb[80].mxu0  ;;  %v1260_v41 = vpop.f32.mrb[80].mxu1 }
 0x1a2   : > { %1442 = vst.msk [vmem:[%s2241_s9 + $0x138] sm:$0xff] %vm1402_vm2, %v1343_v38  ;;  %1491 = vst.msk [vmem:[%s2241_s9 + $0x2c0] sm:$0xff] %vm1402_vm2, %v1392_v39  ;;  %v1016_v42 = vadd.f32 %v2233_v34, %v1015_v40  ;;  %v1261_v43 = vadd.f32 %v2233_v34, %v1260_v41  ;;  %v1017_v44 = vpop.f32.mrb[81].mxu0  ;;  %v1262_v45 = vpop.f32.mrb[81].mxu1 }
 0x1a4   : > { %v1344_v46 = vmax.f32 %v1016_v42, 0.0  ;;  %v1393_v47 = vmax.f32 %v1261_v43, 0.0 }
 0x1a5   : > { %v1020_v48 = vpop.f32.mrb[82].mxu0  ;;  %v1265_v49 = vpop.f32.mrb[82].mxu1 }
 0x1a6   : > { %1443 = vst.msk [vmem:[%s2241_s9 + $0x140] sm:$0xff] %vm1402_vm2, %v1344_v46  ;;  %1492 = vst.msk [vmem:[%s2241_s9 + $0x2c8] sm:$0xff] %vm1402_vm2, %v1393_v47  ;;  %v1021_v50 = vadd.f32 %v2233_v34, %v1020_v48  ;;  %v1266_v51 = vadd.f32 %v2233_v34, %v1265_v49  ;;  %v1022_v52 = vpop.f32.mrb[83].mxu0  ;;  %v1267_v53 = vpop.f32.mrb[83].mxu1 }
 0x1a8   : > { %v1345_v54 = vmax.f32 %v1021_v50, 0.0  ;;  %v1394_v55 = vmax.f32 %v1266_v51, 0.0 }
 0x1a9   : > { %v1025_v56 = vpop.f32.mrb[84].mxu0  ;;  %v1270_v57 = vpop.f32.mrb[84].mxu1 }
 0x1aa   : > { %1444 = vst.msk [vmem:[%s2241_s9 + $0x148] sm:$0xff] %vm1402_vm2, %v1345_v54  ;;  %1493 = vst.msk [vmem:[%s2241_s9 + $0x2d0] sm:$0xff] %vm1402_vm2, %v1394_v55  ;;  %v1026_v58 = vadd.f32 %v2233_v34, %v1025_v56  ;;  %v1271_v59 = vadd.f32 %v2233_v34, %v1270_v57  ;;  %v1027_v60 = vpop.f32.mrb[85].mxu0  ;;  %v1272_v61 = vpop.f32.mrb[85].mxu1 }
 0x1ac   : > { %v1346_v62 = vmax.f32 %v1026_v58, 0.0  ;;  %v1395_v63 = vmax.f32 %v1271_v59, 0.0 }
 0x1ad   : > { %v1030_v0 = vpop.f32.mrb[86].mxu0  ;;  %v1275_v1 = vpop.f32.mrb[86].mxu1 }
 0x1ae   : > { %1445 = vst.msk [vmem:[%s2241_s9 + $0x150] sm:$0xff] %vm1402_vm2, %v1346_v62  ;;  %1494 = vst.msk [vmem:[%s2241_s9 + $0x2d8] sm:$0xff] %vm1402_vm2, %v1395_v63  ;;  %v1031_v2 = vadd.f32 %v2233_v34, %v1030_v0  ;;  %v1276_v3 = vadd.f32 %v2233_v34, %v1275_v1  ;;  %v1032_v4 = vpop.f32.mrb[87].mxu0  ;;  %v1277_v5 = vpop.f32.mrb[87].mxu1 }
 0x1b0   : > { %v1347_v6 = vmax.f32 %v1031_v2, 0.0  ;;  %v1396_v7 = vmax.f32 %v1276_v3, 0.0 }
 0x1b1   : > { %v1035_v8 = vpop.f32.mrb[88].mxu0  ;;  %v1280_v9 = vpop.f32.mrb[88].mxu1 }
 0x1b2   : > { %1446 = vst.msk [vmem:[%s2241_s9 + $0x158] sm:$0xff] %vm1402_vm2, %v1347_v6  ;;  %1495 = vst.msk [vmem:[%s2241_s9 + $0x2e0] sm:$0xff] %vm1402_vm2, %v1396_v7  ;;  %v1036_v10 = vadd.f32 %v2233_v34, %v1035_v8  ;;  %v1281_v11 = vadd.f32 %v2233_v34, %v1280_v9  ;;  %v1037_v12 = vpop.f32.mrb[89].mxu0  ;;  %v1282_v13 = vpop.f32.mrb[89].mxu1 }
 0x1b4   : > { %v1348_v14 = vmax.f32 %v1036_v10, 0.0  ;;  %v1397_v15 = vmax.f32 %v1281_v11, 0.0 }
 0x1b5   : > { %v1040_v16 = vpop.f32.mrb[90].mxu0  ;;  %v1285_v17 = vpop.f32.mrb[90].mxu1 }
 0x1b6   : > { %1447 = vst.msk [vmem:[%s2241_s9 + $0x160] sm:$0xff] %vm1402_vm2, %v1348_v14  ;;  %1496 = vst.msk [vmem:[%s2241_s9 + $0x2e8] sm:$0xff] %vm1402_vm2, %v1397_v15  ;;  %v1041_v18 = vadd.f32 %v2233_v34, %v1040_v16  ;;  %v1286_v19 = vadd.f32 %v2233_v34, %v1285_v17  ;;  %v1042_v20 = vpop.f32.mrb[91].mxu0  ;;  %v1287_v21 = vpop.f32.mrb[91].mxu1 }
 0x1b8   : > { %v1349_v22 = vmax.f32 %v1041_v18, 0.0  ;;  %v1398_v23 = vmax.f32 %v1286_v19, 0.0 }
 0x1b9   : > { %v1045_v24 = vpop.f32.mrb[92].mxu0  ;;  %v1290_v25 = vpop.f32.mrb[92].mxu1 }
 0x1ba   : > { %1448 = vst.msk [vmem:[%s2241_s9 + $0x168] sm:$0xff] %vm1402_vm2, %v1349_v22  ;;  %1497 = vst.msk [vmem:[%s2241_s9 + $0x2f0] sm:$0xff] %vm1402_vm2, %v1398_v23  ;;  %v1046_v26 = vadd.f32 %v2233_v34, %v1045_v24  ;;  %v1291_v27 = vadd.f32 %v2233_v34, %v1290_v25  ;;  %v1047_v28 = vpop.f32.mrb[93].mxu0  ;;  %v1292_v29 = vpop.f32.mrb[93].mxu1 }
 0x1bc   : > { %v1350_v30 = vmax.f32 %v1046_v26, 0.0  ;;  %v1399_v31 = vmax.f32 %v1291_v27, 0.0 }
 0x1bd   : > { %v1050_v32 = vpop.f32.mrb[94].mxu0  ;;  %v1295_v33 = vpop.f32.mrb[94].mxu1 }
 0x1be   : > { %1449 = vst.msk [vmem:[%s2241_s9 + $0x170] sm:$0xff] %vm1402_vm2, %v1350_v30  ;;  %1498 = vst.msk [vmem:[%s2241_s9 + $0x2f8] sm:$0xff] %vm1402_vm2, %v1399_v31  ;;  %v1051_v35 = vadd.f32 %v2233_v34, %v1050_v32  ;;  %v1296_v36 = vadd.f32 %v2233_v34, %v1295_v33  ;;  %v1052_v37 = vpop.f32.mrb[95].mxu0  ;;  %v1297_v38 = vpop.f32.mrb[95].mxu1 }
 0x1c0   : > { %v1351_v39 = vmax.f32 %v1051_v35, 0.0  ;;  %v1400_v40 = vmax.f32 %v1296_v36, 0.0 }
 0x1c1   : > { %v1055_v41 = vpop.f32.mrb[96].mxu0  ;;  %v1300_v42 = vpop.f32.mrb[96].mxu1 }
 0x1c2   : > { %1450 = vst.msk [vmem:[%s2241_s9 + $0x178] sm:$0xff] %vm1402_vm2, %v1351_v39  ;;  %1499 = vst.msk [vmem:[%s2241_s9 + $0x300] sm:$0xff] %vm1402_vm2, %v1400_v40  ;;  %v1056_v43 = vadd.f32 %v2233_v34, %v1055_v41  ;;  %v1301_v44 = vadd.f32 %v2233_v34, %v1300_v42  ;;  %v1057_v45 = vpop.f32.mrb[97].mxu0  ;;  %v1302_v46 = vpop.f32.mrb[97].mxu1 }
 0x1c4   : > { %v1352_v47 = vmax.f32 %v1056_v43, 0.0  ;;  %v1401_v48 = vmax.f32 %v1301_v44, 0.0 }
 0x1c6   : > { %1451 = vst.msk [vmem:[%s2241_s9 + $0x180] sm:$0xff] %vm1402_vm2, %v1352_v47  ;;  %1500 = vst.msk [vmem:[%s2241_s9 + $0x308] sm:$0xff] %vm1402_vm2, %v1401_v48 }
 0x1c7 PF: > { %s13_s14 = sadd.s32 1, %s1811_s14   ;;  %s2548_s12 = smov %s1807_s13 }
 0x1c8   : > { %p10_p5 = scmp.ge.s32.totalorder %s13_s14, 4   ;;  %s2549_s13 = smov %s2551_s15 }
 0x1ca   :  { %12 = sbr.rel (!%p10_p5) target bundleno = 2 (0x2), region = 68 }

// kernel: lenet_forward.5
= control target key start
LH: loop header
LB: loop body
LE: loop exit
PB: predicated region body
PF: predicated region fallthrough
CT: control target
= control target key end

     0   :  { %v1607_v32 = vlaneseq  ;;  %v14827_v33 = vmov 1966171168   ;;  %vm9676_vm0 = vcmask 523264   ;;  %vm14830_vm1 = vmmov 0   ;;  %s20151_s1 = inlined_call_operand.vmem [shape: bf16[3136,1024], index: 1, kind: input, shape index: {}]   ;;  %s20152_s0 = inlined_call_operand.vmem [shape: bf16[2,3136], index: 0, kind: input, shape index: {}]   ;;  %s20153_s3 = inlined_call_operand.vmem [shape: bf16[1024,128], index: 3, kind: input, shape index: {}]   ;;  %s20154_s2 = inlined_call_operand.vmem [shape: f32[1,1024], index: 2, kind: input, shape index: {}]   ;;  %s20155_s5 = inlined_call_operand.vmem [shape: bf16[128,128], index: 5, kind: input, shape index: {}]   ;;  %s20156_s4 = inlined_call_operand.vmem [shape: f32[1,128], index: 4, kind: input, shape index: {}]   ;;  %s20157_s7 = inlined_call_operand.vmem [shape: bf16[128,128], index: 7, kind: input, shape index: {}]   ;;  %s20158_s6 = inlined_call_operand.vmem [shape: f32[1,128], index: 6, kind: input, shape index: {}]   ;;  %s20159_s8 = inlined_call_operand.vmem [shape: f32[1,128], index: 8, kind: input, shape index: {}]   ;;  %s20160_s9 = inlined_call_operand.vmem [shape: f32[2,128], index: 9, kind: output, shape index: {}]  }
   0x1   :  { %v37_v0 = vld [vmem:[%s20151_s1] sm:$0xff]  ;;  %v38_v2 = vld [vmem:[%s20151_s1 + $0x8] sm:$0xff]  ;;  %v1653_v34 = vunpack.c.l.s4 %v14827_v33 }
   0x2   :  { %v41_v1 = vld [vmem:[%s20151_s1 + $0x20] sm:$0xff]  ;;  %v42_v4 = vld [vmem:[%s20151_s1 + $0x28] sm:$0xff]  ;;  %v14947_v43 = vshrl.u32 %v1607_v32, 7 }
   0x3   :  { %v12740_v3 = vcombine.high %v37_v0, %v41_v1  ;;  %v12739_v5 = vcombine.low %v37_v0, %v41_v1  ;;  %v45_v6 = vld [vmem:[%s20151_s1 + $0x40] sm:$0xff]  ;;  %v12742_v8 = vcombine.high %v38_v2, %v42_v4  ;;  %v12741_v9 = vcombine.low %v38_v2, %v42_v4  ;;  %v46_v11 = vld [vmem:[%s20151_s1 + $0x48] sm:$0xff] }
   0x4   :  { %v49_v7 = vld [vmem:[%s20151_s1 + $0x60] sm:$0xff]  ;;  %v50_v12 = vld [vmem:[%s20151_s1 + $0x68] sm:$0xff]  ;;  %v1654_v44 = vunpack.c.0.s8 %v1653_v34 }
   0x5   :  { %v12748_v10 = vcombine.high %v45_v6, %v49_v7  ;;  %v53_v13 = vld [vmem:[%s20151_s1 + $0x80] sm:$0xff]  ;;  %9680 = vmatprep.subr.bf16.mxu0 %v12740_v3  ;;  %v12750_v14 = vcombine.high %v46_v11, %v50_v12  ;;  %v54_v16 = vld [vmem:[%s20151_s1 + $0x88] sm:$0xff]  ;;  %10213 = vmatprep.subr.bf16.mxu1 %v12742_v8  ;;  %v12747_v18 = vcombine.low %v45_v6, %v49_v7 }
   0x6   :  { %v57_v15 = vld [vmem:[%s20151_s1 + $0xa0] sm:$0xff]  ;;  %v58_v17 = vld [vmem:[%s20151_s1 + $0xa8] sm:$0xff]  ;;  %9681 = vmatpush1.bf16.msra.mxu0 %v12739_v5  ;;  %10214 = vmatpush1.bf16.msra.mxu1 %v12741_v9  ;;  %v12749_v19 = vcombine.low %v46_v11, %v50_v12  ;;  %v14962_v53 = vsub.s32 %v1654_v44, %v14947_v43 }
   0x7   :  { %9682 = vmatprep.subr.bf16.mxu0 %v12748_v10  ;;  %v12756_v20 = vcombine.high %v53_v13, %v57_v15  ;;  %10215 = vmatprep.subr.bf16.mxu1 %v12750_v14  ;;  %v12758_v21 = vcombine.high %v54_v16, %v58_v17  ;;  %v61_v22 = vld [vmem:[%s20151_s1 + $0xc0] sm:$0xff]  ;;  %v62_v24 = vld [vmem:[%s20151_s1 + $0xc8] sm:$0xff]  ;;  %v12755_v26 = vcombine.low %v53_v13, %v57_v15 }
   0x8   :  { %v65_v23 = vld [vmem:[%s20151_s1 + $0xe0] sm:$0xff]  ;;  %v66_v25 = vld [vmem:[%s20151_s1 + $0xe8] sm:$0xff]  ;;  %v12757_v27 = vcombine.low %v54_v16, %v58_v17 }
   0x9   :  { %v12764_v28 = vcombine.high %v61_v22, %v65_v23  ;;  %v12766_v29 = vcombine.high %v62_v24, %v66_v25  ;;  %v69_v30 = vld [vmem:[%s20151_s1 + $0x100] sm:$0xff]  ;;  %v70_v35 = vld [vmem:[%s20151_s1 + $0x108] sm:$0xff]  ;;  %v12763_v37 = vcombine.low %v61_v22, %v65_v23  ;;  %v12765_v38 = vcombine.low %v62_v24, %v66_v25 }
   0xa   :  { %9683 = vmatpush1.bf16.msra.mxu0 %v12747_v18  ;;  %10216 = vmatpush1.bf16.msra.mxu1 %v12749_v19  ;;  %v73_v31 = vld [vmem:[%s20151_s1 + $0x120] sm:$0xff]  ;;  %v74_v36 = vld [vmem:[%s20151_s1 + $0x128] sm:$0xff] }
   0xb   :  { %9684 = vmatprep.subr.bf16.mxu0 %v12756_v20  ;;  %10217 = vmatprep.subr.bf16.mxu1 %v12758_v21  ;;  %v12772_v39 = vcombine.high %v69_v30, %v73_v31  ;;  %v12774_v40 = vcombine.high %v70_v35, %v74_v36  ;;  %v77_v41 = vld [vmem:[%s20151_s1 + $0x140] sm:$0xff]  ;;  %v78_v45 = vld [vmem:[%s20151_s1 + $0x148] sm:$0xff]  ;;  %v12771_v47 = vcombine.low %v69_v30, %v73_v31 }
   0xc   :  { %v81_v42 = vld [vmem:[%s20151_s1 + $0x160] sm:$0xff]  ;;  %v82_v46 = vld [vmem:[%s20151_s1 + $0x168] sm:$0xff]  ;;  %v12773_v48 = vcombine.low %v70_v35, %v74_v36 }
   0xd   :  { %v12780_v49 = vcombine.high %v77_v41, %v81_v42  ;;  %v12782_v50 = vcombine.high %v78_v45, %v82_v46  ;;  %v85_v51 = vld [vmem:[%s20151_s1 + $0x180] sm:$0xff]  ;;  %v86_v54 = vld [vmem:[%s20151_s1 + $0x188] sm:$0xff]  ;;  %v12779_v56 = vcombine.low %v77_v41, %v81_v42  ;;  %v12781_v57 = vcombine.low %v78_v45, %v82_v46 }
   0xe   :  { %9685 = vmatpush1.bf16.msra.mxu0 %v12755_v26  ;;  %10218 = vmatpush1.bf16.msra.mxu1 %v12757_v27  ;;  %v89_v52 = vld [vmem:[%s20151_s1 + $0x1a0] sm:$0xff]  ;;  %v90_v55 = vld [vmem:[%s20151_s1 + $0x1a8] sm:$0xff] }
   0xf   :  { %9686 = vmatprep.subr.bf16.mxu0 %v12764_v28  ;;  %10219 = vmatprep.subr.bf16.mxu1 %v12766_v29  ;;  %v12788_v58 = vcombine.high %v85_v51, %v89_v52  ;;  %v14973_v59 = vld [vmem:[%s20152_s0] sm:$0xff]  ;;  %v12790_v60 = vcombine.high %v86_v54, %v90_v55  ;;  %v94_v0 = vld [vmem:[%s20151_s1 + $0x1c8] sm:$0xff]  ;;  %v12787_v2 = vcombine.low %v85_v51, %v89_v52 }
  0x10   :  { %v93_v61 = vld [vmem:[%s20151_s1 + $0x1c0] sm:$0xff]  ;;  %v14983_v63 = vrot.slane %v14973_v59, %v14962_v53  ;;  %v98_v1 = vld [vmem:[%s20151_s1 + $0x1e8] sm:$0xff]  ;;  %v12789_v4 = vcombine.low %v86_v54, %v90_v55 }
  0x11   :  { %v97_v62 = vld [vmem:[%s20151_s1 + $0x1e0] sm:$0xff]  ;;  %v12798_v6 = vcombine.high %v94_v0, %v98_v1  ;;  %v102_v10 = vld [vmem:[%s20151_s1 + $0x208] sm:$0xff]  ;;  %v12797_v13 = vcombine.low %v94_v0, %v98_v1 }
  0x12   :  { %9687 = vmatpush1.bf16.msra.mxu0 %v12763_v37  ;;  %10220 = vmatpush1.bf16.msra.mxu1 %v12765_v38  ;;  %v1666_v3 = vcombine.high %v14983_v63, %v14983_v63  ;;  %v12796_v5 = vcombine.high %v93_v61, %v97_v62  ;;  %v101_v7 = vld [vmem:[%s20151_s1 + $0x200] sm:$0xff]  ;;  %v106_v11 = vld [vmem:[%s20151_s1 + $0x228] sm:$0xff]  ;;  %v12795_v12 = vcombine.low %v93_v61, %v97_v62 }
  0x13   :  { %9688 = vmatprep.subr.bf16.mxu0 %v12772_v39  ;;  %10221 = vmatprep.subr.bf16.mxu1 %v12774_v40  ;;  %v105_v8 = vld [vmem:[%s20151_s1 + $0x220] sm:$0xff]  ;;  %v12806_v15 = vcombine.high %v102_v10, %v106_v11  ;;  %v110_v18 = vld [vmem:[%s20151_s1 + $0x248] sm:$0xff]  ;;  %v12805_v21 = vcombine.low %v102_v10, %v106_v11 }
  0x14   :  { %v15000_v9 = vrot.slane %v1666_v3, %v14962_v53  ;;  %v12804_v14 = vcombine.high %v101_v7, %v105_v8  ;;  %v109_v16 = vld [vmem:[%s20151_s1 + $0x240] sm:$0xff]  ;;  %v114_v19 = vld [vmem:[%s20151_s1 + $0x268] sm:$0xff]  ;;  %v12803_v20 = vcombine.low %v101_v7, %v105_v8 }
  0x15   :  { %v113_v17 = vld [vmem:[%s20151_s1 + $0x260] sm:$0xff]  ;;  %v12814_v23 = vcombine.high %v110_v18, %v114_v19  ;;  %v118_v26 = vld [vmem:[%s20151_s1 + $0x288] sm:$0xff]  ;;  %v12813_v29 = vcombine.low %v110_v18, %v114_v19 }
  0x16   :  { %9689 = vmatpush1.bf16.msra.mxu0 %v12771_v47  ;;  %10222 = vmatpush1.bf16.msra.mxu1 %v12773_v48  ;;  %v12812_v22 = vcombine.high %v109_v16, %v113_v17  ;;  %v117_v24 = vld [vmem:[%s20151_s1 + $0x280] sm:$0xff]  ;;  %v122_v27 = vld [vmem:[%s20151_s1 + $0x2a8] sm:$0xff]  ;;  %v12811_v28 = vcombine.low %v109_v16, %v113_v17 }
  0x17   :  { %9690 = vmatprep.subr.bf16.mxu0 %v12780_v49  ;;  %10223 = vmatprep.subr.bf16.mxu1 %v12782_v50  ;;  %v121_v25 = vld [vmem:[%s20151_s1 + $0x2a0] sm:$0xff]  ;;  %v12822_v31 = vcombine.high %v118_v26, %v122_v27  ;;  %v126_v34 = vld [vmem:[%s20151_s1 + $0x2c8] sm:$0xff]  ;;  %v12821_v37 = vcombine.low %v118_v26, %v122_v27 }
  0x18   :  { %9712 = vmatprep.mubr.bf16.mxu0 %v15000_v9  ;;  %10245 = vmatprep.mubr.bf16.mxu1 %v15000_v9  ;;  %v12820_v30 = vcombine.high %v117_v24, %v121_v25  ;;  %v125_v32 = vld [vmem:[%s20151_s1 + $0x2c0] sm:$0xff]  ;;  %v130_v35 = vld [vmem:[%s20151_s1 + $0x2e8] sm:$0xff]  ;;  %v12819_v36 = vcombine.low %v117_v24, %v121_v25 }
  0x19   :  { %v129_v33 = vld [vmem:[%s20151_s1 + $0x2e0] sm:$0xff]  ;;  %v12830_v39 = vcombine.high %v126_v34, %v130_v35  ;;  %v134_v42 = vld [vmem:[%s20151_s1 + $0x308] sm:$0xff]  ;;  %v12829_v46 = vcombine.low %v126_v34, %v130_v35 }
  0x1a   :  { %9691 = vmatpush1.bf16.msra.mxu0 %v12779_v56  ;;  %10224 = vmatpush1.bf16.msra.mxu1 %v12781_v57  ;;  %v12828_v38 = vcombine.high %v125_v32, %v129_v33  ;;  %v133_v40 = vld [vmem:[%s20151_s1 + $0x300] sm:$0xff]  ;;  %v138_v44 = vld [vmem:[%s20151_s1 + $0x328] sm:$0xff]  ;;  %v12827_v45 = vcombine.low %v125_v32, %v129_v33 }
  0x1b   :  { %9692 = vmatprep.subr.bf16.mxu0 %v12788_v58  ;;  %10225 = vmatprep.subr.bf16.mxu1 %v12790_v60  ;;  %v137_v41 = vld [vmem:[%s20151_s1 + $0x320] sm:$0xff]  ;;  %v12838_v48 = vcombine.high %v134_v42, %v138_v44  ;;  %v142_v51 = vld [vmem:[%s20151_s1 + $0x348] sm:$0xff]  ;;  %v12837_v55 = vcombine.low %v134_v42, %v138_v44 }
  0x1c   :  { %v12836_v47 = vcombine.high %v133_v40, %v137_v41  ;;  %v141_v49 = vld [vmem:[%s20151_s1 + $0x340] sm:$0xff]  ;;  %v146_v52 = vld [vmem:[%s20151_s1 + $0x368] sm:$0xff]  ;;  %v12835_v54 = vcombine.low %v133_v40, %v137_v41 }
  0x1d   :  { %v145_v50 = vld [vmem:[%s20151_s1 + $0x360] sm:$0xff]  ;;  %v12846_v57 = vcombine.high %v142_v51, %v146_v52  ;;  %v150_v61 = vld [vmem:[%s20151_s1 + $0x388] sm:$0xff]  ;;  %v12845_v1 = vcombine.low %v142_v51, %v146_v52 }
  0x1e   :  { %9693 = vmatpush1.bf16.msra.mxu0 %v12787_v2  ;;  %10226 = vmatpush1.bf16.msra.mxu1 %v12789_v4  ;;  %v12844_v56 = vcombine.high %v141_v49, %v145_v50  ;;  %v149_v58 = vld [vmem:[%s20151_s1 + $0x380] sm:$0xff]  ;;  %v154_v62 = vld [vmem:[%s20151_s1 + $0x3a8] sm:$0xff]  ;;  %v12843_v0 = vcombine.low %v141_v49, %v145_v50 }
  0x1f   :  { %9694 = vmatprep.subr.bf16.mxu0 %v12796_v5  ;;  %10227 = vmatprep.subr.bf16.mxu1 %v12798_v6  ;;  %v153_v60 = vld [vmem:[%s20151_s1 + $0x3a0] sm:$0xff]  ;;  %v12854_v3 = vcombine.high %v150_v61, %v154_v62  ;;  %v158_v6 = vld [vmem:[%s20151_s1 + $0x3c8] sm:$0xff]  ;;  %v12853_v10 = vcombine.low %v150_v61, %v154_v62 }
  0x20   :  { %v12852_v2 = vcombine.high %v149_v58, %v153_v60  ;;  %v157_v4 = vld [vmem:[%s20151_s1 + $0x3c0] sm:$0xff]  ;;  %v162_v7 = vld [vmem:[%s20151_s1 + $0x3e8] sm:$0xff]  ;;  %v12851_v8 = vcombine.low %v149_v58, %v153_v60 }
  0x21   :  { %v161_v5 = vld [vmem:[%s20151_s1 + $0x3e0] sm:$0xff]  ;;  %v170_v16 = vld [vmem:[%s20151_s1 + $0x428] sm:$0xff]  ;;  %v12861_v18 = vcombine.low %v158_v6, %v162_v7 }
  0x22   :  { %9695 = vmatpush1.bf16.msra.mxu0 %v12795_v12  ;;  %10228 = vmatpush1.bf16.msra.mxu1 %v12797_v13  ;;  %v12860_v11 = vcombine.high %v157_v4, %v161_v5  ;;  %v12862_v12 = vcombine.high %v158_v6, %v162_v7  ;;  %v165_v13 = vld [vmem:[%s20151_s1 + $0x400] sm:$0xff]  ;;  %v12859_v17 = vcombine.low %v157_v4, %v161_v5  ;;  %v174_v24 = vld [vmem:[%s20151_s1 + $0x448] sm:$0xff] }
  0x23   :  { %9696 = vmatprep.subr.bf16.mxu0 %v12804_v14  ;;  %10229 = vmatprep.subr.bf16.mxu1 %v12806_v15  ;;  %v169_v14 = vld [vmem:[%s20151_s1 + $0x420] sm:$0xff]  ;;  %v166_v15 = vld [vmem:[%s20151_s1 + $0x408] sm:$0xff] }
  0x24   :  { %v12868_v19 = vcombine.high %v165_v13, %v169_v14  ;;  %v178_v25 = vld [vmem:[%s20151_s1 + $0x468] sm:$0xff]  ;;  %v12867_v26 = vcombine.low %v165_v13, %v169_v14  ;;  %v12869_v27 = vcombine.low %v166_v15, %v170_v16 }
  0x25   :  { %v182_v32 = vld [vmem:[%s20151_s1 + $0x488] sm:$0xff]  ;;  %v12877_v35 = vcombine.low %v174_v24, %v178_v25 }
  0x26   :  { %9697 = vmatpush1.bf16.msra.mxu0 %v12803_v20  ;;  %10230 = vmatpush1.bf16.msra.mxu1 %v12805_v21  ;;  %v12870_v20 = vcombine.high %v166_v15, %v170_v16  ;;  %v173_v21 = vld [vmem:[%s20151_s1 + $0x440] sm:$0xff]  ;;  %v186_v33 = vld [vmem:[%s20151_s1 + $0x4a8] sm:$0xff] }
  0x27   :  { %9698 = vmatprep.subr.bf16.mxu0 %v12812_v22  ;;  %10231 = vmatprep.subr.bf16.mxu1 %v12814_v23  ;;  %v177_v22 = vld [vmem:[%s20151_s1 + $0x460] sm:$0xff]  ;;  %v15114_v23 = vrot.slane %v14983_v63, %v14962_v53  ;;  %v190_v40 = vld [vmem:[%s20151_s1 + $0x4c8] sm:$0xff]  ;;  %v12885_v44 = vcombine.low %v182_v32, %v186_v33 }
  0x28   :  { %v181_v63 = vld [vmem:[%s20151_s1 + $0x480] sm:$0xff]  ;;  %v12875_v34 = vcombine.low %v173_v21, %v177_v22  ;;  %v194_v41 = vld [vmem:[%s20151_s1 + $0x4e8] sm:$0xff] }
  0x29   :  { %v198_v49 = vld [vmem:[%s20151_s1 + $0x508] sm:$0xff]  ;;  %v12893_v52 = vcombine.low %v190_v40, %v194_v41 }
  0x2a   :  { %9699 = vmatpush1.bf16.msra.mxu0 %v12811_v28  ;;  %10232 = vmatpush1.bf16.msra.mxu1 %v12813_v29  ;;  %v12876_v28 = vcombine.high %v173_v21, %v177_v22  ;;  %v12878_v29 = vcombine.high %v174_v24, %v178_v25  ;;  %v202_v50 = vld [vmem:[%s20151_s1 + $0x528] sm:$0xff] }
  0x2b   :  { %9700 = vmatprep.subr.bf16.mxu0 %v12820_v30  ;;  %10233 = vmatprep.subr.bf16.mxu1 %v12822_v31  ;;  %v185_v30 = vld [vmem:[%s20151_s1 + $0x4a0] sm:$0xff]  ;;  %v15130_v31 = vcombine.high %v15000_v9, %v15000_v9  ;;  %v206_v58 = vld [vmem:[%s20151_s1 + $0x548] sm:$0xff]  ;;  %v12901_v62 = vcombine.low %v198_v49, %v202_v50 }
  0x2c   :  { %v12883_v42 = vcombine.low %v181_v63, %v185_v30  ;;  %v210_v60 = vld [vmem:[%s20151_s1 + $0x568] sm:$0xff] }
  0x2d   :  { %v214_v4 = vld [vmem:[%s20151_s1 + $0x588] sm:$0xff]  ;;  %v12909_v7 = vcombine.low %v206_v58, %v210_v60 }
  0x2e   :  { %9701 = vmatpush1.bf16.msra.mxu0 %v12819_v36  ;;  %10234 = vmatpush1.bf16.msra.mxu1 %v12821_v37  ;;  %v12884_v36 = vcombine.high %v181_v63, %v185_v30  ;;  %v12886_v37 = vcombine.high %v182_v32, %v186_v33  ;;  %v218_v5 = vld [vmem:[%s20151_s1 + $0x5a8] sm:$0xff] }
  0x2f   :  { %9702 = vmatprep.subr.bf16.mxu0 %v12828_v38  ;;  %10235 = vmatprep.subr.bf16.mxu1 %v12830_v39  ;;  %v189_v38 = vld [vmem:[%s20151_s1 + $0x4c0] sm:$0xff]  ;;  %v222_v13 = vld [vmem:[%s20151_s1 + $0x5c8] sm:$0xff]  ;;  %v12917_v16 = vcombine.low %v214_v4, %v218_v5 }
  0x30   :  { %v193_v39 = vld [vmem:[%s20151_s1 + $0x4e0] sm:$0xff]  ;;  %v226_v14 = vld [vmem:[%s20151_s1 + $0x5e8] sm:$0xff] }
  0x31   :  { %v12891_v51 = vcombine.low %v189_v38, %v193_v39  ;;  %v230_v21 = vld [vmem:[%s20151_s1 + $0x608] sm:$0xff]  ;;  %v12925_v25 = vcombine.low %v222_v13, %v226_v14 }
  0x32   :  { %9703 = vmatpush1.bf16.msra.mxu0 %v12827_v45  ;;  %10236 = vmatpush1.bf16.msra.mxu1 %v12829_v46  ;;  %v12892_v45 = vcombine.high %v189_v38, %v193_v39  ;;  %v12894_v46 = vcombine.high %v190_v40, %v194_v41  ;;  %v234_v22 = vld [vmem:[%s20151_s1 + $0x628] sm:$0xff] }
  0x33   :  { %9704 = vmatprep.subr.bf16.mxu0 %v12836_v47  ;;  %10237 = vmatprep.subr.bf16.mxu1 %v12838_v48  ;;  %v197_v47 = vld [vmem:[%s20151_s1 + $0x500] sm:$0xff]  ;;  %v238_v63 = vld [vmem:[%s20151_s1 + $0x648] sm:$0xff]  ;;  %v12933_v33 = vcombine.low %v230_v21, %v234_v22 }
  0x34   :  { %v201_v48 = vld [vmem:[%s20151_s1 + $0x520] sm:$0xff]  ;;  %v242_v30 = vld [vmem:[%s20151_s1 + $0x668] sm:$0xff] }
  0x35   :  { %v12899_v61 = vcombine.low %v197_v47, %v201_v48  ;;  %v246_v38 = vld [vmem:[%s20151_s1 + $0x688] sm:$0xff]  ;;  %v12941_v41 = vcombine.low %v238_v63, %v242_v30 }
  0x36   :  { %9705 = vmatpush1.bf16.msra.mxu0 %v12835_v54  ;;  %10238 = vmatpush1.bf16.msra.mxu1 %v12837_v55  ;;  %v12900_v54 = vcombine.high %v197_v47, %v201_v48  ;;  %v12902_v55 = vcombine.high %v198_v49, %v202_v50  ;;  %v250_v39 = vld [vmem:[%s20151_s1 + $0x6a8] sm:$0xff] }
  0x37   :  { %9706 = vmatprep.subr.bf16.mxu0 %v12844_v56  ;;  %10239 = vmatprep.subr.bf16.mxu1 %v12846_v57  ;;  %v205_v56 = vld [vmem:[%s20151_s1 + $0x540] sm:$0xff]  ;;  %v254_v47 = vld [vmem:[%s20151_s1 + $0x6c8] sm:$0xff]  ;;  %v12949_v50 = vcombine.low %v246_v38, %v250_v39 }
  0x38   :  { %v209_v57 = vld [vmem:[%s20151_s1 + $0x560] sm:$0xff]  ;;  %v258_v48 = vld [vmem:[%s20151_s1 + $0x6e8] sm:$0xff] }
  0x39   :  { %v12907_v6 = vcombine.low %v205_v56, %v209_v57 }
  0x3a   :  { %9707 = vmatpush1.bf16.msra.mxu0 %v12843_v0  ;;  %10240 = vmatpush1.bf16.msra.mxu1 %v12845_v1  ;;  %v12908_v0 = vcombine.high %v205_v56, %v209_v57  ;;  %v12910_v1 = vcombine.high %v206_v58, %v210_v60  ;;  %v262_v56 = vld [vmem:[%s20151_s1 + $0x708] sm:$0xff]  ;;  %v12957_v60 = vcombine.low %v254_v47, %v258_v48 }
  0x3b   :  { %9708 = vmatprep.subr.bf16.mxu0 %v12852_v2  ;;  %10241 = vmatprep.subr.bf16.mxu1 %v12854_v3  ;;  %v213_v2 = vld [vmem:[%s20151_s1 + $0x580] sm:$0xff]  ;;  %v266_v57 = vld [vmem:[%s20151_s1 + $0x728] sm:$0xff] }
  0x3c   :  { %v217_v3 = vld [vmem:[%s20151_s1 + $0x5a0] sm:$0xff] }
  0x3d   :  { %v12915_v15 = vcombine.low %v213_v2, %v217_v3 }
  0x3e   :  { %9709 = vmatpush1.bf16.msra.mxu0 %v12851_v8  ;;  %10242 = vmatpush1.bf16.msra.mxu1 %v12853_v10  ;;  %v12916_v8 = vcombine.high %v213_v2, %v217_v3  ;;  %v12918_v10 = vcombine.high %v214_v4, %v218_v5  ;;  %v270_v2 = vld [vmem:[%s20151_s1 + $0x748] sm:$0xff]  ;;  %v12965_v5 = vcombine.low %v262_v56, %v266_v57 }
  0x3f   :  { %9710 = vmatprep.subr.bf16.mxu0 %v12860_v11  ;;  %10243 = vmatprep.subr.bf16.mxu1 %v12862_v12  ;;  %v221_v11 = vld [vmem:[%s20151_s1 + $0x5c0] sm:$0xff]  ;;  %v274_v3 = vld [vmem:[%s20151_s1 + $0x768] sm:$0xff] }
  0x40   :  { %v225_v12 = vld [vmem:[%s20151_s1 + $0x5e0] sm:$0xff] }
  0x41   :  { %v12923_v24 = vcombine.low %v221_v11, %v225_v12 }
  0x42   :  { %9711 = vmatpush1.bf16.msra.mxu0 %v12859_v17  ;;  %10244 = vmatpush1.bf16.msra.mxu1 %v12861_v18  ;;  %v12924_v17 = vcombine.high %v221_v11, %v225_v12  ;;  %v12926_v18 = vcombine.high %v222_v13, %v226_v14  ;;  %v278_v11 = vld [vmem:[%s20151_s1 + $0x788] sm:$0xff]  ;;  %v12973_v14 = vcombine.low %v270_v2, %v274_v3 }
  0x43   :  { %9721 = vmatprep.subr.bf16.mxu0 %v12868_v19  ;;  %10254 = vmatprep.subr.bf16.mxu1 %v12870_v20  ;;  %v229_v19 = vld [vmem:[%s20151_s1 + $0x600] sm:$0xff]  ;;  %v282_v12 = vld [vmem:[%s20151_s1 + $0x7a8] sm:$0xff] }
  0x44   :  { %v233_v20 = vld [vmem:[%s20151_s1 + $0x620] sm:$0xff] }
  0x45   :  { %9713 = vmatmul.mubr.bf16.vlgmr.msra.gmra.mrb[0].mxu0 %v15114_v23  ;;  %10246 = vmatmul.mubr.bf16.vlgmr.msra.gmra.mrb[0].mxu1 %v15114_v23  ;;  %v12931_v32 = vcombine.low %v229_v19, %v233_v20 }
  0x46   :  { %9722 = vmatpush1.bf16.msra.mxu0 %v12867_v26  ;;  %10255 = vmatpush1.bf16.msra.mxu1 %v12869_v27  ;;  %v12932_v26 = vcombine.high %v229_v19, %v233_v20  ;;  %v12934_v27 = vcombine.high %v230_v21, %v234_v22  ;;  %v1651_v19 = vcombine.high %v14973_v59, %v14973_v59  ;;  %v286_v20 = vld [vmem:[%s20151_s1 + $0x7c8] sm:$0xff]  ;;  %v293_v59 = vld [vmem:[%s20151_s1 + $0x800] sm:$0xff] }
  0x47   :  { %9723 = vmatprep.subr.bf16.mxu0 %v12876_v28  ;;  %10256 = vmatprep.subr.bf16.mxu1 %v12878_v29  ;;  %v237_v28 = vld [vmem:[%s20151_s1 + $0x640] sm:$0xff]  ;;  %v290_v21 = vld [vmem:[%s20151_s1 + $0x7e8] sm:$0xff] }
  0x48   :  { %9753 = vmatprep.mubr.bf16.mxu0 %v15130_v31  ;;  %10286 = vmatprep.mubr.bf16.mxu1 %v15130_v31  ;;  %v241_v29 = vld [vmem:[%s20151_s1 + $0x660] sm:$0xff] }
  0x49   :  { %v12939_v40 = vcombine.low %v237_v28, %v241_v29 }
  0x4a   :  { %9724 = vmatpush1.bf16.msra.mxu0 %v12875_v34  ;;  %10257 = vmatpush1.bf16.msra.mxu1 %v12877_v35  ;;  %v12940_v34 = vcombine.high %v237_v28, %v241_v29  ;;  %v12942_v35 = vcombine.high %v238_v63, %v242_v30  ;;  %v15307_v28 = vrot.slane %v1651_v19, %v14962_v53  ;;  %v294_v29 = vld [vmem:[%s20151_s1 + $0x808] sm:$0xff]  ;;  %v341_v19 = vld [vmem:[%s20151_s1 + $0x980] sm:$0xff] }
  0x4b   :  { %9725 = vmatprep.subr.bf16.mxu0 %v12884_v36  ;;  %10258 = vmatprep.subr.bf16.mxu1 %v12886_v37  ;;  %v245_v36 = vld [vmem:[%s20151_s1 + $0x680] sm:$0xff]  ;;  %v298_v63 = vld [vmem:[%s20151_s1 + $0x828] sm:$0xff] }
  0x4c   :  { %v249_v37 = vld [vmem:[%s20151_s1 + $0x6a0] sm:$0xff] }
  0x4d   :  { %v12947_v49 = vcombine.low %v245_v36, %v249_v37 }
  0x4e   :  { %9726 = vmatpush1.bf16.msra.mxu0 %v12883_v42  ;;  %10259 = vmatpush1.bf16.msra.mxu1 %v12885_v44  ;;  %v12948_v42 = vcombine.high %v245_v36, %v249_v37  ;;  %v12950_v44 = vcombine.high %v246_v38, %v250_v39  ;;  %v305_v36 = vld [vmem:[%s20151_s1 + $0x860] sm:$0xff]  ;;  %v1667_v37 = vcombine.high %v15307_v28, %v15307_v28  ;;  %v302_v39 = vld [vmem:[%s20151_s1 + $0x848] sm:$0xff] }
  0x4f   :  { %9727 = vmatprep.subr.bf16.mxu0 %v12892_v45  ;;  %10260 = vmatprep.subr.bf16.mxu1 %v12894_v46  ;;  %v253_v45 = vld [vmem:[%s20151_s1 + $0x6c0] sm:$0xff]  ;;  %v15325_v38 = vcombine.high %v15114_v23, %v15114_v23 }
  0x50   :  { %v257_v46 = vld [vmem:[%s20151_s1 + $0x6e0] sm:$0xff] }
  0x51   :  { %v12955_v58 = vcombine.low %v253_v45, %v257_v46 }
  0x52   :  { %9728 = vmatpush1.bf16.msra.mxu0 %v12891_v51  ;;  %10261 = vmatpush1.bf16.msra.mxu1 %v12893_v52  ;;  %v12956_v51 = vcombine.high %v253_v45, %v257_v46  ;;  %v12958_v52 = vcombine.high %v254_v47, %v258_v48  ;;  %v309_v46 = vld [vmem:[%s20151_s1 + $0x880] sm:$0xff]  ;;  %v15340_v48 = vrot.slane %v1667_v37, %v14962_v53 }
  0x53   :  { %9729 = vmatprep.subr.bf16.mxu0 %v12900_v54  ;;  %10262 = vmatprep.subr.bf16.mxu1 %v12902_v55  ;;  %v261_v54 = vld [vmem:[%s20151_s1 + $0x700] sm:$0xff] }
  0x54   :  { %v265_v55 = vld [vmem:[%s20151_s1 + $0x720] sm:$0xff] }
  0x55   :  { %v12963_v4 = vcombine.low %v261_v54, %v265_v55  ;;  %v313_v47 = vld [vmem:[%s20151_s1 + $0x8a0] sm:$0xff] }
  0x56   :  { %9730 = vmatpush1.bf16.msra.mxu0 %v12899_v61  ;;  %10263 = vmatpush1.bf16.msra.mxu1 %v12901_v62  ;;  %v12964_v61 = vcombine.high %v261_v54, %v265_v55  ;;  %v12966_v62 = vcombine.high %v262_v56, %v266_v57  ;;  %v13012_v54 = vcombine.high %v309_v46, %v313_v47  ;;  %v317_v56 = vld [vmem:[%s20151_s1 + $0x8c0] sm:$0xff] }
  0x57   :  { %9731 = vmatprep.subr.bf16.mxu0 %v12908_v0  ;;  %10264 = vmatprep.subr.bf16.mxu1 %v12910_v1  ;;  %v269_v0 = vld [vmem:[%s20151_s1 + $0x740] sm:$0xff] }
  0x58   :  { %v273_v1 = vld [vmem:[%s20151_s1 + $0x760] sm:$0xff] }
  0x59   :  { %v12971_v13 = vcombine.low %v269_v0, %v273_v1  ;;  %v321_v57 = vld [vmem:[%s20151_s1 + $0x8e0] sm:$0xff] }
  0x5a   :  { %9732 = vmatpush1.bf16.msra.mxu0 %v12907_v6  ;;  %10265 = vmatpush1.bf16.msra.mxu1 %v12909_v7  ;;  %v12972_v6 = vcombine.high %v269_v0, %v273_v1  ;;  %v12974_v7 = vcombine.high %v270_v2, %v274_v3  ;;  %v13020_v0 = vcombine.high %v317_v56, %v321_v57  ;;  %v325_v2 = vld [vmem:[%s20151_s1 + $0x900] sm:$0xff] }
  0x5b   :  { %9733 = vmatprep.subr.bf16.mxu0 %v12916_v8  ;;  %10266 = vmatprep.subr.bf16.mxu1 %v12918_v10  ;;  %v277_v8 = vld [vmem:[%s20151_s1 + $0x780] sm:$0xff] }
  0x5c   :  { %v281_v10 = vld [vmem:[%s20151_s1 + $0x7a0] sm:$0xff] }
  0x5d   :  { %v12979_v22 = vcombine.low %v277_v8, %v281_v10  ;;  %v329_v3 = vld [vmem:[%s20151_s1 + $0x920] sm:$0xff] }
  0x5e   :  { %9734 = vmatpush1.bf16.msra.mxu0 %v12915_v15  ;;  %10267 = vmatpush1.bf16.msra.mxu1 %v12917_v16  ;;  %v12980_v15 = vcombine.high %v277_v8, %v281_v10  ;;  %v12982_v16 = vcombine.high %v278_v11, %v282_v12  ;;  %v13028_v8 = vcombine.high %v325_v2, %v329_v3  ;;  %v361_v37 = vld [vmem:[%s20151_s1 + $0xa20] sm:$0xff] }
  0x5f   :  { %9735 = vmatprep.subr.bf16.mxu0 %v12924_v17  ;;  %10268 = vmatprep.subr.bf16.mxu1 %v12926_v18  ;;  %v285_v17 = vld [vmem:[%s20151_s1 + $0x7c0] sm:$0xff] }
  0x60   :  { %v289_v18 = vld [vmem:[%s20151_s1 + $0x7e0] sm:$0xff] }
  0x61   :  { %v12987_v30 = vcombine.low %v285_v17, %v289_v18 }
  0x62   :  { %9736 = vmatpush1.bf16.msra.mxu0 %v12923_v24  ;;  %10269 = vmatpush1.bf16.msra.mxu1 %v12925_v25  ;;  %v12981_v24 = vcombine.low %v278_v11, %v282_v12  ;;  %v12988_v25 = vcombine.high %v285_v17, %v289_v18  ;;  %v333_v11 = vld [vmem:[%s20151_s1 + $0x940] sm:$0xff] }
  0x63   :  { %9737 = vmatprep.subr.bf16.mxu0 %v12932_v26  ;;  %10270 = vmatprep.subr.bf16.mxu1 %v12934_v27  ;;  %v12990_v26 = vcombine.high %v286_v20, %v290_v21  ;;  %v297_v27 = vld [vmem:[%s20151_s1 + $0x820] sm:$0xff] }
  0x64   :  { %v337_v12 = vld [vmem:[%s20151_s1 + $0x960] sm:$0xff] }
  0x65   :  { %v13036_v17 = vcombine.high %v333_v11, %v337_v12 }
  0x66   :  { %9738 = vmatpush1.bf16.msra.mxu0 %v12931_v32  ;;  %10271 = vmatpush1.bf16.msra.mxu1 %v12933_v33  ;;  %v12989_v32 = vcombine.low %v286_v20, %v290_v21  ;;  %v12996_v33 = vcombine.high %v293_v59, %v297_v27  ;;  %v345_v20 = vld [vmem:[%s20151_s1 + $0x9a0] sm:$0xff]  ;;  %v342_v21 = vld [vmem:[%s20151_s1 + $0x988] sm:$0xff] }
  0x67   :  { %9739 = vmatprep.subr.bf16.mxu0 %v12940_v34  ;;  %10272 = vmatprep.subr.bf16.mxu1 %v12942_v35  ;;  %v12998_v34 = vcombine.high %v294_v29, %v298_v63  ;;  %v301_v35 = vld [vmem:[%s20151_s1 + $0x840] sm:$0xff] }
  0x6a   :  { %9740 = vmatpush1.bf16.msra.mxu0 %v12939_v40  ;;  %10273 = vmatpush1.bf16.msra.mxu1 %v12941_v41  ;;  %v306_v40 = vld [vmem:[%s20151_s1 + $0x868] sm:$0xff]  ;;  %v12995_v41 = vcombine.low %v293_v59, %v297_v27  ;;  %v349_v27 = vld [vmem:[%s20151_s1 + $0x9c0] sm:$0xff] }
  0x6b   :  { %9741 = vmatprep.subr.bf16.mxu0 %v12948_v42  ;;  %10274 = vmatprep.subr.bf16.mxu1 %v12950_v44  ;;  %v12997_v42 = vcombine.low %v294_v29, %v298_v63  ;;  %v13004_v44 = vcombine.high %v301_v35, %v305_v36  ;;  %v13006_v45 = vcombine.high %v302_v39, %v306_v40  ;;  %v353_v29 = vld [vmem:[%s20151_s1 + $0x9e0] sm:$0xff]  ;;  %v350_v63 = vld [vmem:[%s20151_s1 + $0x9c8] sm:$0xff] }
  0x6e   :  { %9742 = vmatpush1.bf16.msra.mxu0 %v12947_v49  ;;  %10275 = vmatpush1.bf16.msra.mxu1 %v12949_v50  ;;  %v310_v49 = vld [vmem:[%s20151_s1 + $0x888] sm:$0xff] }
  0x6f   :  { %9743 = vmatprep.subr.bf16.mxu0 %v12956_v51  ;;  %10276 = vmatprep.subr.bf16.mxu1 %v12958_v52  ;;  %v314_v50 = vld [vmem:[%s20151_s1 + $0x8a8] sm:$0xff]  ;;  %v13003_v51 = vcombine.low %v301_v35, %v305_v36  ;;  %v13005_v52 = vcombine.low %v302_v39, %v306_v40  ;;  %v357_v36 = vld [vmem:[%s20151_s1 + $0xa00] sm:$0xff] }
  0x70   :  { %v13014_v55 = vcombine.high %v310_v49, %v314_v50  ;;  %v358_v39 = vld [vmem:[%s20151_s1 + $0xa08] sm:$0xff] }
  0x71   :  { %v362_v40 = vld [vmem:[%s20151_s1 + $0xa28] sm:$0xff] }
  0x72   :  { %9744 = vmatpush1.bf16.msra.mxu0 %v12955_v58  ;;  %10277 = vmatpush1.bf16.msra.mxu1 %v12957_v60  ;;  %v318_v58 = vld [vmem:[%s20151_s1 + $0x8c8] sm:$0xff] }
  0x73   :  { %9745 = vmatprep.subr.bf16.mxu0 %v12964_v61  ;;  %10278 = vmatprep.subr.bf16.mxu1 %v12966_v62  ;;  %v322_v60 = vld [vmem:[%s20151_s1 + $0x8e8] sm:$0xff]  ;;  %v13011_v61 = vcombine.low %v309_v46, %v313_v47  ;;  %v13013_v62 = vcombine.low %v310_v49, %v314_v50  ;;  %v365_v46 = vld [vmem:[%s20151_s1 + $0xa40] sm:$0xff] }
  0x74   :  { %v13022_v1 = vcombine.high %v318_v58, %v322_v60  ;;  %v369_v47 = vld [vmem:[%s20151_s1 + $0xa60] sm:$0xff]  ;;  %v366_v49 = vld [vmem:[%s20151_s1 + $0xa48] sm:$0xff] }
  0x75   :  { %v370_v50 = vld [vmem:[%s20151_s1 + $0xa68] sm:$0xff] }
  0x76   :  { %9746 = vmatpush1.bf16.msra.mxu0 %v12963_v4  ;;  %10279 = vmatpush1.bf16.msra.mxu1 %v12965_v5  ;;  %v326_v4 = vld [vmem:[%s20151_s1 + $0x908] sm:$0xff] }
  0x77   :  { %9747 = vmatprep.subr.bf16.mxu0 %v12972_v6  ;;  %10280 = vmatprep.subr.bf16.mxu1 %v12974_v7  ;;  %v330_v5 = vld [vmem:[%s20151_s1 + $0x928] sm:$0xff]  ;;  %v13019_v6 = vcombine.low %v317_v56, %v321_v57  ;;  %v13021_v7 = vcombine.low %v318_v58, %v322_v60  ;;  %v373_v56 = vld [vmem:[%s20151_s1 + $0xa80] sm:$0xff] }
  0x78   :  { %v13030_v10 = vcombine.high %v326_v4, %v330_v5  ;;  %v377_v57 = vld [vmem:[%s20151_s1 + $0xaa0] sm:$0xff]  ;;  %v374_v58 = vld [vmem:[%s20151_s1 + $0xa88] sm:$0xff] }
  0x79   :  { %v378_v60 = vld [vmem:[%s20151_s1 + $0xaa8] sm:$0xff] }
  0x7a   :  { %9748 = vmatpush1.bf16.msra.mxu0 %v12971_v13  ;;  %10281 = vmatpush1.bf16.msra.mxu1 %v12973_v14  ;;  %v334_v13 = vld [vmem:[%s20151_s1 + $0x948] sm:$0xff] }
  0x7b   :  { %9749 = vmatprep.subr.bf16.mxu0 %v12980_v15  ;;  %10282 = vmatprep.subr.bf16.mxu1 %v12982_v16  ;;  %v338_v14 = vld [vmem:[%s20151_s1 + $0x968] sm:$0xff]  ;;  %v13027_v15 = vcombine.low %v325_v2, %v329_v3  ;;  %v13029_v16 = vcombine.low %v326_v4, %v330_v5  ;;  %v381_v2 = vld [vmem:[%s20151_s1 + $0xac0] sm:$0xff] }
  0x7c   :  { %v13038_v18 = vcombine.high %v334_v13, %v338_v14  ;;  %v385_v3 = vld [vmem:[%s20151_s1 + $0xae0] sm:$0xff]  ;;  %v382_v4 = vld [vmem:[%s20151_s1 + $0xac8] sm:$0xff] }
  0x7d   :  { %v386_v5 = vld [vmem:[%s20151_s1 + $0xae8] sm:$0xff] }
  0x7e   :  { %9750 = vmatpush1.bf16.msra.mxu0 %v12979_v22  ;;  %10283 = vmatpush1.bf16.msra.mxu1 %v12981_v24  ;;  %v346_v22 = vld [vmem:[%s20151_s1 + $0x9a8] sm:$0xff]  ;;  %v13035_v24 = vcombine.low %v333_v11, %v337_v12  ;;  %v389_v11 = vld [vmem:[%s20151_s1 + $0xb00] sm:$0xff] }
  0x7f   :  { %9751 = vmatprep.subr.bf16.mxu0 %v12988_v25  ;;  %10284 = vmatprep.subr.bf16.mxu1 %v12990_v26  ;;  %v13037_v25 = vcombine.low %v334_v13, %v338_v14  ;;  %v13044_v26 = vcombine.high %v341_v19, %v345_v20  ;;  %v13046_v59 = vcombine.high %v342_v21, %v346_v22  ;;  %v393_v12 = vld [vmem:[%s20151_s1 + $0xb20] sm:$0xff]  ;;  %v390_v13 = vld [vmem:[%s20151_s1 + $0xb08] sm:$0xff] }
  0x80   :  { %v394_v14 = vld [vmem:[%s20151_s1 + $0xb28] sm:$0xff] }
  0x82   :  { %9752 = vmatpush1.bf16.msra.mxu0 %v12987_v30  ;;  %10285 = vmatpush1.bf16.msra.mxu1 %v12989_v32  ;;  %v354_v30 = vld [vmem:[%s20151_s1 + $0x9e8] sm:$0xff]  ;;  %v13043_v32 = vcombine.low %v341_v19, %v345_v20  ;;  %v397_v19 = vld [vmem:[%s20151_s1 + $0xb40] sm:$0xff] }
  0x83   :  { %9762 = vmatprep.subr.bf16.mxu0 %v12996_v33  ;;  %10295 = vmatprep.subr.bf16.mxu1 %v12998_v34  ;;  %v13045_v33 = vcombine.low %v342_v21, %v346_v22  ;;  %v13052_v34 = vcombine.high %v349_v27, %v353_v29  ;;  %v13054_v35 = vcombine.high %v350_v63, %v354_v30  ;;  %v401_v20 = vld [vmem:[%s20151_s1 + $0xb60] sm:$0xff]  ;;  %v398_v21 = vld [vmem:[%s20151_s1 + $0xb48] sm:$0xff] }
  0x84   :  { %v402_v22 = vld [vmem:[%s20151_s1 + $0xb68] sm:$0xff] }
  0x85   :  { %9754 = vmatmul.mubr.bf16.vlgmr.msra.gmra.mrb[0].mxu0 %v15325_v38  ;;  %10287 = vmatmul.mubr.bf16.vlgmr.msra.gmra.mrb[0].mxu1 %v15325_v38 }
  0x86   :  { %9763 = vmatpush1.bf16.msra.mxu0 %v12995_v41  ;;  %10296 = vmatpush1.bf16.msra.mxu1 %v12997_v42  ;;  %v13051_v41 = vcombine.low %v349_v27, %v353_v29  ;;  %v13053_v42 = vcombine.low %v350_v63, %v354_v30  ;;  %v405_v27 = vld [vmem:[%s20151_s1 + $0xb80] sm:$0xff]  ;;  %v406_v63 = vld [vmem:[%s20151_s1 + $0xb88] sm:$0xff] }
  0x87   :  { %9764 = vmatprep.subr.bf16.mxu0 %v13004_v44  ;;  %10297 = vmatprep.subr.bf16.mxu1 %v13006_v45  ;;  %v13060_v44 = vcombine.high %v357_v36, %v361_v37  ;;  %v13062_v45 = vcombine.high %v358_v39, %v362_v40  ;;  %v409_v29 = vld [vmem:[%s20151_s1 + $0xba0] sm:$0xff]  ;;  %v410_v30 = vld [vmem:[%s20151_s1 + $0xba8] sm:$0xff] }
  0x88   :  { %9794 = vmatprep.mubr.bf16.mxu0 %v15340_v48  ;;  %10327 = vmatprep.mubr.bf16.mxu1 %v15340_v48 }
  0x8a   :  { %9765 = vmatpush1.bf16.msra.mxu0 %v13003_v51  ;;  %10298 = vmatpush1.bf16.msra.mxu1 %v13005_v52  ;;  %v13059_v51 = vcombine.low %v357_v36, %v361_v37  ;;  %v13061_v52 = vcombine.low %v358_v39, %v362_v40  ;;  %v413_v36 = vld [vmem:[%s20151_s1 + $0xbc0] sm:$0xff]  ;;  %v414_v39 = vld [vmem:[%s20151_s1 + $0xbc8] sm:$0xff] }
  0x8b   :  { %9766 = vmatprep.subr.bf16.mxu0 %v13012_v54  ;;  %10299 = vmatprep.subr.bf16.mxu1 %v13014_v55  ;;  %v13068_v54 = vcombine.high %v365_v46, %v369_v47  ;;  %v13070_v55 = vcombine.high %v366_v49, %v370_v50  ;;  %v417_v37 = vld [vmem:[%s20151_s1 + $0xbe0] sm:$0xff]  ;;  %v418_v40 = vld [vmem:[%s20151_s1 + $0xbe8] sm:$0xff] }
  0x8e   :  { %9767 = vmatpush1.bf16.msra.mxu0 %v13011_v61  ;;  %10300 = vmatpush1.bf16.msra.mxu1 %v13013_v62  ;;  %v13067_v61 = vcombine.low %v365_v46, %v369_v47  ;;  %v13069_v62 = vcombine.low %v366_v49, %v370_v50  ;;  %v421_v46 = vld [vmem:[%s20151_s1 + $0xc00] sm:$0xff]  ;;  %v422_v49 = vld [vmem:[%s20151_s1 + $0xc08] sm:$0xff] }
  0x8f   :  { %9768 = vmatprep.subr.bf16.mxu0 %v13020_v0  ;;  %10301 = vmatprep.subr.bf16.mxu1 %v13022_v1  ;;  %v13076_v0 = vcombine.high %v373_v56, %v377_v57  ;;  %v13078_v1 = vcombine.high %v374_v58, %v378_v60  ;;  %v425_v47 = vld [vmem:[%s20151_s1 + $0xc20] sm:$0xff]  ;;  %v426_v50 = vld [vmem:[%s20151_s1 + $0xc28] sm:$0xff] }
  0x92   :  { %9769 = vmatpush1.bf16.msra.mxu0 %v13019_v6  ;;  %10302 = vmatpush1.bf16.msra.mxu1 %v13021_v7  ;;  %v13075_v6 = vcombine.low %v373_v56, %v377_v57  ;;  %v13077_v7 = vcombine.low %v374_v58, %v378_v60  ;;  %v429_v56 = vld [vmem:[%s20151_s1 + $0xc40] sm:$0xff]  ;;  %v15528_v58 = vrot.slane %v15307_v28, %v14962_v53  ;;  %v430_v60 = vld [vmem:[%s20151_s1 + $0xc48] sm:$0xff] }
  0x93   :  { %9770 = vmatprep.subr.bf16.mxu0 %v13028_v8  ;;  %10303 = vmatprep.subr.bf16.mxu1 %v13030_v10  ;;  %v13084_v8 = vcombine.high %v381_v2, %v385_v3  ;;  %v13086_v10 = vcombine.high %v382_v4, %v386_v5  ;;  %v433_v57 = vld [vmem:[%s20151_s1 + $0xc60] sm:$0xff] }
  0x94   :  { %v437_v28 = vld [vmem:[%s20151_s1 + $0xc80] sm:$0xff] }
  0x96   :  { %9771 = vmatpush1.bf16.msra.mxu0 %v13027_v15  ;;  %10304 = vmatpush1.bf16.msra.mxu1 %v13029_v16  ;;  %v13083_v15 = vcombine.low %v381_v2, %v385_v3  ;;  %v13085_v16 = vcombine.low %v382_v4, %v386_v5  ;;  %v441_v3 = vld [vmem:[%s20151_s1 + $0xca0] sm:$0xff]  ;;  %v15544_v4 = vcombine.high %v15340_v48, %v15340_v48  ;;  %v438_v5 = vld [vmem:[%s20151_s1 + $0xc88] sm:$0xff] }
  0x97   :  { %9772 = vmatprep.subr.bf16.mxu0 %v13036_v17  ;;  %10305 = vmatprep.subr.bf16.mxu1 %v13038_v18  ;;  %v13092_v17 = vcombine.high %v389_v11, %v393_v12  ;;  %v13094_v18 = vcombine.high %v390_v13, %v394_v14 }
  0x9a   :  { %9773 = vmatpush1.bf16.msra.mxu0 %v13035_v24  ;;  %10306 = vmatpush1.bf16.msra.mxu1 %v13037_v25  ;;  %v13091_v24 = vcombine.low %v389_v11, %v393_v12  ;;  %v13093_v25 = vcombine.low %v390_v13, %v394_v14  ;;  %v445_v12 = vld [vmem:[%s20151_s1 + $0xcc0] sm:$0xff]  ;;  %v446_v14 = vld [vmem:[%s20151_s1 + $0xcc8] sm:$0xff] }
  0x9b   :  { %9774 = vmatprep.subr.bf16.mxu0 %v13044_v26  ;;  %10307 = vmatprep.subr.bf16.mxu1 %v13046_v59  ;;  %v13100_v26 = vcombine.high %v397_v19, %v401_v20  ;;  %v13102_v59 = vcombine.high %v398_v21, %v402_v22  ;;  %v449_v13 = vld [vmem:[%s20151_s1 + $0xce0] sm:$0xff] }
  0x9e   :  { %9775 = vmatpush1.bf16.msra.mxu0 %v13043_v32  ;;  %10308 = vmatpush1.bf16.msra.mxu1 %v13045_v33  ;;  %v13099_v32 = vcombine.low %v397_v19, %v401_v20  ;;  %v13101_v33 = vcombine.low %v398_v21, %v402_v22  ;;  %v453_v20 = vld [vmem:[%s20151_s1 + $0xd00] sm:$0xff]  ;;  %v454_v22 = vld [vmem:[%s20151_s1 + $0xd08] sm:$0xff] }
  0x9f   :  { %9776 = vmatprep.subr.bf16.mxu0 %v13052_v34  ;;  %10309 = vmatprep.subr.bf16.mxu1 %v13054_v35  ;;  %v13108_v34 = vcombine.high %v405_v27, %v409_v29  ;;  %v13110_v35 = vcombine.high %v406_v63, %v410_v30  ;;  %v457_v21 = vld [vmem:[%s20151_s1 + $0xd20] sm:$0xff] }
  0xa2   :  { %9777 = vmatpush1.bf16.msra.mxu0 %v13051_v41  ;;  %10310 = vmatpush1.bf16.msra.mxu1 %v13053_v42  ;;  %v13107_v41 = vcombine.low %v405_v27, %v409_v29  ;;  %v13109_v42 = vcombine.low %v406_v63, %v410_v30  ;;  %v461_v29 = vld [vmem:[%s20151_s1 + $0xd40] sm:$0xff]  ;;  %v462_v30 = vld [vmem:[%s20151_s1 + $0xd48] sm:$0xff] }
  0xa3   :  { %9778 = vmatprep.subr.bf16.mxu0 %v13060_v44  ;;  %10311 = vmatprep.subr.bf16.mxu1 %v13062_v45  ;;  %v13116_v44 = vcombine.high %v413_v36, %v417_v37  ;;  %v13118_v45 = vcombine.high %v414_v39, %v418_v40  ;;  %v465_v63 = vld [vmem:[%s20151_s1 + $0xd60] sm:$0xff] }
  0xa6   :  { %9779 = vmatpush1.bf16.msra.mxu0 %v13059_v51  ;;  %10312 = vmatpush1.bf16.msra.mxu1 %v13061_v52  ;;  %v13115_v51 = vcombine.low %v413_v36, %v417_v37  ;;  %v13117_v52 = vcombine.low %v414_v39, %v418_v40  ;;  %v469_v37 = vld [vmem:[%s20151_s1 + $0xd80] sm:$0xff]  ;;  %v470_v40 = vld [vmem:[%s20151_s1 + $0xd88] sm:$0xff] }
  0xa7   :  { %9780 = vmatprep.subr.bf16.mxu0 %v13068_v54  ;;  %10313 = vmatprep.subr.bf16.mxu1 %v13070_v55  ;;  %v13124_v54 = vcombine.high %v421_v46, %v425_v47  ;;  %v13126_v55 = vcombine.high %v422_v49, %v426_v50  ;;  %v473_v39 = vld [vmem:[%s20151_s1 + $0xda0] sm:$0xff] }
  0xaa   :  { %9781 = vmatpush1.bf16.msra.mxu0 %v13067_v61  ;;  %10314 = vmatpush1.bf16.msra.mxu1 %v13069_v62  ;;  %v434_v61 = vld [vmem:[%s20151_s1 + $0xc68] sm:$0xff]  ;;  %v13123_v62 = vcombine.low %v421_v46, %v425_v47  ;;  %v477_v47 = vld [vmem:[%s20151_s1 + $0xdc0] sm:$0xff] }
  0xab   :  { %9782 = vmatprep.subr.bf16.mxu0 %v13076_v0  ;;  %10315 = vmatprep.subr.bf16.mxu1 %v13078_v1  ;;  %v13125_v0 = vcombine.low %v422_v49, %v426_v50  ;;  %v13132_v1 = vcombine.high %v429_v56, %v433_v57  ;;  %v13134_v2 = vcombine.high %v430_v60, %v434_v61  ;;  %v481_v49 = vld [vmem:[%s20151_s1 + $0xde0] sm:$0xff]  ;;  %v478_v50 = vld [vmem:[%s20151_s1 + $0xdc8] sm:$0xff] }
  0xae   :  { %9783 = vmatpush1.bf16.msra.mxu0 %v13075_v6  ;;  %10316 = vmatpush1.bf16.msra.mxu1 %v13077_v7  ;;  %v442_v6 = vld [vmem:[%s20151_s1 + $0xca8] sm:$0xff]  ;;  %v13131_v7 = vcombine.low %v429_v56, %v433_v57  ;;  %v485_v57 = vld [vmem:[%s20151_s1 + $0xe00] sm:$0xff] }
  0xaf   :  { %9784 = vmatprep.subr.bf16.mxu0 %v13084_v8  ;;  %10317 = vmatprep.subr.bf16.mxu1 %v13086_v10  ;;  %v13133_v8 = vcombine.low %v430_v60, %v434_v61  ;;  %v13140_v10 = vcombine.high %v437_v28, %v441_v3  ;;  %v13142_v11 = vcombine.high %v438_v5, %v442_v6  ;;  %v489_v60 = vld [vmem:[%s20151_s1 + $0xe20] sm:$0xff]  ;;  %v486_v61 = vld [vmem:[%s20151_s1 + $0xe08] sm:$0xff] }
  0xb2   :  { %9785 = vmatpush1.bf16.msra.mxu0 %v13083_v15  ;;  %10318 = vmatpush1.bf16.msra.mxu1 %v13085_v16  ;;  %v450_v15 = vld [vmem:[%s20151_s1 + $0xce8] sm:$0xff]  ;;  %v13139_v16 = vcombine.low %v437_v28, %v441_v3  ;;  %v493_v3 = vld [vmem:[%s20151_s1 + $0xe40] sm:$0xff] }
  0xb3   :  { %9786 = vmatprep.subr.bf16.mxu0 %v13092_v17  ;;  %10319 = vmatprep.subr.bf16.mxu1 %v13094_v18  ;;  %v13141_v17 = vcombine.low %v438_v5, %v442_v6  ;;  %v13148_v18 = vcombine.high %v445_v12, %v449_v13  ;;  %v13150_v19 = vcombine.high %v446_v14, %v450_v15  ;;  %v497_v5 = vld [vmem:[%s20151_s1 + $0xe60] sm:$0xff]  ;;  %v494_v6 = vld [vmem:[%s20151_s1 + $0xe48] sm:$0xff] }
  0xb6   :  { %9787 = vmatpush1.bf16.msra.mxu0 %v13091_v24  ;;  %10320 = vmatpush1.bf16.msra.mxu1 %v13093_v25  ;;  %v458_v24 = vld [vmem:[%s20151_s1 + $0xd28] sm:$0xff]  ;;  %v13147_v25 = vcombine.low %v445_v12, %v449_v13  ;;  %v501_v13 = vld [vmem:[%s20151_s1 + $0xe80] sm:$0xff] }
  0xb7   :  { %9788 = vmatprep.subr.bf16.mxu0 %v13100_v26  ;;  %10321 = vmatprep.subr.bf16.mxu1 %v13102_v59  ;;  %v13149_v26 = vcombine.low %v446_v14, %v450_v15  ;;  %v13156_v59 = vcombine.high %v453_v20, %v457_v21  ;;  %v13158_v27 = vcombine.high %v454_v22, %v458_v24  ;;  %v505_v14 = vld [vmem:[%s20151_s1 + $0xea0] sm:$0xff]  ;;  %v502_v15 = vld [vmem:[%s20151_s1 + $0xe88] sm:$0xff] }
  0xba   :  { %9789 = vmatpush1.bf16.msra.mxu0 %v13099_v32  ;;  %10322 = vmatpush1.bf16.msra.mxu1 %v13101_v33  ;;  %v466_v32 = vld [vmem:[%s20151_s1 + $0xd68] sm:$0xff]  ;;  %v13155_v33 = vcombine.low %v453_v20, %v457_v21  ;;  %v509_v21 = vld [vmem:[%s20151_s1 + $0xec0] sm:$0xff] }
  0xbb   :  { %9790 = vmatprep.subr.bf16.mxu0 %v13108_v34  ;;  %10323 = vmatprep.subr.bf16.mxu1 %v13110_v35  ;;  %v13157_v34 = vcombine.low %v454_v22, %v458_v24  ;;  %v13164_v35 = vcombine.high %v461_v29, %v465_v63  ;;  %v13166_v36 = vcombine.high %v462_v30, %v466_v32  ;;  %v513_v22 = vld [vmem:[%s20151_s1 + $0xee0] sm:$0xff]  ;;  %v510_v24 = vld [vmem:[%s20151_s1 + $0xec8] sm:$0xff] }
  0xbe   :  { %9791 = vmatpush1.bf16.msra.mxu0 %v13107_v41  ;;  %10324 = vmatpush1.bf16.msra.mxu1 %v13109_v42  ;;  %v474_v41 = vld [vmem:[%s20151_s1 + $0xda8] sm:$0xff]  ;;  %v13163_v42 = vcombine.low %v461_v29, %v465_v63  ;;  %v517_v63 = vld [vmem:[%s20151_s1 + $0xf00] sm:$0xff] }
  0xbf   :  { %9792 = vmatprep.subr.bf16.mxu0 %v13116_v44  ;;  %10325 = vmatprep.subr.bf16.mxu1 %v13118_v45  ;;  %v13165_v44 = vcombine.low %v462_v30, %v466_v32  ;;  %v13172_v45 = vcombine.high %v469_v37, %v473_v39  ;;  %v13174_v46 = vcombine.high %v470_v40, %v474_v41  ;;  %v521_v30 = vld [vmem:[%s20151_s1 + $0xf20] sm:$0xff]  ;;  %v518_v32 = vld [vmem:[%s20151_s1 + $0xf08] sm:$0xff] }
  0xc2   :  { %9793 = vmatpush1.bf16.msra.mxu0 %v13115_v51  ;;  %10326 = vmatpush1.bf16.msra.mxu1 %v13117_v52  ;;  %v482_v51 = vld [vmem:[%s20151_s1 + $0xde8] sm:$0xff]  ;;  %v13171_v52 = vcombine.low %v469_v37, %v473_v39  ;;  %v525_v39 = vld [vmem:[%s20151_s1 + $0xf40] sm:$0xff] }
  0xc3   :  { %9803 = vmatprep.subr.bf16.mxu0 %v13124_v54  ;;  %10336 = vmatprep.subr.bf16.mxu1 %v13126_v55  ;;  %v13173_v54 = vcombine.low %v470_v40, %v474_v41  ;;  %v13180_v55 = vcombine.high %v477_v47, %v481_v49  ;;  %v13182_v56 = vcombine.high %v478_v50, %v482_v51  ;;  %v529_v40 = vld [vmem:[%s20151_s1 + $0xf60] sm:$0xff]  ;;  %v526_v41 = vld [vmem:[%s20151_s1 + $0xf48] sm:$0xff] }
  0xc5   :  { %9795 = vmatmul.mubr.bf16.vlgmr.msra.gmra.mrb[0].mxu0 %v15528_v58  ;;  %10328 = vmatmul.mubr.bf16.vlgmr.msra.gmra.mrb[0].mxu1 %v15528_v58 }
  0xc6   :  { %9804 = vmatpush1.bf16.msra.mxu0 %v13123_v62  ;;  %10337 = vmatpush1.bf16.msra.mxu1 %v13125_v0  ;;  %v490_v62 = vld [vmem:[%s20151_s1 + $0xe28] sm:$0xff]  ;;  %v13179_v0 = vcombine.low %v477_v47, %v481_v49  ;;  %v533_v49 = vld [vmem:[%s20151_s1 + $0xf80] sm:$0xff] }
  0xc7   :  { %9805 = vmatprep.subr.bf16.mxu0 %v13132_v1  ;;  %10338 = vmatprep.subr.bf16.mxu1 %v13134_v2  ;;  %v13181_v1 = vcombine.low %v478_v50, %v482_v51  ;;  %v13188_v2 = vcombine.high %v485_v57, %v489_v60  ;;  %v13190_v28 = vcombine.high %v486_v61, %v490_v62  ;;  %v537_v50 = vld [vmem:[%s20151_s1 + $0xfa0] sm:$0xff]  ;;  %v534_v51 = vld [vmem:[%s20151_s1 + $0xf88] sm:$0xff] }
  0xc8   :  { %9835 = vmatprep.mubr.bf16.mxu0 %v15544_v4  ;;  %10368 = vmatprep.mubr.bf16.mxu1 %v15544_v4 }
  0xca   :  { %9806 = vmatpush1.bf16.msra.mxu0 %v13131_v7  ;;  %10339 = vmatpush1.bf16.msra.mxu1 %v13133_v8  ;;  %v498_v7 = vld [vmem:[%s20151_s1 + $0xe68] sm:$0xff]  ;;  %v13187_v8 = vcombine.low %v485_v57, %v489_v60  ;;  %v541_v60 = vld [vmem:[%s20151_s1 + $0xfc0] sm:$0xff] }
  0xcb   :  { %9807 = vmatprep.subr.bf16.mxu0 %v13140_v10  ;;  %10340 = vmatprep.subr.bf16.mxu1 %v13142_v11  ;;  %v13189_v10 = vcombine.low %v486_v61, %v490_v62  ;;  %v13196_v11 = vcombine.high %v493_v3, %v497_v5  ;;  %v13198_v12 = vcombine.high %v494_v6, %v498_v7  ;;  %v545_v61 = vld [vmem:[%s20151_s1 + $0xfe0] sm:$0xff]  ;;  %v542_v62 = vld [vmem:[%s20151_s1 + $0xfc8] sm:$0xff] }
  0xce   :  { %9808 = vmatpush1.bf16.msra.mxu0 %v13139_v16  ;;  %10341 = vmatpush1.bf16.msra.mxu1 %v13141_v17  ;;  %v506_v16 = vld [vmem:[%s20151_s1 + $0xea8] sm:$0xff]  ;;  %v13195_v17 = vcombine.low %v493_v3, %v497_v5  ;;  %v13244_v3 = vcombine.high %v541_v60, %v545_v61 }
  0xcf   :  { %9809 = vmatprep.subr.bf16.mxu0 %v13148_v18  ;;  %10342 = vmatprep.subr.bf16.mxu1 %v13150_v19  ;;  %v13197_v18 = vcombine.low %v494_v6, %v498_v7  ;;  %v13204_v19 = vcombine.high %v501_v13, %v505_v14  ;;  %v13206_v20 = vcombine.high %v502_v15, %v506_v16  ;;  %v549_v6 = vld [vmem:[%s20151_s1 + $0x1000] sm:$0xff] }
  0xd0   :  { %v553_v7 = vld [vmem:[%s20151_s1 + $0x1020] sm:$0xff] }
  0xd2   :  { %9810 = vmatpush1.bf16.msra.mxu0 %v13147_v25  ;;  %10343 = vmatpush1.bf16.msra.mxu1 %v13149_v26  ;;  %v514_v25 = vld [vmem:[%s20151_s1 + $0xee8] sm:$0xff]  ;;  %v13203_v26 = vcombine.low %v501_v13, %v505_v14  ;;  %v13252_v14 = vcombine.high %v549_v6, %v553_v7 }
  0xd3   :  { %9811 = vmatprep.subr.bf16.mxu0 %v13156_v59  ;;  %10344 = vmatprep.subr.bf16.mxu1 %v13158_v27  ;;  %v13205_v59 = vcombine.low %v502_v15, %v506_v16  ;;  %v13212_v27 = vcombine.high %v509_v21, %v513_v22  ;;  %v13214_v29 = vcombine.high %v510_v24, %v514_v25  ;;  %v557_v16 = vld [vmem:[%s20151_s1 + $0x1040] sm:$0xff] }
  0xd6   :  { %9812 = vmatpush1.bf16.msra.mxu0 %v13155_v33  ;;  %10345 = vmatpush1.bf16.msra.mxu1 %v13157_v34  ;;  %v522_v33 = vld [vmem:[%s20151_s1 + $0xf28] sm:$0xff]  ;;  %v13211_v34 = vcombine.low %v509_v21, %v513_v22  ;;  %v13251_v22 = vcombine.low %v549_v6, %v553_v7 }
  0xd7   :  { %9813 = vmatprep.subr.bf16.mxu0 %v13164_v35  ;;  %10346 = vmatprep.subr.bf16.mxu1 %v13166_v36  ;;  %v13213_v35 = vcombine.low %v510_v24, %v514_v25  ;;  %v13220_v36 = vcombine.high %v517_v63, %v521_v30  ;;  %v13222_v37 = vcombine.high %v518_v32, %v522_v33  ;;  %v562_v21 = vld [vmem:[%s20151_s1 + $0x1068] sm:$0xff] }
  0xd8   :  { %v598_v6 = vld [vmem:[%s20151_s1 + $0x1188] sm:$0xff] }
  0xd9   :  { %v602_v7 = vld [vmem:[%s20151_s1 + $0x11a8] sm:$0xff] }
  0xda   :  { %9814 = vmatpush1.bf16.msra.mxu0 %v13163_v42  ;;  %10347 = vmatpush1.bf16.msra.mxu1 %v13165_v44  ;;  %v530_v42 = vld [vmem:[%s20151_s1 + $0xf68] sm:$0xff]  ;;  %v13219_v44 = vcombine.low %v517_v63, %v521_v30 }
  0xdb   :  { %9815 = vmatprep.subr.bf16.mxu0 %v13172_v45  ;;  %10348 = vmatprep.subr.bf16.mxu1 %v13174_v46  ;;  %v13221_v45 = vcombine.low %v518_v32, %v522_v33  ;;  %v13228_v46 = vcombine.high %v525_v39, %v529_v40  ;;  %v13230_v47 = vcombine.high %v526_v41, %v530_v42  ;;  %v566_v63 = vld [vmem:[%s20151_s1 + $0x1088] sm:$0xff] }
  0xdc   :  { %v570_v30 = vld [vmem:[%s20151_s1 + $0x10a8] sm:$0xff] }
  0xde   :  { %9816 = vmatpush1.bf16.msra.mxu0 %v13171_v52  ;;  %10349 = vmatpush1.bf16.msra.mxu1 %v13173_v54  ;;  %v538_v52 = vld [vmem:[%s20151_s1 + $0xfa8] sm:$0xff]  ;;  %v13227_v54 = vcombine.low %v525_v39, %v529_v40 }
  0xdf   :  { %9817 = vmatprep.subr.bf16.mxu0 %v13180_v55  ;;  %10350 = vmatprep.subr.bf16.mxu1 %v13182_v56  ;;  %v13229_v55 = vcombine.low %v526_v41, %v530_v42  ;;  %v13236_v56 = vcombine.high %v533_v49, %v537_v50  ;;  %v13238_v57 = vcombine.high %v534_v51, %v538_v52  ;;  %v574_v39 = vld [vmem:[%s20151_s1 + $0x10c8] sm:$0xff] }
  0xe0   :  { %v578_v40 = vld [vmem:[%s20151_s1 + $0x10e8] sm:$0xff]  ;;  %v13269_v42 = vcombine.low %v566_v63, %v570_v30 }
  0xe2   :  { %9818 = vmatpush1.bf16.msra.mxu0 %v13179_v0  ;;  %10351 = vmatpush1.bf16.msra.mxu1 %v13181_v1  ;;  %v546_v0 = vld [vmem:[%s20151_s1 + $0xfe8] sm:$0xff] }
  0xe3   :  { %9819 = vmatprep.subr.bf16.mxu0 %v13188_v2  ;;  %10352 = vmatprep.subr.bf16.mxu1 %v13190_v28  ;;  %v15715_v1 = vld [vmem:[%s20152_s0 + $0x8] sm:$0xff]  ;;  %v13235_v2 = vcombine.low %v533_v49, %v537_v50  ;;  %v13237_v28 = vcombine.low %v534_v51, %v538_v52  ;;  %v13246_v5 = vcombine.high %v542_v62, %v546_v0 }
  0xe4   :  { %v13245_v13 = vcombine.low %v542_v62, %v546_v0  ;;  %v582_v49 = vld [vmem:[%s20151_s1 + $0x1108] sm:$0xff]  ;;  %v13277_v52 = vcombine.low %v574_v39, %v578_v40 }
  0xe5   :  { %v586_v50 = vld [vmem:[%s20151_s1 + $0x1128] sm:$0xff] }
  0xe6   :  { %9820 = vmatpush1.bf16.msra.mxu0 %v13187_v8  ;;  %10353 = vmatpush1.bf16.msra.mxu1 %v13189_v10  ;;  %v15725_v8 = vrot.slane %v15715_v1, %v14962_v53  ;;  %v550_v10 = vld [vmem:[%s20151_s1 + $0x1008] sm:$0xff]  ;;  %v13285_v0 = vcombine.low %v582_v49, %v586_v50 }
  0xe7   :  { %9821 = vmatprep.subr.bf16.mxu0 %v13196_v11  ;;  %10354 = vmatprep.subr.bf16.mxu1 %v13198_v12  ;;  %v554_v11 = vld [vmem:[%s20151_s1 + $0x1028] sm:$0xff]  ;;  %v13243_v12 = vcombine.low %v541_v60, %v545_v61 }
  0xe8   :  { %v13254_v15 = vcombine.high %v550_v10, %v554_v11  ;;  %v13253_v24 = vcombine.low %v550_v10, %v554_v11  ;;  %v590_v60 = vld [vmem:[%s20151_s1 + $0x1148] sm:$0xff] }
  0xe9   :  { %v594_v61 = vld [vmem:[%s20151_s1 + $0x1168] sm:$0xff] }
  0xea   :  { %9822 = vmatpush1.bf16.msra.mxu0 %v13195_v17  ;;  %10355 = vmatpush1.bf16.msra.mxu1 %v13197_v18  ;;  %v561_v17 = vld [vmem:[%s20151_s1 + $0x1060] sm:$0xff]  ;;  %v1715_v18 = vcombine.high %v15725_v8, %v15725_v8  ;;  %v13293_v11 = vcombine.low %v590_v60, %v594_v61 }
  0xeb   :  { %9823 = vmatprep.subr.bf16.mxu0 %v13204_v19  ;;  %10356 = vmatprep.subr.bf16.mxu1 %v13206_v20  ;;  %v15743_v19 = vcombine.high %v15528_v58, %v15528_v58  ;;  %v558_v20 = vld [vmem:[%s20151_s1 + $0x1048] sm:$0xff]  ;;  %v13260_v25 = vcombine.high %v557_v16, %v561_v17  ;;  %v13259_v32 = vcombine.low %v557_v16, %v561_v17 }
  0xec   :  { %v13261_v33 = vcombine.low %v558_v20, %v562_v21  ;;  %v606_v16 = vld [vmem:[%s20151_s1 + $0x11c8] sm:$0xff] }
  0xed   :  { %v610_v17 = vld [vmem:[%s20151_s1 + $0x11e8] sm:$0xff] }
  0xee   :  { %9824 = vmatpush1.bf16.msra.mxu0 %v13203_v26  ;;  %10357 = vmatpush1.bf16.msra.mxu1 %v13205_v59  ;;  %v13262_v26 = vcombine.high %v558_v20, %v562_v21  ;;  %v565_v59 = vld [vmem:[%s20151_s1 + $0x1080] sm:$0xff]  ;;  %v13301_v20 = vcombine.low %v598_v6, %v602_v7 }
  0xef   :  { %9825 = vmatprep.subr.bf16.mxu0 %v13212_v27  ;;  %10358 = vmatprep.subr.bf16.mxu1 %v13214_v29  ;;  %v569_v27 = vld [vmem:[%s20151_s1 + $0x10a0] sm:$0xff]  ;;  %v15758_v29 = vrot.slane %v1715_v18, %v14962_v53 }
  0xf0   :  { %v13267_v41 = vcombine.low %v565_v59, %v569_v27 }
  0xf2   :  { %9826 = vmatpush1.bf16.msra.mxu0 %v13211_v34  ;;  %10359 = vmatpush1.bf16.msra.mxu1 %v13213_v35  ;;  %v13268_v34 = vcombine.high %v565_v59, %v569_v27  ;;  %v13270_v35 = vcombine.high %v566_v63, %v570_v30  ;;  %v618_v59 = vld [vmem:[%s20151_s1 + $0x1228] sm:$0xff]  ;;  %v13309_v63 = vcombine.low %v606_v16, %v610_v17 }
  0xf3   :  { %9827 = vmatprep.subr.bf16.mxu0 %v13220_v36  ;;  %10360 = vmatprep.subr.bf16.mxu1 %v13222_v37  ;;  %v573_v36 = vld [vmem:[%s20151_s1 + $0x10c0] sm:$0xff] }
  0xf4   :  { %v577_v37 = vld [vmem:[%s20151_s1 + $0x10e0] sm:$0xff] }
  0xf5   :  { %v13275_v51 = vcombine.low %v573_v36, %v577_v37 }
  0xf6   :  { %9828 = vmatpush1.bf16.msra.mxu0 %v13219_v44  ;;  %10361 = vmatpush1.bf16.msra.mxu1 %v13221_v45  ;;  %v13276_v44 = vcombine.high %v573_v36, %v577_v37  ;;  %v13278_v45 = vcombine.high %v574_v39, %v578_v40  ;;  %v626_v36 = vld [vmem:[%s20151_s1 + $0x1268] sm:$0xff] }
  0xf7   :  { %9829 = vmatprep.subr.bf16.mxu0 %v13228_v46  ;;  %10362 = vmatprep.subr.bf16.mxu1 %v13230_v47  ;;  %v581_v46 = vld [vmem:[%s20151_s1 + $0x1100] sm:$0xff] }
  0xf8   :  { %v585_v47 = vld [vmem:[%s20151_s1 + $0x1120] sm:$0xff] }
  0xf9   :  { %v13283_v62 = vcombine.low %v581_v46, %v585_v47 }
  0xfa   :  { %9830 = vmatpush1.bf16.msra.mxu0 %v13227_v54  ;;  %10363 = vmatpush1.bf16.msra.mxu1 %v13229_v55  ;;  %v13284_v54 = vcombine.high %v581_v46, %v585_v47  ;;  %v13286_v55 = vcombine.high %v582_v49, %v586_v50  ;;  %v634_v46 = vld [vmem:[%s20151_s1 + $0x12a8] sm:$0xff] }
  0xfb   :  { %9831 = vmatprep.subr.bf16.mxu0 %v13236_v56  ;;  %10364 = vmatprep.subr.bf16.mxu1 %v13238_v57  ;;  %v589_v56 = vld [vmem:[%s20151_s1 + $0x1140] sm:$0xff] }
  0xfc   :  { %v593_v57 = vld [vmem:[%s20151_s1 + $0x1160] sm:$0xff] }
  0xfd   :  { %v13291_v10 = vcombine.low %v589_v56, %v593_v57 }
  0xfe   :  { %9832 = vmatpush1.bf16.msra.mxu0 %v13235_v2  ;;  %10365 = vmatpush1.bf16.msra.mxu1 %v13237_v28  ;;  %v13292_v2 = vcombine.high %v589_v56, %v593_v57  ;;  %v13294_v28 = vcombine.high %v590_v60, %v594_v61  ;;  %v642_v56 = vld [vmem:[%s20151_s1 + $0x12e8] sm:$0xff] }
  0xff   :  { %9833 = vmatprep.subr.bf16.mxu0 %v13244_v3  ;;  %10366 = vmatprep.subr.bf16.mxu1 %v13246_v5  ;;  %v597_v3 = vld [vmem:[%s20151_s1 + $0x1180] sm:$0xff] }
 0x100   :  { %v601_v5 = vld [vmem:[%s20151_s1 + $0x11a0] sm:$0xff] }
 0x101   :  { %v13299_v18 = vcombine.low %v597_v3, %v601_v5 }
 0x102   :  { %9834 = vmatpush1.bf16.msra.mxu0 %v13243_v12  ;;  %10367 = vmatpush1.bf16.msra.mxu1 %v13245_v13  ;;  %v13300_v12 = vcombine.high %v597_v3, %v601_v5  ;;  %v13302_v13 = vcombine.high %v598_v6, %v602_v7  ;;  %v650_v3 = vld [vmem:[%s20151_s1 + $0x1328] sm:$0xff] }
 0x103   :  { %9844 = vmatprep.subr.bf16.mxu0 %v13252_v14  ;;  %10377 = vmatprep.subr.bf16.mxu1 %v13254_v15  ;;  %v605_v14 = vld [vmem:[%s20151_s1 + $0x11c0] sm:$0xff] }
 0x104   :  { %v609_v15 = vld [vmem:[%s20151_s1 + $0x11e0] sm:$0xff] }
 0x105   :  { %9836 = vmatmul.mubr.bf16.vlgmr.msra.gmra.mrb[0].mxu0 %v15743_v19  ;;  %10369 = vmatmul.mubr.bf16.vlgmr.msra.gmra.mrb[0].mxu1 %v15743_v19  ;;  %v13308_v21 = vcombine.high %v605_v14, %v609_v15  ;;  %v13307_v27 = vcombine.low %v605_v14, %v609_v15  ;;  %v658_v14 = vld [vmem:[%s20151_s1 + $0x1368] sm:$0xff] }
 0x106   :  { %9845 = vmatpush1.bf16.msra.mxu0 %v13251_v22  ;;  %10378 = vmatpush1.bf16.msra.mxu1 %v13253_v24  ;;  %v13310_v22 = vcombine.high %v606_v16, %v610_v17  ;;  %v613_v24 = vld [vmem:[%s20151_s1 + $0x1200] sm:$0xff] }
 0x107   :  { %9846 = vmatprep.subr.bf16.mxu0 %v13260_v25  ;;  %10379 = vmatprep.subr.bf16.mxu1 %v13262_v26  ;;  %v617_v25 = vld [vmem:[%s20151_s1 + $0x1220] sm:$0xff]  ;;  %v614_v26 = vld [vmem:[%s20151_s1 + $0x1208] sm:$0xff] }
 0x108   :  { %9876 = vmatprep.mubr.bf16.mxu0 %v15758_v29  ;;  %10409 = vmatprep.mubr.bf16.mxu1 %v15758_v29  ;;  %v13316_v30 = vcombine.high %v613_v24, %v617_v25  ;;  %v13315_v37 = vcombine.low %v613_v24, %v617_v25  ;;  %v13317_v39 = vcombine.low %v614_v26, %v618_v59  ;;  %v666_v24 = vld [vmem:[%s20151_s1 + $0x13a8] sm:$0xff] }
 0x10a   :  { %9847 = vmatpush1.bf16.msra.mxu0 %v13259_v32  ;;  %10380 = vmatpush1.bf16.msra.mxu1 %v13261_v33  ;;  %v13318_v32 = vcombine.high %v614_v26, %v618_v59  ;;  %v621_v33 = vld [vmem:[%s20151_s1 + $0x1240] sm:$0xff] }
 0x10b   :  { %9848 = vmatprep.subr.bf16.mxu0 %v13268_v34  ;;  %10381 = vmatprep.subr.bf16.mxu1 %v13270_v35  ;;  %v625_v34 = vld [vmem:[%s20151_s1 + $0x1260] sm:$0xff]  ;;  %v622_v35 = vld [vmem:[%s20151_s1 + $0x1248] sm:$0xff] }
 0x10c   :  { %v13324_v40 = vcombine.high %v621_v33, %v625_v34  ;;  %v13323_v47 = vcombine.low %v621_v33, %v625_v34  ;;  %v13325_v49 = vcombine.low %v622_v35, %v626_v36  ;;  %v674_v33 = vld [vmem:[%s20151_s1 + $0x13e8] sm:$0xff] }
 0x10e   :  { %9849 = vmatpush1.bf16.msra.mxu0 %v13267_v41  ;;  %10382 = vmatpush1.bf16.msra.mxu1 %v13269_v42  ;;  %v13326_v41 = vcombine.high %v622_v35, %v626_v36  ;;  %v629_v42 = vld [vmem:[%s20151_s1 + $0x1280] sm:$0xff] }
 0x10f   :  { %9850 = vmatprep.subr.bf16.mxu0 %v13276_v44  ;;  %10383 = vmatprep.subr.bf16.mxu1 %v13278_v45  ;;  %v633_v44 = vld [vmem:[%s20151_s1 + $0x12a0] sm:$0xff]  ;;  %v630_v45 = vld [vmem:[%s20151_s1 + $0x1288] sm:$0xff] }
 0x110   :  { %v13332_v50 = vcombine.high %v629_v42, %v633_v44  ;;  %v13331_v57 = vcombine.low %v629_v42, %v633_v44  ;;  %v13333_v60 = vcombine.low %v630_v45, %v634_v46  ;;  %v682_v42 = vld [vmem:[%s20151_s1 + $0x1428] sm:$0xff] }
 0x112   :  { %9851 = vmatpush1.bf16.msra.mxu0 %v13275_v51  ;;  %10384 = vmatpush1.bf16.msra.mxu1 %v13277_v52  ;;  %v13334_v51 = vcombine.high %v630_v45, %v634_v46  ;;  %v637_v52 = vld [vmem:[%s20151_s1 + $0x12c0] sm:$0xff] }
 0x113   :  { %9852 = vmatprep.subr.bf16.mxu0 %v13284_v54  ;;  %10385 = vmatprep.subr.bf16.mxu1 %v13286_v55  ;;  %v641_v54 = vld [vmem:[%s20151_s1 + $0x12e0] sm:$0xff]  ;;  %v638_v55 = vld [vmem:[%s20151_s1 + $0x12c8] sm:$0xff] }
 0x114   :  { %v13340_v61 = vcombine.high %v637_v52, %v641_v54  ;;  %v13339_v5 = vcombine.low %v637_v52, %v641_v54  ;;  %v13341_v6 = vcombine.low %v638_v55, %v642_v56  ;;  %v686_v52 = vld [vmem:[%s20151_s1 + $0x1448] sm:$0xff] }
 0x115   :  { %v690_v54 = vld [vmem:[%s20151_s1 + $0x1468] sm:$0xff] }
 0x116   :  { %9853 = vmatpush1.bf16.msra.mxu0 %v13283_v62  ;;  %10386 = vmatpush1.bf16.msra.mxu1 %v13285_v0  ;;  %v13342_v62 = vcombine.high %v638_v55, %v642_v56  ;;  %v645_v0 = vld [vmem:[%s20151_s1 + $0x1300] sm:$0xff] }
 0x117   :  { %9854 = vmatprep.subr.bf16.mxu0 %v13292_v2  ;;  %10387 = vmatprep.subr.bf16.mxu1 %v13294_v28  ;;  %v649_v2 = vld [vmem:[%s20151_s1 + $0x1320] sm:$0xff]  ;;  %v646_v28 = vld [vmem:[%s20151_s1 + $0x1308] sm:$0xff] }
 0x118   :  { %v13348_v7 = vcombine.high %v645_v0, %v649_v2  ;;  %v13347_v15 = vcombine.low %v645_v0, %v649_v2  ;;  %v13349_v16 = vcombine.low %v646_v28, %v650_v3  ;;  %v694_v0 = vld [vmem:[%s20151_s1 + $0x1488] sm:$0xff] }
 0x119   :  { %v698_v2 = vld [vmem:[%s20151_s1 + $0x14a8] sm:$0xff] }
 0x11a   :  { %9855 = vmatpush1.bf16.msra.mxu0 %v13291_v10  ;;  %10388 = vmatpush1.bf16.msra.mxu1 %v13293_v11  ;;  %v13350_v10 = vcombine.high %v646_v28, %v650_v3  ;;  %v653_v11 = vld [vmem:[%s20151_s1 + $0x1340] sm:$0xff]  ;;  %v13389_v3 = vcombine.low %v686_v52, %v690_v54 }
 0x11b   :  { %9856 = vmatprep.subr.bf16.mxu0 %v13300_v12  ;;  %10389 = vmatprep.subr.bf16.mxu1 %v13302_v13  ;;  %v657_v12 = vld [vmem:[%s20151_s1 + $0x1360] sm:$0xff]  ;;  %v654_v13 = vld [vmem:[%s20151_s1 + $0x1348] sm:$0xff] }
 0x11c   :  { %v13356_v17 = vcombine.high %v653_v11, %v657_v12  ;;  %v13355_v25 = vcombine.low %v653_v11, %v657_v12  ;;  %v13357_v26 = vcombine.low %v654_v13, %v658_v14  ;;  %v702_v11 = vld [vmem:[%s20151_s1 + $0x14c8] sm:$0xff] }
 0x11d   :  { %v706_v12 = vld [vmem:[%s20151_s1 + $0x14e8] sm:$0xff] }
 0x11e   :  { %9857 = vmatpush1.bf16.msra.mxu0 %v13299_v18  ;;  %10390 = vmatpush1.bf16.msra.mxu1 %v13301_v20  ;;  %v13358_v18 = vcombine.high %v654_v13, %v658_v14  ;;  %v661_v20 = vld [vmem:[%s20151_s1 + $0x1380] sm:$0xff]  ;;  %v13397_v14 = vcombine.low %v694_v0, %v698_v2 }
 0x11f   :  { %9858 = vmatprep.subr.bf16.mxu0 %v13308_v21  ;;  %10391 = vmatprep.subr.bf16.mxu1 %v13310_v22  ;;  %v665_v21 = vld [vmem:[%s20151_s1 + $0x13a0] sm:$0xff]  ;;  %v662_v22 = vld [vmem:[%s20151_s1 + $0x1388] sm:$0xff] }
 0x120   :  { %v13364_v59 = vcombine.high %v661_v20, %v665_v21  ;;  %v13363_v34 = vcombine.low %v661_v20, %v665_v21  ;;  %v13365_v35 = vcombine.low %v662_v22, %v666_v24  ;;  %v710_v20 = vld [vmem:[%s20151_s1 + $0x1508] sm:$0xff] }
 0x121   :  { %v714_v21 = vld [vmem:[%s20151_s1 + $0x1528] sm:$0xff] }
 0x122   :  { %9859 = vmatpush1.bf16.msra.mxu0 %v13307_v27  ;;  %10392 = vmatpush1.bf16.msra.mxu1 %v13309_v63  ;;  %v13366_v27 = vcombine.high %v662_v22, %v666_v24  ;;  %v669_v63 = vld [vmem:[%s20151_s1 + $0x13c0] sm:$0xff]  ;;  %v13405_v24 = vcombine.low %v702_v11, %v706_v12 }
 0x123   :  { %9860 = vmatprep.subr.bf16.mxu0 %v13316_v30  ;;  %10393 = vmatprep.subr.bf16.mxu1 %v13318_v32  ;;  %v673_v30 = vld [vmem:[%s20151_s1 + $0x13e0] sm:$0xff]  ;;  %v670_v32 = vld [vmem:[%s20151_s1 + $0x13c8] sm:$0xff] }
 0x124   :  { %v13372_v36 = vcombine.high %v669_v63, %v673_v30  ;;  %v13371_v44 = vcombine.low %v669_v63, %v673_v30  ;;  %v13373_v45 = vcombine.low %v670_v32, %v674_v33  ;;  %v718_v63 = vld [vmem:[%s20151_s1 + $0x1548] sm:$0xff] }
 0x125   :  { %v722_v30 = vld [vmem:[%s20151_s1 + $0x1568] sm:$0xff] }
 0x126   :  { %9861 = vmatpush1.bf16.msra.mxu0 %v13315_v37  ;;  %10394 = vmatpush1.bf16.msra.mxu1 %v13317_v39  ;;  %v13374_v37 = vcombine.high %v670_v32, %v674_v33  ;;  %v677_v39 = vld [vmem:[%s20151_s1 + $0x1400] sm:$0xff]  ;;  %v13413_v33 = vcombine.low %v710_v20, %v714_v21 }
 0x127   :  { %9862 = vmatprep.subr.bf16.mxu0 %v13324_v40  ;;  %10395 = vmatprep.subr.bf16.mxu1 %v13326_v41  ;;  %v681_v40 = vld [vmem:[%s20151_s1 + $0x1420] sm:$0xff]  ;;  %v678_v41 = vld [vmem:[%s20151_s1 + $0x1408] sm:$0xff] }
 0x128   :  { %v13380_v46 = vcombine.high %v677_v39, %v681_v40  ;;  %v13379_v55 = vcombine.low %v677_v39, %v681_v40  ;;  %v13381_v56 = vcombine.low %v678_v41, %v682_v42  ;;  %v726_v39 = vld [vmem:[%s20151_s1 + $0x1588] sm:$0xff] }
 0x129   :  { %v730_v40 = vld [vmem:[%s20151_s1 + $0x15a8] sm:$0xff] }
 0x12a   :  { %9863 = vmatpush1.bf16.msra.mxu0 %v13323_v47  ;;  %10396 = vmatpush1.bf16.msra.mxu1 %v13325_v49  ;;  %v13382_v47 = vcombine.high %v678_v41, %v682_v42  ;;  %v685_v49 = vld [vmem:[%s20151_s1 + $0x1440] sm:$0xff]  ;;  %v13421_v42 = vcombine.low %v718_v63, %v722_v30 }
 0x12b   :  { %9864 = vmatprep.subr.bf16.mxu0 %v13332_v50  ;;  %10397 = vmatprep.subr.bf16.mxu1 %v13334_v51  ;;  %v689_v50 = vld [vmem:[%s20151_s1 + $0x1460] sm:$0xff]  ;;  %v15946_v51 = vrot.slane %v15725_v8, %v14962_v53 }
 0x12c   :  { %v693_v8 = vld [vmem:[%s20151_s1 + $0x1480] sm:$0xff]  ;;  %v13387_v28 = vcombine.low %v685_v49, %v689_v50 }
 0x12e   :  { %9865 = vmatpush1.bf16.msra.mxu0 %v13331_v57  ;;  %10398 = vmatpush1.bf16.msra.mxu1 %v13333_v60  ;;  %v13388_v57 = vcombine.high %v685_v49, %v689_v50  ;;  %v13390_v60 = vcombine.high %v686_v52, %v690_v54  ;;  %v734_v49 = vld [vmem:[%s20151_s1 + $0x15c8] sm:$0xff]  ;;  %v13429_v54 = vcombine.low %v726_v39, %v730_v40 }
 0x12f   :  { %9866 = vmatprep.subr.bf16.mxu0 %v13340_v61  ;;  %10399 = vmatprep.subr.bf16.mxu1 %v13342_v62  ;;  %v697_v61 = vld [vmem:[%s20151_s1 + $0x14a0] sm:$0xff]  ;;  %v15962_v62 = vcombine.high %v15758_v29, %v15758_v29  ;;  %v738_v50 = vld [vmem:[%s20151_s1 + $0x15e8] sm:$0xff] }
 0x130   :  { %v13395_v13 = vcombine.low %v693_v8, %v697_v61 }
 0x132   :  { %9867 = vmatpush1.bf16.msra.mxu0 %v13339_v5  ;;  %10400 = vmatpush1.bf16.msra.mxu1 %v13341_v6  ;;  %v13396_v5 = vcombine.high %v693_v8, %v697_v61  ;;  %v13398_v6 = vcombine.high %v694_v0, %v698_v2  ;;  %v742_v8 = vld [vmem:[%s20151_s1 + $0x1608] sm:$0xff]  ;;  %v13437_v2 = vcombine.low %v734_v49, %v738_v50 }
 0x133   :  { %9868 = vmatprep.subr.bf16.mxu0 %v13348_v7  ;;  %10401 = vmatprep.subr.bf16.mxu1 %v13350_v10  ;;  %v701_v7 = vld [vmem:[%s20151_s1 + $0x14c0] sm:$0xff]  ;;  %v746_v61 = vld [vmem:[%s20151_s1 + $0x1628] sm:$0xff] }
 0x134   :  { %v705_v10 = vld [vmem:[%s20151_s1 + $0x14e0] sm:$0xff] }
 0x135   :  { %v13403_v22 = vcombine.low %v701_v7, %v705_v10 }
 0x136   :  { %9869 = vmatpush1.bf16.msra.mxu0 %v13347_v15  ;;  %10402 = vmatpush1.bf16.msra.mxu1 %v13349_v16  ;;  %v13404_v15 = vcombine.high %v701_v7, %v705_v10  ;;  %v13406_v16 = vcombine.high %v702_v11, %v706_v12  ;;  %v750_v7 = vld [vmem:[%s20151_s1 + $0x1648] sm:$0xff]  ;;  %v13445_v12 = vcombine.low %v742_v8, %v746_v61 }
 0x137   :  { %9870 = vmatprep.subr.bf16.mxu0 %v13356_v17  ;;  %10403 = vmatprep.subr.bf16.mxu1 %v13358_v18  ;;  %v709_v17 = vld [vmem:[%s20151_s1 + $0x1500] sm:$0xff]  ;;  %v754_v10 = vld [vmem:[%s20151_s1 + $0x1668] sm:$0xff] }
 0x138   :  { %v713_v18 = vld [vmem:[%s20151_s1 + $0x1520] sm:$0xff] }
 0x139   :  { %v13411_v32 = vcombine.low %v709_v17, %v713_v18 }
 0x13a   :  { %9871 = vmatpush1.bf16.msra.mxu0 %v13355_v25  ;;  %10404 = vmatpush1.bf16.msra.mxu1 %v13357_v26  ;;  %v13412_v25 = vcombine.high %v709_v17, %v713_v18  ;;  %v13414_v26 = vcombine.high %v710_v20, %v714_v21  ;;  %v758_v17 = vld [vmem:[%s20151_s1 + $0x1688] sm:$0xff]  ;;  %v13453_v21 = vcombine.low %v750_v7, %v754_v10 }
 0x13b   :  { %9872 = vmatprep.subr.bf16.mxu0 %v13364_v59  ;;  %10405 = vmatprep.subr.bf16.mxu1 %v13366_v27  ;;  %v717_v59 = vld [vmem:[%s20151_s1 + $0x1540] sm:$0xff]  ;;  %v762_v18 = vld [vmem:[%s20151_s1 + $0x16a8] sm:$0xff] }
 0x13c   :  { %v721_v27 = vld [vmem:[%s20151_s1 + $0x1560] sm:$0xff] }
 0x13d   :  { %v13419_v41 = vcombine.low %v717_v59, %v721_v27 }
 0x13e   :  { %9873 = vmatpush1.bf16.msra.mxu0 %v13363_v34  ;;  %10406 = vmatpush1.bf16.msra.mxu1 %v13365_v35  ;;  %v13420_v34 = vcombine.high %v717_v59, %v721_v27  ;;  %v13422_v35 = vcombine.high %v718_v63, %v722_v30  ;;  %v766_v59 = vld [vmem:[%s20151_s1 + $0x16c8] sm:$0xff]  ;;  %v13461_v30 = vcombine.low %v758_v17, %v762_v18 }
 0x13f   :  { %9874 = vmatprep.subr.bf16.mxu0 %v13372_v36  ;;  %10407 = vmatprep.subr.bf16.mxu1 %v13374_v37  ;;  %v725_v36 = vld [vmem:[%s20151_s1 + $0x1580] sm:$0xff]  ;;  %v770_v27 = vld [vmem:[%s20151_s1 + $0x16e8] sm:$0xff] }
 0x140   :  { %v729_v37 = vld [vmem:[%s20151_s1 + $0x15a0] sm:$0xff] }
 0x141   :  { %v13427_v52 = vcombine.low %v725_v36, %v729_v37 }
 0x142   :  { %9875 = vmatpush1.bf16.msra.mxu0 %v13371_v44  ;;  %10408 = vmatpush1.bf16.msra.mxu1 %v13373_v45  ;;  %v13428_v44 = vcombine.high %v725_v36, %v729_v37  ;;  %v13430_v45 = vcombine.high %v726_v39, %v730_v40  ;;  %v774_v36 = vld [vmem:[%s20151_s1 + $0x1708] sm:$0xff]  ;;  %v13469_v40 = vcombine.low %v766_v59, %v770_v27 }
 0x143   :  { %9885 = vmatprep.subr.bf16.mxu0 %v13380_v46  ;;  %10418 = vmatprep.subr.bf16.mxu1 %v13382_v47  ;;  %v733_v46 = vld [vmem:[%s20151_s1 + $0x15c0] sm:$0xff]  ;;  %v778_v37 = vld [vmem:[%s20151_s1 + $0x1728] sm:$0xff] }
 0x144   :  { %v737_v47 = vld [vmem:[%s20151_s1 + $0x15e0] sm:$0xff] }
 0x145   :  { %9877 = vmatmul.mubr.bf16.vlgmr.msra.gmra.mrb[0].mxu0 %v15946_v51  ;;  %10410 = vmatmul.mubr.bf16.vlgmr.msra.gmra.mrb[0].mxu1 %v15946_v51  ;;  %v13435_v0 = vcombine.low %v733_v46, %v737_v47 }
 0x146   :  { %9886 = vmatpush1.bf16.msra.mxu0 %v13379_v55  ;;  %10419 = vmatpush1.bf16.msra.mxu1 %v13381_v56  ;;  %v13436_v55 = vcombine.high %v733_v46, %v737_v47  ;;  %v13438_v56 = vcombine.high %v734_v49, %v738_v50  ;;  %v782_v46 = vld [vmem:[%s20151_s1 + $0x1748] sm:$0xff]  ;;  %v13477_v50 = vcombine.low %v774_v36, %v778_v37 }
 0x147   :  { %9887 = vmatprep.subr.bf16.mxu0 %v13388_v57  ;;  %10420 = vmatprep.subr.bf16.mxu1 %v13390_v60  ;;  %v741_v57 = vld [vmem:[%s20151_s1 + $0x1600] sm:$0xff]  ;;  %v786_v47 = vld [vmem:[%s20151_s1 + $0x1768] sm:$0xff] }
 0x148   :  { %9917 = vmatprep.mubr.bf16.mxu0 %v15962_v62  ;;  %10450 = vmatprep.mubr.bf16.mxu1 %v15962_v62  ;;  %v745_v60 = vld [vmem:[%s20151_s1 + $0x1620] sm:$0xff] }
 0x149   :  { %v13443_v11 = vcombine.low %v741_v57, %v745_v60 }
 0x14a   :  { %9888 = vmatpush1.bf16.msra.mxu0 %v13387_v28  ;;  %10421 = vmatpush1.bf16.msra.mxu1 %v13389_v3  ;;  %v13444_v28 = vcombine.high %v741_v57, %v745_v60  ;;  %v13446_v3 = vcombine.high %v742_v8, %v746_v61  ;;  %v790_v57 = vld [vmem:[%s20151_s1 + $0x1788] sm:$0xff]  ;;  %v13485_v61 = vcombine.low %v782_v46, %v786_v47 }
 0x14b   :  { %9889 = vmatprep.subr.bf16.mxu0 %v13396_v5  ;;  %10422 = vmatprep.subr.bf16.mxu1 %v13398_v6  ;;  %v749_v5 = vld [vmem:[%s20151_s1 + $0x1640] sm:$0xff]  ;;  %v794_v60 = vld [vmem:[%s20151_s1 + $0x17a8] sm:$0xff] }
 0x14c   :  { %v753_v6 = vld [vmem:[%s20151_s1 + $0x1660] sm:$0xff] }
 0x14d   :  { %v13451_v20 = vcombine.low %v749_v5, %v753_v6 }
 0x14e   :  { %9890 = vmatpush1.bf16.msra.mxu0 %v13395_v13  ;;  %10423 = vmatpush1.bf16.msra.mxu1 %v13397_v14  ;;  %v13452_v13 = vcombine.high %v749_v5, %v753_v6  ;;  %v13454_v14 = vcombine.high %v750_v7, %v754_v10  ;;  %v1700_v5 = vcombine.high %v15715_v1, %v15715_v1  ;;  %v798_v6 = vld [vmem:[%s20151_s1 + $0x17c8] sm:$0xff]  ;;  %v805_v1 = vld [vmem:[%s20151_s1 + $0x1800] sm:$0xff] }
 0x14f   :  { %9891 = vmatprep.subr.bf16.mxu0 %v13404_v15  ;;  %10424 = vmatprep.subr.bf16.mxu1 %v13406_v16  ;;  %v757_v15 = vld [vmem:[%s20151_s1 + $0x1680] sm:$0xff]  ;;  %v802_v7 = vld [vmem:[%s20151_s1 + $0x17e8] sm:$0xff] }
 0x150   :  { %v761_v16 = vld [vmem:[%s20151_s1 + $0x16a0] sm:$0xff] }
 0x151   :  { %v13459_v63 = vcombine.low %v757_v15, %v761_v16 }
 0x152   :  { %9892 = vmatpush1.bf16.msra.mxu0 %v13403_v22  ;;  %10425 = vmatpush1.bf16.msra.mxu1 %v13405_v24  ;;  %v13460_v22 = vcombine.high %v757_v15, %v761_v16  ;;  %v13462_v24 = vcombine.high %v758_v17, %v762_v18  ;;  %v16139_v15 = vrot.slane %v1700_v5, %v14962_v53  ;;  %v806_v16 = vld [vmem:[%s20151_s1 + $0x1808] sm:$0xff]  ;;  %v845_v5 = vld [vmem:[%s20151_s1 + $0x1940] sm:$0xff] }
 0x153   :  { %9893 = vmatprep.subr.bf16.mxu0 %v13412_v25  ;;  %10426 = vmatprep.subr.bf16.mxu1 %v13414_v26  ;;  %v765_v25 = vld [vmem:[%s20151_s1 + $0x16c0] sm:$0xff]  ;;  %v810_v17 = vld [vmem:[%s20151_s1 + $0x1828] sm:$0xff] }
 0x154   :  { %v769_v26 = vld [vmem:[%s20151_s1 + $0x16e0] sm:$0xff] }
 0x155   :  { %v13467_v39 = vcombine.low %v765_v25, %v769_v26 }
 0x156   :  { %9894 = vmatpush1.bf16.msra.mxu0 %v13411_v32  ;;  %10427 = vmatpush1.bf16.msra.mxu1 %v13413_v33  ;;  %v13468_v32 = vcombine.high %v765_v25, %v769_v26  ;;  %v13470_v33 = vcombine.high %v766_v59, %v770_v27  ;;  %v817_v25 = vld [vmem:[%s20151_s1 + $0x1860] sm:$0xff]  ;;  %v1716_v26 = vcombine.high %v16139_v15, %v16139_v15  ;;  %v814_v27 = vld [vmem:[%s20151_s1 + $0x1848] sm:$0xff] }
 0x157   :  { %9895 = vmatprep.subr.bf16.mxu0 %v13420_v34  ;;  %10428 = vmatprep.subr.bf16.mxu1 %v13422_v35  ;;  %v773_v34 = vld [vmem:[%s20151_s1 + $0x1700] sm:$0xff]  ;;  %v16157_v59 = vcombine.high %v15946_v51, %v15946_v51 }
 0x158   :  { %v777_v35 = vld [vmem:[%s20151_s1 + $0x1720] sm:$0xff] }
 0x159   :  { %v13475_v49 = vcombine.low %v773_v34, %v777_v35 }
 0x15a   :  { %9896 = vmatpush1.bf16.msra.mxu0 %v13419_v41  ;;  %10429 = vmatpush1.bf16.msra.mxu1 %v13421_v42  ;;  %v13476_v41 = vcombine.high %v773_v34, %v777_v35  ;;  %v13478_v42 = vcombine.high %v774_v36, %v778_v37  ;;  %v821_v35 = vld [vmem:[%s20151_s1 + $0x1880] sm:$0xff]  ;;  %v16172_v37 = vrot.slane %v1716_v26, %v14962_v53 }
 0x15b   :  { %9897 = vmatprep.subr.bf16.mxu0 %v13428_v44  ;;  %10430 = vmatprep.subr.bf16.mxu1 %v13430_v45  ;;  %v781_v44 = vld [vmem:[%s20151_s1 + $0x1740] sm:$0xff] }
 0x15c   :  { %v785_v45 = vld [vmem:[%s20151_s1 + $0x1760] sm:$0xff] }
 0x15d   :  { %v13483_v8 = vcombine.low %v781_v44, %v785_v45  ;;  %v825_v36 = vld [vmem:[%s20151_s1 + $0x18a0] sm:$0xff] }
 0x15e   :  { %9898 = vmatpush1.bf16.msra.mxu0 %v13427_v52  ;;  %10431 = vmatpush1.bf16.msra.mxu1 %v13429_v54  ;;  %v13484_v52 = vcombine.high %v781_v44, %v785_v45  ;;  %v13486_v54 = vcombine.high %v782_v46, %v786_v47  ;;  %v13524_v44 = vcombine.high %v821_v35, %v825_v36  ;;  %v829_v46 = vld [vmem:[%s20151_s1 + $0x18c0] sm:$0xff] }
 0x15f   :  { %9899 = vmatprep.subr.bf16.mxu0 %v13436_v55  ;;  %10432 = vmatprep.subr.bf16.mxu1 %v13438_v56  ;;  %v789_v55 = vld [vmem:[%s20151_s1 + $0x1780] sm:$0xff] }
 0x160   :  { %v793_v56 = vld [vmem:[%s20151_s1 + $0x17a0] sm:$0xff] }
 0x161   :  { %v13491_v10 = vcombine.low %v789_v55, %v793_v56  ;;  %v833_v47 = vld [vmem:[%s20151_s1 + $0x18e0] sm:$0xff] }
 0x162   :  { %9900 = vmatpush1.bf16.msra.mxu0 %v13435_v0  ;;  %10433 = vmatpush1.bf16.msra.mxu1 %v13437_v2  ;;  %v13492_v0 = vcombine.high %v789_v55, %v793_v56  ;;  %v13494_v2 = vcombine.high %v790_v57, %v794_v60  ;;  %v13532_v55 = vcombine.high %v829_v46, %v833_v47  ;;  %v865_v26 = vld [vmem:[%s20151_s1 + $0x19e0] sm:$0xff] }
 0x163   :  { %9901 = vmatprep.subr.bf16.mxu0 %v13444_v28  ;;  %10434 = vmatprep.subr.bf16.mxu1 %v13446_v3  ;;  %v797_v28 = vld [vmem:[%s20151_s1 + $0x17c0] sm:$0xff] }
 0x164   :  { %v801_v3 = vld [vmem:[%s20151_s1 + $0x17e0] sm:$0xff] }
 0x165   :  { %v13499_v18 = vcombine.low %v797_v28, %v801_v3 }
 0x166   :  { %9902 = vmatpush1.bf16.msra.mxu0 %v13443_v11  ;;  %10435 = vmatpush1.bf16.msra.mxu1 %v13445_v12  ;;  %v13493_v11 = vcombine.low %v790_v57, %v794_v60  ;;  %v13500_v12 = vcombine.high %v797_v28, %v801_v3  ;;  %v837_v57 = vld [vmem:[%s20151_s1 + $0x1900] sm:$0xff] }
 0x167   :  { %9903 = vmatprep.subr.bf16.mxu0 %v13452_v13  ;;  %10436 = vmatprep.subr.bf16.mxu1 %v13454_v14  ;;  %v13502_v13 = vcombine.high %v798_v6, %v802_v7  ;;  %v809_v14 = vld [vmem:[%s20151_s1 + $0x1820] sm:$0xff] }
 0x168   :  { %v841_v60 = vld [vmem:[%s20151_s1 + $0x1920] sm:$0xff] }
 0x169   :  { %v13540_v28 = vcombine.high %v837_v57, %v841_v60 }
 0x16a   :  { %9904 = vmatpush1.bf16.msra.mxu0 %v13451_v20  ;;  %10437 = vmatpush1.bf16.msra.mxu1 %v13453_v21  ;;  %v13501_v20 = vcombine.low %v798_v6, %v802_v7  ;;  %v13508_v21 = vcombine.high %v805_v1, %v809_v14  ;;  %v849_v6 = vld [vmem:[%s20151_s1 + $0x1960] sm:$0xff]  ;;  %v846_v7 = vld [vmem:[%s20151_s1 + $0x1948] sm:$0xff] }
 0x16b   :  { %9905 = vmatprep.subr.bf16.mxu0 %v13460_v22  ;;  %10438 = vmatprep.subr.bf16.mxu1 %v13462_v24  ;;  %v13510_v22 = vcombine.high %v806_v16, %v810_v17  ;;  %v813_v24 = vld [vmem:[%s20151_s1 + $0x1840] sm:$0xff] }
 0x16e   :  { %9906 = vmatpush1.bf16.msra.mxu0 %v13459_v63  ;;  %10439 = vmatpush1.bf16.msra.mxu1 %v13461_v30  ;;  %v818_v63 = vld [vmem:[%s20151_s1 + $0x1868] sm:$0xff]  ;;  %v13507_v30 = vcombine.low %v805_v1, %v809_v14  ;;  %v853_v14 = vld [vmem:[%s20151_s1 + $0x1980] sm:$0xff] }
 0x16f   :  { %9907 = vmatprep.subr.bf16.mxu0 %v13468_v32  ;;  %10440 = vmatprep.subr.bf16.mxu1 %v13470_v33  ;;  %v13509_v32 = vcombine.low %v806_v16, %v810_v17  ;;  %v13516_v33 = vcombine.high %v813_v24, %v817_v25  ;;  %v13518_v34 = vcombine.high %v814_v27, %v818_v63  ;;  %v857_v16 = vld [vmem:[%s20151_s1 + $0x19a0] sm:$0xff]  ;;  %v854_v17 = vld [vmem:[%s20151_s1 + $0x1988] sm:$0xff] }
 0x172   :  { %9908 = vmatpush1.bf16.msra.mxu0 %v13467_v39  ;;  %10441 = vmatpush1.bf16.msra.mxu1 %v13469_v40  ;;  %v822_v39 = vld [vmem:[%s20151_s1 + $0x1888] sm:$0xff] }
 0x173   :  { %9909 = vmatprep.subr.bf16.mxu0 %v13476_v41  ;;  %10442 = vmatprep.subr.bf16.mxu1 %v13478_v42  ;;  %v826_v40 = vld [vmem:[%s20151_s1 + $0x18a8] sm:$0xff]  ;;  %v13515_v41 = vcombine.low %v813_v24, %v817_v25  ;;  %v13517_v42 = vcombine.low %v814_v27, %v818_v63  ;;  %v861_v25 = vld [vmem:[%s20151_s1 + $0x19c0] sm:$0xff] }
 0x174   :  { %v13526_v45 = vcombine.high %v822_v39, %v826_v40  ;;  %v862_v27 = vld [vmem:[%s20151_s1 + $0x19c8] sm:$0xff] }
 0x175   :  { %v866_v63 = vld [vmem:[%s20151_s1 + $0x19e8] sm:$0xff] }
 0x176   :  { %9910 = vmatpush1.bf16.msra.mxu0 %v13475_v49  ;;  %10443 = vmatpush1.bf16.msra.mxu1 %v13477_v50  ;;  %v830_v49 = vld [vmem:[%s20151_s1 + $0x18c8] sm:$0xff] }
 0x177   :  { %9911 = vmatprep.subr.bf16.mxu0 %v13484_v52  ;;  %10444 = vmatprep.subr.bf16.mxu1 %v13486_v54  ;;  %v834_v50 = vld [vmem:[%s20151_s1 + $0x18e8] sm:$0xff]  ;;  %v13523_v52 = vcombine.low %v821_v35, %v825_v36  ;;  %v13525_v54 = vcombine.low %v822_v39, %v826_v40  ;;  %v869_v35 = vld [vmem:[%s20151_s1 + $0x1a00] sm:$0xff] }
 0x178   :  { %v13534_v56 = vcombine.high %v830_v49, %v834_v50  ;;  %v873_v36 = vld [vmem:[%s20151_s1 + $0x1a20] sm:$0xff]  ;;  %v870_v39 = vld [vmem:[%s20151_s1 + $0x1a08] sm:$0xff] }
 0x179   :  { %v874_v40 = vld [vmem:[%s20151_s1 + $0x1a28] sm:$0xff] }
 0x17a   :  { %9912 = vmatpush1.bf16.msra.mxu0 %v13483_v8  ;;  %10445 = vmatpush1.bf16.msra.mxu1 %v13485_v61  ;;  %v838_v8 = vld [vmem:[%s20151_s1 + $0x1908] sm:$0xff] }
 0x17b   :  { %9913 = vmatprep.subr.bf16.mxu0 %v13492_v0  ;;  %10446 = vmatprep.subr.bf16.mxu1 %v13494_v2  ;;  %v842_v61 = vld [vmem:[%s20151_s1 + $0x1928] sm:$0xff]  ;;  %v13531_v0 = vcombine.low %v829_v46, %v833_v47  ;;  %v13533_v2 = vcombine.low %v830_v49, %v834_v50  ;;  %v877_v46 = vld [vmem:[%s20151_s1 + $0x1a40] sm:$0xff] }
 0x17c   :  { %v13542_v3 = vcombine.high %v838_v8, %v842_v61  ;;  %v881_v47 = vld [vmem:[%s20151_s1 + $0x1a60] sm:$0xff]  ;;  %v878_v49 = vld [vmem:[%s20151_s1 + $0x1a48] sm:$0xff] }
 0x17d   :  { %v882_v50 = vld [vmem:[%s20151_s1 + $0x1a68] sm:$0xff] }
 0x17e   :  { %9914 = vmatpush1.bf16.msra.mxu0 %v13491_v10  ;;  %10447 = vmatpush1.bf16.msra.mxu1 %v13493_v11  ;;  %v850_v10 = vld [vmem:[%s20151_s1 + $0x1968] sm:$0xff]  ;;  %v13539_v11 = vcombine.low %v837_v57, %v841_v60  ;;  %v885_v57 = vld [vmem:[%s20151_s1 + $0x1a80] sm:$0xff] }
 0x17f   :  { %9915 = vmatprep.subr.bf16.mxu0 %v13500_v12  ;;  %10448 = vmatprep.subr.bf16.mxu1 %v13502_v13  ;;  %v13541_v12 = vcombine.low %v838_v8, %v842_v61  ;;  %v13548_v13 = vcombine.high %v845_v5, %v849_v6  ;;  %v13550_v1 = vcombine.high %v846_v7, %v850_v10  ;;  %v889_v60 = vld [vmem:[%s20151_s1 + $0x1aa0] sm:$0xff]  ;;  %v886_v8 = vld [vmem:[%s20151_s1 + $0x1a88] sm:$0xff] }
 0x180   :  { %v890_v61 = vld [vmem:[%s20151_s1 + $0x1aa8] sm:$0xff] }
 0x182   :  { %9916 = vmatpush1.bf16.msra.mxu0 %v13499_v18  ;;  %10449 = vmatpush1.bf16.msra.mxu1 %v13501_v20  ;;  %v858_v18 = vld [vmem:[%s20151_s1 + $0x19a8] sm:$0xff]  ;;  %v13547_v20 = vcombine.low %v845_v5, %v849_v6  ;;  %v893_v5 = vld [vmem:[%s20151_s1 + $0x1ac0] sm:$0xff] }
 0x183   :  { %9926 = vmatprep.subr.bf16.mxu0 %v13508_v21  ;;  %10459 = vmatprep.subr.bf16.mxu1 %v13510_v22  ;;  %v13549_v21 = vcombine.low %v846_v7, %v850_v10  ;;  %v13556_v22 = vcombine.high %v853_v14, %v857_v16  ;;  %v13558_v24 = vcombine.high %v854_v17, %v858_v18  ;;  %v897_v6 = vld [vmem:[%s20151_s1 + $0x1ae0] sm:$0xff]  ;;  %v894_v7 = vld [vmem:[%s20151_s1 + $0x1ac8] sm:$0xff] }
 0x184   :  { %v898_v10 = vld [vmem:[%s20151_s1 + $0x1ae8] sm:$0xff] }
 0x185   :  { %9918 = vmatmul.mubr.bf16.vlgmr.msra.gmra.mrb[0].mxu0 %v16157_v59  ;;  %10451 = vmatmul.mubr.bf16.vlgmr.msra.gmra.mrb[0].mxu1 %v16157_v59 }
 0x186   :  { %9927 = vmatpush1.bf16.msra.mxu0 %v13507_v30  ;;  %10460 = vmatpush1.bf16.msra.mxu1 %v13509_v32  ;;  %v13555_v30 = vcombine.low %v853_v14, %v857_v16  ;;  %v13557_v32 = vcombine.low %v854_v17, %v858_v18  ;;  %v901_v14 = vld [vmem:[%s20151_s1 + $0x1b00] sm:$0xff]  ;;  %v902_v17 = vld [vmem:[%s20151_s1 + $0x1b08] sm:$0xff] }
 0x187   :  { %9928 = vmatprep.subr.bf16.mxu0 %v13516_v33  ;;  %10461 = vmatprep.subr.bf16.mxu1 %v13518_v34  ;;  %v13564_v33 = vcombine.high %v861_v25, %v865_v26  ;;  %v13566_v34 = vcombine.high %v862_v27, %v866_v63  ;;  %v905_v16 = vld [vmem:[%s20151_s1 + $0x1b20] sm:$0xff]  ;;  %v906_v18 = vld [vmem:[%s20151_s1 + $0x1b28] sm:$0xff] }
 0x188   :  { %9958 = vmatprep.mubr.bf16.mxu0 %v16172_v37  ;;  %10491 = vmatprep.mubr.bf16.mxu1 %v16172_v37 }
 0x18a   :  { %9929 = vmatpush1.bf16.msra.mxu0 %v13515_v41  ;;  %10462 = vmatpush1.bf16.msra.mxu1 %v13517_v42  ;;  %v13563_v41 = vcombine.low %v861_v25, %v865_v26  ;;  %v13565_v42 = vcombine.low %v862_v27, %v866_v63  ;;  %v909_v25 = vld [vmem:[%s20151_s1 + $0x1b40] sm:$0xff]  ;;  %v910_v27 = vld [vmem:[%s20151_s1 + $0x1b48] sm:$0xff] }
 0x18b   :  { %9930 = vmatprep.subr.bf16.mxu0 %v13524_v44  ;;  %10463 = vmatprep.subr.bf16.mxu1 %v13526_v45  ;;  %v13572_v44 = vcombine.high %v869_v35, %v873_v36  ;;  %v13574_v45 = vcombine.high %v870_v39, %v874_v40  ;;  %v913_v26 = vld [vmem:[%s20151_s1 + $0x1b60] sm:$0xff]  ;;  %v914_v63 = vld [vmem:[%s20151_s1 + $0x1b68] sm:$0xff] }
 0x18e   :  { %9931 = vmatpush1.bf16.msra.mxu0 %v13523_v52  ;;  %10464 = vmatpush1.bf16.msra.mxu1 %v13525_v54  ;;  %v13571_v52 = vcombine.low %v869_v35, %v873_v36  ;;  %v13573_v54 = vcombine.low %v870_v39, %v874_v40  ;;  %v917_v35 = vld [vmem:[%s20151_s1 + $0x1b80] sm:$0xff]  ;;  %v918_v39 = vld [vmem:[%s20151_s1 + $0x1b88] sm:$0xff] }
 0x18f   :  { %9932 = vmatprep.subr.bf16.mxu0 %v13532_v55  ;;  %10465 = vmatprep.subr.bf16.mxu1 %v13534_v56  ;;  %v13580_v55 = vcombine.high %v877_v46, %v881_v47  ;;  %v13582_v56 = vcombine.high %v878_v49, %v882_v50  ;;  %v921_v36 = vld [vmem:[%s20151_s1 + $0x1ba0] sm:$0xff]  ;;  %v922_v40 = vld [vmem:[%s20151_s1 + $0x1ba8] sm:$0xff] }
 0x192   :  { %9933 = vmatpush1.bf16.msra.mxu0 %v13531_v0  ;;  %10466 = vmatpush1.bf16.msra.mxu1 %v13533_v2  ;;  %v13579_v0 = vcombine.low %v877_v46, %v881_v47  ;;  %v13581_v2 = vcombine.low %v878_v49, %v882_v50  ;;  %v925_v46 = vld [vmem:[%s20151_s1 + $0x1bc0] sm:$0xff]  ;;  %v926_v49 = vld [vmem:[%s20151_s1 + $0x1bc8] sm:$0xff] }
 0x193   :  { %9934 = vmatprep.subr.bf16.mxu0 %v13540_v28  ;;  %10467 = vmatprep.subr.bf16.mxu1 %v13542_v3  ;;  %v13588_v28 = vcombine.high %v885_v57, %v889_v60  ;;  %v13590_v3 = vcombine.high %v886_v8, %v890_v61  ;;  %v929_v47 = vld [vmem:[%s20151_s1 + $0x1be0] sm:$0xff]  ;;  %v930_v50 = vld [vmem:[%s20151_s1 + $0x1be8] sm:$0xff] }
 0x196   :  { %9935 = vmatpush1.bf16.msra.mxu0 %v13539_v11  ;;  %10468 = vmatpush1.bf16.msra.mxu1 %v13541_v12  ;;  %v13587_v11 = vcombine.low %v885_v57, %v889_v60  ;;  %v13589_v12 = vcombine.low %v886_v8, %v890_v61  ;;  %v933_v57 = vld [vmem:[%s20151_s1 + $0x1c00] sm:$0xff]  ;;  %v934_v8 = vld [vmem:[%s20151_s1 + $0x1c08] sm:$0xff] }
 0x197   :  { %9936 = vmatprep.subr.bf16.mxu0 %v13548_v13  ;;  %10469 = vmatprep.subr.bf16.mxu1 %v13550_v1  ;;  %v13596_v13 = vcombine.high %v893_v5, %v897_v6  ;;  %v13598_v1 = vcombine.high %v894_v7, %v898_v10  ;;  %v937_v60 = vld [vmem:[%s20151_s1 + $0x1c20] sm:$0xff]  ;;  %v938_v61 = vld [vmem:[%s20151_s1 + $0x1c28] sm:$0xff] }
 0x19a   :  { %9937 = vmatpush1.bf16.msra.mxu0 %v13547_v20  ;;  %10470 = vmatpush1.bf16.msra.mxu1 %v13549_v21  ;;  %v13595_v20 = vcombine.low %v893_v5, %v897_v6  ;;  %v13597_v21 = vcombine.low %v894_v7, %v898_v10  ;;  %v941_v5 = vld [vmem:[%s20151_s1 + $0x1c40] sm:$0xff]  ;;  %v16360_v7 = vrot.slane %v16139_v15, %v14962_v53  ;;  %v942_v10 = vld [vmem:[%s20151_s1 + $0x1c48] sm:$0xff] }
 0x19b   :  { %9938 = vmatprep.subr.bf16.mxu0 %v13556_v22  ;;  %10471 = vmatprep.subr.bf16.mxu1 %v13558_v24  ;;  %v13604_v22 = vcombine.high %v901_v14, %v905_v16  ;;  %v13606_v24 = vcombine.high %v902_v17, %v906_v18  ;;  %v945_v6 = vld [vmem:[%s20151_s1 + $0x1c60] sm:$0xff] }
 0x19c   :  { %v949_v15 = vld [vmem:[%s20151_s1 + $0x1c80] sm:$0xff] }
 0x19e   :  { %9939 = vmatpush1.bf16.msra.mxu0 %v13555_v30  ;;  %10472 = vmatpush1.bf16.msra.mxu1 %v13557_v32  ;;  %v13603_v30 = vcombine.low %v901_v14, %v905_v16  ;;  %v13605_v32 = vcombine.low %v902_v17, %v906_v18  ;;  %v953_v16 = vld [vmem:[%s20151_s1 + $0x1ca0] sm:$0xff]  ;;  %v16376_v17 = vcombine.high %v16172_v37, %v16172_v37  ;;  %v950_v18 = vld [vmem:[%s20151_s1 + $0x1c88] sm:$0xff] }
 0x19f   :  { %9940 = vmatprep.subr.bf16.mxu0 %v13564_v33  ;;  %10473 = vmatprep.subr.bf16.mxu1 %v13566_v34  ;;  %v13612_v33 = vcombine.high %v909_v25, %v913_v26  ;;  %v13614_v34 = vcombine.high %v910_v27, %v914_v63 }
 0x1a2   :  { %9941 = vmatpush1.bf16.msra.mxu0 %v13563_v41  ;;  %10474 = vmatpush1.bf16.msra.mxu1 %v13565_v42  ;;  %v13611_v41 = vcombine.low %v909_v25, %v913_v26  ;;  %v13613_v42 = vcombine.low %v910_v27, %v914_v63  ;;  %v957_v26 = vld [vmem:[%s20151_s1 + $0x1cc0] sm:$0xff]  ;;  %v958_v63 = vld [vmem:[%s20151_s1 + $0x1cc8] sm:$0xff] }
 0x1a3   :  { %9942 = vmatprep.subr.bf16.mxu0 %v13572_v44  ;;  %10475 = vmatprep.subr.bf16.mxu1 %v13574_v45  ;;  %v13620_v44 = vcombine.high %v917_v35, %v921_v36  ;;  %v13622_v45 = vcombine.high %v918_v39, %v922_v40  ;;  %v961_v27 = vld [vmem:[%s20151_s1 + $0x1ce0] sm:$0xff] }
 0x1a6   :  { %9943 = vmatpush1.bf16.msra.mxu0 %v13571_v52  ;;  %10476 = vmatpush1.bf16.msra.mxu1 %v13573_v54  ;;  %v13619_v52 = vcombine.low %v917_v35, %v921_v36  ;;  %v13621_v54 = vcombine.low %v918_v39, %v922_v40  ;;  %v965_v36 = vld [vmem:[%s20151_s1 + $0x1d00] sm:$0xff]  ;;  %v966_v40 = vld [vmem:[%s20151_s1 + $0x1d08] sm:$0xff] }
 0x1a7   :  { %9944 = vmatprep.subr.bf16.mxu0 %v13580_v55  ;;  %10477 = vmatprep.subr.bf16.mxu1 %v13582_v56  ;;  %v13628_v55 = vcombine.high %v925_v46, %v929_v47  ;;  %v13630_v56 = vcombine.high %v926_v49, %v930_v50  ;;  %v969_v39 = vld [vmem:[%s20151_s1 + $0x1d20] sm:$0xff] }
 0x1aa   :  { %9945 = vmatpush1.bf16.msra.mxu0 %v13579_v0  ;;  %10478 = vmatpush1.bf16.msra.mxu1 %v13581_v2  ;;  %v13627_v0 = vcombine.low %v925_v46, %v929_v47  ;;  %v13629_v2 = vcombine.low %v926_v49, %v930_v50  ;;  %v973_v47 = vld [vmem:[%s20151_s1 + $0x1d40] sm:$0xff]  ;;  %v974_v50 = vld [vmem:[%s20151_s1 + $0x1d48] sm:$0xff] }
 0x1ab   :  { %9946 = vmatprep.subr.bf16.mxu0 %v13588_v28  ;;  %10479 = vmatprep.subr.bf16.mxu1 %v13590_v3  ;;  %v13636_v28 = vcombine.high %v933_v57, %v937_v60  ;;  %v13638_v3 = vcombine.high %v934_v8, %v938_v61  ;;  %v977_v49 = vld [vmem:[%s20151_s1 + $0x1d60] sm:$0xff] }
 0x1ae   :  { %9947 = vmatpush1.bf16.msra.mxu0 %v13587_v11  ;;  %10480 = vmatpush1.bf16.msra.mxu1 %v13589_v12  ;;  %v946_v11 = vld [vmem:[%s20151_s1 + $0x1c68] sm:$0xff]  ;;  %v13635_v12 = vcombine.low %v933_v57, %v937_v60  ;;  %v981_v60 = vld [vmem:[%s20151_s1 + $0x1d80] sm:$0xff] }
 0x1af   :  { %9948 = vmatprep.subr.bf16.mxu0 %v13596_v13  ;;  %10481 = vmatprep.subr.bf16.mxu1 %v13598_v1  ;;  %v13637_v13 = vcombine.low %v934_v8, %v938_v61  ;;  %v13644_v1 = vcombine.high %v941_v5, %v945_v6  ;;  %v13646_v14 = vcombine.high %v942_v10, %v946_v11  ;;  %v985_v8 = vld [vmem:[%s20151_s1 + $0x1da0] sm:$0xff]  ;;  %v982_v61 = vld [vmem:[%s20151_s1 + $0x1d88] sm:$0xff] }
 0x1b2   :  { %9949 = vmatpush1.bf16.msra.mxu0 %v13595_v20  ;;  %10482 = vmatpush1.bf16.msra.mxu1 %v13597_v21  ;;  %v954_v20 = vld [vmem:[%s20151_s1 + $0x1ca8] sm:$0xff]  ;;  %v13643_v21 = vcombine.low %v941_v5, %v945_v6  ;;  %v989_v6 = vld [vmem:[%s20151_s1 + $0x1dc0] sm:$0xff] }
 0x1b3   :  { %9950 = vmatprep.subr.bf16.mxu0 %v13604_v22  ;;  %10483 = vmatprep.subr.bf16.mxu1 %v13606_v24  ;;  %v13645_v22 = vcombine.low %v942_v10, %v946_v11  ;;  %v13652_v24 = vcombine.high %v949_v15, %v953_v16  ;;  %v13654_v25 = vcombine.high %v950_v18, %v954_v20  ;;  %v993_v10 = vld [vmem:[%s20151_s1 + $0x1de0] sm:$0xff]  ;;  %v990_v11 = vld [vmem:[%s20151_s1 + $0x1dc8] sm:$0xff] }
 0x1b6   :  { %9951 = vmatpush1.bf16.msra.mxu0 %v13603_v30  ;;  %10484 = vmatpush1.bf16.msra.mxu1 %v13605_v32  ;;  %v962_v30 = vld [vmem:[%s20151_s1 + $0x1ce8] sm:$0xff]  ;;  %v13651_v32 = vcombine.low %v949_v15, %v953_v16  ;;  %v997_v16 = vld [vmem:[%s20151_s1 + $0x1e00] sm:$0xff] }
 0x1b7   :  { %9952 = vmatprep.subr.bf16.mxu0 %v13612_v33  ;;  %10485 = vmatprep.subr.bf16.mxu1 %v13614_v34  ;;  %v13653_v33 = vcombine.low %v950_v18, %v954_v20  ;;  %v13660_v34 = vcombine.high %v957_v26, %v961_v27  ;;  %v13662_v35 = vcombine.high %v958_v63, %v962_v30  ;;  %v1001_v18 = vld [vmem:[%s20151_s1 + $0x1e20] sm:$0xff]  ;;  %v998_v20 = vld [vmem:[%s20151_s1 + $0x1e08] sm:$0xff] }
 0x1ba   :  { %9953 = vmatpush1.bf16.msra.mxu0 %v13611_v41  ;;  %10486 = vmatpush1.bf16.msra.mxu1 %v13613_v42  ;;  %v970_v41 = vld [vmem:[%s20151_s1 + $0x1d28] sm:$0xff]  ;;  %v13659_v42 = vcombine.low %v957_v26, %v961_v27  ;;  %v1005_v27 = vld [vmem:[%s20151_s1 + $0x1e40] sm:$0xff] }
 0x1bb   :  { %9954 = vmatprep.subr.bf16.mxu0 %v13620_v44  ;;  %10487 = vmatprep.subr.bf16.mxu1 %v13622_v45  ;;  %v13661_v44 = vcombine.low %v958_v63, %v962_v30  ;;  %v13668_v45 = vcombine.high %v965_v36, %v969_v39  ;;  %v13670_v46 = vcombine.high %v966_v40, %v970_v41  ;;  %v1009_v63 = vld [vmem:[%s20151_s1 + $0x1e60] sm:$0xff]  ;;  %v1006_v30 = vld [vmem:[%s20151_s1 + $0x1e48] sm:$0xff] }
 0x1be   :  { %9955 = vmatpush1.bf16.msra.mxu0 %v13619_v52  ;;  %10488 = vmatpush1.bf16.msra.mxu1 %v13621_v54  ;;  %v978_v52 = vld [vmem:[%s20151_s1 + $0x1d68] sm:$0xff]  ;;  %v13667_v54 = vcombine.low %v965_v36, %v969_v39  ;;  %v1013_v39 = vld [vmem:[%s20151_s1 + $0x1e80] sm:$0xff] }
 0x1bf   :  { %9956 = vmatprep.subr.bf16.mxu0 %v13628_v55  ;;  %10489 = vmatprep.subr.bf16.mxu1 %v13630_v56  ;;  %v13669_v55 = vcombine.low %v966_v40, %v970_v41  ;;  %v13676_v56 = vcombine.high %v973_v47, %v977_v49  ;;  %v13678_v57 = vcombine.high %v974_v50, %v978_v52  ;;  %v1017_v40 = vld [vmem:[%s20151_s1 + $0x1ea0] sm:$0xff]  ;;  %v1014_v41 = vld [vmem:[%s20151_s1 + $0x1e88] sm:$0xff] }
 0x1c2   :  { %9957 = vmatpush1.bf16.msra.mxu0 %v13627_v0  ;;  %10490 = vmatpush1.bf16.msra.mxu1 %v13629_v2  ;;  %v986_v0 = vld [vmem:[%s20151_s1 + $0x1da8] sm:$0xff]  ;;  %v13675_v2 = vcombine.low %v973_v47, %v977_v49  ;;  %v1021_v49 = vld [vmem:[%s20151_s1 + $0x1ec0] sm:$0xff] }
 0x1c3   :  { %9967 = vmatprep.subr.bf16.mxu0 %v13636_v28  ;;  %10500 = vmatprep.subr.bf16.mxu1 %v13638_v3  ;;  %v13677_v28 = vcombine.low %v974_v50, %v978_v52  ;;  %v13684_v3 = vcombine.high %v981_v60, %v985_v8  ;;  %v13686_v5 = vcombine.high %v982_v61, %v986_v0  ;;  %v1025_v50 = vld [vmem:[%s20151_s1 + $0x1ee0] sm:$0xff]  ;;  %v1022_v52 = vld [vmem:[%s20151_s1 + $0x1ec8] sm:$0xff] }
 0x1c5   :  { %9959 = vmatmul.mubr.bf16.vlgmr.msra.gmra.mrb[0].mxu0 %v16360_v7  ;;  %10492 = vmatmul.mubr.bf16.vlgmr.msra.gmra.mrb[0].mxu1 %v16360_v7 }
 0x1c6   :  { %9968 = vmatpush1.bf16.msra.mxu0 %v13635_v12  ;;  %10501 = vmatpush1.bf16.msra.mxu1 %v13637_v13  ;;  %v994_v12 = vld [vmem:[%s20151_s1 + $0x1de8] sm:$0xff]  ;;  %v13683_v13 = vcombine.low %v981_v60, %v985_v8  ;;  %v1029_v8 = vld [vmem:[%s20151_s1 + $0x1f00] sm:$0xff] }
 0x1c7   :  { %9969 = vmatprep.subr.bf16.mxu0 %v13644_v1  ;;  %10502 = vmatprep.subr.bf16.mxu1 %v13646_v14  ;;  %v13685_v1 = vcombine.low %v982_v61, %v986_v0  ;;  %v13692_v14 = vcombine.high %v989_v6, %v993_v10  ;;  %v13694_v15 = vcombine.high %v990_v11, %v994_v12  ;;  %v1033_v61 = vld [vmem:[%s20151_s1 + $0x1f20] sm:$0xff]  ;;  %v1030_v0 = vld [vmem:[%s20151_s1 + $0x1f08] sm:$0xff] }
 0x1c8   :  { %9999 = vmatprep.mubr.bf16.mxu0 %v16376_v17  ;;  %10532 = vmatprep.mubr.bf16.mxu1 %v16376_v17 }
 0x1ca   :  { %9970 = vmatpush1.bf16.msra.mxu0 %v13643_v21  ;;  %10503 = vmatpush1.bf16.msra.mxu1 %v13645_v22  ;;  %v1002_v21 = vld [vmem:[%s20151_s1 + $0x1e28] sm:$0xff]  ;;  %v13691_v22 = vcombine.low %v989_v6, %v993_v10  ;;  %v1037_v10 = vld [vmem:[%s20151_s1 + $0x1f40] sm:$0xff] }
 0x1cb   :  { %9971 = vmatprep.subr.bf16.mxu0 %v13652_v24  ;;  %10504 = vmatprep.subr.bf16.mxu1 %v13654_v25  ;;  %v13693_v24 = vcombine.low %v990_v11, %v994_v12  ;;  %v13700_v25 = vcombine.high %v997_v16, %v1001_v18  ;;  %v13702_v26 = vcombine.high %v998_v20, %v1002_v21  ;;  %v1041_v11 = vld [vmem:[%s20151_s1 + $0x1f60] sm:$0xff]  ;;  %v1038_v12 = vld [vmem:[%s20151_s1 + $0x1f48] sm:$0xff] }
 0x1ce   :  { %9972 = vmatpush1.bf16.msra.mxu0 %v13651_v32  ;;  %10505 = vmatpush1.bf16.msra.mxu1 %v13653_v33  ;;  %v1010_v32 = vld [vmem:[%s20151_s1 + $0x1e68] sm:$0xff]  ;;  %v13699_v33 = vcombine.low %v997_v16, %v1001_v18  ;;  %v1045_v18 = vld [vmem:[%s20151_s1 + $0x1f80] sm:$0xff] }
 0x1cf   :  { %9973 = vmatprep.subr.bf16.mxu0 %v13660_v34  ;;  %10506 = vmatprep.subr.bf16.mxu1 %v13662_v35  ;;  %v13701_v34 = vcombine.low %v998_v20, %v1002_v21  ;;  %v13708_v35 = vcombine.high %v1005_v27, %v1009_v63  ;;  %v13710_v36 = vcombine.high %v1006_v30, %v1010_v32  ;;  %v1049_v20 = vld [vmem:[%s20151_s1 + $0x1fa0] sm:$0xff]  ;;  %v1046_v21 = vld [vmem:[%s20151_s1 + $0x1f88] sm:$0xff] }
 0x1d2   :  { %9974 = vmatpush1.bf16.msra.mxu0 %v13659_v42  ;;  %10507 = vmatpush1.bf16.msra.mxu1 %v13661_v44  ;;  %v1018_v42 = vld [vmem:[%s20151_s1 + $0x1ea8] sm:$0xff]  ;;  %v13707_v44 = vcombine.low %v1005_v27, %v1009_v63  ;;  %v1053_v63 = vld [vmem:[%s20151_s1 + $0x1fc0] sm:$0xff] }
 0x1d3   :  { %9975 = vmatprep.subr.bf16.mxu0 %v13668_v45  ;;  %10508 = vmatprep.subr.bf16.mxu1 %v13670_v46  ;;  %v13709_v45 = vcombine.low %v1006_v30, %v1010_v32  ;;  %v13716_v46 = vcombine.high %v1013_v39, %v1017_v40  ;;  %v13718_v47 = vcombine.high %v1014_v41, %v1018_v42  ;;  %v1057_v30 = vld [vmem:[%s20151_s1 + $0x1fe0] sm:$0xff]  ;;  %v1054_v32 = vld [vmem:[%s20151_s1 + $0x1fc8] sm:$0xff] }
 0x1d6   :  { %9976 = vmatpush1.bf16.msra.mxu0 %v13667_v54  ;;  %10509 = vmatpush1.bf16.msra.mxu1 %v13669_v55  ;;  %v1026_v54 = vld [vmem:[%s20151_s1 + $0x1ee8] sm:$0xff]  ;;  %v13715_v55 = vcombine.low %v1013_v39, %v1017_v40  ;;  %v13756_v39 = vcombine.high %v1053_v63, %v1057_v30 }
 0x1d7   :  { %9977 = vmatprep.subr.bf16.mxu0 %v13676_v56  ;;  %10510 = vmatprep.subr.bf16.mxu1 %v13678_v57  ;;  %v13717_v56 = vcombine.low %v1014_v41, %v1018_v42  ;;  %v13724_v57 = vcombine.high %v1021_v49, %v1025_v50  ;;  %v13726_v60 = vcombine.high %v1022_v52, %v1026_v54  ;;  %v1061_v41 = vld [vmem:[%s20151_s1 + $0x2000] sm:$0xff] }
 0x1d8   :  { %v1065_v42 = vld [vmem:[%s20151_s1 + $0x2020] sm:$0xff] }
 0x1da   :  { %9978 = vmatpush1.bf16.msra.mxu0 %v13675_v2  ;;  %10511 = vmatpush1.bf16.msra.mxu1 %v13677_v28  ;;  %v1034_v2 = vld [vmem:[%s20151_s1 + $0x1f28] sm:$0xff]  ;;  %v13723_v28 = vcombine.low %v1021_v49, %v1025_v50  ;;  %v13764_v50 = vcombine.high %v1061_v41, %v1065_v42 }
 0x1db   :  { %9979 = vmatprep.subr.bf16.mxu0 %v13684_v3  ;;  %10512 = vmatprep.subr.bf16.mxu1 %v13686_v5  ;;  %v13725_v3 = vcombine.low %v1022_v52, %v1026_v54  ;;  %v13732_v5 = vcombine.high %v1029_v8, %v1033_v61  ;;  %v13734_v6 = vcombine.high %v1030_v0, %v1034_v2  ;;  %v1069_v54 = vld [vmem:[%s20151_s1 + $0x2040] sm:$0xff] }
 0x1de   :  { %9980 = vmatpush1.bf16.msra.mxu0 %v13683_v13  ;;  %10513 = vmatpush1.bf16.msra.mxu1 %v13685_v1  ;;  %v1042_v13 = vld [vmem:[%s20151_s1 + $0x1f68] sm:$0xff]  ;;  %v13731_v1 = vcombine.low %v1029_v8, %v1033_v61  ;;  %v13763_v61 = vcombine.low %v1061_v41, %v1065_v42 }
 0x1df   :  { %9981 = vmatprep.subr.bf16.mxu0 %v13692_v14  ;;  %10514 = vmatprep.subr.bf16.mxu1 %v13694_v15  ;;  %v13733_v14 = vcombine.low %v1030_v0, %v1034_v2  ;;  %v13740_v15 = vcombine.high %v1037_v10, %v1041_v11  ;;  %v13742_v16 = vcombine.high %v1038_v12, %v1042_v13  ;;  %v1074_v8 = vld [vmem:[%s20151_s1 + $0x2068] sm:$0xff] }
 0x1e0   :  { %v1102_v41 = vld [vmem:[%s20151_s1 + $0x2148] sm:$0xff] }
 0x1e1   :  { %v1106_v42 = vld [vmem:[%s20151_s1 + $0x2168] sm:$0xff] }
 0x1e2   :  { %9982 = vmatpush1.bf16.msra.mxu0 %v13691_v22  ;;  %10515 = vmatpush1.bf16.msra.mxu1 %v13693_v24  ;;  %v1050_v22 = vld [vmem:[%s20151_s1 + $0x1fa8] sm:$0xff]  ;;  %v13739_v24 = vcombine.low %v1037_v10, %v1041_v11 }
 0x1e3   :  { %9983 = vmatprep.subr.bf16.mxu0 %v13700_v25  ;;  %10516 = vmatprep.subr.bf16.mxu1 %v13702_v26  ;;  %v13741_v25 = vcombine.low %v1038_v12, %v1042_v13  ;;  %v13748_v26 = vcombine.high %v1045_v18, %v1049_v20  ;;  %v13750_v27 = vcombine.high %v1046_v21, %v1050_v22  ;;  %v1078_v10 = vld [vmem:[%s20151_s1 + $0x2088] sm:$0xff] }
 0x1e4   :  { %v1082_v11 = vld [vmem:[%s20151_s1 + $0x20a8] sm:$0xff] }
 0x1e6   :  { %9984 = vmatpush1.bf16.msra.mxu0 %v13699_v33  ;;  %10517 = vmatpush1.bf16.msra.mxu1 %v13701_v34  ;;  %v1058_v33 = vld [vmem:[%s20151_s1 + $0x1fe8] sm:$0xff]  ;;  %v16547_v34 = vld [vmem:[%s20152_s0 + $0x10] sm:$0xff] }
 0x1e7   :  { %9985 = vmatprep.subr.bf16.mxu0 %v13708_v35  ;;  %10518 = vmatprep.subr.bf16.mxu1 %v13710_v36  ;;  %v13747_v35 = vcombine.low %v1045_v18, %v1049_v20  ;;  %v13749_v36 = vcombine.low %v1046_v21, %v1050_v22  ;;  %v13758_v40 = vcombine.high %v1054_v32, %v1058_v33  ;;  %v1086_v18 = vld [vmem:[%s20151_s1 + $0x20c8] sm:$0xff] }
 0x1e8   :  { %v13757_v49 = vcombine.low %v1054_v32, %v1058_v33  ;;  %v1090_v20 = vld [vmem:[%s20151_s1 + $0x20e8] sm:$0xff]  ;;  %v13781_v22 = vcombine.low %v1078_v10, %v1082_v11 }
 0x1e9   :  { %v13789_v33 = vcombine.low %v1086_v18, %v1090_v20 }
 0x1ea   :  { %9986 = vmatpush1.bf16.msra.mxu0 %v13707_v44  ;;  %10519 = vmatpush1.bf16.msra.mxu1 %v13709_v45  ;;  %v16557_v44 = vrot.slane %v16547_v34, %v14962_v53  ;;  %v1062_v45 = vld [vmem:[%s20151_s1 + $0x2008] sm:$0xff] }
 0x1eb   :  { %9987 = vmatprep.subr.bf16.mxu0 %v13716_v46  ;;  %10520 = vmatprep.subr.bf16.mxu1 %v13718_v47  ;;  %v1066_v46 = vld [vmem:[%s20151_s1 + $0x2028] sm:$0xff]  ;;  %v13755_v47 = vcombine.low %v1053_v63, %v1057_v30 }
 0x1ec   :  { %v13766_v52 = vcombine.high %v1062_v45, %v1066_v46  ;;  %v13765_v0 = vcombine.low %v1062_v45, %v1066_v46  ;;  %v1094_v63 = vld [vmem:[%s20151_s1 + $0x2108] sm:$0xff] }
 0x1ed   :  { %v1098_v30 = vld [vmem:[%s20151_s1 + $0x2128] sm:$0xff] }
 0x1ee   :  { %9988 = vmatpush1.bf16.msra.mxu0 %v13715_v55  ;;  %10521 = vmatpush1.bf16.msra.mxu1 %v13717_v56  ;;  %v1073_v55 = vld [vmem:[%s20151_s1 + $0x2060] sm:$0xff]  ;;  %v1764_v56 = vcombine.high %v16557_v44, %v16557_v44  ;;  %v13797_v46 = vcombine.low %v1094_v63, %v1098_v30 }
 0x1ef   :  { %9989 = vmatprep.subr.bf16.mxu0 %v13724_v57  ;;  %10522 = vmatprep.subr.bf16.mxu1 %v13726_v60  ;;  %v16575_v57 = vcombine.high %v16360_v7, %v16360_v7  ;;  %v1070_v60 = vld [vmem:[%s20151_s1 + $0x2048] sm:$0xff]  ;;  %v13772_v2 = vcombine.high %v1069_v54, %v1073_v55  ;;  %v13771_v12 = vcombine.low %v1069_v54, %v1073_v55 }
 0x1f0   :  { %v13773_v13 = vcombine.low %v1070_v60, %v1074_v8  ;;  %v1110_v54 = vld [vmem:[%s20151_s1 + $0x2188] sm:$0xff] }
 0x1f1   :  { %v1114_v55 = vld [vmem:[%s20151_s1 + $0x21a8] sm:$0xff] }
 0x1f2   :  { %9990 = vmatpush1.bf16.msra.mxu0 %v13723_v28  ;;  %10523 = vmatpush1.bf16.msra.mxu1 %v13725_v3  ;;  %v13774_v28 = vcombine.high %v1070_v60, %v1074_v8  ;;  %v1077_v3 = vld [vmem:[%s20151_s1 + $0x2080] sm:$0xff]  ;;  %v13805_v60 = vcombine.low %v1102_v41, %v1106_v42 }
 0x1f3   :  { %9991 = vmatprep.subr.bf16.mxu0 %v13732_v5  ;;  %10524 = vmatprep.subr.bf16.mxu1 %v13734_v6  ;;  %v1081_v5 = vld [vmem:[%s20151_s1 + $0x20a0] sm:$0xff]  ;;  %v16590_v6 = vrot.slane %v1764_v56, %v14962_v53 }
 0x1f4   :  { %v13779_v21 = vcombine.low %v1077_v3, %v1081_v5 }
 0x1f6   :  { %9992 = vmatpush1.bf16.msra.mxu0 %v13731_v1  ;;  %10525 = vmatpush1.bf16.msra.mxu1 %v13733_v14  ;;  %v13780_v1 = vcombine.high %v1077_v3, %v1081_v5  ;;  %v13782_v14 = vcombine.high %v1078_v10, %v1082_v11  ;;  %v1122_v3 = vld [vmem:[%s20151_s1 + $0x21e8] sm:$0xff]  ;;  %v13813_v10 = vcombine.low %v1110_v54, %v1114_v55 }
 0x1f7   :  { %9993 = vmatprep.subr.bf16.mxu0 %v13740_v15  ;;  %10526 = vmatprep.subr.bf16.mxu1 %v13742_v16  ;;  %v1085_v15 = vld [vmem:[%s20151_s1 + $0x20c0] sm:$0xff] }
 0x1f8   :  { %v1089_v16 = vld [vmem:[%s20151_s1 + $0x20e0] sm:$0xff] }
 0x1f9   :  { %v13787_v32 = vcombine.low %v1085_v15, %v1089_v16 }
 0x1fa   :  { %9994 = vmatpush1.bf16.msra.mxu0 %v13739_v24  ;;  %10527 = vmatpush1.bf16.msra.mxu1 %v13741_v25  ;;  %v13788_v24 = vcombine.high %v1085_v15, %v1089_v16  ;;  %v13790_v25 = vcombine.high %v1086_v18, %v1090_v20  ;;  %v1130_v15 = vld [vmem:[%s20151_s1 + $0x2228] sm:$0xff] }
 0x1fb   :  { %9995 = vmatprep.subr.bf16.mxu0 %v13748_v26  ;;  %10528 = vmatprep.subr.bf16.mxu1 %v13750_v27  ;;  %v1093_v26 = vld [vmem:[%s20151_s1 + $0x2100] sm:$0xff] }
 0x1fc   :  { %v1097_v27 = vld [vmem:[%s20151_s1 + $0x2120] sm:$0xff] }
 0x1fd   :  { %v13795_v45 = vcombine.low %v1093_v26, %v1097_v27 }
 0x1fe   :  { %9996 = vmatpush1.bf16.msra.mxu0 %v13747_v35  ;;  %10529 = vmatpush1.bf16.msra.mxu1 %v13749_v36  ;;  %v13796_v35 = vcombine.high %v1093_v26, %v1097_v27  ;;  %v13798_v36 = vcombine.high %v1094_v63, %v1098_v30  ;;  %v1138_v26 = vld [vmem:[%s20151_s1 + $0x2268] sm:$0xff] }
 0x1ff   :  { %9997 = vmatprep.subr.bf16.mxu0 %v13756_v39  ;;  %10530 = vmatprep.subr.bf16.mxu1 %v13758_v40  ;;  %v1101_v39 = vld [vmem:[%s20151_s1 + $0x2140] sm:$0xff] }
 0x200   :  { %v1105_v40 = vld [vmem:[%s20151_s1 + $0x2160] sm:$0xff] }
 0x201   :  { %v13803_v56 = vcombine.low %v1101_v39, %v1105_v40 }
 0x202   :  { %9998 = vmatpush1.bf16.msra.mxu0 %v13755_v47  ;;  %10531 = vmatpush1.bf16.msra.mxu1 %v13757_v49  ;;  %v13804_v47 = vcombine.high %v1101_v39, %v1105_v40  ;;  %v13806_v49 = vcombine.high %v1102_v41, %v1106_v42  ;;  %v1146_v39 = vld [vmem:[%s20151_s1 + $0x22a8] sm:$0xff] }
 0x203   :  { %10008 = vmatprep.subr.bf16.mxu0 %v13764_v50  ;;  %10541 = vmatprep.subr.bf16.mxu1 %v13766_v52  ;;  %v1109_v50 = vld [vmem:[%s20151_s1 + $0x2180] sm:$0xff] }
 0x204   :  { %v1113_v52 = vld [vmem:[%s20151_s1 + $0x21a0] sm:$0xff] }
 0x205   :  { %10000 = vmatmul.mubr.bf16.vlgmr.msra.gmra.mrb[0].mxu0 %v16575_v57  ;;  %10533 = vmatmul.mubr.bf16.vlgmr.msra.gmra.mrb[0].mxu1 %v16575_v57  ;;  %v13812_v8 = vcombine.high %v1109_v50, %v1113_v52  ;;  %v13811_v5 = vcombine.low %v1109_v50, %v1113_v52  ;;  %v1154_v50 = vld [vmem:[%s20151_s1 + $0x22e8] sm:$0xff] }
 0x206   :  { %10009 = vmatpush1.bf16.msra.mxu0 %v13763_v61  ;;  %10542 = vmatpush1.bf16.msra.mxu1 %v13765_v0  ;;  %v13814_v61 = vcombine.high %v1110_v54, %v1114_v55  ;;  %v1117_v0 = vld [vmem:[%s20151_s1 + $0x21c0] sm:$0xff] }
 0x207   :  { %10010 = vmatprep.subr.bf16.mxu0 %v13772_v2  ;;  %10543 = vmatprep.subr.bf16.mxu1 %v13774_v28  ;;  %v1121_v2 = vld [vmem:[%s20151_s1 + $0x21e0] sm:$0xff]  ;;  %v1118_v28 = vld [vmem:[%s20151_s1 + $0x21c8] sm:$0xff] }
 0x208   :  { %10040 = vmatprep.mubr.bf16.mxu0 %v16590_v6  ;;  %10573 = vmatprep.mubr.bf16.mxu1 %v16590_v6  ;;  %v13820_v11 = vcombine.high %v1117_v0, %v1121_v2  ;;  %v13819_v16 = vcombine.low %v1117_v0, %v1121_v2  ;;  %v13821_v18 = vcombine.low %v1118_v28, %v1122_v3  ;;  %v1162_v0 = vld [vmem:[%s20151_s1 + $0x2328] sm:$0xff] }
 0x20a   :  { %10011 = vmatpush1.bf16.msra.mxu0 %v13771_v12  ;;  %10544 = vmatpush1.bf16.msra.mxu1 %v13773_v13  ;;  %v13822_v12 = vcombine.high %v1118_v28, %v1122_v3  ;;  %v1125_v13 = vld [vmem:[%s20151_s1 + $0x2200] sm:$0xff] }
 0x20b   :  { %10012 = vmatprep.subr.bf16.mxu0 %v13780_v1  ;;  %10545 = vmatprep.subr.bf16.mxu1 %v13782_v14  ;;  %v1129_v1 = vld [vmem:[%s20151_s1 + $0x2220] sm:$0xff]  ;;  %v1126_v14 = vld [vmem:[%s20151_s1 + $0x2208] sm:$0xff] }
 0x20c   :  { %v13828_v20 = vcombine.high %v1125_v13, %v1129_v1  ;;  %v13827_v27 = vcombine.low %v1125_v13, %v1129_v1  ;;  %v13829_v63 = vcombine.low %v1126_v14, %v1130_v15  ;;  %v1170_v13 = vld [vmem:[%s20151_s1 + $0x2368] sm:$0xff] }
 0x20e   :  { %10013 = vmatpush1.bf16.msra.mxu0 %v13779_v21  ;;  %10546 = vmatpush1.bf16.msra.mxu1 %v13781_v22  ;;  %v13830_v21 = vcombine.high %v1126_v14, %v1130_v15  ;;  %v1133_v22 = vld [vmem:[%s20151_s1 + $0x2240] sm:$0xff] }
 0x20f   :  { %10014 = vmatprep.subr.bf16.mxu0 %v13788_v24  ;;  %10547 = vmatprep.subr.bf16.mxu1 %v13790_v25  ;;  %v1137_v24 = vld [vmem:[%s20151_s1 + $0x2260] sm:$0xff]  ;;  %v1134_v25 = vld [vmem:[%s20151_s1 + $0x2248] sm:$0xff] }
 0x210   :  { %v13836_v30 = vcombine.high %v1133_v22, %v1137_v24  ;;  %v13835_v40 = vcombine.low %v1133_v22, %v1137_v24  ;;  %v13837_v41 = vcombine.low %v1134_v25, %v1138_v26  ;;  %v1178_v22 = vld [vmem:[%s20151_s1 + $0x23a8] sm:$0xff] }
 0x212   :  { %10015 = vmatpush1.bf16.msra.mxu0 %v13787_v32  ;;  %10548 = vmatpush1.bf16.msra.mxu1 %v13789_v33  ;;  %v13838_v32 = vcombine.high %v1134_v25, %v1138_v26  ;;  %v1141_v33 = vld [vmem:[%s20151_s1 + $0x2280] sm:$0xff] }
 0x213   :  { %10016 = vmatprep.subr.bf16.mxu0 %v13796_v35  ;;  %10549 = vmatprep.subr.bf16.mxu1 %v13798_v36  ;;  %v1145_v35 = vld [vmem:[%s20151_s1 + $0x22a0] sm:$0xff]  ;;  %v1142_v36 = vld [vmem:[%s20151_s1 + $0x2288] sm:$0xff] }
 0x214   :  { %v13844_v42 = vcombine.high %v1141_v33, %v1145_v35  ;;  %v13843_v52 = vcombine.low %v1141_v33, %v1145_v35  ;;  %v13845_v54 = vcombine.low %v1142_v36, %v1146_v39  ;;  %v1186_v33 = vld [vmem:[%s20151_s1 + $0x23e8] sm:$0xff] }
 0x216   :  { %10017 = vmatpush1.bf16.msra.mxu0 %v13795_v45  ;;  %10550 = vmatpush1.bf16.msra.mxu1 %v13797_v46  ;;  %v13846_v45 = vcombine.high %v1142_v36, %v1146_v39  ;;  %v1149_v46 = vld [vmem:[%s20151_s1 + $0x22c0] sm:$0xff] }
 0x217   :  { %10018 = vmatprep.subr.bf16.mxu0 %v13804_v47  ;;  %10551 = vmatprep.subr.bf16.mxu1 %v13806_v49  ;;  %v1153_v47 = vld [vmem:[%s20151_s1 + $0x22e0] sm:$0xff]  ;;  %v1150_v49 = vld [vmem:[%s20151_s1 + $0x22c8] sm:$0xff] }
 0x218   :  { %v13852_v55 = vcombine.high %v1149_v46, %v1153_v47  ;;  %v13851_v2 = vcombine.low %v1149_v46, %v1153_v47  ;;  %v13853_v28 = vcombine.low %v1150_v49, %v1154_v50  ;;  %v1194_v46 = vld [vmem:[%s20151_s1 + $0x2428] sm:$0xff] }
 0x21a   :  { %10019 = vmatpush1.bf16.msra.mxu0 %v13803_v56  ;;  %10552 = vmatpush1.bf16.msra.mxu1 %v13805_v60  ;;  %v13854_v56 = vcombine.high %v1150_v49, %v1154_v50  ;;  %v1157_v60 = vld [vmem:[%s20151_s1 + $0x2300] sm:$0xff] }
 0x21b   :  { %10020 = vmatprep.subr.bf16.mxu0 %v13812_v8  ;;  %10553 = vmatprep.subr.bf16.mxu1 %v13814_v61  ;;  %v1161_v8 = vld [vmem:[%s20151_s1 + $0x2320] sm:$0xff]  ;;  %v1158_v61 = vld [vmem:[%s20151_s1 + $0x2308] sm:$0xff] }
 0x21c   :  { %v13860_v3 = vcombine.high %v1157_v60, %v1161_v8  ;;  %v13859_v1 = vcombine.low %v1157_v60, %v1161_v8  ;;  %v13861_v14 = vcombine.low %v1158_v61, %v1162_v0  ;;  %v1198_v60 = vld [vmem:[%s20151_s1 + $0x2448] sm:$0xff] }
 0x21d   :  { %v1202_v8 = vld [vmem:[%s20151_s1 + $0x2468] sm:$0xff] }
 0x21e   :  { %10021 = vmatpush1.bf16.msra.mxu0 %v13811_v5  ;;  %10554 = vmatpush1.bf16.msra.mxu1 %v13813_v10  ;;  %v13862_v5 = vcombine.high %v1158_v61, %v1162_v0  ;;  %v1165_v10 = vld [vmem:[%s20151_s1 + $0x2340] sm:$0xff] }
 0x21f   :  { %10022 = vmatprep.subr.bf16.mxu0 %v13820_v11  ;;  %10555 = vmatprep.subr.bf16.mxu1 %v13822_v12  ;;  %v1169_v11 = vld [vmem:[%s20151_s1 + $0x2360] sm:$0xff]  ;;  %v1166_v12 = vld [vmem:[%s20151_s1 + $0x2348] sm:$0xff] }
 0x220   :  { %v13868_v15 = vcombine.high %v1165_v10, %v1169_v11  ;;  %v13867_v24 = vcombine.low %v1165_v10, %v1169_v11  ;;  %v13869_v25 = vcombine.low %v1166_v12, %v1170_v13  ;;  %v1206_v10 = vld [vmem:[%s20151_s1 + $0x2488] sm:$0xff] }
 0x221   :  { %v1210_v11 = vld [vmem:[%s20151_s1 + $0x24a8] sm:$0xff] }
 0x222   :  { %10023 = vmatpush1.bf16.msra.mxu0 %v13819_v16  ;;  %10556 = vmatpush1.bf16.msra.mxu1 %v13821_v18  ;;  %v13870_v16 = vcombine.high %v1166_v12, %v1170_v13  ;;  %v1173_v18 = vld [vmem:[%s20151_s1 + $0x2380] sm:$0xff]  ;;  %v13901_v13 = vcombine.low %v1198_v60, %v1202_v8 }
 0x223   :  { %10024 = vmatprep.subr.bf16.mxu0 %v13828_v20  ;;  %10557 = vmatprep.subr.bf16.mxu1 %v13830_v21  ;;  %v1177_v20 = vld [vmem:[%s20151_s1 + $0x23a0] sm:$0xff]  ;;  %v1174_v21 = vld [vmem:[%s20151_s1 + $0x2388] sm:$0xff] }
 0x224   :  { %v13876_v26 = vcombine.high %v1173_v18, %v1177_v20  ;;  %v13875_v35 = vcombine.low %v1173_v18, %v1177_v20  ;;  %v13877_v36 = vcombine.low %v1174_v21, %v1178_v22  ;;  %v1214_v18 = vld [vmem:[%s20151_s1 + $0x24c8] sm:$0xff] }
 0x225   :  { %v1218_v20 = vld [vmem:[%s20151_s1 + $0x24e8] sm:$0xff] }
 0x226   :  { %10025 = vmatpush1.bf16.msra.mxu0 %v13827_v27  ;;  %10558 = vmatpush1.bf16.msra.mxu1 %v13829_v63  ;;  %v13878_v27 = vcombine.high %v1174_v21, %v1178_v22  ;;  %v1181_v63 = vld [vmem:[%s20151_s1 + $0x23c0] sm:$0xff]  ;;  %v13909_v22 = vcombine.low %v1206_v10, %v1210_v11 }
 0x227   :  { %10026 = vmatprep.subr.bf16.mxu0 %v13836_v30  ;;  %10559 = vmatprep.subr.bf16.mxu1 %v13838_v32  ;;  %v1185_v30 = vld [vmem:[%s20151_s1 + $0x23e0] sm:$0xff]  ;;  %v1182_v32 = vld [vmem:[%s20151_s1 + $0x23c8] sm:$0xff] }
 0x228   :  { %v13884_v39 = vcombine.high %v1181_v63, %v1185_v30  ;;  %v13883_v47 = vcombine.low %v1181_v63, %v1185_v30  ;;  %v13885_v49 = vcombine.low %v1182_v32, %v1186_v33  ;;  %v1222_v63 = vld [vmem:[%s20151_s1 + $0x2508] sm:$0xff] }
 0x229   :  { %v1226_v30 = vld [vmem:[%s20151_s1 + $0x2528] sm:$0xff] }
 0x22a   :  { %10027 = vmatpush1.bf16.msra.mxu0 %v13835_v40  ;;  %10560 = vmatpush1.bf16.msra.mxu1 %v13837_v41  ;;  %v13886_v40 = vcombine.high %v1182_v32, %v1186_v33  ;;  %v1189_v41 = vld [vmem:[%s20151_s1 + $0x2400] sm:$0xff]  ;;  %v13917_v33 = vcombine.low %v1214_v18, %v1218_v20 }
 0x22b   :  { %10028 = vmatprep.subr.bf16.mxu0 %v13844_v42  ;;  %10561 = vmatprep.subr.bf16.mxu1 %v13846_v45  ;;  %v1193_v42 = vld [vmem:[%s20151_s1 + $0x2420] sm:$0xff]  ;;  %v1190_v45 = vld [vmem:[%s20151_s1 + $0x2408] sm:$0xff] }
 0x22c   :  { %v13892_v50 = vcombine.high %v1189_v41, %v1193_v42  ;;  %v13891_v61 = vcombine.low %v1189_v41, %v1193_v42  ;;  %v13893_v0 = vcombine.low %v1190_v45, %v1194_v46  ;;  %v1230_v41 = vld [vmem:[%s20151_s1 + $0x2548] sm:$0xff] }
 0x22d   :  { %v1234_v42 = vld [vmem:[%s20151_s1 + $0x2568] sm:$0xff] }
 0x22e   :  { %10029 = vmatpush1.bf16.msra.mxu0 %v13843_v52  ;;  %10562 = vmatpush1.bf16.msra.mxu1 %v13845_v54  ;;  %v13894_v52 = vcombine.high %v1190_v45, %v1194_v46  ;;  %v1197_v54 = vld [vmem:[%s20151_s1 + $0x2440] sm:$0xff]  ;;  %v13925_v46 = vcombine.low %v1222_v63, %v1226_v30 }
 0x22f   :  { %10030 = vmatprep.subr.bf16.mxu0 %v13852_v55  ;;  %10563 = vmatprep.subr.bf16.mxu1 %v13854_v56  ;;  %v1201_v55 = vld [vmem:[%s20151_s1 + $0x2460] sm:$0xff]  ;;  %v16778_v56 = vrot.slane %v16557_v44, %v14962_v53 }
 0x230   :  { %v1205_v44 = vld [vmem:[%s20151_s1 + $0x2480] sm:$0xff]  ;;  %v13899_v12 = vcombine.low %v1197_v54, %v1201_v55 }
 0x232   :  { %10031 = vmatpush1.bf16.msra.mxu0 %v13851_v2  ;;  %10564 = vmatpush1.bf16.msra.mxu1 %v13853_v28  ;;  %v13900_v2 = vcombine.high %v1197_v54, %v1201_v55  ;;  %v13902_v28 = vcombine.high %v1198_v60, %v1202_v8  ;;  %v1238_v54 = vld [vmem:[%s20151_s1 + $0x2588] sm:$0xff]  ;;  %v13933_v8 = vcombine.low %v1230_v41, %v1234_v42 }
 0x233   :  { %10032 = vmatprep.subr.bf16.mxu0 %v13860_v3  ;;  %10565 = vmatprep.subr.bf16.mxu1 %v13862_v5  ;;  %v1209_v3 = vld [vmem:[%s20151_s1 + $0x24a0] sm:$0xff]  ;;  %v16794_v5 = vcombine.high %v16590_v6, %v16590_v6  ;;  %v1242_v55 = vld [vmem:[%s20151_s1 + $0x25a8] sm:$0xff] }
 0x234   :  { %v13907_v21 = vcombine.low %v1205_v44, %v1209_v3 }
 0x236   :  { %10033 = vmatpush1.bf16.msra.mxu0 %v13859_v1  ;;  %10566 = vmatpush1.bf16.msra.mxu1 %v13861_v14  ;;  %v13908_v1 = vcombine.high %v1205_v44, %v1209_v3  ;;  %v13910_v14 = vcombine.high %v1206_v10, %v1210_v11  ;;  %v1246_v44 = vld [vmem:[%s20151_s1 + $0x25c8] sm:$0xff]  ;;  %v13941_v11 = vcombine.low %v1238_v54, %v1242_v55 }
 0x237   :  { %10034 = vmatprep.subr.bf16.mxu0 %v13868_v15  ;;  %10567 = vmatprep.subr.bf16.mxu1 %v13870_v16  ;;  %v1213_v15 = vld [vmem:[%s20151_s1 + $0x24c0] sm:$0xff]  ;;  %v1250_v3 = vld [vmem:[%s20151_s1 + $0x25e8] sm:$0xff] }
 0x238   :  { %v1217_v16 = vld [vmem:[%s20151_s1 + $0x24e0] sm:$0xff] }
 0x239   :  { %v13915_v32 = vcombine.low %v1213_v15, %v1217_v16 }
 0x23a   :  { %10035 = vmatpush1.bf16.msra.mxu0 %v13867_v24  ;;  %10568 = vmatpush1.bf16.msra.mxu1 %v13869_v25  ;;  %v13916_v24 = vcombine.high %v1213_v15, %v1217_v16  ;;  %v13918_v25 = vcombine.high %v1214_v18, %v1218_v20  ;;  %v1254_v15 = vld [vmem:[%s20151_s1 + $0x2608] sm:$0xff]  ;;  %v13949_v20 = vcombine.low %v1246_v44, %v1250_v3 }
 0x23b   :  { %10036 = vmatprep.subr.bf16.mxu0 %v13876_v26  ;;  %10569 = vmatprep.subr.bf16.mxu1 %v13878_v27  ;;  %v1221_v26 = vld [vmem:[%s20151_s1 + $0x2500] sm:$0xff]  ;;  %v1258_v16 = vld [vmem:[%s20151_s1 + $0x2628] sm:$0xff] }
 0x23c   :  { %v1225_v27 = vld [vmem:[%s20151_s1 + $0x2520] sm:$0xff] }
 0x23d   :  { %v13923_v45 = vcombine.low %v1221_v26, %v1225_v27 }
 0x23e   :  { %10037 = vmatpush1.bf16.msra.mxu0 %v13875_v35  ;;  %10570 = vmatpush1.bf16.msra.mxu1 %v13877_v36  ;;  %v13924_v35 = vcombine.high %v1221_v26, %v1225_v27  ;;  %v13926_v36 = vcombine.high %v1222_v63, %v1226_v30  ;;  %v1262_v26 = vld [vmem:[%s20151_s1 + $0x2648] sm:$0xff]  ;;  %v13957_v30 = vcombine.low %v1254_v15, %v1258_v16 }
 0x23f   :  { %10038 = vmatprep.subr.bf16.mxu0 %v13884_v39  ;;  %10571 = vmatprep.subr.bf16.mxu1 %v13886_v40  ;;  %v1229_v39 = vld [vmem:[%s20151_s1 + $0x2540] sm:$0xff]  ;;  %v1266_v27 = vld [vmem:[%s20151_s1 + $0x2668] sm:$0xff] }
 0x240   :  { %v1233_v40 = vld [vmem:[%s20151_s1 + $0x2560] sm:$0xff] }
 0x241   :  { %v13931_v60 = vcombine.low %v1229_v39, %v1233_v40 }
 0x242   :  { %10039 = vmatpush1.bf16.msra.mxu0 %v13883_v47  ;;  %10572 = vmatpush1.bf16.msra.mxu1 %v13885_v49  ;;  %v13932_v47 = vcombine.high %v1229_v39, %v1233_v40  ;;  %v13934_v49 = vcombine.high %v1230_v41, %v1234_v42  ;;  %v1270_v39 = vld [vmem:[%s20151_s1 + $0x2688] sm:$0xff]  ;;  %v13965_v42 = vcombine.low %v1262_v26, %v1266_v27 }
 0x243   :  { %10049 = vmatprep.subr.bf16.mxu0 %v13892_v50  ;;  %10582 = vmatprep.subr.bf16.mxu1 %v13894_v52  ;;  %v1237_v50 = vld [vmem:[%s20151_s1 + $0x2580] sm:$0xff]  ;;  %v1274_v40 = vld [vmem:[%s20151_s1 + $0x26a8] sm:$0xff] }
 0x244   :  { %v1241_v52 = vld [vmem:[%s20151_s1 + $0x25a0] sm:$0xff] }
 0x245   :  { %10041 = vmatmul.mubr.bf16.vlgmr.msra.gmra.mrb[0].mxu0 %v16778_v56  ;;  %10574 = vmatmul.mubr.bf16.vlgmr.msra.gmra.mrb[0].mxu1 %v16778_v56  ;;  %v13939_v10 = vcombine.low %v1237_v50, %v1241_v52 }
 0x246   :  { %10050 = vmatpush1.bf16.msra.mxu0 %v13891_v61  ;;  %10583 = vmatpush1.bf16.msra.mxu1 %v13893_v0  ;;  %v13940_v61 = vcombine.high %v1237_v50, %v1241_v52  ;;  %v13942_v0 = vcombine.high %v1238_v54, %v1242_v55  ;;  %v1278_v50 = vld [vmem:[%s20151_s1 + $0x26c8] sm:$0xff]  ;;  %v13973_v55 = vcombine.low %v1270_v39, %v1274_v40 }
 0x247   :  { %10051 = vmatprep.subr.bf16.mxu0 %v13900_v2  ;;  %10584 = vmatprep.subr.bf16.mxu1 %v13902_v28  ;;  %v1245_v2 = vld [vmem:[%s20151_s1 + $0x25c0] sm:$0xff]  ;;  %v1282_v52 = vld [vmem:[%s20151_s1 + $0x26e8] sm:$0xff] }
 0x248   :  { %10081 = vmatprep.mubr.bf16.mxu0 %v16794_v5  ;;  %10614 = vmatprep.mubr.bf16.mxu1 %v16794_v5  ;;  %v1249_v28 = vld [vmem:[%s20151_s1 + $0x25e0] sm:$0xff] }
 0x249   :  { %v13947_v18 = vcombine.low %v1245_v2, %v1249_v28 }
 0x24a   :  { %10052 = vmatpush1.bf16.msra.mxu0 %v13899_v12  ;;  %10585 = vmatpush1.bf16.msra.mxu1 %v13901_v13  ;;  %v13948_v12 = vcombine.high %v1245_v2, %v1249_v28  ;;  %v13950_v13 = vcombine.high %v1246_v44, %v1250_v3  ;;  %v1286_v2 = vld [vmem:[%s20151_s1 + $0x2708] sm:$0xff]  ;;  %v13981_v3 = vcombine.low %v1278_v50, %v1282_v52 }
 0x24b   :  { %10053 = vmatprep.subr.bf16.mxu0 %v13908_v1  ;;  %10586 = vmatprep.subr.bf16.mxu1 %v13910_v14  ;;  %v1253_v1 = vld [vmem:[%s20151_s1 + $0x2600] sm:$0xff]  ;;  %v1290_v28 = vld [vmem:[%s20151_s1 + $0x2728] sm:$0xff] }
 0x24c   :  { %v1257_v14 = vld [vmem:[%s20151_s1 + $0x2620] sm:$0xff] }
 0x24d   :  { %v13955_v63 = vcombine.low %v1253_v1, %v1257_v14 }
 0x24e   :  { %10054 = vmatpush1.bf16.msra.mxu0 %v13907_v21  ;;  %10587 = vmatpush1.bf16.msra.mxu1 %v13909_v22  ;;  %v13956_v21 = vcombine.high %v1253_v1, %v1257_v14  ;;  %v13958_v22 = vcombine.high %v1254_v15, %v1258_v16  ;;  %v1294_v1 = vld [vmem:[%s20151_s1 + $0x2748] sm:$0xff]  ;;  %v13989_v16 = vcombine.low %v1286_v2, %v1290_v28 }
 0x24f   :  { %10055 = vmatprep.subr.bf16.mxu0 %v13916_v24  ;;  %10588 = vmatprep.subr.bf16.mxu1 %v13918_v25  ;;  %v1261_v24 = vld [vmem:[%s20151_s1 + $0x2640] sm:$0xff]  ;;  %v1298_v14 = vld [vmem:[%s20151_s1 + $0x2768] sm:$0xff] }
 0x250   :  { %v1265_v25 = vld [vmem:[%s20151_s1 + $0x2660] sm:$0xff] }
 0x251   :  { %v13963_v41 = vcombine.low %v1261_v24, %v1265_v25 }
 0x252   :  { %10056 = vmatpush1.bf16.msra.mxu0 %v13915_v32  ;;  %10589 = vmatpush1.bf16.msra.mxu1 %v13917_v33  ;;  %v13964_v32 = vcombine.high %v1261_v24, %v1265_v25  ;;  %v13966_v33 = vcombine.high %v1262_v26, %v1266_v27  ;;  %v1302_v24 = vld [vmem:[%s20151_s1 + $0x2788] sm:$0xff]  ;;  %v13997_v27 = vcombine.low %v1294_v1, %v1298_v14 }
 0x253   :  { %10057 = vmatprep.subr.bf16.mxu0 %v13924_v35  ;;  %10590 = vmatprep.subr.bf16.mxu1 %v13926_v36  ;;  %v1269_v35 = vld [vmem:[%s20151_s1 + $0x2680] sm:$0xff]  ;;  %v1306_v25 = vld [vmem:[%s20151_s1 + $0x27a8] sm:$0xff] }
 0x254   :  { %v1273_v36 = vld [vmem:[%s20151_s1 + $0x26a0] sm:$0xff] }
 0x255   :  { %v13971_v54 = vcombine.low %v1269_v35, %v1273_v36 }
 0x256   :  { %10058 = vmatpush1.bf16.msra.mxu0 %v13923_v45  ;;  %10591 = vmatpush1.bf16.msra.mxu1 %v13925_v46  ;;  %v13972_v45 = vcombine.high %v1269_v35, %v1273_v36  ;;  %v13974_v46 = vcombine.high %v1270_v39, %v1274_v40  ;;  %v1749_v35 = vcombine.high %v16547_v34, %v16547_v34  ;;  %v1310_v36 = vld [vmem:[%s20151_s1 + $0x27c8] sm:$0xff]  ;;  %v1317_v34 = vld [vmem:[%s20151_s1 + $0x2800] sm:$0xff] }
 0x257   :  { %10059 = vmatprep.subr.bf16.mxu0 %v13932_v47  ;;  %10592 = vmatprep.subr.bf16.mxu1 %v13934_v49  ;;  %v1277_v47 = vld [vmem:[%s20151_s1 + $0x26c0] sm:$0xff]  ;;  %v1314_v39 = vld [vmem:[%s20151_s1 + $0x27e8] sm:$0xff] }
 0x258   :  { %v1281_v49 = vld [vmem:[%s20151_s1 + $0x26e0] sm:$0xff] }
 0x259   :  { %v13979_v44 = vcombine.low %v1277_v47, %v1281_v49 }
 0x25a   :  { %10060 = vmatpush1.bf16.msra.mxu0 %v13931_v60  ;;  %10593 = vmatpush1.bf16.msra.mxu1 %v13933_v8  ;;  %v13980_v60 = vcombine.high %v1277_v47, %v1281_v49  ;;  %v13982_v8 = vcombine.high %v1278_v50, %v1282_v52  ;;  %v16971_v47 = vrot.slane %v1749_v35, %v14962_v53  ;;  %v1318_v49 = vld [vmem:[%s20151_s1 + $0x2808] sm:$0xff]  ;;  %v1349_v35 = vld [vmem:[%s20151_s1 + $0x2900] sm:$0xff] }
 0x25b   :  { %10061 = vmatprep.subr.bf16.mxu0 %v13940_v61  ;;  %10594 = vmatprep.subr.bf16.mxu1 %v13942_v0  ;;  %v1285_v61 = vld [vmem:[%s20151_s1 + $0x2700] sm:$0xff]  ;;  %v1322_v50 = vld [vmem:[%s20151_s1 + $0x2828] sm:$0xff] }
 0x25c   :  { %v1289_v0 = vld [vmem:[%s20151_s1 + $0x2720] sm:$0xff] }
 0x25d   :  { %v13987_v15 = vcombine.low %v1285_v61, %v1289_v0 }
 0x25e   :  { %10062 = vmatpush1.bf16.msra.mxu0 %v13939_v10  ;;  %10595 = vmatpush1.bf16.msra.mxu1 %v13941_v11  ;;  %v13988_v10 = vcombine.high %v1285_v61, %v1289_v0  ;;  %v13990_v11 = vcombine.high %v1286_v2, %v1290_v28  ;;  %v1329_v61 = vld [vmem:[%s20151_s1 + $0x2860] sm:$0xff]  ;;  %v1765_v0 = vcombine.high %v16971_v47, %v16971_v47  ;;  %v1326_v28 = vld [vmem:[%s20151_s1 + $0x2848] sm:$0xff] }
 0x25f   :  { %10063 = vmatprep.subr.bf16.mxu0 %v13948_v12  ;;  %10596 = vmatprep.subr.bf16.mxu1 %v13950_v13  ;;  %v1293_v12 = vld [vmem:[%s20151_s1 + $0x2740] sm:$0xff]  ;;  %v16989_v2 = vcombine.high %v16778_v56, %v16778_v56 }
 0x260   :  { %v1297_v13 = vld [vmem:[%s20151_s1 + $0x2760] sm:$0xff] }
 0x261   :  { %v13995_v26 = vcombine.low %v1293_v12, %v1297_v13 }
 0x262   :  { %10064 = vmatpush1.bf16.msra.mxu0 %v13947_v18  ;;  %10597 = vmatpush1.bf16.msra.mxu1 %v13949_v20  ;;  %v13996_v18 = vcombine.high %v1293_v12, %v1297_v13  ;;  %v13998_v20 = vcombine.high %v1294_v1, %v1298_v14  ;;  %v1333_v13 = vld [vmem:[%s20151_s1 + $0x2880] sm:$0xff]  ;;  %v17004_v14 = vrot.slane %v1765_v0, %v14962_v53 }
 0x263   :  { %10065 = vmatprep.subr.bf16.mxu0 %v13956_v21  ;;  %10598 = vmatprep.subr.bf16.mxu1 %v13958_v22  ;;  %v1301_v21 = vld [vmem:[%s20151_s1 + $0x2780] sm:$0xff] }
 0x264   :  { %v1305_v22 = vld [vmem:[%s20151_s1 + $0x27a0] sm:$0xff] }
 0x265   :  { %v14003_v40 = vcombine.low %v1301_v21, %v1305_v22  ;;  %v1337_v1 = vld [vmem:[%s20151_s1 + $0x28a0] sm:$0xff] }
 0x266   :  { %10066 = vmatpush1.bf16.msra.mxu0 %v13955_v63  ;;  %10599 = vmatpush1.bf16.msra.mxu1 %v13957_v30  ;;  %v14004_v63 = vcombine.high %v1301_v21, %v1305_v22  ;;  %v14006_v30 = vcombine.high %v1302_v24, %v1306_v25  ;;  %v14036_v21 = vcombine.high %v1333_v13, %v1337_v1  ;;  %v1369_v0 = vld [vmem:[%s20151_s1 + $0x29a0] sm:$0xff] }
 0x267   :  { %10067 = vmatprep.subr.bf16.mxu0 %v13964_v32  ;;  %10600 = vmatprep.subr.bf16.mxu1 %v13966_v33  ;;  %v1309_v32 = vld [vmem:[%s20151_s1 + $0x27c0] sm:$0xff] }
 0x268   :  { %v1313_v33 = vld [vmem:[%s20151_s1 + $0x27e0] sm:$0xff] }
 0x269   :  { %v14011_v52 = vcombine.low %v1309_v32, %v1313_v33 }
 0x26a   :  { %10068 = vmatpush1.bf16.msra.mxu0 %v13963_v41  ;;  %10601 = vmatpush1.bf16.msra.mxu1 %v13965_v42  ;;  %v14005_v41 = vcombine.low %v1302_v24, %v1306_v25  ;;  %v14012_v42 = vcombine.high %v1309_v32, %v1313_v33  ;;  %v1341_v24 = vld [vmem:[%s20151_s1 + $0x28c0] sm:$0xff] }
 0x26b   :  { %10069 = vmatprep.subr.bf16.mxu0 %v13972_v45  ;;  %10602 = vmatprep.subr.bf16.mxu1 %v13974_v46  ;;  %v14014_v45 = vcombine.high %v1310_v36, %v1314_v39  ;;  %v1321_v46 = vld [vmem:[%s20151_s1 + $0x2820] sm:$0xff] }
 0x26c   :  { %v1345_v25 = vld [vmem:[%s20151_s1 + $0x28e0] sm:$0xff] }
 0x26d   :  { %v14044_v32 = vcombine.high %v1341_v24, %v1345_v25 }
 0x26e   :  { %10070 = vmatpush1.bf16.msra.mxu0 %v13971_v54  ;;  %10603 = vmatpush1.bf16.msra.mxu1 %v13973_v55  ;;  %v14013_v54 = vcombine.low %v1310_v36, %v1314_v39  ;;  %v14020_v55 = vcombine.high %v1317_v34, %v1321_v46  ;;  %v1353_v36 = vld [vmem:[%s20151_s1 + $0x2920] sm:$0xff]  ;;  %v1350_v39 = vld [vmem:[%s20151_s1 + $0x2908] sm:$0xff] }
 0x26f   :  { %10071 = vmatprep.subr.bf16.mxu0 %v13980_v60  ;;  %10604 = vmatprep.subr.bf16.mxu1 %v13982_v8  ;;  %v14022_v60 = vcombine.high %v1318_v49, %v1322_v50  ;;  %v1325_v8 = vld [vmem:[%s20151_s1 + $0x2840] sm:$0xff] }
 0x272   :  { %10072 = vmatpush1.bf16.msra.mxu0 %v13979_v44  ;;  %10605 = vmatpush1.bf16.msra.mxu1 %v13981_v3  ;;  %v1330_v44 = vld [vmem:[%s20151_s1 + $0x2868] sm:$0xff]  ;;  %v14019_v3 = vcombine.low %v1317_v34, %v1321_v46  ;;  %v1357_v46 = vld [vmem:[%s20151_s1 + $0x2940] sm:$0xff] }
 0x273   :  { %10073 = vmatprep.subr.bf16.mxu0 %v13988_v10  ;;  %10606 = vmatprep.subr.bf16.mxu1 %v13990_v11  ;;  %v14021_v10 = vcombine.low %v1318_v49, %v1322_v50  ;;  %v14028_v11 = vcombine.high %v1325_v8, %v1329_v61  ;;  %v14030_v12 = vcombine.high %v1326_v28, %v1330_v44  ;;  %v1361_v49 = vld [vmem:[%s20151_s1 + $0x2960] sm:$0xff]  ;;  %v1358_v50 = vld [vmem:[%s20151_s1 + $0x2948] sm:$0xff] }
 0x276   :  { %10074 = vmatpush1.bf16.msra.mxu0 %v13987_v15  ;;  %10607 = vmatpush1.bf16.msra.mxu1 %v13989_v16  ;;  %v1334_v15 = vld [vmem:[%s20151_s1 + $0x2888] sm:$0xff] }
 0x277   :  { %10075 = vmatprep.subr.bf16.mxu0 %v13996_v18  ;;  %10608 = vmatprep.subr.bf16.mxu1 %v13998_v20  ;;  %v1338_v16 = vld [vmem:[%s20151_s1 + $0x28a8] sm:$0xff]  ;;  %v14027_v18 = vcombine.low %v1325_v8, %v1329_v61  ;;  %v14029_v20 = vcombine.low %v1326_v28, %v1330_v44  ;;  %v1365_v61 = vld [vmem:[%s20151_s1 + $0x2980] sm:$0xff] }
 0x278   :  { %v14038_v22 = vcombine.high %v1334_v15, %v1338_v16  ;;  %v1366_v28 = vld [vmem:[%s20151_s1 + $0x2988] sm:$0xff] }
 0x279   :  { %v1370_v44 = vld [vmem:[%s20151_s1 + $0x29a8] sm:$0xff] }
 0x27a   :  { %10076 = vmatpush1.bf16.msra.mxu0 %v13995_v26  ;;  %10609 = vmatpush1.bf16.msra.mxu1 %v13997_v27  ;;  %v1342_v26 = vld [vmem:[%s20151_s1 + $0x28c8] sm:$0xff] }
 0x27b   :  { %10077 = vmatprep.subr.bf16.mxu0 %v14004_v63  ;;  %10610 = vmatprep.subr.bf16.mxu1 %v14006_v30  ;;  %v1346_v27 = vld [vmem:[%s20151_s1 + $0x28e8] sm:$0xff]  ;;  %v14035_v63 = vcombine.low %v1333_v13, %v1337_v1  ;;  %v14037_v30 = vcombine.low %v1334_v15, %v1338_v16  ;;  %v1373_v13 = vld [vmem:[%s20151_s1 + $0x29c0] sm:$0xff] }
 0x27c   :  { %v14046_v33 = vcombine.high %v1342_v26, %v1346_v27  ;;  %v1377_v1 = vld [vmem:[%s20151_s1 + $0x29e0] sm:$0xff]  ;;  %v1374_v15 = vld [vmem:[%s20151_s1 + $0x29c8] sm:$0xff] }
 0x27d   :  { %v1378_v16 = vld [vmem:[%s20151_s1 + $0x29e8] sm:$0xff] }
 0x27e   :  { %10078 = vmatpush1.bf16.msra.mxu0 %v14003_v40  ;;  %10611 = vmatpush1.bf16.msra.mxu1 %v14005_v41  ;;  %v1354_v40 = vld [vmem:[%s20151_s1 + $0x2928] sm:$0xff]  ;;  %v14043_v41 = vcombine.low %v1341_v24, %v1345_v25  ;;  %v1381_v24 = vld [vmem:[%s20151_s1 + $0x2a00] sm:$0xff] }
 0x27f   :  { %10079 = vmatprep.subr.bf16.mxu0 %v14012_v42  ;;  %10612 = vmatprep.subr.bf16.mxu1 %v14014_v45  ;;  %v14045_v42 = vcombine.low %v1342_v26, %v1346_v27  ;;  %v14052_v45 = vcombine.high %v1349_v35, %v1353_v36  ;;  %v14054_v34 = vcombine.high %v1350_v39, %v1354_v40  ;;  %v1385_v25 = vld [vmem:[%s20151_s1 + $0x2a20] sm:$0xff]  ;;  %v1382_v26 = vld [vmem:[%s20151_s1 + $0x2a08] sm:$0xff] }
 0x280   :  { %v1386_v27 = vld [vmem:[%s20151_s1 + $0x2a28] sm:$0xff] }
 0x282   :  { %10080 = vmatpush1.bf16.msra.mxu0 %v14011_v52  ;;  %10613 = vmatpush1.bf16.msra.mxu1 %v14013_v54  ;;  %v1362_v52 = vld [vmem:[%s20151_s1 + $0x2968] sm:$0xff]  ;;  %v14051_v54 = vcombine.low %v1349_v35, %v1353_v36  ;;  %v1389_v35 = vld [vmem:[%s20151_s1 + $0x2a40] sm:$0xff] }
 0x283   :  { %10090 = vmatprep.subr.bf16.mxu0 %v14020_v55  ;;  %10623 = vmatprep.subr.bf16.mxu1 %v14022_v60  ;;  %v14053_v55 = vcombine.low %v1350_v39, %v1354_v40  ;;  %v14060_v60 = vcombine.high %v1357_v46, %v1361_v49  ;;  %v14062_v8 = vcombine.high %v1358_v50, %v1362_v52  ;;  %v1393_v36 = vld [vmem:[%s20151_s1 + $0x2a60] sm:$0xff]  ;;  %v1390_v39 = vld [vmem:[%s20151_s1 + $0x2a48] sm:$0xff] }
 0x284   :  { %v1394_v40 = vld [vmem:[%s20151_s1 + $0x2a68] sm:$0xff] }
 0x285   :  { %10082 = vmatmul.mubr.bf16.vlgmr.msra.gmra.mrb[0].mxu0 %v16989_v2  ;;  %10615 = vmatmul.mubr.bf16.vlgmr.msra.gmra.mrb[0].mxu1 %v16989_v2 }
 0x286   :  { %10091 = vmatpush1.bf16.msra.mxu0 %v14019_v3  ;;  %10624 = vmatpush1.bf16.msra.mxu1 %v14021_v10  ;;  %v14059_v3 = vcombine.low %v1357_v46, %v1361_v49  ;;  %v14061_v10 = vcombine.low %v1358_v50, %v1362_v52  ;;  %v1397_v46 = vld [vmem:[%s20151_s1 + $0x2a80] sm:$0xff]  ;;  %v1398_v50 = vld [vmem:[%s20151_s1 + $0x2a88] sm:$0xff] }
 0x287   :  { %10092 = vmatprep.subr.bf16.mxu0 %v14028_v11  ;;  %10625 = vmatprep.subr.bf16.mxu1 %v14030_v12  ;;  %v14068_v11 = vcombine.high %v1365_v61, %v1369_v0  ;;  %v14070_v12 = vcombine.high %v1366_v28, %v1370_v44  ;;  %v1401_v49 = vld [vmem:[%s20151_s1 + $0x2aa0] sm:$0xff]  ;;  %v1402_v52 = vld [vmem:[%s20151_s1 + $0x2aa8] sm:$0xff] }
 0x288   :  { %10122 = vmatprep.mubr.bf16.mxu0 %v17004_v14  ;;  %10655 = vmatprep.mubr.bf16.mxu1 %v17004_v14 }
 0x28a   :  { %10093 = vmatpush1.bf16.msra.mxu0 %v14027_v18  ;;  %10626 = vmatpush1.bf16.msra.mxu1 %v14029_v20  ;;  %v14067_v18 = vcombine.low %v1365_v61, %v1369_v0  ;;  %v14069_v20 = vcombine.low %v1366_v28, %v1370_v44  ;;  %v1405_v61 = vld [vmem:[%s20151_s1 + $0x2ac0] sm:$0xff]  ;;  %v1406_v28 = vld [vmem:[%s20151_s1 + $0x2ac8] sm:$0xff] }
 0x28b   :  { %10094 = vmatprep.subr.bf16.mxu0 %v14036_v21  ;;  %10627 = vmatprep.subr.bf16.mxu1 %v14038_v22  ;;  %v14076_v21 = vcombine.high %v1373_v13, %v1377_v1  ;;  %v14078_v22 = vcombine.high %v1374_v15, %v1378_v16  ;;  %v1409_v0 = vld [vmem:[%s20151_s1 + $0x2ae0] sm:$0xff]  ;;  %v1410_v44 = vld [vmem:[%s20151_s1 + $0x2ae8] sm:$0xff] }
 0x28e   :  { %10095 = vmatpush1.bf16.msra.mxu0 %v14035_v63  ;;  %10628 = vmatpush1.bf16.msra.mxu1 %v14037_v30  ;;  %v14075_v63 = vcombine.low %v1373_v13, %v1377_v1  ;;  %v14077_v30 = vcombine.low %v1374_v15, %v1378_v16  ;;  %v1413_v13 = vld [vmem:[%s20151_s1 + $0x2b00] sm:$0xff]  ;;  %v1414_v15 = vld [vmem:[%s20151_s1 + $0x2b08] sm:$0xff] }
 0x28f   :  { %10096 = vmatprep.subr.bf16.mxu0 %v14044_v32  ;;  %10629 = vmatprep.subr.bf16.mxu1 %v14046_v33  ;;  %v14084_v32 = vcombine.high %v1381_v24, %v1385_v25  ;;  %v14086_v33 = vcombine.high %v1382_v26, %v1386_v27  ;;  %v1417_v1 = vld [vmem:[%s20151_s1 + $0x2b20] sm:$0xff]  ;;  %v1418_v16 = vld [vmem:[%s20151_s1 + $0x2b28] sm:$0xff] }
 0x292   :  { %10097 = vmatpush1.bf16.msra.mxu0 %v14043_v41  ;;  %10630 = vmatpush1.bf16.msra.mxu1 %v14045_v42  ;;  %v14083_v41 = vcombine.low %v1381_v24, %v1385_v25  ;;  %v14085_v42 = vcombine.low %v1382_v26, %v1386_v27  ;;  %v1421_v24 = vld [vmem:[%s20151_s1 + $0x2b40] sm:$0xff]  ;;  %v1422_v26 = vld [vmem:[%s20151_s1 + $0x2b48] sm:$0xff] }
 0x293   :  { %10098 = vmatprep.subr.bf16.mxu0 %v14052_v45  ;;  %10631 = vmatprep.subr.bf16.mxu1 %v14054_v34  ;;  %v14092_v45 = vcombine.high %v1389_v35, %v1393_v36  ;;  %v14094_v34 = vcombine.high %v1390_v39, %v1394_v40  ;;  %v1425_v25 = vld [vmem:[%s20151_s1 + $0x2b60] sm:$0xff]  ;;  %v1426_v27 = vld [vmem:[%s20151_s1 + $0x2b68] sm:$0xff] }
 0x296   :  { %10099 = vmatpush1.bf16.msra.mxu0 %v14051_v54  ;;  %10632 = vmatpush1.bf16.msra.mxu1 %v14053_v55  ;;  %v14091_v54 = vcombine.low %v1389_v35, %v1393_v36  ;;  %v14093_v55 = vcombine.low %v1390_v39, %v1394_v40  ;;  %v1429_v35 = vld [vmem:[%s20151_s1 + $0x2b80] sm:$0xff]  ;;  %v1430_v39 = vld [vmem:[%s20151_s1 + $0x2b88] sm:$0xff] }
 0x297   :  { %10100 = vmatprep.subr.bf16.mxu0 %v14060_v60  ;;  %10633 = vmatprep.subr.bf16.mxu1 %v14062_v8  ;;  %v14100_v60 = vcombine.high %v1397_v46, %v1401_v49  ;;  %v14102_v8 = vcombine.high %v1398_v50, %v1402_v52  ;;  %v1433_v36 = vld [vmem:[%s20151_s1 + $0x2ba0] sm:$0xff]  ;;  %v1434_v40 = vld [vmem:[%s20151_s1 + $0x2ba8] sm:$0xff] }
 0x29a   :  { %10101 = vmatpush1.bf16.msra.mxu0 %v14059_v3  ;;  %10634 = vmatpush1.bf16.msra.mxu1 %v14061_v10  ;;  %v14099_v3 = vcombine.low %v1397_v46, %v1401_v49  ;;  %v14101_v10 = vcombine.low %v1398_v50, %v1402_v52  ;;  %v1437_v46 = vld [vmem:[%s20151_s1 + $0x2bc0] sm:$0xff]  ;;  %v1438_v50 = vld [vmem:[%s20151_s1 + $0x2bc8] sm:$0xff] }
 0x29b   :  { %10102 = vmatprep.subr.bf16.mxu0 %v14068_v11  ;;  %10635 = vmatprep.subr.bf16.mxu1 %v14070_v12  ;;  %v14108_v11 = vcombine.high %v1405_v61, %v1409_v0  ;;  %v14110_v12 = vcombine.high %v1406_v28, %v1410_v44  ;;  %v1441_v49 = vld [vmem:[%s20151_s1 + $0x2be0] sm:$0xff]  ;;  %v1442_v52 = vld [vmem:[%s20151_s1 + $0x2be8] sm:$0xff] }
 0x29e   :  { %10103 = vmatpush1.bf16.msra.mxu0 %v14067_v18  ;;  %10636 = vmatpush1.bf16.msra.mxu1 %v14069_v20  ;;  %v14107_v18 = vcombine.low %v1405_v61, %v1409_v0  ;;  %v14109_v20 = vcombine.low %v1406_v28, %v1410_v44  ;;  %v1445_v61 = vld [vmem:[%s20151_s1 + $0x2c00] sm:$0xff]  ;;  %v1446_v28 = vld [vmem:[%s20151_s1 + $0x2c08] sm:$0xff] }
 0x29f   :  { %10104 = vmatprep.subr.bf16.mxu0 %v14076_v21  ;;  %10637 = vmatprep.subr.bf16.mxu1 %v14078_v22  ;;  %v14116_v21 = vcombine.high %v1413_v13, %v1417_v1  ;;  %v14118_v22 = vcombine.high %v1414_v15, %v1418_v16  ;;  %v1449_v0 = vld [vmem:[%s20151_s1 + $0x2c20] sm:$0xff]  ;;  %v1450_v44 = vld [vmem:[%s20151_s1 + $0x2c28] sm:$0xff] }
 0x2a2   :  { %10105 = vmatpush1.bf16.msra.mxu0 %v14075_v63  ;;  %10638 = vmatpush1.bf16.msra.mxu1 %v14077_v30  ;;  %v14115_v63 = vcombine.low %v1413_v13, %v1417_v1  ;;  %v14117_v30 = vcombine.low %v1414_v15, %v1418_v16  ;;  %v1453_v13 = vld [vmem:[%s20151_s1 + $0x2c40] sm:$0xff]  ;;  %v17192_v15 = vrot.slane %v16971_v47, %v14962_v53  ;;  %v1454_v16 = vld [vmem:[%s20151_s1 + $0x2c48] sm:$0xff] }
 0x2a3   :  { %10106 = vmatprep.subr.bf16.mxu0 %v14084_v32  ;;  %10639 = vmatprep.subr.bf16.mxu1 %v14086_v33  ;;  %v14124_v32 = vcombine.high %v1421_v24, %v1425_v25  ;;  %v14126_v33 = vcombine.high %v1422_v26, %v1426_v27  ;;  %v1457_v1 = vld [vmem:[%s20151_s1 + $0x2c60] sm:$0xff] }
 0x2a4   :  { %v1461_v47 = vld [vmem:[%s20151_s1 + $0x2c80] sm:$0xff] }
 0x2a6   :  { %10107 = vmatpush1.bf16.msra.mxu0 %v14083_v41  ;;  %10640 = vmatpush1.bf16.msra.mxu1 %v14085_v42  ;;  %v14123_v41 = vcombine.low %v1421_v24, %v1425_v25  ;;  %v14125_v42 = vcombine.low %v1422_v26, %v1426_v27  ;;  %v1465_v25 = vld [vmem:[%s20151_s1 + $0x2ca0] sm:$0xff]  ;;  %v17208_v26 = vcombine.high %v17004_v14, %v17004_v14  ;;  %v1462_v27 = vld [vmem:[%s20151_s1 + $0x2c88] sm:$0xff] }
 0x2a7   :  { %10108 = vmatprep.subr.bf16.mxu0 %v14092_v45  ;;  %10641 = vmatprep.subr.bf16.mxu1 %v14094_v34  ;;  %v14132_v45 = vcombine.high %v1429_v35, %v1433_v36  ;;  %v14134_v34 = vcombine.high %v1430_v39, %v1434_v40 }
 0x2aa   :  { %10109 = vmatpush1.bf16.msra.mxu0 %v14091_v54  ;;  %10642 = vmatpush1.bf16.msra.mxu1 %v14093_v55  ;;  %v14131_v54 = vcombine.low %v1429_v35, %v1433_v36  ;;  %v14133_v55 = vcombine.low %v1430_v39, %v1434_v40  ;;  %v1469_v36 = vld [vmem:[%s20151_s1 + $0x2cc0] sm:$0xff]  ;;  %v1470_v40 = vld [vmem:[%s20151_s1 + $0x2cc8] sm:$0xff] }
 0x2ab   :  { %10110 = vmatprep.subr.bf16.mxu0 %v14100_v60  ;;  %10643 = vmatprep.subr.bf16.mxu1 %v14102_v8  ;;  %v14140_v60 = vcombine.high %v1437_v46, %v1441_v49  ;;  %v14142_v8 = vcombine.high %v1438_v50, %v1442_v52  ;;  %v1473_v39 = vld [vmem:[%s20151_s1 + $0x2ce0] sm:$0xff] }
 0x2ae   :  { %10111 = vmatpush1.bf16.msra.mxu0 %v14099_v3  ;;  %10644 = vmatpush1.bf16.msra.mxu1 %v14101_v10  ;;  %v14139_v3 = vcombine.low %v1437_v46, %v1441_v49  ;;  %v14141_v10 = vcombine.low %v1438_v50, %v1442_v52  ;;  %v1477_v49 = vld [vmem:[%s20151_s1 + $0x2d00] sm:$0xff]  ;;  %v1478_v52 = vld [vmem:[%s20151_s1 + $0x2d08] sm:$0xff] }
 0x2af   :  { %10112 = vmatprep.subr.bf16.mxu0 %v14108_v11  ;;  %10645 = vmatprep.subr.bf16.mxu1 %v14110_v12  ;;  %v14148_v11 = vcombine.high %v1445_v61, %v1449_v0  ;;  %v14150_v12 = vcombine.high %v1446_v28, %v1450_v44  ;;  %v1481_v50 = vld [vmem:[%s20151_s1 + $0x2d20] sm:$0xff] }
 0x2b2   :  { %10113 = vmatpush1.bf16.msra.mxu0 %v14107_v18  ;;  %10646 = vmatpush1.bf16.msra.mxu1 %v14109_v20  ;;  %v1458_v18 = vld [vmem:[%s20151_s1 + $0x2c68] sm:$0xff]  ;;  %v14147_v20 = vcombine.low %v1445_v61, %v1449_v0  ;;  %v1485_v0 = vld [vmem:[%s20151_s1 + $0x2d40] sm:$0xff] }
 0x2b3   :  { %10114 = vmatprep.subr.bf16.mxu0 %v14116_v21  ;;  %10647 = vmatprep.subr.bf16.mxu1 %v14118_v22  ;;  %v14149_v21 = vcombine.low %v1446_v28, %v1450_v44  ;;  %v14156_v22 = vcombine.high %v1453_v13, %v1457_v1  ;;  %v14158_v24 = vcombine.high %v1454_v16, %v1458_v18  ;;  %v1489_v28 = vld [vmem:[%s20151_s1 + $0x2d60] sm:$0xff]  ;;  %v1486_v44 = vld [vmem:[%s20151_s1 + $0x2d48] sm:$0xff] }
 0x2b6   :  { %10115 = vmatpush1.bf16.msra.mxu0 %v14115_v63  ;;  %10648 = vmatpush1.bf16.msra.mxu1 %v14117_v30  ;;  %v1466_v63 = vld [vmem:[%s20151_s1 + $0x2ca8] sm:$0xff]  ;;  %v14155_v30 = vcombine.low %v1453_v13, %v1457_v1  ;;  %v1493_v1 = vld [vmem:[%s20151_s1 + $0x2d80] sm:$0xff] }
 0x2b7   :  { %10116 = vmatprep.subr.bf16.mxu0 %v14124_v32  ;;  %10649 = vmatprep.subr.bf16.mxu1 %v14126_v33  ;;  %v14157_v32 = vcombine.low %v1454_v16, %v1458_v18  ;;  %v14164_v33 = vcombine.high %v1461_v47, %v1465_v25  ;;  %v14166_v35 = vcombine.high %v1462_v27, %v1466_v63  ;;  %v1497_v16 = vld [vmem:[%s20151_s1 + $0x2da0] sm:$0xff]  ;;  %v1494_v18 = vld [vmem:[%s20151_s1 + $0x2d88] sm:$0xff] }
 0x2ba   :  { %10117 = vmatpush1.bf16.msra.mxu0 %v14123_v41  ;;  %10650 = vmatpush1.bf16.msra.mxu1 %v14125_v42  ;;  %v1474_v41 = vld [vmem:[%s20151_s1 + $0x2ce8] sm:$0xff]  ;;  %v14163_v42 = vcombine.low %v1461_v47, %v1465_v25  ;;  %v1501_v25 = vld [vmem:[%s20151_s1 + $0x2dc0] sm:$0xff] }
 0x2bb   :  { %10118 = vmatprep.subr.bf16.mxu0 %v14132_v45  ;;  %10651 = vmatprep.subr.bf16.mxu1 %v14134_v34  ;;  %v14165_v45 = vcombine.low %v1462_v27, %v1466_v63  ;;  %v14172_v34 = vcombine.high %v1469_v36, %v1473_v39  ;;  %v14174_v46 = vcombine.high %v1470_v40, %v1474_v41  ;;  %v1505_v27 = vld [vmem:[%s20151_s1 + $0x2de0] sm:$0xff]  ;;  %v1502_v63 = vld [vmem:[%s20151_s1 + $0x2dc8] sm:$0xff] }
 0x2be   :  { %10119 = vmatpush1.bf16.msra.mxu0 %v14131_v54  ;;  %10652 = vmatpush1.bf16.msra.mxu1 %v14133_v55  ;;  %v1482_v54 = vld [vmem:[%s20151_s1 + $0x2d28] sm:$0xff]  ;;  %v14171_v55 = vcombine.low %v1469_v36, %v1473_v39  ;;  %v1509_v39 = vld [vmem:[%s20151_s1 + $0x2e00] sm:$0xff] }
 0x2bf   :  { %10120 = vmatprep.subr.bf16.mxu0 %v14140_v60  ;;  %10653 = vmatprep.subr.bf16.mxu1 %v14142_v8  ;;  %v14173_v60 = vcombine.low %v1470_v40, %v1474_v41  ;;  %v14180_v8 = vcombine.high %v1477_v49, %v1481_v50  ;;  %v14182_v61 = vcombine.high %v1478_v52, %v1482_v54  ;;  %v1513_v40 = vld [vmem:[%s20151_s1 + $0x2e20] sm:$0xff]  ;;  %v1510_v41 = vld [vmem:[%s20151_s1 + $0x2e08] sm:$0xff] }
 0x2c2   :  { %10121 = vmatpush1.bf16.msra.mxu0 %v14139_v3  ;;  %10654 = vmatpush1.bf16.msra.mxu1 %v14141_v10  ;;  %v1490_v3 = vld [vmem:[%s20151_s1 + $0x2d68] sm:$0xff]  ;;  %v14179_v10 = vcombine.low %v1477_v49, %v1481_v50  ;;  %v1517_v50 = vld [vmem:[%s20151_s1 + $0x2e40] sm:$0xff] }
 0x2c3   :  { %10131 = vmatprep.subr.bf16.mxu0 %v14148_v11  ;;  %10664 = vmatprep.subr.bf16.mxu1 %v14150_v12  ;;  %v14181_v11 = vcombine.low %v1478_v52, %v1482_v54  ;;  %v14188_v12 = vcombine.high %v1485_v0, %v1489_v28  ;;  %v14190_v13 = vcombine.high %v1486_v44, %v1490_v3  ;;  %v1521_v52 = vld [vmem:[%s20151_s1 + $0x2e60] sm:$0xff]  ;;  %v1518_v54 = vld [vmem:[%s20151_s1 + $0x2e48] sm:$0xff] }
 0x2c5   :  { %10123 = vmatmul.mubr.bf16.vlgmr.msra.gmra.mrb[0].mxu0 %v17192_v15  ;;  %10656 = vmatmul.mubr.bf16.vlgmr.msra.gmra.mrb[0].mxu1 %v17192_v15 }
 0x2c6   :  { %10132 = vmatpush1.bf16.msra.mxu0 %v14147_v20  ;;  %10665 = vmatpush1.bf16.msra.mxu1 %v14149_v21  ;;  %v1498_v20 = vld [vmem:[%s20151_s1 + $0x2da8] sm:$0xff]  ;;  %v14187_v21 = vcombine.low %v1485_v0, %v1489_v28  ;;  %v1525_v28 = vld [vmem:[%s20151_s1 + $0x2e80] sm:$0xff] }
 0x2c7   :  { %10133 = vmatprep.subr.bf16.mxu0 %v14156_v22  ;;  %10666 = vmatprep.subr.bf16.mxu1 %v14158_v24  ;;  %v14189_v22 = vcombine.low %v1486_v44, %v1490_v3  ;;  %v14196_v24 = vcombine.high %v1493_v1, %v1497_v16  ;;  %v14198_v47 = vcombine.high %v1494_v18, %v1498_v20  ;;  %v1529_v44 = vld [vmem:[%s20151_s1 + $0x2ea0] sm:$0xff]  ;;  %v1526_v3 = vld [vmem:[%s20151_s1 + $0x2e88] sm:$0xff] }
 0x2c8   :  { %10163 = vmatprep.mubr.bf16.mxu0 %v17208_v26  ;;  %10696 = vmatprep.mubr.bf16.mxu1 %v17208_v26 }
 0x2ca   :  { %10134 = vmatpush1.bf16.msra.mxu0 %v14155_v30  ;;  %10667 = vmatpush1.bf16.msra.mxu1 %v14157_v32  ;;  %v1506_v30 = vld [vmem:[%s20151_s1 + $0x2de8] sm:$0xff]  ;;  %v14195_v32 = vcombine.low %v1493_v1, %v1497_v16  ;;  %v1533_v16 = vld [vmem:[%s20151_s1 + $0x2ec0] sm:$0xff] }
 0x2cb   :  { %10135 = vmatprep.subr.bf16.mxu0 %v14164_v33  ;;  %10668 = vmatprep.subr.bf16.mxu1 %v14166_v35  ;;  %v14197_v33 = vcombine.low %v1494_v18, %v1498_v20  ;;  %v14204_v35 = vcombine.high %v1501_v25, %v1505_v27  ;;  %v14206_v36 = vcombine.high %v1502_v63, %v1506_v30  ;;  %v1537_v18 = vld [vmem:[%s20151_s1 + $0x2ee0] sm:$0xff]  ;;  %v1534_v20 = vld [vmem:[%s20151_s1 + $0x2ec8] sm:$0xff] }
 0x2ce   :  { %10136 = vmatpush1.bf16.msra.mxu0 %v14163_v42  ;;  %10669 = vmatpush1.bf16.msra.mxu1 %v14165_v45  ;;  %v1514_v42 = vld [vmem:[%s20151_s1 + $0x2e28] sm:$0xff]  ;;  %v14203_v45 = vcombine.low %v1501_v25, %v1505_v27  ;;  %v1541_v27 = vld [vmem:[%s20151_s1 + $0x2f00] sm:$0xff] }
 0x2cf   :  { %10137 = vmatprep.subr.bf16.mxu0 %v14172_v34  ;;  %10670 = vmatprep.subr.bf16.mxu1 %v14174_v46  ;;  %v14205_v34 = vcombine.low %v1502_v63, %v1506_v30  ;;  %v14212_v46 = vcombine.high %v1509_v39, %v1513_v40  ;;  %v14214_v49 = vcombine.high %v1510_v41, %v1514_v42  ;;  %v1545_v63 = vld [vmem:[%s20151_s1 + $0x2f20] sm:$0xff]  ;;  %v1542_v30 = vld [vmem:[%s20151_s1 + $0x2f08] sm:$0xff] }
 0x2d2   :  { %10138 = vmatpush1.bf16.msra.mxu0 %v14171_v55  ;;  %10671 = vmatpush1.bf16.msra.mxu1 %v14173_v60  ;;  %v1522_v55 = vld [vmem:[%s20151_s1 + $0x2e68] sm:$0xff]  ;;  %v14211_v60 = vcombine.low %v1509_v39, %v1513_v40  ;;  %v1549_v40 = vld [vmem:[%s20151_s1 + $0x2f40] sm:$0xff] }
 0x2d3   :  { %10139 = vmatprep.subr.bf16.mxu0 %v14180_v8  ;;  %10672 = vmatprep.subr.bf16.mxu1 %v14182_v61  ;;  %v14213_v8 = vcombine.low %v1510_v41, %v1514_v42  ;;  %v14220_v61 = vcombine.high %v1517_v50, %v1521_v52  ;;  %v14222_v0 = vcombine.high %v1518_v54, %v1522_v55  ;;  %v1553_v41 = vld [vmem:[%s20151_s1 + $0x2f60] sm:$0xff]  ;;  %v1550_v42 = vld [vmem:[%s20151_s1 + $0x2f48] sm:$0xff] }
 0x2d6   :  { %10140 = vmatpush1.bf16.msra.mxu0 %v14179_v10  ;;  %10673 = vmatpush1.bf16.msra.mxu1 %v14181_v11  ;;  %v1530_v10 = vld [vmem:[%s20151_s1 + $0x2ea8] sm:$0xff]  ;;  %v14219_v11 = vcombine.low %v1517_v50, %v1521_v52  ;;  %v1557_v52 = vld [vmem:[%s20151_s1 + $0x2f80] sm:$0xff] }
 0x2d7   :  { %10141 = vmatprep.subr.bf16.mxu0 %v14188_v12  ;;  %10674 = vmatprep.subr.bf16.mxu1 %v14190_v13  ;;  %v14221_v12 = vcombine.low %v1518_v54, %v1522_v55  ;;  %v14228_v13 = vcombine.high %v1525_v28, %v1529_v44  ;;  %v14230_v1 = vcombine.high %v1526_v3, %v1530_v10  ;;  %v1561_v54 = vld [vmem:[%s20151_s1 + $0x2fa0] sm:$0xff]  ;;  %v1558_v55 = vld [vmem:[%s20151_s1 + $0x2f88] sm:$0xff] }
 0x2da   :  { %10142 = vmatpush1.bf16.msra.mxu0 %v14187_v21  ;;  %10675 = vmatpush1.bf16.msra.mxu1 %v14189_v22  ;;  %v1538_v21 = vld [vmem:[%s20151_s1 + $0x2ee8] sm:$0xff]  ;;  %v14227_v22 = vcombine.low %v1525_v28, %v1529_v44  ;;  %v1565_v44 = vld [vmem:[%s20151_s1 + $0x2fc0] sm:$0xff] }
 0x2db   :  { %10143 = vmatprep.subr.bf16.mxu0 %v14196_v24  ;;  %10676 = vmatprep.subr.bf16.mxu1 %v14198_v47  ;;  %v14229_v24 = vcombine.low %v1526_v3, %v1530_v10  ;;  %v14236_v47 = vcombine.high %v1533_v16, %v1537_v18  ;;  %v14238_v25 = vcombine.high %v1534_v20, %v1538_v21  ;;  %v1569_v3 = vld [vmem:[%s20151_s1 + $0x2fe0] sm:$0xff]  ;;  %v1566_v10 = vld [vmem:[%s20151_s1 + $0x2fc8] sm:$0xff] }
 0x2de   :  { %10144 = vmatpush1.bf16.msra.mxu0 %v14195_v32  ;;  %10677 = vmatpush1.bf16.msra.mxu1 %v14197_v33  ;;  %v1546_v32 = vld [vmem:[%s20151_s1 + $0x2f28] sm:$0xff]  ;;  %v14235_v33 = vcombine.low %v1533_v16, %v1537_v18  ;;  %v1573_v18 = vld [vmem:[%s20151_s1 + $0x3000] sm:$0xff] }
 0x2df   :  { %10145 = vmatprep.subr.bf16.mxu0 %v14204_v35  ;;  %10678 = vmatprep.subr.bf16.mxu1 %v14206_v36  ;;  %v14237_v35 = vcombine.low %v1534_v20, %v1538_v21  ;;  %v14244_v36 = vcombine.high %v1541_v27, %v1545_v63  ;;  %v14246_v39 = vcombine.high %v1542_v30, %v1546_v32  ;;  %v1577_v20 = vld [vmem:[%s20151_s1 + $0x3020] sm:$0xff]  ;;  %v1574_v21 = vld [vmem:[%s20151_s1 + $0x3008] sm:$0xff] }
 0x2e2   :  { %10146 = vmatpush1.bf16.msra.mxu0 %v14203_v45  ;;  %10679 = vmatpush1.bf16.msra.mxu1 %v14205_v34  ;;  %v1554_v45 = vld [vmem:[%s20151_s1 + $0x2f68] sm:$0xff]  ;;  %v14243_v34 = vcombine.low %v1541_v27, %v1545_v63  ;;  %v1581_v63 = vld [vmem:[%s20151_s1 + $0x3040] sm:$0xff] }
 0x2e3   :  { %10147 = vmatprep.subr.bf16.mxu0 %v14212_v46  ;;  %10680 = vmatprep.subr.bf16.mxu1 %v14214_v49  ;;  %v14245_v46 = vcombine.low %v1542_v30, %v1546_v32  ;;  %v14252_v49 = vcombine.high %v1549_v40, %v1553_v41  ;;  %v14254_v50 = vcombine.high %v1550_v42, %v1554_v45  ;;  %v1585_v30 = vld [vmem:[%s20151_s1 + $0x3060] sm:$0xff] }
 0x2e4   :  { %v17396_v32 = vcombine.high %v17192_v15, %v17192_v15 }
 0x2e6   :  { %10148 = vmatpush1.bf16.msra.mxu0 %v14211_v60  ;;  %10681 = vmatpush1.bf16.msra.mxu1 %v14213_v8  ;;  %v1562_v60 = vld [vmem:[%s20151_s1 + $0x2fa8] sm:$0xff]  ;;  %v14251_v8 = vcombine.low %v1549_v40, %v1553_v41  ;;  %v14284_v40 = vcombine.high %v1581_v63, %v1585_v30 }
 0x2e7   :  { %10149 = vmatprep.subr.bf16.mxu0 %v14220_v61  ;;  %10682 = vmatprep.subr.bf16.mxu1 %v14222_v0  ;;  %v14253_v61 = vcombine.low %v1550_v42, %v1554_v45  ;;  %v14260_v0 = vcombine.high %v1557_v52, %v1561_v54  ;;  %v14262_v28 = vcombine.high %v1558_v55, %v1562_v60  ;;  %v1589_v42 = vld [vmem:[%s20151_s1 + $0x3080] sm:$0xff] }
 0x2e8   :  { %v1593_v45 = vld [vmem:[%s20151_s1 + $0x30a0] sm:$0xff] }
 0x2ea   :  { %10150 = vmatpush1.bf16.msra.mxu0 %v14219_v11  ;;  %10683 = vmatpush1.bf16.msra.mxu1 %v14221_v12  ;;  %v1570_v11 = vld [vmem:[%s20151_s1 + $0x2fe8] sm:$0xff]  ;;  %v14259_v12 = vcombine.low %v1557_v52, %v1561_v54  ;;  %v14292_v52 = vcombine.high %v1589_v42, %v1593_v45 }
 0x2eb   :  { %10151 = vmatprep.subr.bf16.mxu0 %v14228_v13  ;;  %10684 = vmatprep.subr.bf16.mxu1 %v14230_v1  ;;  %v14261_v13 = vcombine.low %v1558_v55, %v1562_v60  ;;  %v14268_v1 = vcombine.high %v1565_v44, %v1569_v3  ;;  %v14270_v16 = vcombine.high %v1566_v10, %v1570_v11  ;;  %v1597_v55 = vld [vmem:[%s20151_s1 + $0x30c0] sm:$0xff] }
 0x2ec   :  { %v1601_v60 = vld [vmem:[%s20151_s1 + $0x30e0] sm:$0xff] }
 0x2ee   :  { %10152 = vmatpush1.bf16.msra.mxu0 %v14227_v22  ;;  %10685 = vmatpush1.bf16.msra.mxu1 %v14229_v24  ;;  %v1578_v22 = vld [vmem:[%s20151_s1 + $0x3028] sm:$0xff]  ;;  %v14267_v24 = vcombine.low %v1565_v44, %v1569_v3  ;;  %v14300_v3 = vcombine.high %v1597_v55, %v1601_v60 }
 0x2ef   :  { %10153 = vmatprep.subr.bf16.mxu0 %v14236_v47  ;;  %10686 = vmatprep.subr.bf16.mxu1 %v14238_v25  ;;  %v14269_v47 = vcombine.low %v1566_v10, %v1570_v11  ;;  %v14276_v25 = vcombine.high %v1573_v18, %v1577_v20  ;;  %v14278_v27 = vcombine.high %v1574_v21, %v1578_v22  ;;  %v39_v11 = vld [vmem:[%s20151_s1 + $0x10] sm:$0xff] }
 0x2f2   :  { %10154 = vmatpush1.bf16.msra.mxu0 %v14235_v33  ;;  %10687 = vmatpush1.bf16.msra.mxu1 %v14237_v35  ;;  %v1582_v33 = vld [vmem:[%s20151_s1 + $0x3048] sm:$0xff] }
 0x2f3   :  { %10155 = vmatprep.subr.bf16.mxu0 %v14244_v36  ;;  %10688 = vmatprep.subr.bf16.mxu1 %v14246_v39  ;;  %v1586_v35 = vld [vmem:[%s20151_s1 + $0x3068] sm:$0xff]  ;;  %v14275_v36 = vcombine.low %v1573_v18, %v1577_v20  ;;  %v14277_v39 = vcombine.low %v1574_v21, %v1578_v22  ;;  %v12738_v18 = vld.sshfl [vmem:[%s20152_s0 + $0x18] sm:$0x1 pattern:$0x75316420] }
 0x2f4   :  { %v14286_v41 = vcombine.high %v1582_v33, %v1586_v35 }
 0x2f6   :  { %10156 = vmatpush1.bf16.msra.mxu0 %v14243_v34  ;;  %10689 = vmatpush1.bf16.msra.mxu1 %v14245_v46  ;;  %v1590_v34 = vld [vmem:[%s20151_s1 + $0x3088] sm:$0xff] }
 0x2f7   :  { %10157 = vmatprep.subr.bf16.mxu0 %v14252_v49  ;;  %10690 = vmatprep.subr.bf16.mxu1 %v14254_v50  ;;  %v1594_v46 = vld [vmem:[%s20151_s1 + $0x30a8] sm:$0xff]  ;;  %v14283_v49 = vcombine.low %v1581_v63, %v1585_v30  ;;  %v14285_v50 = vcombine.low %v1582_v33, %v1586_v35  ;;  %v52_v63 = vld [vmem:[%s20151_s1 + $0x78] sm:$0xff] }
 0x2f8   :  { %v14294_v54 = vcombine.high %v1590_v34, %v1594_v46  ;;  %v14293_v44 = vcombine.low %v1590_v34, %v1594_v46 }
 0x2fa   :  { %10158 = vmatpush1.bf16.msra.mxu0 %v14251_v8  ;;  %10691 = vmatpush1.bf16.msra.mxu1 %v14253_v61  ;;  %v14828_v8 = vmov 0   ;;  %v1598_v61 = vld [vmem:[%s20151_s1 + $0x30c8] sm:$0xff] }
 0x2fb   :  { %10159 = vmatprep.subr.bf16.mxu0 %v14260_v0  ;;  %10692 = vmatprep.subr.bf16.mxu1 %v14262_v28  ;;  %v1602_v0 = vld [vmem:[%s20151_s1 + $0x30e8] sm:$0xff]  ;;  %v14291_v28 = vcombine.low %v1589_v42, %v1593_v45 }
 0x2fc   :  { %v14302_v10 = vcombine.high %v1598_v61, %v1602_v0  ;;  %v14301_v20 = vcombine.low %v1598_v61, %v1602_v0 }
 0x2fe   :  { %10160 = vmatpush1.bf16.msra.mxu0 %v14259_v12  ;;  %10693 = vmatpush1.bf16.msra.mxu1 %v14261_v13  ;;  %v43_v12 = vld [vmem:[%s20151_s1 + $0x30] sm:$0xff]  ;;  %v40_v13 = vld [vmem:[%s20151_s1 + $0x18] sm:$0xff] }
 0x2ff   :  { %10161 = vmatprep.subr.bf16.mxu0 %v14268_v1  ;;  %10694 = vmatprep.subr.bf16.mxu1 %v14270_v16  ;;  %v44_v1 = vld [vmem:[%s20151_s1 + $0x38] sm:$0xff]  ;;  %v14299_v16 = vcombine.low %v1597_v55, %v1601_v60  ;;  %v12744_v21 = vcombine.high %v39_v11, %v43_v12  ;;  %v12743_v30 = vcombine.low %v39_v11, %v43_v12 }
 0x300   :  { %v12746_v22 = vcombine.high %v40_v13, %v44_v1  ;;  %v12745_v33 = vcombine.low %v40_v13, %v44_v1  ;;  %v79_v1 = vld [vmem:[%s20151_s1 + $0x150] sm:$0xff] }
 0x302   :  { %10162 = vmatpush1.bf16.msra.mxu0 %v14267_v24  ;;  %10695 = vmatpush1.bf16.msra.mxu1 %v14269_v47  ;;  %v47_v24 = vld [vmem:[%s20151_s1 + $0x50] sm:$0xff] }
 0x303   :  { %10172 = vmatprep.subr.bf16.mxu0 %v14276_v25  ;;  %10705 = vmatprep.subr.bf16.mxu1 %v14278_v27  ;;  %v51_v47 = vld [vmem:[%s20151_s1 + $0x70] sm:$0xff]  ;;  %v17454_v25 = vrot.slane %v12738_v18, %v14962_v53  ;;  %v48_v27 = vld [vmem:[%s20151_s1 + $0x58] sm:$0xff] }
 0x304   :  { %v12752_v35 = vcombine.high %v47_v24, %v51_v47  ;;  %v55_v53 = vld [vmem:[%s20151_s1 + $0x90] sm:$0xff]  ;;  %v12751_v42 = vcombine.low %v47_v24, %v51_v47  ;;  %v12753_v45 = vcombine.low %v48_v27, %v52_v63  ;;  %v80_v18 = vld [vmem:[%s20151_s1 + $0x158] sm:$0xff] }
 0x305   :  { %10164 = vmatmul.mubr.bf16.vlgmr.msra.gmra.mrb[0].mxu0 %v17396_v32  ;;  %10697 = vmatmul.mubr.bf16.vlgmr.msra.gmra.mrb[0].mxu1 %v17396_v32 }
 0x306   :  { %10173 = vmatpush1.bf16.msra.mxu0 %v14275_v36  ;;  %10706 = vmatpush1.bf16.msra.mxu1 %v14277_v39  ;;  %v12754_v36 = vcombine.high %v48_v27, %v52_v63  ;;  %v59_v39 = vld [vmem:[%s20151_s1 + $0xb0] sm:$0xff] }
 0x307   :  { %10174 = vmatprep.subr.bf16.mxu0 %v14284_v40  ;;  %10707 = vmatprep.subr.bf16.mxu1 %v14286_v41  ;;  %v56_v40 = vld [vmem:[%s20151_s1 + $0x98] sm:$0xff]  ;;  %v12760_v34 = vcombine.high %v55_v53, %v59_v39  ;;  %v12759_v55 = vcombine.low %v55_v53, %v59_v39  ;;  %v87_v27 = vld [vmem:[%s20151_s1 + $0x190] sm:$0xff] }
 0x308   :  { %10204 = vmatprep.mubr.bf16.mxu0 %v14828_v8  ;;  %10737 = vmatprep.mubr.bf16.mxu1 %v14828_v8  ;;  %v60_v41 = vld [vmem:[%s20151_s1 + $0xb8] sm:$0xff]  ;;  %v91_v63 = vld [vmem:[%s20151_s1 + $0x1b0] sm:$0xff] }
 0x309   :  { %v12762_v46 = vcombine.high %v56_v40, %v60_v41  ;;  %v12761_v60 = vcombine.low %v56_v40, %v60_v41  ;;  %v12792_v53 = vcombine.high %v87_v27, %v91_v63  ;;  %v95_v40 = vld [vmem:[%s20151_s1 + $0x1d0] sm:$0xff] }
 0x30a   :  { %10175 = vmatpush1.bf16.msra.mxu0 %v14283_v49  ;;  %10708 = vmatpush1.bf16.msra.mxu1 %v14285_v50  ;;  %v63_v49 = vld [vmem:[%s20151_s1 + $0xd0] sm:$0xff] }
 0x30b   :  { %10176 = vmatprep.subr.bf16.mxu0 %v14292_v52  ;;  %10709 = vmatprep.subr.bf16.mxu1 %v14294_v54  ;;  %v67_v50 = vld [vmem:[%s20151_s1 + $0xf0] sm:$0xff]  ;;  %v64_v52 = vld [vmem:[%s20151_s1 + $0xd8] sm:$0xff] }
 0x30c   :  { %v68_v54 = vld [vmem:[%s20151_s1 + $0xf8] sm:$0xff]  ;;  %v12768_v61 = vcombine.high %v63_v49, %v67_v50  ;;  %v99_v41 = vld [vmem:[%s20151_s1 + $0x1f0] sm:$0xff] }
 0x30d   :  { %v12770_v0 = vcombine.high %v64_v52, %v68_v54  ;;  %v12769_v11 = vcombine.low %v64_v52, %v68_v54  ;;  %v103_v52 = vld [vmem:[%s20151_s1 + $0x210] sm:$0xff] }
 0x30e   :  { %10177 = vmatpush1.bf16.msra.mxu0 %v14291_v28  ;;  %10710 = vmatpush1.bf16.msra.mxu1 %v14293_v44  ;;  %v71_v28 = vld [vmem:[%s20151_s1 + $0x110] sm:$0xff] }
 0x30f   :  { %10178 = vmatprep.subr.bf16.mxu0 %v14300_v3  ;;  %10711 = vmatprep.subr.bf16.mxu1 %v14302_v10  ;;  %v75_v44 = vld [vmem:[%s20151_s1 + $0x130] sm:$0xff]  ;;  %v76_v3 = vld [vmem:[%s20151_s1 + $0x138] sm:$0xff]  ;;  %v12767_v10 = vcombine.low %v63_v49, %v67_v50  ;;  %v12800_v49 = vcombine.high %v95_v40, %v99_v41 }
 0x310   :  { %v12776_v12 = vcombine.high %v71_v28, %v75_v44  ;;  %v107_v54 = vld [vmem:[%s20151_s1 + $0x230] sm:$0xff] }
 0x312   :  { %10179 = vmatpush1.bf16.msra.mxu0 %v14299_v16  ;;  %10712 = vmatpush1.bf16.msra.mxu1 %v14301_v20  ;;  %v83_v16 = vld [vmem:[%s20151_s1 + $0x170] sm:$0xff]  ;;  %v84_v20 = vld [vmem:[%s20151_s1 + $0x178] sm:$0xff] }
 0x313   :  { %10746 = vmatprep.subr.bf16.mxu0 %v12744_v21  ;;  %11279 = vmatprep.subr.bf16.mxu1 %v12746_v22  ;;  %v12775_v21 = vcombine.low %v71_v28, %v75_v44  ;;  %v12784_v24 = vcombine.high %v79_v1, %v83_v16  ;;  %v12786_v47 = vcombine.high %v80_v18, %v84_v20 }
 0x314   :  { %v12808_v28 = vcombine.high %v103_v52, %v107_v54 }
 0x315   :  { %14307 = vmatmul.mubr.msk.bf16.vlgmr.msra.gmra.mrb[0].mxu0 %vm9676_vm0, %v17454_v25  ;;  %14308 = vmatmul.mubr.msk.bf16.vlgmr.msra.gmra.mrb[0].mxu1 %vm9676_vm0, %v17454_v25 }
 0x316   :  { %10747 = vmatpush1.bf16.msra.mxu0 %v12743_v30  ;;  %11280 = vmatpush1.bf16.msra.mxu1 %v12745_v33  ;;  %v88_v30 = vld [vmem:[%s20151_s1 + $0x198] sm:$0xff] }
 0x317   :  { %10748 = vmatprep.subr.bf16.mxu0 %v12752_v35  ;;  %11281 = vmatprep.subr.bf16.mxu1 %v12754_v36  ;;  %v92_v33 = vld [vmem:[%s20151_s1 + $0x1b8] sm:$0xff]  ;;  %v12783_v35 = vcombine.low %v79_v1, %v83_v16  ;;  %v12785_v36 = vcombine.low %v80_v18, %v84_v20  ;;  %v119_v18 = vld [vmem:[%s20151_s1 + $0x290] sm:$0xff] }
 0x318   :  { %10778 = vmatprep.mubr.bf16.mxu0 %v15000_v9  ;;  %11311 = vmatprep.mubr.bf16.mxu1 %v15000_v9  ;;  %v72_v9 = vld [vmem:[%s20151_s1 + $0x118] sm:$0xff]  ;;  %v12794_v39 = vcombine.high %v88_v30, %v92_v33  ;;  %v123_v20 = vld [vmem:[%s20151_s1 + $0x2b0] sm:$0xff] }
 0x319   :  { %v12778_v13 = vcombine.high %v72_v9, %v76_v3  ;;  %v12777_v22 = vcombine.low %v72_v9, %v76_v3  ;;  %v111_v9 = vld [vmem:[%s20151_s1 + $0x250] sm:$0xff] }
 0x31a   :  { %10749 = vmatpush1.bf16.msra.mxu0 %v12751_v42  ;;  %11282 = vmatpush1.bf16.msra.mxu1 %v12753_v45  ;;  %v96_v42 = vld [vmem:[%s20151_s1 + $0x1d8] sm:$0xff]  ;;  %v115_v3 = vld [vmem:[%s20151_s1 + $0x270] sm:$0xff] }
 0x31b   :  { %10750 = vmatprep.subr.bf16.mxu0 %v12760_v34  ;;  %11283 = vmatprep.subr.bf16.mxu1 %v12762_v46  ;;  %v100_v45 = vld [vmem:[%s20151_s1 + $0x1f8] sm:$0xff]  ;;  %v12791_v34 = vcombine.low %v87_v27, %v91_v63  ;;  %v12793_v46 = vcombine.low %v88_v30, %v92_v33  ;;  %v12816_v1 = vcombine.high %v111_v9, %v115_v3  ;;  %v127_v30 = vld [vmem:[%s20151_s1 + $0x2d0] sm:$0xff] }
 0x31c   :  { %v12802_v50 = vcombine.high %v96_v42, %v100_v45  ;;  %v12824_v27 = vcombine.high %v119_v18, %v123_v20  ;;  %v131_v33 = vld [vmem:[%s20151_s1 + $0x2f0] sm:$0xff] }
 0x31e   :  { %10751 = vmatpush1.bf16.msra.mxu0 %v12759_v55  ;;  %11284 = vmatpush1.bf16.msra.mxu1 %v12761_v60  ;;  %v104_v55 = vld [vmem:[%s20151_s1 + $0x218] sm:$0xff] }
 0x31f   :  { %10752 = vmatprep.subr.bf16.mxu0 %v12768_v61  ;;  %11285 = vmatprep.subr.bf16.mxu1 %v12770_v0  ;;  %v108_v60 = vld [vmem:[%s20151_s1 + $0x238] sm:$0xff]  ;;  %v12799_v61 = vcombine.low %v95_v40, %v99_v41  ;;  %v12801_v0 = vcombine.low %v96_v42, %v100_v45  ;;  %v12832_v40 = vcombine.high %v127_v30, %v131_v33  ;;  %v135_v42 = vld [vmem:[%s20151_s1 + $0x310] sm:$0xff] }
 0x320   :  { %v12810_v44 = vcombine.high %v104_v55, %v108_v60  ;;  %v139_v45 = vld [vmem:[%s20151_s1 + $0x330] sm:$0xff] }
 0x322   :  { %10753 = vmatpush1.bf16.msra.mxu0 %v12767_v10  ;;  %11286 = vmatpush1.bf16.msra.mxu1 %v12769_v11  ;;  %v112_v10 = vld [vmem:[%s20151_s1 + $0x258] sm:$0xff] }
 0x323   :  { %10754 = vmatprep.subr.bf16.mxu0 %v12776_v12  ;;  %11287 = vmatprep.subr.bf16.mxu1 %v12778_v13  ;;  %v116_v11 = vld [vmem:[%s20151_s1 + $0x278] sm:$0xff]  ;;  %v12807_v12 = vcombine.low %v103_v52, %v107_v54  ;;  %v12809_v13 = vcombine.low %v104_v55, %v108_v60  ;;  %v12840_v52 = vcombine.high %v135_v42, %v139_v45  ;;  %v143_v55 = vld [vmem:[%s20151_s1 + $0x350] sm:$0xff] }
 0x324   :  { %v12818_v16 = vcombine.high %v112_v10, %v116_v11  ;;  %v147_v60 = vld [vmem:[%s20151_s1 + $0x370] sm:$0xff] }
 0x326   :  { %10755 = vmatpush1.bf16.msra.mxu0 %v12775_v21  ;;  %11288 = vmatpush1.bf16.msra.mxu1 %v12777_v22  ;;  %v120_v21 = vld [vmem:[%s20151_s1 + $0x298] sm:$0xff] }
 0x327   :  { %10756 = vmatprep.subr.bf16.mxu0 %v12784_v24  ;;  %11289 = vmatprep.subr.bf16.mxu1 %v12786_v47  ;;  %v124_v22 = vld [vmem:[%s20151_s1 + $0x2b8] sm:$0xff]  ;;  %v12815_v24 = vcombine.low %v111_v9, %v115_v3  ;;  %v12817_v47 = vcombine.low %v112_v10, %v116_v11  ;;  %v12848_v9 = vcombine.high %v143_v55, %v147_v60  ;;  %v151_v10 = vld [vmem:[%s20151_s1 + $0x390] sm:$0xff] }
 0x328   :  { %v12826_v63 = vcombine.high %v120_v21, %v124_v22  ;;  %v155_v11 = vld [vmem:[%s20151_s1 + $0x3b0] sm:$0xff] }
 0x32a   :  { %10757 = vmatpush1.bf16.msra.mxu0 %v12783_v35  ;;  %11290 = vmatpush1.bf16.msra.mxu1 %v12785_v36  ;;  %v128_v35 = vld [vmem:[%s20151_s1 + $0x2d8] sm:$0xff] }
 0x32b   :  { %10758 = vmatprep.subr.bf16.mxu0 %v12792_v53  ;;  %11291 = vmatprep.subr.bf16.mxu1 %v12794_v39  ;;  %v132_v36 = vld [vmem:[%s20151_s1 + $0x2f8] sm:$0xff]  ;;  %v12823_v53 = vcombine.low %v119_v18, %v123_v20  ;;  %v12825_v39 = vcombine.low %v120_v21, %v124_v22  ;;  %v12856_v18 = vcombine.high %v151_v10, %v155_v11  ;;  %v159_v21 = vld [vmem:[%s20151_s1 + $0x3d0] sm:$0xff] }
 0x32c   :  { %v12834_v41 = vcombine.high %v128_v35, %v132_v36  ;;  %v163_v22 = vld [vmem:[%s20151_s1 + $0x3f0] sm:$0xff] }
 0x32e   :  { %10759 = vmatpush1.bf16.msra.mxu0 %v12791_v34  ;;  %11292 = vmatpush1.bf16.msra.mxu1 %v12793_v46  ;;  %v136_v34 = vld [vmem:[%s20151_s1 + $0x318] sm:$0xff] }
 0x32f   :  { %10760 = vmatprep.subr.bf16.mxu0 %v12800_v49  ;;  %11293 = vmatprep.subr.bf16.mxu1 %v12802_v50  ;;  %v140_v46 = vld [vmem:[%s20151_s1 + $0x338] sm:$0xff]  ;;  %v12831_v49 = vcombine.low %v127_v30, %v131_v33  ;;  %v12833_v50 = vcombine.low %v128_v35, %v132_v36  ;;  %v12864_v30 = vcombine.high %v159_v21, %v163_v22  ;;  %v167_v35 = vld [vmem:[%s20151_s1 + $0x410] sm:$0xff] }
 0x330   :  { %v12842_v54 = vcombine.high %v136_v34, %v140_v46  ;;  %v171_v36 = vld [vmem:[%s20151_s1 + $0x430] sm:$0xff] }
 0x332   :  { %10761 = vmatpush1.bf16.msra.mxu0 %v12799_v61  ;;  %11294 = vmatpush1.bf16.msra.mxu1 %v12801_v0  ;;  %v144_v61 = vld [vmem:[%s20151_s1 + $0x358] sm:$0xff] }
 0x333   :  { %10762 = vmatprep.subr.bf16.mxu0 %v12808_v28  ;;  %11295 = vmatprep.subr.bf16.mxu1 %v12810_v44  ;;  %v148_v0 = vld [vmem:[%s20151_s1 + $0x378] sm:$0xff]  ;;  %v12839_v28 = vcombine.low %v135_v42, %v139_v45  ;;  %v12841_v44 = vcombine.low %v136_v34, %v140_v46  ;;  %v12872_v42 = vcombine.high %v167_v35, %v171_v36  ;;  %v175_v34 = vld [vmem:[%s20151_s1 + $0x450] sm:$0xff] }
 0x334   :  { %v12850_v3 = vcombine.high %v144_v61, %v148_v0  ;;  %v179_v46 = vld [vmem:[%s20151_s1 + $0x470] sm:$0xff] }
 0x336   :  { %10763 = vmatpush1.bf16.msra.mxu0 %v12807_v12  ;;  %11296 = vmatpush1.bf16.msra.mxu1 %v12809_v13  ;;  %v152_v12 = vld [vmem:[%s20151_s1 + $0x398] sm:$0xff] }
 0x337   :  { %10764 = vmatprep.subr.bf16.mxu0 %v12816_v1  ;;  %11297 = vmatprep.subr.bf16.mxu1 %v12818_v16  ;;  %v156_v13 = vld [vmem:[%s20151_s1 + $0x3b8] sm:$0xff]  ;;  %v12847_v1 = vcombine.low %v143_v55, %v147_v60  ;;  %v12849_v16 = vcombine.low %v144_v61, %v148_v0  ;;  %v12880_v55 = vcombine.high %v175_v34, %v179_v46  ;;  %v183_v61 = vld [vmem:[%s20151_s1 + $0x490] sm:$0xff] }
 0x338   :  { %v12858_v20 = vcombine.high %v152_v12, %v156_v13  ;;  %v187_v0 = vld [vmem:[%s20151_s1 + $0x4b0] sm:$0xff] }
 0x33a   :  { %10765 = vmatpush1.bf16.msra.mxu0 %v12815_v24  ;;  %11298 = vmatpush1.bf16.msra.mxu1 %v12817_v47  ;;  %v160_v24 = vld [vmem:[%s20151_s1 + $0x3d8] sm:$0xff] }
 0x33b   :  { %10766 = vmatprep.subr.bf16.mxu0 %v12824_v27  ;;  %11299 = vmatprep.subr.bf16.mxu1 %v12826_v63  ;;  %v164_v47 = vld [vmem:[%s20151_s1 + $0x3f8] sm:$0xff]  ;;  %v12855_v27 = vcombine.low %v151_v10, %v155_v11  ;;  %v12857_v63 = vcombine.low %v152_v12, %v156_v13  ;;  %v12888_v10 = vcombine.high %v183_v61, %v187_v0  ;;  %v191_v12 = vld [vmem:[%s20151_s1 + $0x4d0] sm:$0xff] }
 0x33c   :  { %v12866_v33 = vcombine.high %v160_v24, %v164_v47  ;;  %v195_v13 = vld [vmem:[%s20151_s1 + $0x4f0] sm:$0xff] }
 0x33e   :  { %10767 = vmatpush1.bf16.msra.mxu0 %v12823_v53  ;;  %11300 = vmatpush1.bf16.msra.mxu1 %v12825_v39  ;;  %v168_v53 = vld [vmem:[%s20151_s1 + $0x418] sm:$0xff] }
 0x33f   :  { %10768 = vmatprep.subr.bf16.mxu0 %v12832_v40  ;;  %11301 = vmatprep.subr.bf16.mxu1 %v12834_v41  ;;  %v172_v39 = vld [vmem:[%s20151_s1 + $0x438] sm:$0xff]  ;;  %v12863_v40 = vcombine.low %v159_v21, %v163_v22  ;;  %v12865_v41 = vcombine.low %v160_v24, %v164_v47  ;;  %v199_v22 = vld [vmem:[%s20151_s1 + $0x510] sm:$0xff] }
 0x340   :  { %v12874_v45 = vcombine.high %v168_v53, %v172_v39  ;;  %v203_v24 = vld [vmem:[%s20151_s1 + $0x530] sm:$0xff]  ;;  %v204_v47 = vld [vmem:[%s20151_s1 + $0x538] sm:$0xff] }
 0x342   :  { %10769 = vmatpush1.bf16.msra.mxu0 %v12831_v49  ;;  %11302 = vmatpush1.bf16.msra.mxu1 %v12833_v50  ;;  %v176_v49 = vld [vmem:[%s20151_s1 + $0x458] sm:$0xff] }
 0x343   :  { %10770 = vmatprep.subr.bf16.mxu0 %v12840_v52  ;;  %11303 = vmatprep.subr.bf16.mxu1 %v12842_v54  ;;  %v180_v50 = vld [vmem:[%s20151_s1 + $0x478] sm:$0xff]  ;;  %v12871_v52 = vcombine.low %v167_v35, %v171_v36  ;;  %v12873_v54 = vcombine.low %v168_v53, %v172_v39  ;;  %v207_v35 = vld [vmem:[%s20151_s1 + $0x550] sm:$0xff] }
 0x344   :  { %v12882_v60 = vcombine.high %v176_v49, %v180_v50  ;;  %v211_v36 = vld [vmem:[%s20151_s1 + $0x570] sm:$0xff]  ;;  %v208_v53 = vld [vmem:[%s20151_s1 + $0x558] sm:$0xff] }
 0x345   :  { %v212_v39 = vld [vmem:[%s20151_s1 + $0x578] sm:$0xff] }
 0x346   :  { %10771 = vmatpush1.bf16.msra.mxu0 %v12839_v28  ;;  %11304 = vmatpush1.bf16.msra.mxu1 %v12841_v44  ;;  %v184_v28 = vld [vmem:[%s20151_s1 + $0x498] sm:$0xff] }
 0x347   :  { %10772 = vmatprep.subr.bf16.mxu0 %v12848_v9  ;;  %11305 = vmatprep.subr.bf16.mxu1 %v12850_v3  ;;  %v188_v44 = vld [vmem:[%s20151_s1 + $0x4b8] sm:$0xff]  ;;  %v12879_v9 = vcombine.low %v175_v34, %v179_v46  ;;  %v12881_v3 = vcombine.low %v176_v49, %v180_v50  ;;  %v215_v34 = vld [vmem:[%s20151_s1 + $0x590] sm:$0xff] }
 0x348   :  { %v12890_v11 = vcombine.high %v184_v28, %v188_v44  ;;  %v219_v46 = vld [vmem:[%s20151_s1 + $0x5b0] sm:$0xff]  ;;  %v216_v49 = vld [vmem:[%s20151_s1 + $0x598] sm:$0xff] }
 0x349   :  { %v220_v50 = vld [vmem:[%s20151_s1 + $0x5b8] sm:$0xff] }
 0x34a   :  { %10773 = vmatpush1.bf16.msra.mxu0 %v12847_v1  ;;  %11306 = vmatpush1.bf16.msra.mxu1 %v12849_v16  ;;  %v196_v1 = vld [vmem:[%s20151_s1 + $0x4f8] sm:$0xff]  ;;  %v12887_v16 = vcombine.low %v183_v61, %v187_v0  ;;  %v223_v61 = vld [vmem:[%s20151_s1 + $0x5d0] sm:$0xff] }
 0x34b   :  { %10774 = vmatprep.subr.bf16.mxu0 %v12856_v18  ;;  %11307 = vmatprep.subr.bf16.mxu1 %v12858_v20  ;;  %v12889_v18 = vcombine.low %v184_v28, %v188_v44  ;;  %v12896_v20 = vcombine.high %v191_v12, %v195_v13  ;;  %v227_v0 = vld [vmem:[%s20151_s1 + $0x5f0] sm:$0xff]  ;;  %v224_v28 = vld [vmem:[%s20151_s1 + $0x5d8] sm:$0xff] }
 0x34c   :  { %v228_v44 = vld [vmem:[%s20151_s1 + $0x5f8] sm:$0xff] }
 0x34e   :  { %10775 = vmatpush1.bf16.msra.mxu0 %v12855_v27  ;;  %11308 = vmatpush1.bf16.msra.mxu1 %v12857_v63  ;;  %v12895_v27 = vcombine.low %v191_v12, %v195_v13  ;;  %v231_v12 = vld [vmem:[%s20151_s1 + $0x610] sm:$0xff] }
 0x34f   :  { %10776 = vmatprep.subr.bf16.mxu0 %v12864_v30  ;;  %11309 = vmatprep.subr.bf16.mxu1 %v12866_v33  ;;  %v12904_v30 = vcombine.high %v199_v22, %v203_v24  ;;  %v235_v13 = vld [vmem:[%s20151_s1 + $0x630] sm:$0xff] }
 0x352   :  { %10777 = vmatpush1.bf16.msra.mxu0 %v12863_v40  ;;  %11310 = vmatpush1.bf16.msra.mxu1 %v12865_v41  ;;  %v12903_v40 = vcombine.low %v199_v22, %v203_v24  ;;  %v239_v22 = vld [vmem:[%s20151_s1 + $0x650] sm:$0xff] }
 0x353   :  { %10787 = vmatprep.subr.bf16.mxu0 %v12872_v42  ;;  %11320 = vmatprep.subr.bf16.mxu1 %v12874_v45  ;;  %v12912_v42 = vcombine.high %v207_v35, %v211_v36  ;;  %v12914_v45 = vcombine.high %v208_v53, %v212_v39  ;;  %v243_v24 = vld [vmem:[%s20151_s1 + $0x670] sm:$0xff] }
 0x355   :  { %10779 = vmatmul.mubr.bf16.vlgmr.msra.gmra.mrb[4].mxu0 %v15114_v23  ;;  %11312 = vmatmul.mubr.bf16.vlgmr.msra.gmra.mrb[4].mxu1 %v15114_v23  ;;  %v192_v23 = vld [vmem:[%s20151_s1 + $0x4d8] sm:$0xff] }
 0x356   :  { %10788 = vmatpush1.bf16.msra.mxu0 %v12871_v52  ;;  %11321 = vmatpush1.bf16.msra.mxu1 %v12873_v54  ;;  %v12898_v21 = vcombine.high %v192_v23, %v196_v1  ;;  %v12897_v63 = vcombine.low %v192_v23, %v196_v1  ;;  %v12911_v52 = vcombine.low %v207_v35, %v211_v36  ;;  %v232_v23 = vld [vmem:[%s20151_s1 + $0x618] sm:$0xff]  ;;  %v247_v35 = vld [vmem:[%s20151_s1 + $0x690] sm:$0xff] }
 0x357   :  { %10789 = vmatprep.subr.bf16.mxu0 %v12880_v55  ;;  %11322 = vmatprep.subr.bf16.mxu1 %v12882_v60  ;;  %v12913_v54 = vcombine.low %v208_v53, %v212_v39  ;;  %v12920_v55 = vcombine.high %v215_v34, %v219_v46  ;;  %v12922_v60 = vcombine.high %v216_v49, %v220_v50  ;;  %v236_v1 = vld [vmem:[%s20151_s1 + $0x638] sm:$0xff]  ;;  %v251_v36 = vld [vmem:[%s20151_s1 + $0x6b0] sm:$0xff] }
 0x358   :  { %10819 = vmatprep.mubr.bf16.mxu0 %v15130_v31  ;;  %11352 = vmatprep.mubr.bf16.mxu1 %v15130_v31  ;;  %v200_v31 = vld [vmem:[%s20151_s1 + $0x518] sm:$0xff] }
 0x359   :  { %v12906_v33 = vcombine.high %v200_v31, %v204_v47  ;;  %v12905_v41 = vcombine.low %v200_v31, %v204_v47  ;;  %v240_v31 = vld [vmem:[%s20151_s1 + $0x658] sm:$0xff] }
 0x35a   :  { %10790 = vmatpush1.bf16.msra.mxu0 %v12879_v9  ;;  %11323 = vmatpush1.bf16.msra.mxu1 %v12881_v3  ;;  %v12919_v9 = vcombine.low %v215_v34, %v219_v46  ;;  %v12921_v3 = vcombine.low %v216_v49, %v220_v50  ;;  %v244_v47 = vld [vmem:[%s20151_s1 + $0x678] sm:$0xff]  ;;  %v255_v34 = vld [vmem:[%s20151_s1 + $0x6d0] sm:$0xff] }
 0x35b   :  { %10791 = vmatprep.subr.bf16.mxu0 %v12888_v10  ;;  %11324 = vmatprep.subr.bf16.mxu1 %v12890_v11  ;;  %v12928_v10 = vcombine.high %v223_v61, %v227_v0  ;;  %v12930_v11 = vcombine.high %v224_v28, %v228_v44  ;;  %v248_v53 = vld [vmem:[%s20151_s1 + $0x698] sm:$0xff]  ;;  %v259_v46 = vld [vmem:[%s20151_s1 + $0x6f0] sm:$0xff] }
 0x35c   :  { %v252_v39 = vld [vmem:[%s20151_s1 + $0x6b8] sm:$0xff] }
 0x35d   :  { %v256_v49 = vld [vmem:[%s20151_s1 + $0x6d8] sm:$0xff] }
 0x35e   :  { %10792 = vmatpush1.bf16.msra.mxu0 %v12887_v16  ;;  %11325 = vmatpush1.bf16.msra.mxu1 %v12889_v18  ;;  %v12927_v16 = vcombine.low %v223_v61, %v227_v0  ;;  %v12929_v18 = vcombine.low %v224_v28, %v228_v44  ;;  %v260_v50 = vld [vmem:[%s20151_s1 + $0x6f8] sm:$0xff]  ;;  %v263_v61 = vld [vmem:[%s20151_s1 + $0x710] sm:$0xff] }
 0x35f   :  { %10793 = vmatprep.subr.bf16.mxu0 %v12896_v20  ;;  %11326 = vmatprep.subr.bf16.mxu1 %v12898_v21  ;;  %v12936_v20 = vcombine.high %v231_v12, %v235_v13  ;;  %v12938_v21 = vcombine.high %v232_v23, %v236_v1  ;;  %v267_v0 = vld [vmem:[%s20151_s1 + $0x730] sm:$0xff]  ;;  %v264_v28 = vld [vmem:[%s20151_s1 + $0x718] sm:$0xff] }
 0x360   :  { %v268_v44 = vld [vmem:[%s20151_s1 + $0x738] sm:$0xff] }
 0x362   :  { %10794 = vmatpush1.bf16.msra.mxu0 %v12895_v27  ;;  %11327 = vmatpush1.bf16.msra.mxu1 %v12897_v63  ;;  %v12935_v27 = vcombine.low %v231_v12, %v235_v13  ;;  %v12937_v63 = vcombine.low %v232_v23, %v236_v1  ;;  %v271_v12 = vld [vmem:[%s20151_s1 + $0x750] sm:$0xff]  ;;  %v272_v23 = vld [vmem:[%s20151_s1 + $0x758] sm:$0xff] }
 0x363   :  { %10795 = vmatprep.subr.bf16.mxu0 %v12904_v30  ;;  %11328 = vmatprep.subr.bf16.mxu1 %v12906_v33  ;;  %v12944_v30 = vcombine.high %v239_v22, %v243_v24  ;;  %v12946_v33 = vcombine.high %v240_v31, %v244_v47  ;;  %v275_v13 = vld [vmem:[%s20151_s1 + $0x770] sm:$0xff]  ;;  %v276_v1 = vld [vmem:[%s20151_s1 + $0x778] sm:$0xff] }
 0x366   :  { %10796 = vmatpush1.bf16.msra.mxu0 %v12903_v40  ;;  %11329 = vmatpush1.bf16.msra.mxu1 %v12905_v41  ;;  %v12943_v40 = vcombine.low %v239_v22, %v243_v24  ;;  %v12945_v41 = vcombine.low %v240_v31, %v244_v47  ;;  %v279_v22 = vld [vmem:[%s20151_s1 + $0x790] sm:$0xff]  ;;  %v280_v31 = vld [vmem:[%s20151_s1 + $0x798] sm:$0xff] }
 0x367   :  { %10797 = vmatprep.subr.bf16.mxu0 %v12912_v42  ;;  %11330 = vmatprep.subr.bf16.mxu1 %v12914_v45  ;;  %v12952_v42 = vcombine.high %v247_v35, %v251_v36  ;;  %v12954_v45 = vcombine.high %v248_v53, %v252_v39  ;;  %v283_v24 = vld [vmem:[%s20151_s1 + $0x7b0] sm:$0xff]  ;;  %v284_v47 = vld [vmem:[%s20151_s1 + $0x7b8] sm:$0xff] }
 0x36a   :  { %10798 = vmatpush1.bf16.msra.mxu0 %v12911_v52  ;;  %11331 = vmatpush1.bf16.msra.mxu1 %v12913_v54  ;;  %v12951_v52 = vcombine.low %v247_v35, %v251_v36  ;;  %v12953_v54 = vcombine.low %v248_v53, %v252_v39  ;;  %v287_v35 = vld [vmem:[%s20151_s1 + $0x7d0] sm:$0xff]  ;;  %v288_v53 = vld [vmem:[%s20151_s1 + $0x7d8] sm:$0xff] }
 0x36b   :  { %10799 = vmatprep.subr.bf16.mxu0 %v12920_v55  ;;  %11332 = vmatprep.subr.bf16.mxu1 %v12922_v60  ;;  %v12960_v55 = vcombine.high %v255_v34, %v259_v46  ;;  %v12962_v60 = vcombine.high %v256_v49, %v260_v50  ;;  %v291_v36 = vld [vmem:[%s20151_s1 + $0x7f0] sm:$0xff]  ;;  %v292_v39 = vld [vmem:[%s20151_s1 + $0x7f8] sm:$0xff] }
 0x36e   :  { %10800 = vmatpush1.bf16.msra.mxu0 %v12919_v9  ;;  %11333 = vmatpush1.bf16.msra.mxu1 %v12921_v3  ;;  %v12959_v9 = vcombine.low %v255_v34, %v259_v46  ;;  %v12961_v3 = vcombine.low %v256_v49, %v260_v50  ;;  %v295_v34 = vld [vmem:[%s20151_s1 + $0x810] sm:$0xff]  ;;  %v296_v49 = vld [vmem:[%s20151_s1 + $0x818] sm:$0xff] }
 0x36f   :  { %10801 = vmatprep.subr.bf16.mxu0 %v12928_v10  ;;  %11334 = vmatprep.subr.bf16.mxu1 %v12930_v11  ;;  %v12968_v10 = vcombine.high %v263_v61, %v267_v0  ;;  %v12970_v11 = vcombine.high %v264_v28, %v268_v44  ;;  %v299_v46 = vld [vmem:[%s20151_s1 + $0x830] sm:$0xff]  ;;  %v300_v50 = vld [vmem:[%s20151_s1 + $0x838] sm:$0xff] }
 0x372   :  { %10802 = vmatpush1.bf16.msra.mxu0 %v12927_v16  ;;  %11335 = vmatpush1.bf16.msra.mxu1 %v12929_v18  ;;  %v12967_v16 = vcombine.low %v263_v61, %v267_v0  ;;  %v12969_v18 = vcombine.low %v264_v28, %v268_v44  ;;  %v303_v61 = vld [vmem:[%s20151_s1 + $0x850] sm:$0xff]  ;;  %v304_v28 = vld [vmem:[%s20151_s1 + $0x858] sm:$0xff] }
 0x373   :  { %10803 = vmatprep.subr.bf16.mxu0 %v12936_v20  ;;  %11336 = vmatprep.subr.bf16.mxu1 %v12938_v21  ;;  %v12976_v20 = vcombine.high %v271_v12, %v275_v13  ;;  %v12978_v21 = vcombine.high %v272_v23, %v276_v1  ;;  %v307_v0 = vld [vmem:[%s20151_s1 + $0x870] sm:$0xff]  ;;  %v308_v44 = vld [vmem:[%s20151_s1 + $0x878] sm:$0xff] }
 0x376   :  { %10804 = vmatpush1.bf16.msra.mxu0 %v12935_v27  ;;  %11337 = vmatpush1.bf16.msra.mxu1 %v12937_v63  ;;  %v12975_v27 = vcombine.low %v271_v12, %v275_v13  ;;  %v12977_v63 = vcombine.low %v272_v23, %v276_v1  ;;  %v311_v12 = vld [vmem:[%s20151_s1 + $0x890] sm:$0xff]  ;;  %v312_v23 = vld [vmem:[%s20151_s1 + $0x898] sm:$0xff] }
 0x377   :  { %10805 = vmatprep.subr.bf16.mxu0 %v12944_v30  ;;  %11338 = vmatprep.subr.bf16.mxu1 %v12946_v33  ;;  %v12984_v30 = vcombine.high %v279_v22, %v283_v24  ;;  %v12986_v33 = vcombine.high %v280_v31, %v284_v47  ;;  %v315_v13 = vld [vmem:[%s20151_s1 + $0x8b0] sm:$0xff]  ;;  %v316_v1 = vld [vmem:[%s20151_s1 + $0x8b8] sm:$0xff] }
 0x37a   :  { %10806 = vmatpush1.bf16.msra.mxu0 %v12943_v40  ;;  %11339 = vmatpush1.bf16.msra.mxu1 %v12945_v41  ;;  %v12983_v40 = vcombine.low %v279_v22, %v283_v24  ;;  %v12985_v41 = vcombine.low %v280_v31, %v284_v47  ;;  %v319_v22 = vld [vmem:[%s20151_s1 + $0x8d0] sm:$0xff]  ;;  %v324_v31 = vld [vmem:[%s20151_s1 + $0x8f8] sm:$0xff]  ;;  %v13015_v47 = vcombine.low %v311_v12, %v315_v13 }
 0x37b   :  { %10807 = vmatprep.subr.bf16.mxu0 %v12952_v42  ;;  %11340 = vmatprep.subr.bf16.mxu1 %v12954_v45  ;;  %v12992_v42 = vcombine.high %v287_v35, %v291_v36  ;;  %v12994_v45 = vcombine.high %v288_v53, %v292_v39  ;;  %v323_v24 = vld [vmem:[%s20151_s1 + $0x8f0] sm:$0xff] }
 0x37e   :  { %10808 = vmatpush1.bf16.msra.mxu0 %v12951_v52  ;;  %11341 = vmatpush1.bf16.msra.mxu1 %v12953_v54  ;;  %v12991_v52 = vcombine.low %v287_v35, %v291_v36  ;;  %v12993_v54 = vcombine.low %v288_v53, %v292_v39  ;;  %v331_v35 = vld [vmem:[%s20151_s1 + $0x930] sm:$0xff]  ;;  %v332_v36 = vld [vmem:[%s20151_s1 + $0x938] sm:$0xff]  ;;  %v13023_v53 = vcombine.low %v319_v22, %v323_v24 }
 0x37f   :  { %10809 = vmatprep.subr.bf16.mxu0 %v12960_v55  ;;  %11342 = vmatprep.subr.bf16.mxu1 %v12962_v60  ;;  %v13000_v55 = vcombine.high %v295_v34, %v299_v46  ;;  %v13002_v60 = vcombine.high %v296_v49, %v300_v50 }
 0x382   :  { %10810 = vmatpush1.bf16.msra.mxu0 %v12959_v9  ;;  %11343 = vmatpush1.bf16.msra.mxu1 %v12961_v3  ;;  %v12999_v9 = vcombine.low %v295_v34, %v299_v46  ;;  %v13001_v3 = vcombine.low %v296_v49, %v300_v50  ;;  %v336_v34 = vld [vmem:[%s20151_s1 + $0x958] sm:$0xff] }
 0x383   :  { %10811 = vmatprep.subr.bf16.mxu0 %v12968_v10  ;;  %11344 = vmatprep.subr.bf16.mxu1 %v12970_v11  ;;  %v13008_v10 = vcombine.high %v303_v61, %v307_v0  ;;  %v13010_v11 = vcombine.high %v304_v28, %v308_v44  ;;  %v340_v46 = vld [vmem:[%s20151_s1 + $0x978] sm:$0xff] }
 0x386   :  { %10812 = vmatpush1.bf16.msra.mxu0 %v12967_v16  ;;  %11345 = vmatpush1.bf16.msra.mxu1 %v12969_v18  ;;  %v13007_v16 = vcombine.low %v303_v61, %v307_v0  ;;  %v13009_v18 = vcombine.low %v304_v28, %v308_v44  ;;  %v344_v61 = vld [vmem:[%s20151_s1 + $0x998] sm:$0xff]  ;;  %v13041_v44 = vcombine.low %v336_v34, %v340_v46 }
 0x387   :  { %10813 = vmatprep.subr.bf16.mxu0 %v12976_v20  ;;  %11346 = vmatprep.subr.bf16.mxu1 %v12978_v21  ;;  %v13016_v20 = vcombine.high %v311_v12, %v315_v13  ;;  %v13018_v21 = vcombine.high %v312_v23, %v316_v1  ;;  %v348_v0 = vld [vmem:[%s20151_s1 + $0x9b8] sm:$0xff] }
 0x388   :  { %v352_v12 = vld [vmem:[%s20151_s1 + $0x9d8] sm:$0xff] }
 0x389   :  { %v356_v13 = vld [vmem:[%s20151_s1 + $0x9f8] sm:$0xff] }
 0x38a   :  { %10814 = vmatpush1.bf16.msra.mxu0 %v12975_v27  ;;  %11347 = vmatpush1.bf16.msra.mxu1 %v12977_v63  ;;  %v13017_v27 = vcombine.low %v312_v23, %v316_v1  ;;  %v13024_v63 = vcombine.high %v319_v22, %v323_v24  ;;  %v13049_v1 = vcombine.low %v344_v61, %v348_v0  ;;  %v360_v22 = vld [vmem:[%s20151_s1 + $0xa18] sm:$0xff] }
 0x38b   :  { %10815 = vmatprep.subr.bf16.mxu0 %v12984_v30  ;;  %11348 = vmatprep.subr.bf16.mxu1 %v12986_v33  ;;  %v327_v33 = vld [vmem:[%s20151_s1 + $0x910] sm:$0xff]  ;;  %v364_v24 = vld [vmem:[%s20151_s1 + $0xa38] sm:$0xff] }
 0x38c   :  { %v13031_v49 = vcombine.low %v327_v33, %v331_v35 }
 0x38e   :  { %10816 = vmatpush1.bf16.msra.mxu0 %v12983_v40  ;;  %11349 = vmatpush1.bf16.msra.mxu1 %v12985_v41  ;;  %v13032_v40 = vcombine.high %v327_v33, %v331_v35  ;;  %v368_v33 = vld [vmem:[%s20151_s1 + $0xa58] sm:$0xff] }
 0x38f   :  { %10817 = vmatprep.subr.bf16.mxu0 %v12992_v42  ;;  %11350 = vmatprep.subr.bf16.mxu1 %v12994_v45  ;;  %v335_v42 = vld [vmem:[%s20151_s1 + $0x950] sm:$0xff]  ;;  %v372_v35 = vld [vmem:[%s20151_s1 + $0xa78] sm:$0xff] }
 0x390   :  { %v339_v45 = vld [vmem:[%s20151_s1 + $0x970] sm:$0xff] }
 0x391   :  { %v13039_v28 = vcombine.low %v335_v42, %v339_v45 }
 0x392   :  { %10818 = vmatpush1.bf16.msra.mxu0 %v12991_v52  ;;  %11351 = vmatpush1.bf16.msra.mxu1 %v12993_v54  ;;  %v13040_v52 = vcombine.high %v335_v42, %v339_v45  ;;  %v13042_v54 = vcombine.high %v336_v34, %v340_v46  ;;  %v376_v42 = vld [vmem:[%s20151_s1 + $0xa98] sm:$0xff]  ;;  %v13073_v46 = vcombine.low %v368_v33, %v372_v35 }
 0x393   :  { %10828 = vmatprep.subr.bf16.mxu0 %v13000_v55  ;;  %11361 = vmatprep.subr.bf16.mxu1 %v13002_v60  ;;  %v343_v55 = vld [vmem:[%s20151_s1 + $0x990] sm:$0xff]  ;;  %v380_v45 = vld [vmem:[%s20151_s1 + $0xab8] sm:$0xff] }
 0x394   :  { %v347_v60 = vld [vmem:[%s20151_s1 + $0x9b0] sm:$0xff] }
 0x395   :  { %10820 = vmatmul.mubr.bf16.vlgmr.msra.gmra.mrb[4].mxu0 %v15325_v38  ;;  %11353 = vmatmul.mubr.bf16.vlgmr.msra.gmra.mrb[4].mxu1 %v15325_v38  ;;  %v320_v38 = vld [vmem:[%s20151_s1 + $0x8d8] sm:$0xff]  ;;  %v13047_v23 = vcombine.low %v343_v55, %v347_v60 }
 0x396   :  { %10829 = vmatpush1.bf16.msra.mxu0 %v12999_v9  ;;  %11362 = vmatpush1.bf16.msra.mxu1 %v13001_v3  ;;  %v13026_v30 = vcombine.high %v320_v38, %v324_v31  ;;  %v13025_v39 = vcombine.low %v320_v38, %v324_v31  ;;  %v13048_v9 = vcombine.high %v343_v55, %v347_v60  ;;  %v384_v55 = vld [vmem:[%s20151_s1 + $0xad8] sm:$0xff] }
 0x397   :  { %10830 = vmatprep.subr.bf16.mxu0 %v13008_v10  ;;  %11363 = vmatprep.subr.bf16.mxu1 %v13010_v11  ;;  %v13050_v3 = vcombine.high %v344_v61, %v348_v0  ;;  %v351_v10 = vld [vmem:[%s20151_s1 + $0x9d0] sm:$0xff]  ;;  %v13057_v31 = vcombine.low %v352_v12, %v356_v13  ;;  %v388_v60 = vld [vmem:[%s20151_s1 + $0xaf8] sm:$0xff]  ;;  %v13081_v0 = vcombine.low %v376_v42, %v380_v45 }
 0x398   :  { %10860 = vmatprep.mubr.bf16.mxu0 %v15340_v48  ;;  %11393 = vmatprep.mubr.bf16.mxu1 %v15340_v48  ;;  %v328_v48 = vld [vmem:[%s20151_s1 + $0x918] sm:$0xff]  ;;  %v355_v11 = vld [vmem:[%s20151_s1 + $0x9f0] sm:$0xff] }
 0x399   :  { %v13034_v41 = vcombine.high %v328_v48, %v332_v36  ;;  %v13033_v50 = vcombine.low %v328_v48, %v332_v36  ;;  %v13055_v38 = vcombine.low %v351_v10, %v355_v11  ;;  %v13065_v36 = vcombine.low %v360_v22, %v364_v24 }
 0x39a   :  { %10831 = vmatpush1.bf16.msra.mxu0 %v13007_v16  ;;  %11364 = vmatpush1.bf16.msra.mxu1 %v13009_v18  ;;  %v13056_v16 = vcombine.high %v351_v10, %v355_v11  ;;  %v13058_v18 = vcombine.high %v352_v12, %v356_v13  ;;  %v392_v10 = vld [vmem:[%s20151_s1 + $0xb18] sm:$0xff]  ;;  %v13089_v13 = vcombine.low %v384_v55, %v388_v60 }
 0x39b   :  { %10832 = vmatprep.subr.bf16.mxu0 %v13016_v20  ;;  %11365 = vmatprep.subr.bf16.mxu1 %v13018_v21  ;;  %v359_v20 = vld [vmem:[%s20151_s1 + $0xa10] sm:$0xff]  ;;  %v396_v11 = vld [vmem:[%s20151_s1 + $0xb38] sm:$0xff] }
 0x39c   :  { %v363_v21 = vld [vmem:[%s20151_s1 + $0xa30] sm:$0xff] }
 0x39d   :  { %v13063_v48 = vcombine.low %v359_v20, %v363_v21 }
 0x39e   :  { %10833 = vmatpush1.bf16.msra.mxu0 %v13015_v47  ;;  %11366 = vmatpush1.bf16.msra.mxu1 %v13017_v27  ;;  %v13064_v47 = vcombine.high %v359_v20, %v363_v21  ;;  %v13066_v27 = vcombine.high %v360_v22, %v364_v24  ;;  %v400_v20 = vld [vmem:[%s20151_s1 + $0xb58] sm:$0xff]  ;;  %v13097_v24 = vcombine.low %v392_v10, %v396_v11 }
 0x39f   :  { %10834 = vmatprep.subr.bf16.mxu0 %v13024_v63  ;;  %11367 = vmatprep.subr.bf16.mxu1 %v13026_v30  ;;  %v367_v63 = vld [vmem:[%s20151_s1 + $0xa50] sm:$0xff]  ;;  %v404_v21 = vld [vmem:[%s20151_s1 + $0xb78] sm:$0xff] }
 0x3a0   :  { %v371_v30 = vld [vmem:[%s20151_s1 + $0xa70] sm:$0xff] }
 0x3a1   :  { %v13071_v34 = vcombine.low %v367_v63, %v371_v30 }
 0x3a2   :  { %10835 = vmatpush1.bf16.msra.mxu0 %v13023_v53  ;;  %11368 = vmatpush1.bf16.msra.mxu1 %v13025_v39  ;;  %v13072_v53 = vcombine.high %v367_v63, %v371_v30  ;;  %v13074_v39 = vcombine.high %v368_v33, %v372_v35  ;;  %v408_v63 = vld [vmem:[%s20151_s1 + $0xb98] sm:$0xff]  ;;  %v13105_v35 = vcombine.low %v400_v20, %v404_v21 }
 0x3a3   :  { %10836 = vmatprep.subr.bf16.mxu0 %v13032_v40  ;;  %11369 = vmatprep.subr.bf16.mxu1 %v13034_v41  ;;  %v375_v40 = vld [vmem:[%s20151_s1 + $0xa90] sm:$0xff]  ;;  %v412_v30 = vld [vmem:[%s20151_s1 + $0xbb8] sm:$0xff] }
 0x3a4   :  { %v379_v41 = vld [vmem:[%s20151_s1 + $0xab0] sm:$0xff] }
 0x3a5   :  { %v13079_v61 = vcombine.low %v375_v40, %v379_v41 }
 0x3a6   :  { %10837 = vmatpush1.bf16.msra.mxu0 %v13031_v49  ;;  %11370 = vmatpush1.bf16.msra.mxu1 %v13033_v50  ;;  %v13080_v49 = vcombine.high %v375_v40, %v379_v41  ;;  %v13082_v50 = vcombine.high %v376_v42, %v380_v45  ;;  %v416_v40 = vld [vmem:[%s20151_s1 + $0xbd8] sm:$0xff]  ;;  %v13113_v45 = vcombine.low %v408_v63, %v412_v30 }
 0x3a7   :  { %10838 = vmatprep.subr.bf16.mxu0 %v13040_v52  ;;  %11371 = vmatprep.subr.bf16.mxu1 %v13042_v54  ;;  %v383_v52 = vld [vmem:[%s20151_s1 + $0xad0] sm:$0xff]  ;;  %v420_v41 = vld [vmem:[%s20151_s1 + $0xbf8] sm:$0xff] }
 0x3a8   :  { %v387_v54 = vld [vmem:[%s20151_s1 + $0xaf0] sm:$0xff] }
 0x3a9   :  { %v13087_v12 = vcombine.low %v383_v52, %v387_v54 }
 0x3aa   :  { %10839 = vmatpush1.bf16.msra.mxu0 %v13039_v28  ;;  %11372 = vmatpush1.bf16.msra.mxu1 %v13041_v44  ;;  %v13088_v28 = vcombine.high %v383_v52, %v387_v54  ;;  %v13090_v44 = vcombine.high %v384_v55, %v388_v60  ;;  %v424_v52 = vld [vmem:[%s20151_s1 + $0xc18] sm:$0xff]  ;;  %v13121_v60 = vcombine.low %v416_v40, %v420_v41 }
 0x3ab   :  { %10840 = vmatprep.subr.bf16.mxu0 %v13048_v9  ;;  %11373 = vmatprep.subr.bf16.mxu1 %v13050_v3  ;;  %v391_v9 = vld [vmem:[%s20151_s1 + $0xb10] sm:$0xff]  ;;  %v428_v54 = vld [vmem:[%s20151_s1 + $0xc38] sm:$0xff] }
 0x3ac   :  { %v395_v3 = vld [vmem:[%s20151_s1 + $0xb30] sm:$0xff] }
 0x3ad   :  { %v13095_v22 = vcombine.low %v391_v9, %v395_v3 }
 0x3ae   :  { %10841 = vmatpush1.bf16.msra.mxu0 %v13047_v23  ;;  %11374 = vmatpush1.bf16.msra.mxu1 %v13049_v1  ;;  %v13096_v23 = vcombine.high %v391_v9, %v395_v3  ;;  %v13098_v1 = vcombine.high %v392_v10, %v396_v11  ;;  %v432_v9 = vld [vmem:[%s20151_s1 + $0xc58] sm:$0xff]  ;;  %v13129_v11 = vcombine.low %v424_v52, %v428_v54 }
 0x3af   :  { %10842 = vmatprep.subr.bf16.mxu0 %v13056_v16  ;;  %11375 = vmatprep.subr.bf16.mxu1 %v13058_v18  ;;  %v399_v16 = vld [vmem:[%s20151_s1 + $0xb50] sm:$0xff]  ;;  %v436_v3 = vld [vmem:[%s20151_s1 + $0xc78] sm:$0xff] }
 0x3b0   :  { %v403_v18 = vld [vmem:[%s20151_s1 + $0xb70] sm:$0xff] }
 0x3b1   :  { %v13103_v33 = vcombine.low %v399_v16, %v403_v18 }
 0x3b2   :  { %10843 = vmatpush1.bf16.msra.mxu0 %v13055_v38  ;;  %11376 = vmatpush1.bf16.msra.mxu1 %v13057_v31  ;;  %v13104_v38 = vcombine.high %v399_v16, %v403_v18  ;;  %v13106_v31 = vcombine.high %v400_v20, %v404_v21  ;;  %v440_v16 = vld [vmem:[%s20151_s1 + $0xc98] sm:$0xff]  ;;  %v13137_v21 = vcombine.low %v432_v9, %v436_v3 }
 0x3b3   :  { %10844 = vmatprep.subr.bf16.mxu0 %v13064_v47  ;;  %11377 = vmatprep.subr.bf16.mxu1 %v13066_v27  ;;  %v407_v47 = vld [vmem:[%s20151_s1 + $0xb90] sm:$0xff]  ;;  %v444_v18 = vld [vmem:[%s20151_s1 + $0xcb8] sm:$0xff] }
 0x3b4   :  { %v411_v27 = vld [vmem:[%s20151_s1 + $0xbb0] sm:$0xff] }
 0x3b5   :  { %v13111_v42 = vcombine.low %v407_v47, %v411_v27 }
 0x3b6   :  { %10845 = vmatpush1.bf16.msra.mxu0 %v13063_v48  ;;  %11378 = vmatpush1.bf16.msra.mxu1 %v13065_v36  ;;  %v13112_v48 = vcombine.high %v407_v47, %v411_v27  ;;  %v13114_v36 = vcombine.high %v408_v63, %v412_v30  ;;  %v452_v47 = vld [vmem:[%s20151_s1 + $0xcf8] sm:$0xff]  ;;  %v13145_v63 = vcombine.low %v440_v16, %v444_v18 }
 0x3b7   :  { %10846 = vmatprep.subr.bf16.mxu0 %v13072_v53  ;;  %11379 = vmatprep.subr.bf16.mxu1 %v13074_v39  ;;  %v415_v53 = vld [vmem:[%s20151_s1 + $0xbd0] sm:$0xff] }
 0x3b8   :  { %v419_v39 = vld [vmem:[%s20151_s1 + $0xbf0] sm:$0xff] }
 0x3b9   :  { %v13119_v55 = vcombine.low %v415_v53, %v419_v39 }
 0x3ba   :  { %10847 = vmatpush1.bf16.msra.mxu0 %v13071_v34  ;;  %11380 = vmatpush1.bf16.msra.mxu1 %v13073_v46  ;;  %v13120_v34 = vcombine.high %v415_v53, %v419_v39  ;;  %v13122_v46 = vcombine.high %v416_v40, %v420_v41 }
 0x3bb   :  { %10848 = vmatprep.subr.bf16.mxu0 %v13080_v49  ;;  %11381 = vmatprep.subr.bf16.mxu1 %v13082_v50  ;;  %v423_v49 = vld [vmem:[%s20151_s1 + $0xc10] sm:$0xff] }
 0x3bc   :  { %v427_v50 = vld [vmem:[%s20151_s1 + $0xc30] sm:$0xff] }
 0x3bd   :  { %v13127_v10 = vcombine.low %v423_v49, %v427_v50 }
 0x3be   :  { %10849 = vmatpush1.bf16.msra.mxu0 %v13079_v61  ;;  %11382 = vmatpush1.bf16.msra.mxu1 %v13081_v0  ;;  %v13128_v61 = vcombine.high %v423_v49, %v427_v50  ;;  %v13130_v0 = vcombine.high %v424_v52, %v428_v54 }
 0x3bf   :  { %10850 = vmatprep.subr.bf16.mxu0 %v13088_v28  ;;  %11383 = vmatprep.subr.bf16.mxu1 %v13090_v44  ;;  %v431_v28 = vld [vmem:[%s20151_s1 + $0xc50] sm:$0xff] }
 0x3c0   :  { %v435_v44 = vld [vmem:[%s20151_s1 + $0xc70] sm:$0xff] }
 0x3c1   :  { %v13135_v20 = vcombine.low %v431_v28, %v435_v44 }
 0x3c2   :  { %10851 = vmatpush1.bf16.msra.mxu0 %v13087_v12  ;;  %11384 = vmatpush1.bf16.msra.mxu1 %v13089_v13  ;;  %v13136_v12 = vcombine.high %v431_v28, %v435_v44  ;;  %v13138_v13 = vcombine.high %v432_v9, %v436_v3 }
 0x3c3   :  { %10852 = vmatprep.subr.bf16.mxu0 %v13096_v23  ;;  %11385 = vmatprep.subr.bf16.mxu1 %v13098_v1  ;;  %v439_v23 = vld [vmem:[%s20151_s1 + $0xc90] sm:$0xff] }
 0x3c4   :  { %v443_v1 = vld [vmem:[%s20151_s1 + $0xcb0] sm:$0xff] }
 0x3c5   :  { %v13143_v27 = vcombine.low %v439_v23, %v443_v1 }
 0x3c6   :  { %10853 = vmatpush1.bf16.msra.mxu0 %v13095_v22  ;;  %11386 = vmatpush1.bf16.msra.mxu1 %v13097_v24  ;;  %v13144_v22 = vcombine.high %v439_v23, %v443_v1  ;;  %v13146_v24 = vcombine.high %v440_v16, %v444_v18  ;;  %v480_v1 = vld [vmem:[%s20151_s1 + $0xdd8] sm:$0xff] }
 0x3c7   :  { %10854 = vmatprep.subr.bf16.mxu0 %v13104_v38  ;;  %11387 = vmatprep.subr.bf16.mxu1 %v13106_v31  ;;  %v447_v38 = vld [vmem:[%s20151_s1 + $0xcd0] sm:$0xff]  ;;  %v484_v16 = vld [vmem:[%s20151_s1 + $0xdf8] sm:$0xff] }
 0x3c8   :  { %v451_v31 = vld [vmem:[%s20151_s1 + $0xcf0] sm:$0xff] }
 0x3c9   :  { %v13152_v30 = vcombine.high %v447_v38, %v451_v31  ;;  %v13151_v53 = vcombine.low %v447_v38, %v451_v31 }
 0x3ca   :  { %10855 = vmatpush1.bf16.msra.mxu0 %v13103_v33  ;;  %11388 = vmatpush1.bf16.msra.mxu1 %v13105_v35  ;;  %v455_v35 = vld [vmem:[%s20151_s1 + $0xd10] sm:$0xff] }
 0x3cb   :  { %10856 = vmatprep.subr.bf16.mxu0 %v13112_v48  ;;  %11389 = vmatprep.subr.bf16.mxu1 %v13114_v36  ;;  %v459_v48 = vld [vmem:[%s20151_s1 + $0xd30] sm:$0xff]  ;;  %v460_v36 = vld [vmem:[%s20151_s1 + $0xd38] sm:$0xff] }
 0x3cc   :  { %v13160_v40 = vcombine.high %v455_v35, %v459_v48  ;;  %v13159_v49 = vcombine.low %v455_v35, %v459_v48  ;;  %v13185_v48 = vcombine.low %v480_v1, %v484_v16 }
 0x3ce   :  { %10857 = vmatpush1.bf16.msra.mxu0 %v13111_v42  ;;  %11390 = vmatpush1.bf16.msra.mxu1 %v13113_v45  ;;  %v463_v42 = vld [vmem:[%s20151_s1 + $0xd50] sm:$0xff] }
 0x3cf   :  { %10858 = vmatprep.subr.bf16.mxu0 %v13120_v34  ;;  %11391 = vmatprep.subr.bf16.mxu1 %v13122_v46  ;;  %v467_v45 = vld [vmem:[%s20151_s1 + $0xd70] sm:$0xff]  ;;  %v464_v34 = vld [vmem:[%s20151_s1 + $0xd58] sm:$0xff] }
 0x3d0   :  { %v468_v46 = vld [vmem:[%s20151_s1 + $0xd78] sm:$0xff]  ;;  %v13168_v52 = vcombine.high %v463_v42, %v467_v45  ;;  %v13167_v28 = vcombine.low %v463_v42, %v467_v45 }
 0x3d1   :  { %v13170_v54 = vcombine.high %v464_v34, %v468_v46  ;;  %v13169_v44 = vcombine.low %v464_v34, %v468_v46 }
 0x3d2   :  { %10859 = vmatpush1.bf16.msra.mxu0 %v13119_v55  ;;  %11392 = vmatpush1.bf16.msra.mxu1 %v13121_v60  ;;  %v471_v55 = vld [vmem:[%s20151_s1 + $0xd90] sm:$0xff] }
 0x3d3   :  { %10869 = vmatprep.subr.bf16.mxu0 %v13128_v61  ;;  %11402 = vmatprep.subr.bf16.mxu1 %v13130_v0  ;;  %v475_v60 = vld [vmem:[%s20151_s1 + $0xdb0] sm:$0xff]  ;;  %v472_v61 = vld [vmem:[%s20151_s1 + $0xd98] sm:$0xff] }
 0x3d4   :  { %v476_v0 = vld [vmem:[%s20151_s1 + $0xdb8] sm:$0xff]  ;;  %v13176_v9 = vcombine.high %v471_v55, %v475_v60 }
 0x3d5   :  { %10861 = vmatmul.mubr.bf16.vlgmr.msra.gmra.mrb[4].mxu0 %v15528_v58  ;;  %11394 = vmatmul.mubr.bf16.vlgmr.msra.gmra.mrb[4].mxu1 %v15528_v58  ;;  %v448_v58 = vld [vmem:[%s20151_s1 + $0xcd8] sm:$0xff]  ;;  %v13177_v38 = vcombine.low %v472_v61, %v476_v0 }
 0x3d6   :  { %10870 = vmatpush1.bf16.msra.mxu0 %v13127_v10  ;;  %11403 = vmatpush1.bf16.msra.mxu1 %v13129_v11  ;;  %v13154_v33 = vcombine.high %v448_v58, %v452_v47  ;;  %v13153_v39 = vcombine.low %v448_v58, %v452_v47  ;;  %v13178_v10 = vcombine.high %v472_v61, %v476_v0  ;;  %v479_v11 = vld [vmem:[%s20151_s1 + $0xdd0] sm:$0xff] }
 0x3d7   :  { %10871 = vmatprep.subr.bf16.mxu0 %v13136_v12  ;;  %11404 = vmatprep.subr.bf16.mxu1 %v13138_v13  ;;  %v483_v12 = vld [vmem:[%s20151_s1 + $0xdf0] sm:$0xff]  ;;  %v13186_v47 = vcombine.high %v480_v1, %v484_v16 }
 0x3d8   :  { %10901 = vmatprep.mubr.bf16.mxu0 %v15544_v4  ;;  %11434 = vmatprep.mubr.bf16.mxu1 %v15544_v4  ;;  %v456_v4 = vld [vmem:[%s20151_s1 + $0xd18] sm:$0xff]  ;;  %v13184_v31 = vcombine.high %v479_v11, %v483_v12  ;;  %v13183_v35 = vcombine.low %v479_v11, %v483_v12 }
 0x3d9   :  { %v13162_v41 = vcombine.high %v456_v4, %v460_v36  ;;  %v13161_v50 = vcombine.low %v456_v4, %v460_v36 }
 0x3da   :  { %10872 = vmatpush1.bf16.msra.mxu0 %v13135_v20  ;;  %11405 = vmatpush1.bf16.msra.mxu1 %v13137_v21  ;;  %v13175_v21 = vcombine.low %v471_v55, %v475_v60 }
 0x3db   :  { %10873 = vmatprep.subr.bf16.mxu0 %v13144_v22  ;;  %11406 = vmatprep.subr.bf16.mxu1 %v13146_v24 }
 0x3de   :  { %10874 = vmatpush1.bf16.msra.mxu0 %v13143_v27  ;;  %11407 = vmatpush1.bf16.msra.mxu1 %v13145_v63  ;;  %v487_v27 = vld [vmem:[%s20151_s1 + $0xe10] sm:$0xff] }
 0x3df   :  { %10875 = vmatprep.subr.bf16.mxu0 %v13152_v30  ;;  %11408 = vmatprep.subr.bf16.mxu1 %v13154_v33  ;;  %v491_v63 = vld [vmem:[%s20151_s1 + $0xe30] sm:$0xff]  ;;  %v488_v30 = vld [vmem:[%s20151_s1 + $0xe18] sm:$0xff] }
 0x3e0   :  { %v492_v33 = vld [vmem:[%s20151_s1 + $0xe38] sm:$0xff]  ;;  %v13192_v4 = vcombine.high %v487_v27, %v491_v63  ;;  %v13191_v42 = vcombine.low %v487_v27, %v491_v63  ;;  %v527_v27 = vld [vmem:[%s20151_s1 + $0xf50] sm:$0xff] }
 0x3e1   :  { %v13194_v36 = vcombine.high %v488_v30, %v492_v33  ;;  %v13193_v45 = vcombine.low %v488_v30, %v492_v33  ;;  %v531_v63 = vld [vmem:[%s20151_s1 + $0xf70] sm:$0xff]  ;;  %v528_v30 = vld [vmem:[%s20151_s1 + $0xf58] sm:$0xff] }
 0x3e2   :  { %10876 = vmatpush1.bf16.msra.mxu0 %v13151_v53  ;;  %11409 = vmatpush1.bf16.msra.mxu1 %v13153_v39  ;;  %v495_v53 = vld [vmem:[%s20151_s1 + $0xe50] sm:$0xff]  ;;  %v532_v33 = vld [vmem:[%s20151_s1 + $0xf78] sm:$0xff] }
 0x3e3   :  { %10877 = vmatprep.subr.bf16.mxu0 %v13160_v40  ;;  %11410 = vmatprep.subr.bf16.mxu1 %v13162_v41  ;;  %v499_v39 = vld [vmem:[%s20151_s1 + $0xe70] sm:$0xff]  ;;  %v496_v40 = vld [vmem:[%s20151_s1 + $0xe58] sm:$0xff] }
 0x3e4   :  { %v500_v41 = vld [vmem:[%s20151_s1 + $0xe78] sm:$0xff]  ;;  %v13200_v34 = vcombine.high %v495_v53, %v499_v39  ;;  %v13199_v55 = vcombine.low %v495_v53, %v499_v39  ;;  %v535_v53 = vld [vmem:[%s20151_s1 + $0xf90] sm:$0xff] }
 0x3e5   :  { %v13202_v46 = vcombine.high %v496_v40, %v500_v41  ;;  %v13201_v60 = vcombine.low %v496_v40, %v500_v41  ;;  %v539_v39 = vld [vmem:[%s20151_s1 + $0xfb0] sm:$0xff]  ;;  %v536_v40 = vld [vmem:[%s20151_s1 + $0xf98] sm:$0xff] }
 0x3e6   :  { %10878 = vmatpush1.bf16.msra.mxu0 %v13159_v49  ;;  %11411 = vmatpush1.bf16.msra.mxu1 %v13161_v50  ;;  %v503_v49 = vld [vmem:[%s20151_s1 + $0xe90] sm:$0xff]  ;;  %v540_v41 = vld [vmem:[%s20151_s1 + $0xfb8] sm:$0xff] }
 0x3e7   :  { %10879 = vmatprep.subr.bf16.mxu0 %v13168_v52  ;;  %11412 = vmatprep.subr.bf16.mxu1 %v13170_v54  ;;  %v507_v50 = vld [vmem:[%s20151_s1 + $0xeb0] sm:$0xff]  ;;  %v504_v52 = vld [vmem:[%s20151_s1 + $0xe98] sm:$0xff] }
 0x3e8   :  { %v18116_v3 = vpop.f32.mrb[0].mxu0  ;;  %v18124_v13 = vpop.f32.mrb[0].mxu1  ;;  %v508_v54 = vld [vmem:[%s20151_s1 + $0xeb8] sm:$0xff]  ;;  %v13208_v61 = vcombine.high %v503_v49, %v507_v50  ;;  %v13207_v11 = vcombine.low %v503_v49, %v507_v50  ;;  %v543_v49 = vld [vmem:[%s20151_s1 + $0xfd0] sm:$0xff] }
 0x3e9   :  { %v18126_v23 = vpop.f32.mrb[1].mxu0  ;;  %v18134_v18 = vpop.f32.mrb[1].mxu1  ;;  %v13210_v0 = vcombine.high %v504_v52, %v508_v54  ;;  %v13209_v12 = vcombine.low %v504_v52, %v508_v54  ;;  %v547_v50 = vld [vmem:[%s20151_s1 + $0xff0] sm:$0xff]  ;;  %v544_v52 = vld [vmem:[%s20151_s1 + $0xfd8] sm:$0xff] }
 0x3ea   :  { %v10210_v20 = vpop.f32.mrb[2].mxu0  ;;  %10880 = vmatpush1.bf16.msra.mxu0 %v13167_v28  ;;  %v10743_v22 = vpop.f32.mrb[2].mxu1  ;;  %11413 = vmatpush1.bf16.msra.mxu1 %v13169_v44  ;;  %v511_v28 = vld [vmem:[%s20151_s1 + $0xed0] sm:$0xff]  ;;  %v548_v54 = vld [vmem:[%s20151_s1 + $0xff8] sm:$0xff] }
 0x3eb   :  { %v10211_v24 = vpop.f32.mrb[3].mxu0  ;;  %10881 = vmatprep.subr.bf16.mxu0 %v13176_v9  ;;  %v10744_v58 = vpop.f32.mrb[3].mxu1  ;;  %11414 = vmatprep.subr.bf16.mxu1 %v13178_v10  ;;  %v515_v44 = vld [vmem:[%s20151_s1 + $0xef0] sm:$0xff]  ;;  %v512_v9 = vld [vmem:[%s20151_s1 + $0xed8] sm:$0xff] }
 0x3ec   :  { %v516_v10 = vld [vmem:[%s20151_s1 + $0xef8] sm:$0xff]  ;;  %v13216_v1 = vcombine.high %v511_v28, %v515_v44  ;;  %v519_v20 = vld [vmem:[%s20151_s1 + $0xf10] sm:$0xff] }
 0x3ed   :  { %v13218_v16 = vcombine.high %v512_v9, %v516_v10  ;;  %v520_v22 = vld [vmem:[%s20151_s1 + $0xf18] sm:$0xff] }
 0x3ee   :  { %10882 = vmatpush1.bf16.msra.mxu0 %v13175_v21  ;;  %11415 = vmatpush1.bf16.msra.mxu1 %v13177_v38  ;;  %v523_v21 = vld [vmem:[%s20151_s1 + $0xf30] sm:$0xff]  ;;  %v524_v24 = vld [vmem:[%s20151_s1 + $0xf38] sm:$0xff]  ;;  %v13215_v38 = vcombine.low %v511_v28, %v515_v44 }
 0x3ef   :  { %10883 = vmatprep.subr.bf16.mxu0 %v13184_v31  ;;  %11416 = vmatprep.subr.bf16.mxu1 %v13186_v47  ;;  %v13217_v31 = vcombine.low %v512_v9, %v516_v10  ;;  %v13224_v58 = vcombine.high %v519_v20, %v523_v21  ;;  %v13226_v47 = vcombine.high %v520_v22, %v524_v24  ;;  %v551_v28 = vld [vmem:[%s20151_s1 + $0x1010] sm:$0xff]  ;;  %v552_v9 = vld [vmem:[%s20151_s1 + $0x1018] sm:$0xff] }
 0x3f0   :  { %v555_v44 = vld [vmem:[%s20151_s1 + $0x1030] sm:$0xff]  ;;  %v556_v10 = vld [vmem:[%s20151_s1 + $0x1038] sm:$0xff] }
 0x3f2   :  { %10884 = vmatpush1.bf16.msra.mxu0 %v13183_v35  ;;  %11417 = vmatpush1.bf16.msra.mxu1 %v13185_v48  ;;  %v13223_v35 = vcombine.low %v519_v20, %v523_v21  ;;  %v13225_v48 = vcombine.low %v520_v22, %v524_v24  ;;  %v559_v20 = vld [vmem:[%s20151_s1 + $0x1050] sm:$0xff]  ;;  %v560_v22 = vld [vmem:[%s20151_s1 + $0x1058] sm:$0xff] }
 0x3f3   :  { %10885 = vmatprep.subr.bf16.mxu0 %v13192_v4  ;;  %11418 = vmatprep.subr.bf16.mxu1 %v13194_v36  ;;  %v13232_v4 = vcombine.high %v527_v27, %v531_v63  ;;  %v13234_v36 = vcombine.high %v528_v30, %v532_v33  ;;  %v563_v21 = vld [vmem:[%s20151_s1 + $0x1070] sm:$0xff]  ;;  %v564_v24 = vld [vmem:[%s20151_s1 + $0x1078] sm:$0xff] }
 0x3f6   :  { %10886 = vmatpush1.bf16.msra.mxu0 %v13191_v42  ;;  %11419 = vmatpush1.bf16.msra.mxu1 %v13193_v45  ;;  %v13231_v42 = vcombine.low %v527_v27, %v531_v63  ;;  %v13233_v45 = vcombine.low %v528_v30, %v532_v33  ;;  %v567_v27 = vld [vmem:[%s20151_s1 + $0x1090] sm:$0xff]  ;;  %v568_v30 = vld [vmem:[%s20151_s1 + $0x1098] sm:$0xff] }
 0x3f7   :  { %10887 = vmatprep.subr.bf16.mxu0 %v13200_v34  ;;  %11420 = vmatprep.subr.bf16.mxu1 %v13202_v46  ;;  %v13240_v34 = vcombine.high %v535_v53, %v539_v39  ;;  %v13242_v46 = vcombine.high %v536_v40, %v540_v41  ;;  %v571_v63 = vld [vmem:[%s20151_s1 + $0x10b0] sm:$0xff]  ;;  %v572_v33 = vld [vmem:[%s20151_s1 + $0x10b8] sm:$0xff] }
 0x3fa   :  { %10888 = vmatpush1.bf16.msra.mxu0 %v13199_v55  ;;  %11421 = vmatpush1.bf16.msra.mxu1 %v13201_v60  ;;  %v13239_v55 = vcombine.low %v535_v53, %v539_v39  ;;  %v13241_v60 = vcombine.low %v536_v40, %v540_v41  ;;  %v575_v53 = vld [vmem:[%s20151_s1 + $0x10d0] sm:$0xff]  ;;  %v580_v40 = vld [vmem:[%s20151_s1 + $0x10f8] sm:$0xff]  ;;  %v13271_v41 = vcombine.low %v567_v27, %v571_v63 }
 0x3fb   :  { %10889 = vmatprep.subr.bf16.mxu0 %v13208_v61  ;;  %11422 = vmatprep.subr.bf16.mxu1 %v13210_v0  ;;  %v13248_v61 = vcombine.high %v543_v49, %v547_v50  ;;  %v13250_v0 = vcombine.high %v544_v52, %v548_v54  ;;  %v579_v39 = vld [vmem:[%s20151_s1 + $0x10f0] sm:$0xff] }
 0x3fe   :  { %10890 = vmatpush1.bf16.msra.mxu0 %v13207_v11  ;;  %11423 = vmatpush1.bf16.msra.mxu1 %v13209_v12  ;;  %v13247_v11 = vcombine.low %v543_v49, %v547_v50  ;;  %v13249_v12 = vcombine.low %v544_v52, %v548_v54  ;;  %v587_v49 = vld [vmem:[%s20151_s1 + $0x1130] sm:$0xff]  ;;  %v588_v50 = vld [vmem:[%s20151_s1 + $0x1138] sm:$0xff]  ;;  %v13279_v52 = vcombine.low %v575_v53, %v579_v39 }
 0x3ff   :  { %10891 = vmatprep.subr.bf16.mxu0 %v13216_v1  ;;  %11424 = vmatprep.subr.bf16.mxu1 %v13218_v16  ;;  %v13256_v1 = vcombine.high %v551_v28, %v555_v44  ;;  %v13258_v16 = vcombine.high %v552_v9, %v556_v10 }
 0x402   :  { %10892 = vmatpush1.bf16.msra.mxu0 %v13215_v38  ;;  %11425 = vmatpush1.bf16.msra.mxu1 %v13217_v31  ;;  %v13255_v38 = vcombine.low %v551_v28, %v555_v44  ;;  %v13257_v31 = vcombine.low %v552_v9, %v556_v10  ;;  %v592_v28 = vld [vmem:[%s20151_s1 + $0x1158] sm:$0xff] }
 0x403   :  { %10893 = vmatprep.subr.bf16.mxu0 %v13224_v58  ;;  %11426 = vmatprep.subr.bf16.mxu1 %v13226_v47  ;;  %v13264_v58 = vcombine.high %v559_v20, %v563_v21  ;;  %v13266_v47 = vcombine.high %v560_v22, %v564_v24  ;;  %v596_v44 = vld [vmem:[%s20151_s1 + $0x1178] sm:$0xff] }
 0x406   :  { %10894 = vmatpush1.bf16.msra.mxu0 %v13223_v35  ;;  %11427 = vmatpush1.bf16.msra.mxu1 %v13225_v48  ;;  %v13263_v35 = vcombine.low %v559_v20, %v563_v21  ;;  %v13265_v48 = vcombine.low %v560_v22, %v564_v24  ;;  %v600_v20 = vld [vmem:[%s20151_s1 + $0x1198] sm:$0xff]  ;;  %v13297_v24 = vcombine.low %v592_v28, %v596_v44 }
 0x407   :  { %10895 = vmatprep.subr.bf16.mxu0 %v13232_v4  ;;  %11428 = vmatprep.subr.bf16.mxu1 %v13234_v36  ;;  %v13272_v4 = vcombine.high %v567_v27, %v571_v63  ;;  %v13274_v36 = vcombine.high %v568_v30, %v572_v33  ;;  %v604_v21 = vld [vmem:[%s20151_s1 + $0x11b8] sm:$0xff] }
 0x408   :  { %v608_v27 = vld [vmem:[%s20151_s1 + $0x11d8] sm:$0xff] }
 0x409   :  { %v612_v63 = vld [vmem:[%s20151_s1 + $0x11f8] sm:$0xff] }
 0x40a   :  { %10896 = vmatpush1.bf16.msra.mxu0 %v13231_v42  ;;  %11429 = vmatpush1.bf16.msra.mxu1 %v13233_v45  ;;  %v13273_v42 = vcombine.low %v568_v30, %v572_v33  ;;  %v13280_v45 = vcombine.high %v575_v53, %v579_v39  ;;  %v13305_v33 = vcombine.low %v600_v20, %v604_v21  ;;  %v616_v53 = vld [vmem:[%s20151_s1 + $0x1218] sm:$0xff] }
 0x40b   :  { %10897 = vmatprep.subr.bf16.mxu0 %v13240_v34  ;;  %11430 = vmatprep.subr.bf16.mxu1 %v13242_v46  ;;  %v583_v46 = vld [vmem:[%s20151_s1 + $0x1110] sm:$0xff]  ;;  %v620_v39 = vld [vmem:[%s20151_s1 + $0x1238] sm:$0xff] }
 0x40c   :  { %v13287_v9 = vcombine.low %v583_v46, %v587_v49 }
 0x40e   :  { %10898 = vmatpush1.bf16.msra.mxu0 %v13239_v55  ;;  %11431 = vmatpush1.bf16.msra.mxu1 %v13241_v60  ;;  %v13288_v55 = vcombine.high %v583_v46, %v587_v49  ;;  %v624_v46 = vld [vmem:[%s20151_s1 + $0x1258] sm:$0xff] }
 0x40f   :  { %10899 = vmatprep.subr.bf16.mxu0 %v13248_v61  ;;  %11432 = vmatprep.subr.bf16.mxu1 %v13250_v0  ;;  %v591_v61 = vld [vmem:[%s20151_s1 + $0x1150] sm:$0xff]  ;;  %v628_v49 = vld [vmem:[%s20151_s1 + $0x1278] sm:$0xff] }
 0x410   :  { %v595_v0 = vld [vmem:[%s20151_s1 + $0x1170] sm:$0xff] }
 0x411   :  { %v13295_v22 = vcombine.low %v591_v61, %v595_v0 }
 0x412   :  { %10900 = vmatpush1.bf16.msra.mxu0 %v13247_v11  ;;  %11433 = vmatpush1.bf16.msra.mxu1 %v13249_v12  ;;  %v13296_v11 = vcombine.high %v591_v61, %v595_v0  ;;  %v13298_v12 = vcombine.high %v592_v28, %v596_v44  ;;  %v632_v61 = vld [vmem:[%s20151_s1 + $0x1298] sm:$0xff]  ;;  %v13329_v44 = vcombine.low %v624_v46, %v628_v49 }
 0x413   :  { %10910 = vmatprep.subr.bf16.mxu0 %v13256_v1  ;;  %11443 = vmatprep.subr.bf16.mxu1 %v13258_v16  ;;  %v599_v1 = vld [vmem:[%s20151_s1 + $0x1190] sm:$0xff]  ;;  %v636_v0 = vld [vmem:[%s20151_s1 + $0x12b8] sm:$0xff] }
 0x414   :  { %v603_v16 = vld [vmem:[%s20151_s1 + $0x11b0] sm:$0xff] }
 0x415   :  { %10902 = vmatmul.mubr.bf16.vlgmr.msra.gmra.mrb[4].mxu0 %v15743_v19  ;;  %11435 = vmatmul.mubr.bf16.vlgmr.msra.gmra.mrb[4].mxu1 %v15743_v19  ;;  %v576_v19 = vld [vmem:[%s20151_s1 + $0x10d8] sm:$0xff]  ;;  %v13303_v30 = vcombine.low %v599_v1, %v603_v16 }
 0x416   :  { %10911 = vmatpush1.bf16.msra.mxu0 %v13255_v38  ;;  %11444 = vmatpush1.bf16.msra.mxu1 %v13257_v31  ;;  %v13282_v34 = vcombine.high %v576_v19, %v580_v40  ;;  %v13281_v54 = vcombine.low %v576_v19, %v580_v40  ;;  %v13304_v38 = vcombine.high %v599_v1, %v603_v16  ;;  %v640_v1 = vld [vmem:[%s20151_s1 + $0x12d8] sm:$0xff] }
 0x417   :  { %10912 = vmatprep.subr.bf16.mxu0 %v13264_v58  ;;  %11445 = vmatprep.subr.bf16.mxu1 %v13266_v47  ;;  %v13306_v31 = vcombine.high %v600_v20, %v604_v21  ;;  %v607_v58 = vld [vmem:[%s20151_s1 + $0x11d0] sm:$0xff]  ;;  %v13313_v40 = vcombine.low %v608_v27, %v612_v63  ;;  %v644_v16 = vld [vmem:[%s20151_s1 + $0x12f8] sm:$0xff]  ;;  %v13337_v21 = vcombine.low %v632_v61, %v636_v0 }
 0x418   :  { %10942 = vmatprep.mubr.bf16.mxu0 %v15758_v29  ;;  %11475 = vmatprep.mubr.bf16.mxu1 %v15758_v29  ;;  %v584_v29 = vld [vmem:[%s20151_s1 + $0x1118] sm:$0xff]  ;;  %v611_v47 = vld [vmem:[%s20151_s1 + $0x11f0] sm:$0xff] }
 0x419   :  { %v13290_v60 = vcombine.high %v584_v29, %v588_v50  ;;  %v13289_v10 = vcombine.low %v584_v29, %v588_v50  ;;  %v13311_v19 = vcombine.low %v607_v58, %v611_v47  ;;  %v13321_v50 = vcombine.low %v616_v53, %v620_v39 }
 0x41a   :  { %10913 = vmatpush1.bf16.msra.mxu0 %v13263_v35  ;;  %11446 = vmatpush1.bf16.msra.mxu1 %v13265_v48  ;;  %v13312_v35 = vcombine.high %v607_v58, %v611_v47  ;;  %v13314_v48 = vcombine.high %v608_v27, %v612_v63  ;;  %v648_v58 = vld [vmem:[%s20151_s1 + $0x1318] sm:$0xff]  ;;  %v13345_v63 = vcombine.low %v640_v1, %v644_v16 }
 0x41b   :  { %10914 = vmatprep.subr.bf16.mxu0 %v13272_v4  ;;  %11447 = vmatprep.subr.bf16.mxu1 %v13274_v36  ;;  %v615_v4 = vld [vmem:[%s20151_s1 + $0x1210] sm:$0xff]  ;;  %v652_v47 = vld [vmem:[%s20151_s1 + $0x1338] sm:$0xff] }
 0x41c   :  { %v619_v36 = vld [vmem:[%s20151_s1 + $0x1230] sm:$0xff] }
 0x41d   :  { %v13319_v29 = vcombine.low %v615_v4, %v619_v36 }
 0x41e   :  { %10915 = vmatpush1.bf16.msra.mxu0 %v13271_v41  ;;  %11448 = vmatpush1.bf16.msra.mxu1 %v13273_v42  ;;  %v13320_v41 = vcombine.high %v615_v4, %v619_v36  ;;  %v13322_v42 = vcombine.high %v616_v53, %v620_v39  ;;  %v656_v4 = vld [vmem:[%s20151_s1 + $0x1358] sm:$0xff]  ;;  %v13353_v39 = vcombine.low %v648_v58, %v652_v47 }
 0x41f   :  { %10916 = vmatprep.subr.bf16.mxu0 %v13280_v45  ;;  %11449 = vmatprep.subr.bf16.mxu1 %v13282_v34  ;;  %v623_v45 = vld [vmem:[%s20151_s1 + $0x1250] sm:$0xff]  ;;  %v660_v36 = vld [vmem:[%s20151_s1 + $0x1378] sm:$0xff] }
 0x420   :  { %v627_v34 = vld [vmem:[%s20151_s1 + $0x1270] sm:$0xff] }
 0x421   :  { %v13327_v28 = vcombine.low %v623_v45, %v627_v34 }
 0x422   :  { %10917 = vmatpush1.bf16.msra.mxu0 %v13279_v52  ;;  %11450 = vmatpush1.bf16.msra.mxu1 %v13281_v54  ;;  %v13328_v52 = vcombine.high %v623_v45, %v627_v34  ;;  %v13330_v54 = vcombine.high %v624_v46, %v628_v49  ;;  %v664_v45 = vld [vmem:[%s20151_s1 + $0x1398] sm:$0xff]  ;;  %v13361_v49 = vcombine.low %v656_v4, %v660_v36 }
 0x423   :  { %10918 = vmatprep.subr.bf16.mxu0 %v13288_v55  ;;  %11451 = vmatprep.subr.bf16.mxu1 %v13290_v60  ;;  %v631_v55 = vld [vmem:[%s20151_s1 + $0x1290] sm:$0xff]  ;;  %v668_v34 = vld [vmem:[%s20151_s1 + $0x13b8] sm:$0xff] }
 0x424   :  { %v635_v60 = vld [vmem:[%s20151_s1 + $0x12b0] sm:$0xff] }
 0x425   :  { %v13335_v20 = vcombine.low %v631_v55, %v635_v60 }
 0x426   :  { %10919 = vmatpush1.bf16.msra.mxu0 %v13287_v9  ;;  %11452 = vmatpush1.bf16.msra.mxu1 %v13289_v10  ;;  %v13336_v9 = vcombine.high %v631_v55, %v635_v60  ;;  %v13338_v10 = vcombine.high %v632_v61, %v636_v0  ;;  %v672_v55 = vld [vmem:[%s20151_s1 + $0x13d8] sm:$0xff]  ;;  %v13369_v0 = vcombine.low %v664_v45, %v668_v34 }
 0x427   :  { %10920 = vmatprep.subr.bf16.mxu0 %v13296_v11  ;;  %11453 = vmatprep.subr.bf16.mxu1 %v13298_v12  ;;  %v639_v11 = vld [vmem:[%s20151_s1 + $0x12d0] sm:$0xff]  ;;  %v676_v60 = vld [vmem:[%s20151_s1 + $0x13f8] sm:$0xff] }
 0x428   :  { %v643_v12 = vld [vmem:[%s20151_s1 + $0x12f0] sm:$0xff] }
 0x429   :  { %v13343_v27 = vcombine.low %v639_v11, %v643_v12 }
 0x42a   :  { %10921 = vmatpush1.bf16.msra.mxu0 %v13295_v22  ;;  %11454 = vmatpush1.bf16.msra.mxu1 %v13297_v24  ;;  %v13344_v22 = vcombine.high %v639_v11, %v643_v12  ;;  %v13346_v24 = vcombine.high %v640_v1, %v644_v16  ;;  %v680_v11 = vld [vmem:[%s20151_s1 + $0x1418] sm:$0xff]  ;;  %v13377_v16 = vcombine.low %v672_v55, %v676_v60 }
 0x42b   :  { %10922 = vmatprep.subr.bf16.mxu0 %v13304_v38  ;;  %11455 = vmatprep.subr.bf16.mxu1 %v13306_v31  ;;  %v647_v38 = vld [vmem:[%s20151_s1 + $0x1310] sm:$0xff]  ;;  %v684_v12 = vld [vmem:[%s20151_s1 + $0x1438] sm:$0xff] }
 0x42c   :  { %v651_v31 = vld [vmem:[%s20151_s1 + $0x1330] sm:$0xff] }
 0x42d   :  { %v13351_v53 = vcombine.low %v647_v38, %v651_v31 }
 0x42e   :  { %10923 = vmatpush1.bf16.msra.mxu0 %v13303_v30  ;;  %11456 = vmatpush1.bf16.msra.mxu1 %v13305_v33  ;;  %v13352_v30 = vcombine.high %v647_v38, %v651_v31  ;;  %v13354_v33 = vcombine.high %v648_v58, %v652_v47  ;;  %v688_v38 = vld [vmem:[%s20151_s1 + $0x1458] sm:$0xff]  ;;  %v13385_v47 = vcombine.low %v680_v11, %v684_v12 }
 0x42f   :  { %10924 = vmatprep.subr.bf16.mxu0 %v13312_v35  ;;  %11457 = vmatprep.subr.bf16.mxu1 %v13314_v48  ;;  %v655_v35 = vld [vmem:[%s20151_s1 + $0x1350] sm:$0xff]  ;;  %v692_v31 = vld [vmem:[%s20151_s1 + $0x1478] sm:$0xff] }
 0x430   :  { %v659_v48 = vld [vmem:[%s20151_s1 + $0x1370] sm:$0xff] }
 0x431   :  { %v13359_v46 = vcombine.low %v655_v35, %v659_v48 }
 0x432   :  { %10925 = vmatpush1.bf16.msra.mxu0 %v13311_v19  ;;  %11458 = vmatpush1.bf16.msra.mxu1 %v13313_v40  ;;  %v13360_v19 = vcombine.high %v655_v35, %v659_v48  ;;  %v13362_v40 = vcombine.high %v656_v4, %v660_v36  ;;  %v696_v35 = vld [vmem:[%s20151_s1 + $0x1498] sm:$0xff]  ;;  %v13393_v36 = vcombine.low %v688_v38, %v692_v31 }
 0x433   :  { %10926 = vmatprep.subr.bf16.mxu0 %v13320_v41  ;;  %11459 = vmatprep.subr.bf16.mxu1 %v13322_v42  ;;  %v663_v41 = vld [vmem:[%s20151_s1 + $0x1390] sm:$0xff]  ;;  %v700_v48 = vld [vmem:[%s20151_s1 + $0x14b8] sm:$0xff] }
 0x434   :  { %v667_v42 = vld [vmem:[%s20151_s1 + $0x13b0] sm:$0xff] }
 0x435   :  { %v13367_v61 = vcombine.low %v663_v41, %v667_v42 }
 0x436   :  { %10927 = vmatpush1.bf16.msra.mxu0 %v13319_v29  ;;  %11460 = vmatpush1.bf16.msra.mxu1 %v13321_v50  ;;  %v13368_v29 = vcombine.high %v663_v41, %v667_v42  ;;  %v13370_v50 = vcombine.high %v664_v45, %v668_v34  ;;  %v708_v41 = vld [vmem:[%s20151_s1 + $0x14f8] sm:$0xff]  ;;  %v13401_v45 = vcombine.low %v696_v35, %v700_v48 }
 0x437   :  { %10928 = vmatprep.subr.bf16.mxu0 %v13328_v52  ;;  %11461 = vmatprep.subr.bf16.mxu1 %v13330_v54  ;;  %v671_v52 = vld [vmem:[%s20151_s1 + $0x13d0] sm:$0xff] }
 0x438   :  { %v675_v54 = vld [vmem:[%s20151_s1 + $0x13f0] sm:$0xff] }
 0x439   :  { %v13375_v1 = vcombine.low %v671_v52, %v675_v54 }
 0x43a   :  { %10929 = vmatpush1.bf16.msra.mxu0 %v13327_v28  ;;  %11462 = vmatpush1.bf16.msra.mxu1 %v13329_v44  ;;  %v13376_v28 = vcombine.high %v671_v52, %v675_v54  ;;  %v13378_v44 = vcombine.high %v672_v55, %v676_v60 }
 0x43b   :  { %10930 = vmatprep.subr.bf16.mxu0 %v13336_v9  ;;  %11463 = vmatprep.subr.bf16.mxu1 %v13338_v10  ;;  %v679_v9 = vld [vmem:[%s20151_s1 + $0x1410] sm:$0xff] }
 0x43c   :  { %v683_v10 = vld [vmem:[%s20151_s1 + $0x1430] sm:$0xff] }
 0x43d   :  { %v13383_v58 = vcombine.low %v679_v9, %v683_v10 }
 0x43e   :  { %10931 = vmatpush1.bf16.msra.mxu0 %v13335_v20  ;;  %11464 = vmatpush1.bf16.msra.mxu1 %v13337_v21  ;;  %v13384_v20 = vcombine.high %v679_v9, %v683_v10  ;;  %v13386_v21 = vcombine.high %v680_v11, %v684_v12 }
 0x43f   :  { %10932 = vmatprep.subr.bf16.mxu0 %v13344_v22  ;;  %11465 = vmatprep.subr.bf16.mxu1 %v13346_v24  ;;  %v687_v22 = vld [vmem:[%s20151_s1 + $0x1450] sm:$0xff] }
 0x440   :  { %v691_v24 = vld [vmem:[%s20151_s1 + $0x1470] sm:$0xff] }
 0x441   :  { %v13391_v4 = vcombine.low %v687_v22, %v691_v24 }
 0x442   :  { %10933 = vmatpush1.bf16.msra.mxu0 %v13343_v27  ;;  %11466 = vmatpush1.bf16.msra.mxu1 %v13345_v63  ;;  %v13392_v27 = vcombine.high %v687_v22, %v691_v24  ;;  %v13394_v63 = vcombine.high %v688_v38, %v692_v31 }
 0x443   :  { %10934 = vmatprep.subr.bf16.mxu0 %v13352_v30  ;;  %11467 = vmatprep.subr.bf16.mxu1 %v13354_v33  ;;  %v695_v30 = vld [vmem:[%s20151_s1 + $0x1490] sm:$0xff] }
 0x444   :  { %v699_v33 = vld [vmem:[%s20151_s1 + $0x14b0] sm:$0xff] }
 0x445   :  { %v13399_v42 = vcombine.low %v695_v30, %v699_v33 }
 0x446   :  { %10935 = vmatpush1.bf16.msra.mxu0 %v13351_v53  ;;  %11468 = vmatpush1.bf16.msra.mxu1 %v13353_v39  ;;  %v13400_v53 = vcombine.high %v695_v30, %v699_v33  ;;  %v13402_v39 = vcombine.high %v696_v35, %v700_v48 }
 0x447   :  { %10936 = vmatprep.subr.bf16.mxu0 %v13360_v19  ;;  %11469 = vmatprep.subr.bf16.mxu1 %v13362_v40  ;;  %v703_v19 = vld [vmem:[%s20151_s1 + $0x14d0] sm:$0xff] }
 0x448   :  { %v707_v40 = vld [vmem:[%s20151_s1 + $0x14f0] sm:$0xff] }
 0x449   :  { %v13408_v34 = vcombine.high %v703_v19, %v707_v40  ;;  %v13407_v52 = vcombine.low %v703_v19, %v707_v40 }
 0x44a   :  { %10937 = vmatpush1.bf16.msra.mxu0 %v13359_v46  ;;  %11470 = vmatpush1.bf16.msra.mxu1 %v13361_v49  ;;  %v711_v49 = vld [vmem:[%s20151_s1 + $0x1510] sm:$0xff] }
 0x44b   :  { %10938 = vmatprep.subr.bf16.mxu0 %v13368_v29  ;;  %11471 = vmatprep.subr.bf16.mxu1 %v13370_v50  ;;  %v715_v29 = vld [vmem:[%s20151_s1 + $0x1530] sm:$0xff]  ;;  %v716_v50 = vld [vmem:[%s20151_s1 + $0x1538] sm:$0xff] }
 0x44c   :  { %v13416_v55 = vcombine.high %v711_v49, %v715_v29  ;;  %v13415_v9 = vcombine.low %v711_v49, %v715_v29 }
 0x44e   :  { %10939 = vmatpush1.bf16.msra.mxu0 %v13367_v61  ;;  %11472 = vmatpush1.bf16.msra.mxu1 %v13369_v0  ;;  %v719_v61 = vld [vmem:[%s20151_s1 + $0x1550] sm:$0xff] }
 0x44f   :  { %10940 = vmatprep.subr.bf16.mxu0 %v13376_v28  ;;  %11473 = vmatprep.subr.bf16.mxu1 %v13378_v44  ;;  %v723_v0 = vld [vmem:[%s20151_s1 + $0x1570] sm:$0xff]  ;;  %v720_v28 = vld [vmem:[%s20151_s1 + $0x1558] sm:$0xff] }
 0x450   :  { %v724_v44 = vld [vmem:[%s20151_s1 + $0x1578] sm:$0xff]  ;;  %v13424_v11 = vcombine.high %v719_v61, %v723_v0  ;;  %v13423_v22 = vcombine.low %v719_v61, %v723_v0 }
 0x451   :  { %v13426_v12 = vcombine.high %v720_v28, %v724_v44  ;;  %v13425_v24 = vcombine.low %v720_v28, %v724_v44 }
 0x452   :  { %10941 = vmatpush1.bf16.msra.mxu0 %v13375_v1  ;;  %11474 = vmatpush1.bf16.msra.mxu1 %v13377_v16  ;;  %v727_v1 = vld [vmem:[%s20151_s1 + $0x1590] sm:$0xff] }
 0x453   :  { %10951 = vmatprep.subr.bf16.mxu0 %v13384_v20  ;;  %11484 = vmatprep.subr.bf16.mxu1 %v13386_v21  ;;  %v731_v16 = vld [vmem:[%s20151_s1 + $0x15b0] sm:$0xff]  ;;  %v728_v20 = vld [vmem:[%s20151_s1 + $0x1598] sm:$0xff] }
 0x454   :  { %v732_v21 = vld [vmem:[%s20151_s1 + $0x15b8] sm:$0xff]  ;;  %v13432_v38 = vcombine.high %v727_v1, %v731_v16  ;;  %v13431_v30 = vcombine.low %v727_v1, %v731_v16 }
 0x455   :  { %10943 = vmatmul.mubr.bf16.vlgmr.msra.gmra.mrb[4].mxu0 %v15946_v51  ;;  %11476 = vmatmul.mubr.bf16.vlgmr.msra.gmra.mrb[4].mxu1 %v15946_v51  ;;  %v704_v51 = vld [vmem:[%s20151_s1 + $0x14d8] sm:$0xff]  ;;  %v13434_v31 = vcombine.high %v728_v20, %v732_v21  ;;  %v13433_v33 = vcombine.low %v728_v20, %v732_v21 }
 0x456   :  { %10952 = vmatpush1.bf16.msra.mxu0 %v13383_v58  ;;  %11485 = vmatpush1.bf16.msra.mxu1 %v13385_v47  ;;  %v13410_v46 = vcombine.high %v704_v51, %v708_v41  ;;  %v13409_v54 = vcombine.low %v704_v51, %v708_v41  ;;  %v735_v58 = vld [vmem:[%s20151_s1 + $0x15d0] sm:$0xff] }
 0x457   :  { %10953 = vmatprep.subr.bf16.mxu0 %v13392_v27  ;;  %11486 = vmatprep.subr.bf16.mxu1 %v13394_v63  ;;  %v739_v47 = vld [vmem:[%s20151_s1 + $0x15f0] sm:$0xff]  ;;  %v736_v27 = vld [vmem:[%s20151_s1 + $0x15d8] sm:$0xff] }
 0x458   :  { %10983 = vmatprep.mubr.bf16.mxu0 %v15962_v62  ;;  %11516 = vmatprep.mubr.bf16.mxu1 %v15962_v62  ;;  %v712_v62 = vld [vmem:[%s20151_s1 + $0x1518] sm:$0xff]  ;;  %v13440_v35 = vcombine.high %v735_v58, %v739_v47  ;;  %v13439_v19 = vcombine.low %v735_v58, %v739_v47 }
 0x459   :  { %v13418_v60 = vcombine.high %v712_v62, %v716_v50  ;;  %v13417_v10 = vcombine.low %v712_v62, %v716_v50  ;;  %v740_v63 = vld [vmem:[%s20151_s1 + $0x15f8] sm:$0xff] }
 0x45a   :  { %10954 = vmatpush1.bf16.msra.mxu0 %v13391_v4  ;;  %11487 = vmatpush1.bf16.msra.mxu1 %v13393_v36  ;;  %v13442_v48 = vcombine.high %v736_v27, %v740_v63  ;;  %v743_v4 = vld [vmem:[%s20151_s1 + $0x1610] sm:$0xff]  ;;  %v13441_v40 = vcombine.low %v736_v27, %v740_v63 }
 0x45b   :  { %10955 = vmatprep.subr.bf16.mxu0 %v13400_v53  ;;  %11488 = vmatprep.subr.bf16.mxu1 %v13402_v39  ;;  %v747_v36 = vld [vmem:[%s20151_s1 + $0x1630] sm:$0xff]  ;;  %v744_v53 = vld [vmem:[%s20151_s1 + $0x1618] sm:$0xff] }
 0x45c   :  { %v748_v39 = vld [vmem:[%s20151_s1 + $0x1638] sm:$0xff]  ;;  %v13448_v51 = vcombine.high %v743_v4, %v747_v36  ;;  %v13447_v49 = vcombine.low %v743_v4, %v747_v36 }
 0x45d   :  { %v13450_v41 = vcombine.high %v744_v53, %v748_v39  ;;  %v13449_v29 = vcombine.low %v744_v53, %v748_v39 }
 0x45e   :  { %10956 = vmatpush1.bf16.msra.mxu0 %v13399_v42  ;;  %11489 = vmatpush1.bf16.msra.mxu1 %v13401_v45  ;;  %v751_v42 = vld [vmem:[%s20151_s1 + $0x1650] sm:$0xff] }
 0x45f   :  { %10957 = vmatprep.subr.bf16.mxu0 %v13408_v34  ;;  %11490 = vmatprep.subr.bf16.mxu1 %v13410_v46  ;;  %v755_v45 = vld [vmem:[%s20151_s1 + $0x1670] sm:$0xff]  ;;  %v752_v34 = vld [vmem:[%s20151_s1 + $0x1658] sm:$0xff] }
 0x460   :  { %v756_v46 = vld [vmem:[%s20151_s1 + $0x1678] sm:$0xff]  ;;  %v13456_v62 = vcombine.high %v751_v42, %v755_v45  ;;  %v13455_v61 = vcombine.low %v751_v42, %v755_v45 }
 0x461   :  { %v13458_v50 = vcombine.high %v752_v34, %v756_v46  ;;  %v13457_v0 = vcombine.low %v752_v34, %v756_v46 }
 0x462   :  { %10958 = vmatpush1.bf16.msra.mxu0 %v13407_v52  ;;  %11491 = vmatpush1.bf16.msra.mxu1 %v13409_v54  ;;  %v759_v52 = vld [vmem:[%s20151_s1 + $0x1690] sm:$0xff] }
 0x463   :  { %10959 = vmatprep.subr.bf16.mxu0 %v13416_v55  ;;  %11492 = vmatprep.subr.bf16.mxu1 %v13418_v60  ;;  %v763_v54 = vld [vmem:[%s20151_s1 + $0x16b0] sm:$0xff]  ;;  %v760_v55 = vld [vmem:[%s20151_s1 + $0x1698] sm:$0xff] }
 0x464   :  { %v764_v60 = vld [vmem:[%s20151_s1 + $0x16b8] sm:$0xff]  ;;  %v13464_v28 = vcombine.high %v759_v52, %v763_v54  ;;  %v13463_v1 = vcombine.low %v759_v52, %v763_v54 }
 0x465   :  { %v13466_v44 = vcombine.high %v760_v55, %v764_v60  ;;  %v13465_v16 = vcombine.low %v760_v55, %v764_v60 }
 0x466   :  { %10960 = vmatpush1.bf16.msra.mxu0 %v13415_v9  ;;  %11493 = vmatpush1.bf16.msra.mxu1 %v13417_v10  ;;  %v767_v9 = vld [vmem:[%s20151_s1 + $0x16d0] sm:$0xff] }
 0x467   :  { %10961 = vmatprep.subr.bf16.mxu0 %v13424_v11  ;;  %11494 = vmatprep.subr.bf16.mxu1 %v13426_v12  ;;  %v771_v10 = vld [vmem:[%s20151_s1 + $0x16f0] sm:$0xff]  ;;  %v768_v11 = vld [vmem:[%s20151_s1 + $0x16d8] sm:$0xff] }
 0x468   :  { %v772_v12 = vld [vmem:[%s20151_s1 + $0x16f8] sm:$0xff]  ;;  %v13472_v20 = vcombine.high %v767_v9, %v771_v10  ;;  %v13471_v58 = vcombine.low %v767_v9, %v771_v10 }
 0x469   :  { %v13474_v21 = vcombine.high %v768_v11, %v772_v12  ;;  %v13473_v47 = vcombine.low %v768_v11, %v772_v12 }
 0x46a   :  { %10962 = vmatpush1.bf16.msra.mxu0 %v13423_v22  ;;  %11495 = vmatpush1.bf16.msra.mxu1 %v13425_v24  ;;  %v775_v22 = vld [vmem:[%s20151_s1 + $0x1710] sm:$0xff] }
 0x46b   :  { %10963 = vmatprep.subr.bf16.mxu0 %v13432_v38  ;;  %11496 = vmatprep.subr.bf16.mxu1 %v13434_v31  ;;  %v779_v24 = vld [vmem:[%s20151_s1 + $0x1730] sm:$0xff]  ;;  %v776_v38 = vld [vmem:[%s20151_s1 + $0x1718] sm:$0xff] }
 0x46c   :  { %v780_v31 = vld [vmem:[%s20151_s1 + $0x1738] sm:$0xff]  ;;  %v13480_v27 = vcombine.high %v775_v22, %v779_v24  ;;  %v13479_v4 = vcombine.low %v775_v22, %v779_v24 }
 0x46d   :  { %v13482_v63 = vcombine.high %v776_v38, %v780_v31  ;;  %v13481_v36 = vcombine.low %v776_v38, %v780_v31 }
 0x46e   :  { %10964 = vmatpush1.bf16.msra.mxu0 %v13431_v30  ;;  %11497 = vmatpush1.bf16.msra.mxu1 %v13433_v33  ;;  %v783_v30 = vld [vmem:[%s20151_s1 + $0x1750] sm:$0xff] }
 0x46f   :  { %10965 = vmatprep.subr.bf16.mxu0 %v13440_v35  ;;  %11498 = vmatprep.subr.bf16.mxu1 %v13442_v48  ;;  %v787_v33 = vld [vmem:[%s20151_s1 + $0x1770] sm:$0xff]  ;;  %v784_v35 = vld [vmem:[%s20151_s1 + $0x1758] sm:$0xff] }
 0x470   :  { %v788_v48 = vld [vmem:[%s20151_s1 + $0x1778] sm:$0xff]  ;;  %v13488_v53 = vcombine.high %v783_v30, %v787_v33  ;;  %v13487_v42 = vcombine.low %v783_v30, %v787_v33 }
 0x471   :  { %v13490_v39 = vcombine.high %v784_v35, %v788_v48  ;;  %v13489_v45 = vcombine.low %v784_v35, %v788_v48 }
 0x472   :  { %10966 = vmatpush1.bf16.msra.mxu0 %v13439_v19  ;;  %11499 = vmatpush1.bf16.msra.mxu1 %v13441_v40  ;;  %v791_v19 = vld [vmem:[%s20151_s1 + $0x1790] sm:$0xff] }
 0x473   :  { %10967 = vmatprep.subr.bf16.mxu0 %v13448_v51  ;;  %11500 = vmatprep.subr.bf16.mxu1 %v13450_v41  ;;  %v795_v40 = vld [vmem:[%s20151_s1 + $0x17b0] sm:$0xff]  ;;  %v792_v51 = vld [vmem:[%s20151_s1 + $0x1798] sm:$0xff] }
 0x474   :  { %v796_v41 = vld [vmem:[%s20151_s1 + $0x17b8] sm:$0xff]  ;;  %v13496_v34 = vcombine.high %v791_v19, %v795_v40  ;;  %v13495_v52 = vcombine.low %v791_v19, %v795_v40 }
 0x475   :  { %v13498_v46 = vcombine.high %v792_v51, %v796_v41  ;;  %v13497_v54 = vcombine.low %v792_v51, %v796_v41  ;;  %v839_v41 = vld [vmem:[%s20151_s1 + $0x1910] sm:$0xff] }
 0x476   :  { %10968 = vmatpush1.bf16.msra.mxu0 %v13447_v49  ;;  %11501 = vmatpush1.bf16.msra.mxu1 %v13449_v29  ;;  %v799_v49 = vld [vmem:[%s20151_s1 + $0x17d0] sm:$0xff] }
 0x477   :  { %10969 = vmatprep.subr.bf16.mxu0 %v13456_v62  ;;  %11502 = vmatprep.subr.bf16.mxu1 %v13458_v50  ;;  %v803_v29 = vld [vmem:[%s20151_s1 + $0x17f0] sm:$0xff]  ;;  %v800_v62 = vld [vmem:[%s20151_s1 + $0x17d8] sm:$0xff] }
 0x478   :  { %v804_v50 = vld [vmem:[%s20151_s1 + $0x17f8] sm:$0xff]  ;;  %v13504_v55 = vcombine.high %v799_v49, %v803_v29  ;;  %v13503_v9 = vcombine.low %v799_v49, %v803_v29 }
 0x479   :  { %v13506_v60 = vcombine.high %v800_v62, %v804_v50  ;;  %v13505_v10 = vcombine.low %v800_v62, %v804_v50  ;;  %v847_v62 = vld [vmem:[%s20151_s1 + $0x1950] sm:$0xff] }
 0x47a   :  { %10970 = vmatpush1.bf16.msra.mxu0 %v13455_v61  ;;  %11503 = vmatpush1.bf16.msra.mxu1 %v13457_v0  ;;  %v807_v61 = vld [vmem:[%s20151_s1 + $0x1810] sm:$0xff] }
 0x47b   :  { %10971 = vmatprep.subr.bf16.mxu0 %v13464_v28  ;;  %11504 = vmatprep.subr.bf16.mxu1 %v13466_v44  ;;  %v811_v0 = vld [vmem:[%s20151_s1 + $0x1830] sm:$0xff]  ;;  %v808_v28 = vld [vmem:[%s20151_s1 + $0x1818] sm:$0xff] }
 0x47c   :  { %v812_v44 = vld [vmem:[%s20151_s1 + $0x1838] sm:$0xff]  ;;  %v13512_v11 = vcombine.high %v807_v61, %v811_v0  ;;  %v13511_v22 = vcombine.low %v807_v61, %v811_v0  ;;  %v851_v50 = vld [vmem:[%s20151_s1 + $0x1970] sm:$0xff] }
 0x47d   :  { %v13514_v12 = vcombine.high %v808_v28, %v812_v44  ;;  %v13513_v24 = vcombine.low %v808_v28, %v812_v44  ;;  %v13552_v61 = vcombine.high %v847_v62, %v851_v50  ;;  %v855_v28 = vld [vmem:[%s20151_s1 + $0x1990] sm:$0xff] }
 0x47e   :  { %10972 = vmatpush1.bf16.msra.mxu0 %v13463_v1  ;;  %11505 = vmatpush1.bf16.msra.mxu1 %v13465_v16  ;;  %v815_v1 = vld [vmem:[%s20151_s1 + $0x1850] sm:$0xff] }
 0x47f   :  { %10973 = vmatprep.subr.bf16.mxu0 %v13472_v20  ;;  %11506 = vmatprep.subr.bf16.mxu1 %v13474_v21  ;;  %v819_v16 = vld [vmem:[%s20151_s1 + $0x1870] sm:$0xff]  ;;  %v816_v20 = vld [vmem:[%s20151_s1 + $0x1858] sm:$0xff] }
 0x480   :  { %v820_v21 = vld [vmem:[%s20151_s1 + $0x1878] sm:$0xff]  ;;  %v13520_v38 = vcombine.high %v815_v1, %v819_v16  ;;  %v13519_v30 = vcombine.low %v815_v1, %v819_v16  ;;  %v859_v44 = vld [vmem:[%s20151_s1 + $0x19b0] sm:$0xff] }
 0x481   :  { %v13522_v31 = vcombine.high %v816_v20, %v820_v21  ;;  %v13521_v33 = vcombine.low %v816_v20, %v820_v21  ;;  %v13560_v1 = vcombine.high %v855_v28, %v859_v44  ;;  %v863_v20 = vld [vmem:[%s20151_s1 + $0x19d0] sm:$0xff] }
 0x482   :  { %10974 = vmatpush1.bf16.msra.mxu0 %v13471_v58  ;;  %11507 = vmatpush1.bf16.msra.mxu1 %v13473_v47  ;;  %v823_v58 = vld [vmem:[%s20151_s1 + $0x1890] sm:$0xff] }
 0x483   :  { %10975 = vmatprep.subr.bf16.mxu0 %v13480_v27  ;;  %11508 = vmatprep.subr.bf16.mxu1 %v13482_v63  ;;  %v827_v47 = vld [vmem:[%s20151_s1 + $0x18b0] sm:$0xff]  ;;  %v824_v27 = vld [vmem:[%s20151_s1 + $0x1898] sm:$0xff] }
 0x484   :  { %v828_v63 = vld [vmem:[%s20151_s1 + $0x18b8] sm:$0xff]  ;;  %v13528_v35 = vcombine.high %v823_v58, %v827_v47  ;;  %v867_v21 = vld [vmem:[%s20151_s1 + $0x19f0] sm:$0xff] }
 0x485   :  { %v13530_v48 = vcombine.high %v824_v27, %v828_v63  ;;  %v13529_v19 = vcombine.low %v824_v27, %v828_v63  ;;  %v871_v27 = vld [vmem:[%s20151_s1 + $0x1a10] sm:$0xff] }
 0x486   :  { %10976 = vmatpush1.bf16.msra.mxu0 %v13479_v4  ;;  %11509 = vmatpush1.bf16.msra.mxu1 %v13481_v36  ;;  %v831_v4 = vld [vmem:[%s20151_s1 + $0x18d0] sm:$0xff] }
 0x487   :  { %10977 = vmatprep.subr.bf16.mxu0 %v13488_v53  ;;  %11510 = vmatprep.subr.bf16.mxu1 %v13490_v39  ;;  %v835_v36 = vld [vmem:[%s20151_s1 + $0x18f0] sm:$0xff]  ;;  %v836_v53 = vld [vmem:[%s20151_s1 + $0x18f8] sm:$0xff]  ;;  %v13527_v39 = vcombine.low %v823_v58, %v827_v47  ;;  %v13568_v58 = vcombine.high %v863_v20, %v867_v21 }
 0x488   :  { %v13536_v40 = vcombine.high %v831_v4, %v835_v36  ;;  %v875_v63 = vld [vmem:[%s20151_s1 + $0x1a30] sm:$0xff] }
 0x48a   :  { %10978 = vmatpush1.bf16.msra.mxu0 %v13487_v42  ;;  %11511 = vmatpush1.bf16.msra.mxu1 %v13489_v45  ;;  %v843_v42 = vld [vmem:[%s20151_s1 + $0x1930] sm:$0xff]  ;;  %v844_v45 = vld [vmem:[%s20151_s1 + $0x1938] sm:$0xff] }
 0x48b   :  { %10979 = vmatprep.subr.bf16.mxu0 %v13496_v34  ;;  %11512 = vmatprep.subr.bf16.mxu1 %v13498_v46  ;;  %v13535_v34 = vcombine.low %v831_v4, %v835_v36  ;;  %v13544_v49 = vcombine.high %v839_v41, %v843_v42  ;;  %v13576_v4 = vcombine.high %v871_v27, %v875_v63 }
 0x48e   :  { %10980 = vmatpush1.bf16.msra.mxu0 %v13495_v52  ;;  %11513 = vmatpush1.bf16.msra.mxu1 %v13497_v54  ;;  %v848_v52 = vld [vmem:[%s20151_s1 + $0x1958] sm:$0xff] }
 0x48f   :  { %10981 = vmatprep.subr.bf16.mxu0 %v13504_v55  ;;  %11514 = vmatprep.subr.bf16.mxu1 %v13506_v60  ;;  %v852_v54 = vld [vmem:[%s20151_s1 + $0x1978] sm:$0xff]  ;;  %v13543_v55 = vcombine.low %v839_v41, %v843_v42 }
 0x490   :  { %v13554_v0 = vcombine.high %v848_v52, %v852_v54 }
 0x492   :  { %10982 = vmatpush1.bf16.msra.mxu0 %v13503_v9  ;;  %11515 = vmatpush1.bf16.msra.mxu1 %v13505_v10  ;;  %v856_v9 = vld [vmem:[%s20151_s1 + $0x1998] sm:$0xff] }
 0x493   :  { %10992 = vmatprep.subr.bf16.mxu0 %v13512_v11  ;;  %11525 = vmatprep.subr.bf16.mxu1 %v13514_v12  ;;  %v860_v10 = vld [vmem:[%s20151_s1 + $0x19b8] sm:$0xff]  ;;  %v13551_v11 = vcombine.low %v847_v62, %v851_v50  ;;  %v13553_v12 = vcombine.low %v848_v52, %v852_v54  ;;  %v895_v52 = vld [vmem:[%s20151_s1 + $0x1ad0] sm:$0xff] }
 0x494   :  { %v13562_v16 = vcombine.high %v856_v9, %v860_v10  ;;  %v899_v54 = vld [vmem:[%s20151_s1 + $0x1af0] sm:$0xff] }
 0x495   :  { %10984 = vmatmul.mubr.bf16.vlgmr.msra.gmra.mrb[4].mxu0 %v16157_v59  ;;  %11517 = vmatmul.mubr.bf16.vlgmr.msra.gmra.mrb[4].mxu1 %v16157_v59  ;;  %v832_v59 = vld [vmem:[%s20151_s1 + $0x18d8] sm:$0xff] }
 0x496   :  { %10993 = vmatpush1.bf16.msra.mxu0 %v13511_v22  ;;  %11526 = vmatpush1.bf16.msra.mxu1 %v13513_v24  ;;  %v13538_v51 = vcombine.high %v832_v59, %v836_v53  ;;  %v13537_v46 = vcombine.low %v832_v59, %v836_v53  ;;  %v864_v22 = vld [vmem:[%s20151_s1 + $0x19d8] sm:$0xff]  ;;  %v879_v59 = vld [vmem:[%s20151_s1 + $0x1a50] sm:$0xff] }
 0x497   :  { %10994 = vmatprep.subr.bf16.mxu0 %v13520_v38  ;;  %11527 = vmatprep.subr.bf16.mxu1 %v13522_v31  ;;  %v868_v24 = vld [vmem:[%s20151_s1 + $0x19f8] sm:$0xff]  ;;  %v13559_v38 = vcombine.low %v855_v28, %v859_v44  ;;  %v13561_v31 = vcombine.low %v856_v9, %v860_v10  ;;  %v883_v53 = vld [vmem:[%s20151_s1 + $0x1a70] sm:$0xff]  ;;  %v13600_v28 = vcombine.high %v895_v52, %v899_v54 }
 0x498   :  { %11024 = vmatprep.mubr.bf16.mxu0 %v16172_v37  ;;  %11557 = vmatprep.mubr.bf16.mxu1 %v16172_v37  ;;  %v840_v37 = vld [vmem:[%s20151_s1 + $0x1918] sm:$0xff]  ;;  %v13570_v47 = vcombine.high %v864_v22, %v868_v24  ;;  %v13584_v41 = vcombine.high %v879_v59, %v883_v53  ;;  %v903_v9 = vld [vmem:[%s20151_s1 + $0x1b10] sm:$0xff] }
 0x499   :  { %v13546_v29 = vcombine.high %v840_v37, %v844_v45  ;;  %v13545_v60 = vcombine.low %v840_v37, %v844_v45  ;;  %v887_v37 = vld [vmem:[%s20151_s1 + $0x1a90] sm:$0xff] }
 0x49a   :  { %10995 = vmatpush1.bf16.msra.mxu0 %v13519_v30  ;;  %11528 = vmatpush1.bf16.msra.mxu1 %v13521_v33  ;;  %v872_v30 = vld [vmem:[%s20151_s1 + $0x1a18] sm:$0xff]  ;;  %v891_v45 = vld [vmem:[%s20151_s1 + $0x1ab0] sm:$0xff] }
 0x49b   :  { %10996 = vmatprep.subr.bf16.mxu0 %v13528_v35  ;;  %11529 = vmatprep.subr.bf16.mxu1 %v13530_v48  ;;  %v876_v33 = vld [vmem:[%s20151_s1 + $0x1a38] sm:$0xff]  ;;  %v13567_v35 = vcombine.low %v863_v20, %v867_v21  ;;  %v13569_v48 = vcombine.low %v864_v22, %v868_v24  ;;  %v13592_v62 = vcombine.high %v887_v37, %v891_v45  ;;  %v907_v10 = vld [vmem:[%s20151_s1 + $0x1b30] sm:$0xff] }
 0x49c   :  { %v13578_v36 = vcombine.high %v872_v30, %v876_v33  ;;  %v13608_v20 = vcombine.high %v903_v9, %v907_v10  ;;  %v911_v22 = vld [vmem:[%s20151_s1 + $0x1b50] sm:$0xff] }
 0x49d   :  { %v915_v24 = vld [vmem:[%s20151_s1 + $0x1b70] sm:$0xff] }
 0x49e   :  { %10997 = vmatpush1.bf16.msra.mxu0 %v13527_v39  ;;  %11530 = vmatpush1.bf16.msra.mxu1 %v13529_v19  ;;  %v880_v39 = vld [vmem:[%s20151_s1 + $0x1a58] sm:$0xff] }
 0x49f   :  { %10998 = vmatprep.subr.bf16.mxu0 %v13536_v40  ;;  %11531 = vmatprep.subr.bf16.mxu1 %v13538_v51  ;;  %v884_v19 = vld [vmem:[%s20151_s1 + $0x1a78] sm:$0xff]  ;;  %v13575_v40 = vcombine.low %v871_v27, %v875_v63  ;;  %v13577_v51 = vcombine.low %v872_v30, %v876_v33  ;;  %v13616_v27 = vcombine.high %v911_v22, %v915_v24  ;;  %v919_v30 = vld [vmem:[%s20151_s1 + $0x1b90] sm:$0xff] }
 0x4a0   :  { %v13586_v42 = vcombine.high %v880_v39, %v884_v19  ;;  %v923_v33 = vld [vmem:[%s20151_s1 + $0x1bb0] sm:$0xff] }
 0x4a2   :  { %10999 = vmatpush1.bf16.msra.mxu0 %v13535_v34  ;;  %11532 = vmatpush1.bf16.msra.mxu1 %v13537_v46  ;;  %v888_v34 = vld [vmem:[%s20151_s1 + $0x1a98] sm:$0xff] }
 0x4a3   :  { %11000 = vmatprep.subr.bf16.mxu0 %v13544_v49  ;;  %11533 = vmatprep.subr.bf16.mxu1 %v13546_v29  ;;  %v892_v46 = vld [vmem:[%s20151_s1 + $0x1ab8] sm:$0xff]  ;;  %v13583_v49 = vcombine.low %v879_v59, %v883_v53  ;;  %v13585_v29 = vcombine.low %v880_v39, %v884_v19  ;;  %v13624_v59 = vcombine.high %v919_v30, %v923_v33  ;;  %v927_v39 = vld [vmem:[%s20151_s1 + $0x1bd0] sm:$0xff] }
 0x4a4   :  { %v13594_v50 = vcombine.high %v888_v34, %v892_v46  ;;  %v931_v19 = vld [vmem:[%s20151_s1 + $0x1bf0] sm:$0xff] }
 0x4a6   :  { %11001 = vmatpush1.bf16.msra.mxu0 %v13543_v55  ;;  %11534 = vmatpush1.bf16.msra.mxu1 %v13545_v60  ;;  %v896_v55 = vld [vmem:[%s20151_s1 + $0x1ad8] sm:$0xff] }
 0x4a7   :  { %11002 = vmatprep.subr.bf16.mxu0 %v13552_v61  ;;  %11535 = vmatprep.subr.bf16.mxu1 %v13554_v0  ;;  %v900_v60 = vld [vmem:[%s20151_s1 + $0x1af8] sm:$0xff]  ;;  %v13591_v61 = vcombine.low %v887_v37, %v891_v45  ;;  %v13593_v0 = vcombine.low %v888_v34, %v892_v46  ;;  %v13632_v37 = vcombine.high %v927_v39, %v931_v19  ;;  %v935_v34 = vld [vmem:[%s20151_s1 + $0x1c10] sm:$0xff] }
 0x4a8   :  { %v13602_v44 = vcombine.high %v896_v55, %v900_v60  ;;  %v939_v46 = vld [vmem:[%s20151_s1 + $0x1c30] sm:$0xff] }
 0x4aa   :  { %11003 = vmatpush1.bf16.msra.mxu0 %v13551_v11  ;;  %11536 = vmatpush1.bf16.msra.mxu1 %v13553_v12  ;;  %v904_v11 = vld [vmem:[%s20151_s1 + $0x1b18] sm:$0xff] }
 0x4ab   :  { %11004 = vmatprep.subr.bf16.mxu0 %v13560_v1  ;;  %11537 = vmatprep.subr.bf16.mxu1 %v13562_v16  ;;  %v908_v12 = vld [vmem:[%s20151_s1 + $0x1b38] sm:$0xff]  ;;  %v13599_v1 = vcombine.low %v895_v52, %v899_v54  ;;  %v13601_v16 = vcombine.low %v896_v55, %v900_v60  ;;  %v13640_v52 = vcombine.high %v935_v34, %v939_v46  ;;  %v943_v55 = vld [vmem:[%s20151_s1 + $0x1c50] sm:$0xff] }
 0x4ac   :  { %v13610_v21 = vcombine.high %v904_v11, %v908_v12  ;;  %v947_v60 = vld [vmem:[%s20151_s1 + $0x1c70] sm:$0xff] }
 0x4ae   :  { %11005 = vmatpush1.bf16.msra.mxu0 %v13559_v38  ;;  %11538 = vmatpush1.bf16.msra.mxu1 %v13561_v31  ;;  %v912_v38 = vld [vmem:[%s20151_s1 + $0x1b58] sm:$0xff] }
 0x4af   :  { %11006 = vmatprep.subr.bf16.mxu0 %v13568_v58  ;;  %11539 = vmatprep.subr.bf16.mxu1 %v13570_v47  ;;  %v916_v31 = vld [vmem:[%s20151_s1 + $0x1b78] sm:$0xff]  ;;  %v13607_v58 = vcombine.low %v903_v9, %v907_v10  ;;  %v13609_v47 = vcombine.low %v904_v11, %v908_v12  ;;  %v13648_v9 = vcombine.high %v943_v55, %v947_v60  ;;  %v951_v11 = vld [vmem:[%s20151_s1 + $0x1c90] sm:$0xff] }
 0x4b0   :  { %v13618_v63 = vcombine.high %v912_v38, %v916_v31  ;;  %v955_v12 = vld [vmem:[%s20151_s1 + $0x1cb0] sm:$0xff] }
 0x4b2   :  { %11007 = vmatpush1.bf16.msra.mxu0 %v13567_v35  ;;  %11540 = vmatpush1.bf16.msra.mxu1 %v13569_v48  ;;  %v920_v35 = vld [vmem:[%s20151_s1 + $0x1b98] sm:$0xff] }
 0x4b3   :  { %11008 = vmatprep.subr.bf16.mxu0 %v13576_v4  ;;  %11541 = vmatprep.subr.bf16.mxu1 %v13578_v36  ;;  %v924_v48 = vld [vmem:[%s20151_s1 + $0x1bb8] sm:$0xff]  ;;  %v13615_v4 = vcombine.low %v911_v22, %v915_v24  ;;  %v13617_v36 = vcombine.low %v912_v38, %v916_v31  ;;  %v13656_v22 = vcombine.high %v951_v11, %v955_v12  ;;  %v959_v38 = vld [vmem:[%s20151_s1 + $0x1cd0] sm:$0xff] }
 0x4b4   :  { %v13626_v53 = vcombine.high %v920_v35, %v924_v48  ;;  %v963_v31 = vld [vmem:[%s20151_s1 + $0x1cf0] sm:$0xff] }
 0x4b6   :  { %11009 = vmatpush1.bf16.msra.mxu0 %v13575_v40  ;;  %11542 = vmatpush1.bf16.msra.mxu1 %v13577_v51  ;;  %v928_v40 = vld [vmem:[%s20151_s1 + $0x1bd8] sm:$0xff] }
 0x4b7   :  { %11010 = vmatprep.subr.bf16.mxu0 %v13584_v41  ;;  %11543 = vmatprep.subr.bf16.mxu1 %v13586_v42  ;;  %v932_v51 = vld [vmem:[%s20151_s1 + $0x1bf8] sm:$0xff]  ;;  %v13623_v41 = vcombine.low %v919_v30, %v923_v33  ;;  %v13625_v42 = vcombine.low %v920_v35, %v924_v48  ;;  %v967_v33 = vld [vmem:[%s20151_s1 + $0x1d10] sm:$0xff] }
 0x4b8   :  { %v13634_v45 = vcombine.high %v928_v40, %v932_v51  ;;  %v971_v35 = vld [vmem:[%s20151_s1 + $0x1d30] sm:$0xff]  ;;  %v972_v48 = vld [vmem:[%s20151_s1 + $0x1d38] sm:$0xff] }
 0x4ba   :  { %11011 = vmatpush1.bf16.msra.mxu0 %v13583_v49  ;;  %11544 = vmatpush1.bf16.msra.mxu1 %v13585_v29  ;;  %v936_v49 = vld [vmem:[%s20151_s1 + $0x1c18] sm:$0xff] }
 0x4bb   :  { %11012 = vmatprep.subr.bf16.mxu0 %v13592_v62  ;;  %11545 = vmatprep.subr.bf16.mxu1 %v13594_v50  ;;  %v940_v29 = vld [vmem:[%s20151_s1 + $0x1c38] sm:$0xff]  ;;  %v13631_v62 = vcombine.low %v927_v39, %v931_v19  ;;  %v13633_v50 = vcombine.low %v928_v40, %v932_v51  ;;  %v975_v39 = vld [vmem:[%s20151_s1 + $0x1d50] sm:$0xff] }
 0x4bc   :  { %v13642_v54 = vcombine.high %v936_v49, %v940_v29  ;;  %v979_v19 = vld [vmem:[%s20151_s1 + $0x1d70] sm:$0xff]  ;;  %v976_v40 = vld [vmem:[%s20151_s1 + $0x1d58] sm:$0xff] }
 0x4bd   :  { %v980_v51 = vld [vmem:[%s20151_s1 + $0x1d78] sm:$0xff] }
 0x4be   :  { %11013 = vmatpush1.bf16.msra.mxu0 %v13591_v61  ;;  %11546 = vmatpush1.bf16.msra.mxu1 %v13593_v0  ;;  %v944_v61 = vld [vmem:[%s20151_s1 + $0x1c58] sm:$0xff] }
 0x4bf   :  { %11014 = vmatprep.subr.bf16.mxu0 %v13600_v28  ;;  %11547 = vmatprep.subr.bf16.mxu1 %v13602_v44  ;;  %v948_v0 = vld [vmem:[%s20151_s1 + $0x1c78] sm:$0xff]  ;;  %v13639_v28 = vcombine.low %v935_v34, %v939_v46  ;;  %v13641_v44 = vcombine.low %v936_v49, %v940_v29  ;;  %v983_v34 = vld [vmem:[%s20151_s1 + $0x1d90] sm:$0xff] }
 0x4c0   :  { %v13650_v10 = vcombine.high %v944_v61, %v948_v0  ;;  %v987_v46 = vld [vmem:[%s20151_s1 + $0x1db0] sm:$0xff]  ;;  %v984_v49 = vld [vmem:[%s20151_s1 + $0x1d98] sm:$0xff] }
 0x4c1   :  { %v988_v29 = vld [vmem:[%s20151_s1 + $0x1db8] sm:$0xff] }
 0x4c2   :  { %11015 = vmatpush1.bf16.msra.mxu0 %v13599_v1  ;;  %11548 = vmatpush1.bf16.msra.mxu1 %v13601_v16  ;;  %v952_v1 = vld [vmem:[%s20151_s1 + $0x1c98] sm:$0xff] }
 0x4c3   :  { %11016 = vmatprep.subr.bf16.mxu0 %v13608_v20  ;;  %11549 = vmatprep.subr.bf16.mxu1 %v13610_v21  ;;  %v956_v16 = vld [vmem:[%s20151_s1 + $0x1cb8] sm:$0xff]  ;;  %v13647_v20 = vcombine.low %v943_v55, %v947_v60  ;;  %v13649_v21 = vcombine.low %v944_v61, %v948_v0  ;;  %v991_v55 = vld [vmem:[%s20151_s1 + $0x1dd0] sm:$0xff] }
 0x4c4   :  { %v13658_v24 = vcombine.high %v952_v1, %v956_v16  ;;  %v995_v60 = vld [vmem:[%s20151_s1 + $0x1df0] sm:$0xff]  ;;  %v992_v61 = vld [vmem:[%s20151_s1 + $0x1dd8] sm:$0xff] }
 0x4c5   :  { %v996_v0 = vld [vmem:[%s20151_s1 + $0x1df8] sm:$0xff] }
 0x4c6   :  { %11017 = vmatpush1.bf16.msra.mxu0 %v13607_v58  ;;  %11550 = vmatpush1.bf16.msra.mxu1 %v13609_v47  ;;  %v964_v58 = vld [vmem:[%s20151_s1 + $0x1cf8] sm:$0xff]  ;;  %v13655_v47 = vcombine.low %v951_v11, %v955_v12  ;;  %v999_v11 = vld [vmem:[%s20151_s1 + $0x1e10] sm:$0xff] }
 0x4c7   :  { %11018 = vmatprep.subr.bf16.mxu0 %v13616_v27  ;;  %11551 = vmatprep.subr.bf16.mxu1 %v13618_v63  ;;  %v13657_v27 = vcombine.low %v952_v1, %v956_v16  ;;  %v13664_v63 = vcombine.high %v959_v38, %v963_v31  ;;  %v1003_v12 = vld [vmem:[%s20151_s1 + $0x1e30] sm:$0xff]  ;;  %v1000_v1 = vld [vmem:[%s20151_s1 + $0x1e18] sm:$0xff] }
 0x4c8   :  { %v1004_v16 = vld [vmem:[%s20151_s1 + $0x1e38] sm:$0xff] }
 0x4ca   :  { %11019 = vmatpush1.bf16.msra.mxu0 %v13615_v4  ;;  %11552 = vmatpush1.bf16.msra.mxu1 %v13617_v36  ;;  %v13663_v4 = vcombine.low %v959_v38, %v963_v31  ;;  %v1007_v38 = vld [vmem:[%s20151_s1 + $0x1e50] sm:$0xff] }
 0x4cb   :  { %11020 = vmatprep.subr.bf16.mxu0 %v13624_v59  ;;  %11553 = vmatprep.subr.bf16.mxu1 %v13626_v53  ;;  %v13672_v59 = vcombine.high %v967_v33, %v971_v35  ;;  %v1011_v31 = vld [vmem:[%s20151_s1 + $0x1e70] sm:$0xff] }
 0x4ce   :  { %11021 = vmatpush1.bf16.msra.mxu0 %v13623_v41  ;;  %11554 = vmatpush1.bf16.msra.mxu1 %v13625_v42  ;;  %v13671_v41 = vcombine.low %v967_v33, %v971_v35  ;;  %v1015_v33 = vld [vmem:[%s20151_s1 + $0x1e90] sm:$0xff] }
 0x4cf   :  { %11022 = vmatprep.subr.bf16.mxu0 %v13632_v37  ;;  %11555 = vmatprep.subr.bf16.mxu1 %v13634_v45  ;;  %v13680_v37 = vcombine.high %v975_v39, %v979_v19  ;;  %v13682_v45 = vcombine.high %v976_v40, %v980_v51  ;;  %v1019_v35 = vld [vmem:[%s20151_s1 + $0x1eb0] sm:$0xff] }
 0x4d2   :  { %11023 = vmatpush1.bf16.msra.mxu0 %v13631_v62  ;;  %11556 = vmatpush1.bf16.msra.mxu1 %v13633_v50  ;;  %v13679_v62 = vcombine.low %v975_v39, %v979_v19  ;;  %v13681_v50 = vcombine.low %v976_v40, %v980_v51  ;;  %v1023_v39 = vld [vmem:[%s20151_s1 + $0x1ed0] sm:$0xff]  ;;  %v1024_v40 = vld [vmem:[%s20151_s1 + $0x1ed8] sm:$0xff] }
 0x4d3   :  { %11033 = vmatprep.subr.bf16.mxu0 %v13640_v52  ;;  %11566 = vmatprep.subr.bf16.mxu1 %v13642_v54  ;;  %v13688_v52 = vcombine.high %v983_v34, %v987_v46  ;;  %v13690_v54 = vcombine.high %v984_v49, %v988_v29  ;;  %v1027_v19 = vld [vmem:[%s20151_s1 + $0x1ef0] sm:$0xff]  ;;  %v1028_v51 = vld [vmem:[%s20151_s1 + $0x1ef8] sm:$0xff] }
 0x4d5   :  { %11025 = vmatmul.mubr.bf16.vlgmr.msra.gmra.mrb[4].mxu0 %v16360_v7  ;;  %11558 = vmatmul.mubr.bf16.vlgmr.msra.gmra.mrb[4].mxu1 %v16360_v7  ;;  %v960_v7 = vld [vmem:[%s20151_s1 + $0x1cd8] sm:$0xff] }
 0x4d6   :  { %11034 = vmatpush1.bf16.msra.mxu0 %v13639_v28  ;;  %11567 = vmatpush1.bf16.msra.mxu1 %v13641_v44  ;;  %v13666_v30 = vcombine.high %v960_v7, %v964_v58  ;;  %v13665_v36 = vcombine.low %v960_v7, %v964_v58  ;;  %v13687_v28 = vcombine.low %v983_v34, %v987_v46  ;;  %v1008_v7 = vld [vmem:[%s20151_s1 + $0x1e58] sm:$0xff]  ;;  %v1031_v34 = vld [vmem:[%s20151_s1 + $0x1f10] sm:$0xff] }
 0x4d7   :  { %11035 = vmatprep.subr.bf16.mxu0 %v13648_v9  ;;  %11568 = vmatprep.subr.bf16.mxu1 %v13650_v10  ;;  %v13689_v44 = vcombine.low %v984_v49, %v988_v29  ;;  %v13696_v9 = vcombine.high %v991_v55, %v995_v60  ;;  %v13698_v10 = vcombine.high %v992_v61, %v996_v0  ;;  %v1012_v58 = vld [vmem:[%s20151_s1 + $0x1e78] sm:$0xff]  ;;  %v1035_v46 = vld [vmem:[%s20151_s1 + $0x1f30] sm:$0xff] }
 0x4d8   :  { %11065 = vmatprep.mubr.bf16.mxu0 %v16376_v17  ;;  %11598 = vmatprep.mubr.bf16.mxu1 %v16376_v17  ;;  %v968_v17 = vld [vmem:[%s20151_s1 + $0x1d18] sm:$0xff] }
 0x4d9   :  { %v13674_v53 = vcombine.high %v968_v17, %v972_v48  ;;  %v13673_v42 = vcombine.low %v968_v17, %v972_v48  ;;  %v1016_v17 = vld [vmem:[%s20151_s1 + $0x1e98] sm:$0xff] }
 0x4da   :  { %11036 = vmatpush1.bf16.msra.mxu0 %v13647_v20  ;;  %11569 = vmatpush1.bf16.msra.mxu1 %v13649_v21  ;;  %v13695_v20 = vcombine.low %v991_v55, %v995_v60  ;;  %v13697_v21 = vcombine.low %v992_v61, %v996_v0  ;;  %v1020_v48 = vld [vmem:[%s20151_s1 + $0x1eb8] sm:$0xff]  ;;  %v1039_v55 = vld [vmem:[%s20151_s1 + $0x1f50] sm:$0xff] }
 0x4db   :  { %11037 = vmatprep.subr.bf16.mxu0 %v13656_v22  ;;  %11570 = vmatprep.subr.bf16.mxu1 %v13658_v24  ;;  %v13704_v22 = vcombine.high %v999_v11, %v1003_v12  ;;  %v13706_v24 = vcombine.high %v1000_v1, %v1004_v16  ;;  %v1032_v49 = vld [vmem:[%s20151_s1 + $0x1f18] sm:$0xff]  ;;  %v1043_v60 = vld [vmem:[%s20151_s1 + $0x1f70] sm:$0xff] }
 0x4dc   :  { %v1036_v29 = vld [vmem:[%s20151_s1 + $0x1f38] sm:$0xff] }
 0x4dd   :  { %v1040_v61 = vld [vmem:[%s20151_s1 + $0x1f58] sm:$0xff] }
 0x4de   :  { %11038 = vmatpush1.bf16.msra.mxu0 %v13655_v47  ;;  %11571 = vmatpush1.bf16.msra.mxu1 %v13657_v27  ;;  %v13703_v47 = vcombine.low %v999_v11, %v1003_v12  ;;  %v13705_v27 = vcombine.low %v1000_v1, %v1004_v16  ;;  %v1044_v0 = vld [vmem:[%s20151_s1 + $0x1f78] sm:$0xff]  ;;  %v1047_v11 = vld [vmem:[%s20151_s1 + $0x1f90] sm:$0xff] }
 0x4df   :  { %11039 = vmatprep.subr.bf16.mxu0 %v13664_v63  ;;  %11572 = vmatprep.subr.bf16.mxu1 %v13666_v30  ;;  %v13712_v63 = vcombine.high %v1007_v38, %v1011_v31  ;;  %v13714_v30 = vcombine.high %v1008_v7, %v1012_v58  ;;  %v1051_v12 = vld [vmem:[%s20151_s1 + $0x1fb0] sm:$0xff]  ;;  %v1048_v1 = vld [vmem:[%s20151_s1 + $0x1f98] sm:$0xff] }
 0x4e0   :  { %v1052_v16 = vld [vmem:[%s20151_s1 + $0x1fb8] sm:$0xff] }
 0x4e2   :  { %11040 = vmatpush1.bf16.msra.mxu0 %v13663_v4  ;;  %11573 = vmatpush1.bf16.msra.mxu1 %v13665_v36  ;;  %v13711_v4 = vcombine.low %v1007_v38, %v1011_v31  ;;  %v13713_v36 = vcombine.low %v1008_v7, %v1012_v58  ;;  %v1055_v38 = vld [vmem:[%s20151_s1 + $0x1fd0] sm:$0xff]  ;;  %v1056_v7 = vld [vmem:[%s20151_s1 + $0x1fd8] sm:$0xff] }
 0x4e3   :  { %11041 = vmatprep.subr.bf16.mxu0 %v13672_v59  ;;  %11574 = vmatprep.subr.bf16.mxu1 %v13674_v53  ;;  %v13720_v59 = vcombine.high %v1015_v33, %v1019_v35  ;;  %v13722_v53 = vcombine.high %v1016_v17, %v1020_v48  ;;  %v1059_v31 = vld [vmem:[%s20151_s1 + $0x1ff0] sm:$0xff]  ;;  %v1060_v58 = vld [vmem:[%s20151_s1 + $0x1ff8] sm:$0xff] }
 0x4e6   :  { %11042 = vmatpush1.bf16.msra.mxu0 %v13671_v41  ;;  %11575 = vmatpush1.bf16.msra.mxu1 %v13673_v42  ;;  %v13719_v41 = vcombine.low %v1015_v33, %v1019_v35  ;;  %v13721_v42 = vcombine.low %v1016_v17, %v1020_v48  ;;  %v1063_v33 = vld [vmem:[%s20151_s1 + $0x2010] sm:$0xff]  ;;  %v1064_v17 = vld [vmem:[%s20151_s1 + $0x2018] sm:$0xff] }
 0x4e7   :  { %11043 = vmatprep.subr.bf16.mxu0 %v13680_v37  ;;  %11576 = vmatprep.subr.bf16.mxu1 %v13682_v45  ;;  %v13728_v37 = vcombine.high %v1023_v39, %v1027_v19  ;;  %v13730_v45 = vcombine.high %v1024_v40, %v1028_v51  ;;  %v1067_v35 = vld [vmem:[%s20151_s1 + $0x2030] sm:$0xff]  ;;  %v1068_v48 = vld [vmem:[%s20151_s1 + $0x2038] sm:$0xff] }
 0x4ea   :  { %11044 = vmatpush1.bf16.msra.mxu0 %v13679_v62  ;;  %11577 = vmatpush1.bf16.msra.mxu1 %v13681_v50  ;;  %v13727_v62 = vcombine.low %v1023_v39, %v1027_v19  ;;  %v13729_v50 = vcombine.low %v1024_v40, %v1028_v51  ;;  %v1071_v39 = vld [vmem:[%s20151_s1 + $0x2050] sm:$0xff]  ;;  %v1072_v40 = vld [vmem:[%s20151_s1 + $0x2058] sm:$0xff] }
 0x4eb   :  { %11045 = vmatprep.subr.bf16.mxu0 %v13688_v52  ;;  %11578 = vmatprep.subr.bf16.mxu1 %v13690_v54  ;;  %v13736_v52 = vcombine.high %v1031_v34, %v1035_v46  ;;  %v13738_v54 = vcombine.high %v1032_v49, %v1036_v29  ;;  %v1075_v19 = vld [vmem:[%s20151_s1 + $0x2070] sm:$0xff]  ;;  %v1076_v51 = vld [vmem:[%s20151_s1 + $0x2078] sm:$0xff] }
 0x4ee   :  { %11046 = vmatpush1.bf16.msra.mxu0 %v13687_v28  ;;  %11579 = vmatpush1.bf16.msra.mxu1 %v13689_v44  ;;  %v13735_v28 = vcombine.low %v1031_v34, %v1035_v46  ;;  %v13737_v44 = vcombine.low %v1032_v49, %v1036_v29  ;;  %v1079_v34 = vld [vmem:[%s20151_s1 + $0x2090] sm:$0xff]  ;;  %v1080_v49 = vld [vmem:[%s20151_s1 + $0x2098] sm:$0xff] }
 0x4ef   :  { %11047 = vmatprep.subr.bf16.mxu0 %v13696_v9  ;;  %11580 = vmatprep.subr.bf16.mxu1 %v13698_v10  ;;  %v13744_v9 = vcombine.high %v1039_v55, %v1043_v60  ;;  %v13746_v10 = vcombine.high %v1040_v61, %v1044_v0  ;;  %v1083_v46 = vld [vmem:[%s20151_s1 + $0x20b0] sm:$0xff]  ;;  %v1084_v29 = vld [vmem:[%s20151_s1 + $0x20b8] sm:$0xff] }
 0x4f2   :  { %11048 = vmatpush1.bf16.msra.mxu0 %v13695_v20  ;;  %11581 = vmatpush1.bf16.msra.mxu1 %v13697_v21  ;;  %v13743_v20 = vcombine.low %v1039_v55, %v1043_v60  ;;  %v13745_v21 = vcombine.low %v1040_v61, %v1044_v0  ;;  %v1087_v55 = vld [vmem:[%s20151_s1 + $0x20d0] sm:$0xff]  ;;  %v1092_v61 = vld [vmem:[%s20151_s1 + $0x20f8] sm:$0xff]  ;;  %v13783_v0 = vcombine.low %v1079_v34, %v1083_v46 }
 0x4f3   :  { %11049 = vmatprep.subr.bf16.mxu0 %v13704_v22  ;;  %11582 = vmatprep.subr.bf16.mxu1 %v13706_v24  ;;  %v13752_v22 = vcombine.high %v1047_v11, %v1051_v12  ;;  %v13754_v24 = vcombine.high %v1048_v1, %v1052_v16  ;;  %v1091_v60 = vld [vmem:[%s20151_s1 + $0x20f0] sm:$0xff] }
 0x4f6   :  { %11050 = vmatpush1.bf16.msra.mxu0 %v13703_v47  ;;  %11583 = vmatpush1.bf16.msra.mxu1 %v13705_v27  ;;  %v13751_v47 = vcombine.low %v1047_v11, %v1051_v12  ;;  %v13753_v27 = vcombine.low %v1048_v1, %v1052_v16  ;;  %v1099_v11 = vld [vmem:[%s20151_s1 + $0x2130] sm:$0xff]  ;;  %v1100_v12 = vld [vmem:[%s20151_s1 + $0x2138] sm:$0xff]  ;;  %v13791_v1 = vcombine.low %v1087_v55, %v1091_v60 }
 0x4f7   :  { %11051 = vmatprep.subr.bf16.mxu0 %v13712_v63  ;;  %11584 = vmatprep.subr.bf16.mxu1 %v13714_v30  ;;  %v13760_v63 = vcombine.high %v1055_v38, %v1059_v31  ;;  %v13762_v30 = vcombine.high %v1056_v7, %v1060_v58 }
 0x4fa   :  { %11052 = vmatpush1.bf16.msra.mxu0 %v13711_v4  ;;  %11585 = vmatpush1.bf16.msra.mxu1 %v13713_v36  ;;  %v13759_v4 = vcombine.low %v1055_v38, %v1059_v31  ;;  %v13761_v36 = vcombine.low %v1056_v7, %v1060_v58  ;;  %v1104_v38 = vld [vmem:[%s20151_s1 + $0x2158] sm:$0xff] }
 0x4fb   :  { %11053 = vmatprep.subr.bf16.mxu0 %v13720_v59  ;;  %11586 = vmatprep.subr.bf16.mxu1 %v13722_v53  ;;  %v13768_v59 = vcombine.high %v1063_v33, %v1067_v35  ;;  %v13770_v53 = vcombine.high %v1064_v17, %v1068_v48  ;;  %v1108_v31 = vld [vmem:[%s20151_s1 + $0x2178] sm:$0xff] }
 0x4fe   :  { %11054 = vmatpush1.bf16.msra.mxu0 %v13719_v41  ;;  %11587 = vmatpush1.bf16.msra.mxu1 %v13721_v42  ;;  %v13767_v41 = vcombine.low %v1063_v33, %v1067_v35  ;;  %v13769_v42 = vcombine.low %v1064_v17, %v1068_v48  ;;  %v1112_v33 = vld [vmem:[%s20151_s1 + $0x2198] sm:$0xff]  ;;  %v13809_v48 = vcombine.low %v1104_v38, %v1108_v31 }
 0x4ff   :  { %11055 = vmatprep.subr.bf16.mxu0 %v13728_v37  ;;  %11588 = vmatprep.subr.bf16.mxu1 %v13730_v45  ;;  %v13776_v37 = vcombine.high %v1071_v39, %v1075_v19  ;;  %v13778_v45 = vcombine.high %v1072_v40, %v1076_v51  ;;  %v1116_v35 = vld [vmem:[%s20151_s1 + $0x21b8] sm:$0xff] }
 0x502   :  { %11056 = vmatpush1.bf16.msra.mxu0 %v13727_v62  ;;  %11589 = vmatpush1.bf16.msra.mxu1 %v13729_v50  ;;  %v13775_v62 = vcombine.low %v1071_v39, %v1075_v19  ;;  %v13777_v50 = vcombine.low %v1072_v40, %v1076_v51  ;;  %v1120_v39 = vld [vmem:[%s20151_s1 + $0x21d8] sm:$0xff]  ;;  %v13817_v51 = vcombine.low %v1112_v33, %v1116_v35 }
 0x503   :  { %11057 = vmatprep.subr.bf16.mxu0 %v13736_v52  ;;  %11590 = vmatprep.subr.bf16.mxu1 %v13738_v54  ;;  %v13784_v52 = vcombine.high %v1079_v34, %v1083_v46  ;;  %v13786_v54 = vcombine.high %v1080_v49, %v1084_v29  ;;  %v1124_v19 = vld [vmem:[%s20151_s1 + $0x21f8] sm:$0xff] }
 0x504   :  { %v1128_v34 = vld [vmem:[%s20151_s1 + $0x2218] sm:$0xff] }
 0x505   :  { %v1132_v46 = vld [vmem:[%s20151_s1 + $0x2238] sm:$0xff] }
 0x506   :  { %11058 = vmatpush1.bf16.msra.mxu0 %v13735_v28  ;;  %11591 = vmatpush1.bf16.msra.mxu1 %v13737_v44  ;;  %v13785_v28 = vcombine.low %v1080_v49, %v1084_v29  ;;  %v13792_v44 = vcombine.high %v1087_v55, %v1091_v60  ;;  %v13825_v29 = vcombine.low %v1120_v39, %v1124_v19  ;;  %v1136_v55 = vld [vmem:[%s20151_s1 + $0x2258] sm:$0xff] }
 0x507   :  { %11059 = vmatprep.subr.bf16.mxu0 %v13744_v9  ;;  %11592 = vmatprep.subr.bf16.mxu1 %v13746_v10  ;;  %v1095_v10 = vld [vmem:[%s20151_s1 + $0x2110] sm:$0xff]  ;;  %v1140_v60 = vld [vmem:[%s20151_s1 + $0x2278] sm:$0xff] }
 0x508   :  { %v13799_v7 = vcombine.low %v1095_v10, %v1099_v11 }
 0x50a   :  { %11060 = vmatpush1.bf16.msra.mxu0 %v13743_v20  ;;  %11593 = vmatpush1.bf16.msra.mxu1 %v13745_v21  ;;  %v13800_v20 = vcombine.high %v1095_v10, %v1099_v11  ;;  %v1144_v10 = vld [vmem:[%s20151_s1 + $0x2298] sm:$0xff] }
 0x50b   :  { %11061 = vmatprep.subr.bf16.mxu0 %v13752_v22  ;;  %11594 = vmatprep.subr.bf16.mxu1 %v13754_v24  ;;  %v1103_v22 = vld [vmem:[%s20151_s1 + $0x2150] sm:$0xff]  ;;  %v1148_v11 = vld [vmem:[%s20151_s1 + $0x22b8] sm:$0xff] }
 0x50c   :  { %v1107_v24 = vld [vmem:[%s20151_s1 + $0x2170] sm:$0xff] }
 0x50d   :  { %v13807_v17 = vcombine.low %v1103_v22, %v1107_v24 }
 0x50e   :  { %11062 = vmatpush1.bf16.msra.mxu0 %v13751_v47  ;;  %11595 = vmatpush1.bf16.msra.mxu1 %v13753_v27  ;;  %v13808_v47 = vcombine.high %v1103_v22, %v1107_v24  ;;  %v13810_v27 = vcombine.high %v1104_v38, %v1108_v31  ;;  %v1152_v22 = vld [vmem:[%s20151_s1 + $0x22d8] sm:$0xff]  ;;  %v13849_v31 = vcombine.low %v1144_v10, %v1148_v11 }
 0x50f   :  { %11063 = vmatprep.subr.bf16.mxu0 %v13760_v63  ;;  %11596 = vmatprep.subr.bf16.mxu1 %v13762_v30  ;;  %v1111_v63 = vld [vmem:[%s20151_s1 + $0x2190] sm:$0xff]  ;;  %v1156_v24 = vld [vmem:[%s20151_s1 + $0x22f8] sm:$0xff] }
 0x510   :  { %v1115_v30 = vld [vmem:[%s20151_s1 + $0x21b0] sm:$0xff] }
 0x511   :  { %v13815_v40 = vcombine.low %v1111_v63, %v1115_v30 }
 0x512   :  { %11064 = vmatpush1.bf16.msra.mxu0 %v13759_v4  ;;  %11597 = vmatpush1.bf16.msra.mxu1 %v13761_v36  ;;  %v13816_v4 = vcombine.high %v1111_v63, %v1115_v30  ;;  %v13818_v36 = vcombine.high %v1112_v33, %v1116_v35  ;;  %v1160_v63 = vld [vmem:[%s20151_s1 + $0x2318] sm:$0xff]  ;;  %v13857_v35 = vcombine.low %v1152_v22, %v1156_v24 }
 0x513   :  { %11074 = vmatprep.subr.bf16.mxu0 %v13768_v59  ;;  %11607 = vmatprep.subr.bf16.mxu1 %v13770_v53  ;;  %v1119_v59 = vld [vmem:[%s20151_s1 + $0x21d0] sm:$0xff]  ;;  %v1164_v30 = vld [vmem:[%s20151_s1 + $0x2338] sm:$0xff] }
 0x514   :  { %v1123_v53 = vld [vmem:[%s20151_s1 + $0x21f0] sm:$0xff] }
 0x515   :  { %11066 = vmatmul.mubr.bf16.vlgmr.msra.gmra.mrb[4].mxu0 %v16575_v57  ;;  %11599 = vmatmul.mubr.bf16.vlgmr.msra.gmra.mrb[4].mxu1 %v16575_v57  ;;  %v1088_v57 = vld [vmem:[%s20151_s1 + $0x20d8] sm:$0xff]  ;;  %v13823_v49 = vcombine.low %v1119_v59, %v1123_v53 }
 0x516   :  { %11075 = vmatpush1.bf16.msra.mxu0 %v13767_v41  ;;  %11608 = vmatpush1.bf16.msra.mxu1 %v13769_v42  ;;  %v13794_v9 = vcombine.high %v1088_v57, %v1092_v61  ;;  %v13793_v16 = vcombine.low %v1088_v57, %v1092_v61  ;;  %v13824_v41 = vcombine.high %v1119_v59, %v1123_v53  ;;  %v1168_v59 = vld [vmem:[%s20151_s1 + $0x2358] sm:$0xff] }
 0x517   :  { %11076 = vmatprep.subr.bf16.mxu0 %v13776_v37  ;;  %11609 = vmatprep.subr.bf16.mxu1 %v13778_v45  ;;  %v13826_v42 = vcombine.high %v1120_v39, %v1124_v19  ;;  %v1127_v37 = vld [vmem:[%s20151_s1 + $0x2210] sm:$0xff]  ;;  %v13833_v61 = vcombine.low %v1128_v34, %v1132_v46  ;;  %v1172_v53 = vld [vmem:[%s20151_s1 + $0x2378] sm:$0xff]  ;;  %v13865_v19 = vcombine.low %v1160_v63, %v1164_v30 }
 0x518   :  { %11106 = vmatprep.mubr.bf16.mxu0 %v16590_v6  ;;  %11639 = vmatprep.mubr.bf16.mxu1 %v16590_v6  ;;  %v1096_v6 = vld [vmem:[%s20151_s1 + $0x2118] sm:$0xff]  ;;  %v1131_v45 = vld [vmem:[%s20151_s1 + $0x2230] sm:$0xff] }
 0x519   :  { %v13802_v21 = vcombine.high %v1096_v6, %v1100_v12  ;;  %v13801_v58 = vcombine.low %v1096_v6, %v1100_v12  ;;  %v13831_v57 = vcombine.low %v1127_v37, %v1131_v45  ;;  %v13841_v12 = vcombine.low %v1136_v55, %v1140_v60 }
 0x51a   :  { %11077 = vmatpush1.bf16.msra.mxu0 %v13775_v62  ;;  %11610 = vmatpush1.bf16.msra.mxu1 %v13777_v50  ;;  %v13832_v62 = vcombine.high %v1127_v37, %v1131_v45  ;;  %v13834_v50 = vcombine.high %v1128_v34, %v1132_v46  ;;  %v1176_v37 = vld [vmem:[%s20151_s1 + $0x2398] sm:$0xff]  ;;  %v13873_v46 = vcombine.low %v1168_v59, %v1172_v53 }
 0x51b   :  { %11078 = vmatprep.subr.bf16.mxu0 %v13784_v52  ;;  %11611 = vmatprep.subr.bf16.mxu1 %v13786_v54  ;;  %v1135_v52 = vld [vmem:[%s20151_s1 + $0x2250] sm:$0xff]  ;;  %v1180_v45 = vld [vmem:[%s20151_s1 + $0x23b8] sm:$0xff] }
 0x51c   :  { %v1139_v54 = vld [vmem:[%s20151_s1 + $0x2270] sm:$0xff] }
 0x51d   :  { %v13839_v6 = vcombine.low %v1135_v52, %v1139_v54 }
 0x51e   :  { %11079 = vmatpush1.bf16.msra.mxu0 %v13783_v0  ;;  %11612 = vmatpush1.bf16.msra.mxu1 %v13785_v28  ;;  %v13840_v0 = vcombine.high %v1135_v52, %v1139_v54  ;;  %v13842_v28 = vcombine.high %v1136_v55, %v1140_v60  ;;  %v1184_v52 = vld [vmem:[%s20151_s1 + $0x23d8] sm:$0xff]  ;;  %v13881_v60 = vcombine.low %v1176_v37, %v1180_v45 }
 0x51f   :  { %11080 = vmatprep.subr.bf16.mxu0 %v13792_v44  ;;  %11613 = vmatprep.subr.bf16.mxu1 %v13794_v9  ;;  %v1143_v44 = vld [vmem:[%s20151_s1 + $0x2290] sm:$0xff]  ;;  %v1188_v54 = vld [vmem:[%s20151_s1 + $0x23f8] sm:$0xff] }
 0x520   :  { %v1147_v9 = vld [vmem:[%s20151_s1 + $0x22b0] sm:$0xff] }
 0x521   :  { %v13847_v38 = vcombine.low %v1143_v44, %v1147_v9 }
 0x522   :  { %11081 = vmatpush1.bf16.msra.mxu0 %v13791_v1  ;;  %11614 = vmatpush1.bf16.msra.mxu1 %v13793_v16  ;;  %v13848_v1 = vcombine.high %v1143_v44, %v1147_v9  ;;  %v13850_v16 = vcombine.high %v1144_v10, %v1148_v11  ;;  %v1192_v44 = vld [vmem:[%s20151_s1 + $0x2418] sm:$0xff]  ;;  %v13889_v11 = vcombine.low %v1184_v52, %v1188_v54 }
 0x523   :  { %11082 = vmatprep.subr.bf16.mxu0 %v13800_v20  ;;  %11615 = vmatprep.subr.bf16.mxu1 %v13802_v21  ;;  %v1151_v20 = vld [vmem:[%s20151_s1 + $0x22d0] sm:$0xff]  ;;  %v1196_v9 = vld [vmem:[%s20151_s1 + $0x2438] sm:$0xff] }
 0x524   :  { %v1155_v21 = vld [vmem:[%s20151_s1 + $0x22f0] sm:$0xff] }
 0x525   :  { %v13855_v33 = vcombine.low %v1151_v20, %v1155_v21 }
 0x526   :  { %11083 = vmatpush1.bf16.msra.mxu0 %v13799_v7  ;;  %11616 = vmatpush1.bf16.msra.mxu1 %v13801_v58  ;;  %v13856_v7 = vcombine.high %v1151_v20, %v1155_v21  ;;  %v13858_v58 = vcombine.high %v1152_v22, %v1156_v24  ;;  %v1200_v20 = vld [vmem:[%s20151_s1 + $0x2458] sm:$0xff]  ;;  %v13897_v24 = vcombine.low %v1192_v44, %v1196_v9 }
 0x527   :  { %11084 = vmatprep.subr.bf16.mxu0 %v13808_v47  ;;  %11617 = vmatprep.subr.bf16.mxu1 %v13810_v27  ;;  %v1159_v47 = vld [vmem:[%s20151_s1 + $0x2310] sm:$0xff]  ;;  %v1204_v21 = vld [vmem:[%s20151_s1 + $0x2478] sm:$0xff] }
 0x528   :  { %v1163_v27 = vld [vmem:[%s20151_s1 + $0x2330] sm:$0xff] }
 0x529   :  { %v13863_v39 = vcombine.low %v1159_v47, %v1163_v27 }
 0x52a   :  { %11085 = vmatpush1.bf16.msra.mxu0 %v13807_v17  ;;  %11618 = vmatpush1.bf16.msra.mxu1 %v13809_v48  ;;  %v13864_v17 = vcombine.high %v1159_v47, %v1163_v27  ;;  %v13866_v48 = vcombine.high %v1160_v63, %v1164_v30  ;;  %v1208_v47 = vld [vmem:[%s20151_s1 + $0x2498] sm:$0xff]  ;;  %v13905_v30 = vcombine.low %v1200_v20, %v1204_v21 }
 0x52b   :  { %11086 = vmatprep.subr.bf16.mxu0 %v13816_v4  ;;  %11619 = vmatprep.subr.bf16.mxu1 %v13818_v36  ;;  %v1167_v4 = vld [vmem:[%s20151_s1 + $0x2350] sm:$0xff]  ;;  %v1212_v27 = vld [vmem:[%s20151_s1 + $0x24b8] sm:$0xff] }
 0x52c   :  { %v1171_v36 = vld [vmem:[%s20151_s1 + $0x2370] sm:$0xff] }
 0x52d   :  { %v13871_v34 = vcombine.low %v1167_v4, %v1171_v36 }
 0x52e   :  { %11087 = vmatpush1.bf16.msra.mxu0 %v13815_v40  ;;  %11620 = vmatpush1.bf16.msra.mxu1 %v13817_v51  ;;  %v13872_v40 = vcombine.high %v1167_v4, %v1171_v36  ;;  %v13874_v51 = vcombine.high %v1168_v59, %v1172_v53  ;;  %v1220_v4 = vld [vmem:[%s20151_s1 + $0x24f8] sm:$0xff]  ;;  %v13913_v59 = vcombine.low %v1208_v47, %v1212_v27 }
 0x52f   :  { %11088 = vmatprep.subr.bf16.mxu0 %v13824_v41  ;;  %11621 = vmatprep.subr.bf16.mxu1 %v13826_v42  ;;  %v1175_v41 = vld [vmem:[%s20151_s1 + $0x2390] sm:$0xff] }
 0x530   :  { %v1179_v42 = vld [vmem:[%s20151_s1 + $0x23b0] sm:$0xff] }
 0x531   :  { %v13879_v55 = vcombine.low %v1175_v41, %v1179_v42 }
 0x532   :  { %11089 = vmatpush1.bf16.msra.mxu0 %v13823_v49  ;;  %11622 = vmatpush1.bf16.msra.mxu1 %v13825_v29  ;;  %v13880_v49 = vcombine.high %v1175_v41, %v1179_v42  ;;  %v13882_v29 = vcombine.high %v1176_v37, %v1180_v45 }
 0x533   :  { %11090 = vmatprep.subr.bf16.mxu0 %v13832_v62  ;;  %11623 = vmatprep.subr.bf16.mxu1 %v13834_v50  ;;  %v1183_v62 = vld [vmem:[%s20151_s1 + $0x23d0] sm:$0xff] }
 0x534   :  { %v1187_v50 = vld [vmem:[%s20151_s1 + $0x23f0] sm:$0xff] }
 0x535   :  { %v13887_v10 = vcombine.low %v1183_v62, %v1187_v50 }
 0x536   :  { %11091 = vmatpush1.bf16.msra.mxu0 %v13831_v57  ;;  %11624 = vmatpush1.bf16.msra.mxu1 %v13833_v61  ;;  %v13888_v57 = vcombine.high %v1183_v62, %v1187_v50  ;;  %v13890_v61 = vcombine.high %v1184_v52, %v1188_v54 }
 0x537   :  { %11092 = vmatprep.subr.bf16.mxu0 %v13840_v0  ;;  %11625 = vmatprep.subr.bf16.mxu1 %v13842_v28  ;;  %v1191_v0 = vld [vmem:[%s20151_s1 + $0x2410] sm:$0xff] }
 0x538   :  { %v1195_v28 = vld [vmem:[%s20151_s1 + $0x2430] sm:$0xff] }
 0x539   :  { %v13895_v22 = vcombine.low %v1191_v0, %v1195_v28 }
 0x53a   :  { %11093 = vmatpush1.bf16.msra.mxu0 %v13839_v6  ;;  %11626 = vmatpush1.bf16.msra.mxu1 %v13841_v12  ;;  %v13896_v6 = vcombine.high %v1191_v0, %v1195_v28  ;;  %v13898_v12 = vcombine.high %v1192_v44, %v1196_v9 }
 0x53b   :  { %11094 = vmatprep.subr.bf16.mxu0 %v13848_v1  ;;  %11627 = vmatprep.subr.bf16.mxu1 %v13850_v16  ;;  %v1199_v1 = vld [vmem:[%s20151_s1 + $0x2450] sm:$0xff] }
 0x53c   :  { %v1203_v16 = vld [vmem:[%s20151_s1 + $0x2470] sm:$0xff] }
 0x53d   :  { %v13903_v63 = vcombine.low %v1199_v1, %v1203_v16 }
 0x53e   :  { %11095 = vmatpush1.bf16.msra.mxu0 %v13847_v38  ;;  %11628 = vmatpush1.bf16.msra.mxu1 %v13849_v31  ;;  %v13904_v38 = vcombine.high %v1199_v1, %v1203_v16  ;;  %v13906_v31 = vcombine.high %v1200_v20, %v1204_v21 }
 0x53f   :  { %11096 = vmatprep.subr.bf16.mxu0 %v13856_v7  ;;  %11629 = vmatprep.subr.bf16.mxu1 %v13858_v58  ;;  %v1207_v7 = vld [vmem:[%s20151_s1 + $0x2490] sm:$0xff] }
 0x540   :  { %v1211_v58 = vld [vmem:[%s20151_s1 + $0x24b0] sm:$0xff] }
 0x541   :  { %v13911_v36 = vcombine.low %v1207_v7, %v1211_v58 }
 0x542   :  { %11097 = vmatpush1.bf16.msra.mxu0 %v13855_v33  ;;  %11630 = vmatpush1.bf16.msra.mxu1 %v13857_v35  ;;  %v13912_v33 = vcombine.high %v1207_v7, %v1211_v58  ;;  %v13914_v35 = vcombine.high %v1208_v47, %v1212_v27 }
 0x543   :  { %11098 = vmatprep.subr.bf16.mxu0 %v13864_v17  ;;  %11631 = vmatprep.subr.bf16.mxu1 %v13866_v48  ;;  %v1215_v17 = vld [vmem:[%s20151_s1 + $0x24d0] sm:$0xff] }
 0x544   :  { %v1219_v48 = vld [vmem:[%s20151_s1 + $0x24f0] sm:$0xff] }
 0x545   :  { %v13920_v53 = vcombine.high %v1215_v17, %v1219_v48  ;;  %v13919_v41 = vcombine.low %v1215_v17, %v1219_v48 }
 0x546   :  { %11099 = vmatpush1.bf16.msra.mxu0 %v13863_v39  ;;  %11632 = vmatpush1.bf16.msra.mxu1 %v13865_v19  ;;  %v1223_v19 = vld [vmem:[%s20151_s1 + $0x2510] sm:$0xff] }
 0x547   :  { %11100 = vmatprep.subr.bf16.mxu0 %v13872_v40  ;;  %11633 = vmatprep.subr.bf16.mxu1 %v13874_v51  ;;  %v1227_v40 = vld [vmem:[%s20151_s1 + $0x2530] sm:$0xff]  ;;  %v1228_v51 = vld [vmem:[%s20151_s1 + $0x2538] sm:$0xff] }
 0x548   :  { %v13928_v37 = vcombine.high %v1223_v19, %v1227_v40  ;;  %v13927_v62 = vcombine.low %v1223_v19, %v1227_v40 }
 0x54a   :  { %11101 = vmatpush1.bf16.msra.mxu0 %v13871_v34  ;;  %11634 = vmatpush1.bf16.msra.mxu1 %v13873_v46  ;;  %v1231_v34 = vld [vmem:[%s20151_s1 + $0x2550] sm:$0xff] }
 0x54b   :  { %11102 = vmatprep.subr.bf16.mxu0 %v13880_v49  ;;  %11635 = vmatprep.subr.bf16.mxu1 %v13882_v29  ;;  %v1235_v46 = vld [vmem:[%s20151_s1 + $0x2570] sm:$0xff]  ;;  %v1232_v49 = vld [vmem:[%s20151_s1 + $0x2558] sm:$0xff] }
 0x54c   :  { %v1236_v29 = vld [vmem:[%s20151_s1 + $0x2578] sm:$0xff]  ;;  %v13936_v52 = vcombine.high %v1231_v34, %v1235_v46  ;;  %v13935_v0 = vcombine.low %v1231_v34, %v1235_v46 }
 0x54d   :  { %v13938_v54 = vcombine.high %v1232_v49, %v1236_v29  ;;  %v13937_v28 = vcombine.low %v1232_v49, %v1236_v29 }
 0x54e   :  { %11103 = vmatpush1.bf16.msra.mxu0 %v13879_v55  ;;  %11636 = vmatpush1.bf16.msra.mxu1 %v13881_v60  ;;  %v1239_v55 = vld [vmem:[%s20151_s1 + $0x2590] sm:$0xff] }
 0x54f   :  { %11104 = vmatprep.subr.bf16.mxu0 %v13888_v57  ;;  %11637 = vmatprep.subr.bf16.mxu1 %v13890_v61  ;;  %v1243_v60 = vld [vmem:[%s20151_s1 + $0x25b0] sm:$0xff]  ;;  %v1240_v57 = vld [vmem:[%s20151_s1 + $0x2598] sm:$0xff] }
 0x550   :  { %v1244_v61 = vld [vmem:[%s20151_s1 + $0x25b8] sm:$0xff]  ;;  %v13944_v44 = vcombine.high %v1239_v55, %v1243_v60  ;;  %v13943_v1 = vcombine.low %v1239_v55, %v1243_v60 }
 0x551   :  { %v13946_v9 = vcombine.high %v1240_v57, %v1244_v61  ;;  %v13945_v16 = vcombine.low %v1240_v57, %v1244_v61 }
 0x552   :  { %11105 = vmatpush1.bf16.msra.mxu0 %v13887_v10  ;;  %11638 = vmatpush1.bf16.msra.mxu1 %v13889_v11  ;;  %v1247_v10 = vld [vmem:[%s20151_s1 + $0x25d0] sm:$0xff] }
 0x553   :  { %11115 = vmatprep.subr.bf16.mxu0 %v13896_v6  ;;  %11648 = vmatprep.subr.bf16.mxu1 %v13898_v12  ;;  %v1251_v11 = vld [vmem:[%s20151_s1 + $0x25f0] sm:$0xff]  ;;  %v1248_v6 = vld [vmem:[%s20151_s1 + $0x25d8] sm:$0xff] }
 0x554   :  { %v1252_v12 = vld [vmem:[%s20151_s1 + $0x25f8] sm:$0xff]  ;;  %v13952_v20 = vcombine.high %v1247_v10, %v1251_v11  ;;  %v13951_v7 = vcombine.low %v1247_v10, %v1251_v11 }
 0x555   :  { %11107 = vmatmul.mubr.bf16.vlgmr.msra.gmra.mrb[4].mxu0 %v16778_v56  ;;  %11640 = vmatmul.mubr.bf16.vlgmr.msra.gmra.mrb[4].mxu1 %v16778_v56  ;;  %v1216_v56 = vld [vmem:[%s20151_s1 + $0x24d8] sm:$0xff]  ;;  %v13954_v21 = vcombine.high %v1248_v6, %v1252_v12  ;;  %v13953_v58 = vcombine.low %v1248_v6, %v1252_v12 }
 0x556   :  { %11116 = vmatpush1.bf16.msra.mxu0 %v13895_v22  ;;  %11649 = vmatpush1.bf16.msra.mxu1 %v13897_v24  ;;  %v13922_v39 = vcombine.high %v1216_v56, %v1220_v4  ;;  %v13921_v42 = vcombine.low %v1216_v56, %v1220_v4  ;;  %v1255_v22 = vld [vmem:[%s20151_s1 + $0x2610] sm:$0xff] }
 0x557   :  { %11117 = vmatprep.subr.bf16.mxu0 %v13904_v38  ;;  %11650 = vmatprep.subr.bf16.mxu1 %v13906_v31  ;;  %v1259_v24 = vld [vmem:[%s20151_s1 + $0x2630] sm:$0xff]  ;;  %v1256_v38 = vld [vmem:[%s20151_s1 + $0x2618] sm:$0xff] }
 0x558   :  { %11147 = vmatprep.mubr.bf16.mxu0 %v16794_v5  ;;  %11680 = vmatprep.mubr.bf16.mxu1 %v16794_v5  ;;  %v1224_v5 = vld [vmem:[%s20151_s1 + $0x2518] sm:$0xff]  ;;  %v13960_v47 = vcombine.high %v1255_v22, %v1259_v24  ;;  %v13959_v17 = vcombine.low %v1255_v22, %v1259_v24 }
 0x559   :  { %v13930_v45 = vcombine.high %v1224_v5, %v1228_v51  ;;  %v13929_v50 = vcombine.low %v1224_v5, %v1228_v51  ;;  %v1260_v31 = vld [vmem:[%s20151_s1 + $0x2638] sm:$0xff] }
 0x55a   :  { %11118 = vmatpush1.bf16.msra.mxu0 %v13903_v63  ;;  %11651 = vmatpush1.bf16.msra.mxu1 %v13905_v30  ;;  %v13962_v27 = vcombine.high %v1256_v38, %v1260_v31  ;;  %v1263_v63 = vld [vmem:[%s20151_s1 + $0x2650] sm:$0xff]  ;;  %v13961_v48 = vcombine.low %v1256_v38, %v1260_v31 }
 0x55b   :  { %11119 = vmatprep.subr.bf16.mxu0 %v13912_v33  ;;  %11652 = vmatprep.subr.bf16.mxu1 %v13914_v35  ;;  %v1267_v30 = vld [vmem:[%s20151_s1 + $0x2670] sm:$0xff]  ;;  %v1264_v33 = vld [vmem:[%s20151_s1 + $0x2658] sm:$0xff] }
 0x55c   :  { %v1268_v35 = vld [vmem:[%s20151_s1 + $0x2678] sm:$0xff]  ;;  %v13968_v56 = vcombine.high %v1263_v63, %v1267_v30  ;;  %v13967_v19 = vcombine.low %v1263_v63, %v1267_v30 }
 0x55d   :  { %v13970_v4 = vcombine.high %v1264_v33, %v1268_v35  ;;  %v13969_v40 = vcombine.low %v1264_v33, %v1268_v35 }
 0x55e   :  { %11120 = vmatpush1.bf16.msra.mxu0 %v13911_v36  ;;  %11653 = vmatpush1.bf16.msra.mxu1 %v13913_v59  ;;  %v1271_v36 = vld [vmem:[%s20151_s1 + $0x2690] sm:$0xff] }
 0x55f   :  { %11121 = vmatprep.subr.bf16.mxu0 %v13920_v53  ;;  %11654 = vmatprep.subr.bf16.mxu1 %v13922_v39  ;;  %v1275_v59 = vld [vmem:[%s20151_s1 + $0x26b0] sm:$0xff]  ;;  %v1272_v53 = vld [vmem:[%s20151_s1 + $0x2698] sm:$0xff] }
 0x560   :  { %v1276_v39 = vld [vmem:[%s20151_s1 + $0x26b8] sm:$0xff]  ;;  %v13976_v5 = vcombine.high %v1271_v36, %v1275_v59  ;;  %v13975_v34 = vcombine.low %v1271_v36, %v1275_v59 }
 0x561   :  { %v13978_v51 = vcombine.high %v1272_v53, %v1276_v39  ;;  %v13977_v46 = vcombine.low %v1272_v53, %v1276_v39 }
 0x562   :  { %11122 = vmatpush1.bf16.msra.mxu0 %v13919_v41  ;;  %11655 = vmatpush1.bf16.msra.mxu1 %v13921_v42  ;;  %v1279_v41 = vld [vmem:[%s20151_s1 + $0x26d0] sm:$0xff] }
 0x563   :  { %11123 = vmatprep.subr.bf16.mxu0 %v13928_v37  ;;  %11656 = vmatprep.subr.bf16.mxu1 %v13930_v45  ;;  %v1283_v42 = vld [vmem:[%s20151_s1 + $0x26f0] sm:$0xff]  ;;  %v1280_v37 = vld [vmem:[%s20151_s1 + $0x26d8] sm:$0xff] }
 0x564   :  { %v1284_v45 = vld [vmem:[%s20151_s1 + $0x26f8] sm:$0xff]  ;;  %v13984_v49 = vcombine.high %v1279_v41, %v1283_v42  ;;  %v13983_v55 = vcombine.low %v1279_v41, %v1283_v42 }
 0x565   :  { %v13986_v29 = vcombine.high %v1280_v37, %v1284_v45  ;;  %v13985_v60 = vcombine.low %v1280_v37, %v1284_v45 }
 0x566   :  { %11124 = vmatpush1.bf16.msra.mxu0 %v13927_v62  ;;  %11657 = vmatpush1.bf16.msra.mxu1 %v13929_v50  ;;  %v1287_v62 = vld [vmem:[%s20151_s1 + $0x2710] sm:$0xff] }
 0x567   :  { %11125 = vmatprep.subr.bf16.mxu0 %v13936_v52  ;;  %11658 = vmatprep.subr.bf16.mxu1 %v13938_v54  ;;  %v1291_v50 = vld [vmem:[%s20151_s1 + $0x2730] sm:$0xff]  ;;  %v1288_v52 = vld [vmem:[%s20151_s1 + $0x2718] sm:$0xff] }
 0x568   :  { %v1292_v54 = vld [vmem:[%s20151_s1 + $0x2738] sm:$0xff]  ;;  %v13992_v57 = vcombine.high %v1287_v62, %v1291_v50  ;;  %v13991_v10 = vcombine.low %v1287_v62, %v1291_v50 }
 0x569   :  { %v13994_v61 = vcombine.high %v1288_v52, %v1292_v54  ;;  %v13993_v11 = vcombine.low %v1288_v52, %v1292_v54 }
 0x56a   :  { %11126 = vmatpush1.bf16.msra.mxu0 %v13935_v0  ;;  %11659 = vmatpush1.bf16.msra.mxu1 %v13937_v28  ;;  %v1295_v0 = vld [vmem:[%s20151_s1 + $0x2750] sm:$0xff] }
 0x56b   :  { %11127 = vmatprep.subr.bf16.mxu0 %v13944_v44  ;;  %11660 = vmatprep.subr.bf16.mxu1 %v13946_v9  ;;  %v1299_v28 = vld [vmem:[%s20151_s1 + $0x2770] sm:$0xff]  ;;  %v1296_v44 = vld [vmem:[%s20151_s1 + $0x2758] sm:$0xff] }
 0x56c   :  { %v1300_v9 = vld [vmem:[%s20151_s1 + $0x2778] sm:$0xff]  ;;  %v14000_v6 = vcombine.high %v1295_v0, %v1299_v28  ;;  %v13999_v22 = vcombine.low %v1295_v0, %v1299_v28 }
 0x56d   :  { %v14002_v12 = vcombine.high %v1296_v44, %v1300_v9  ;;  %v14001_v24 = vcombine.low %v1296_v44, %v1300_v9  ;;  %v1351_v9 = vld [vmem:[%s20151_s1 + $0x2910] sm:$0xff] }
 0x56e   :  { %11128 = vmatpush1.bf16.msra.mxu0 %v13943_v1  ;;  %11661 = vmatpush1.bf16.msra.mxu1 %v13945_v16  ;;  %v1303_v1 = vld [vmem:[%s20151_s1 + $0x2790] sm:$0xff] }
 0x56f   :  { %11129 = vmatprep.subr.bf16.mxu0 %v13952_v20  ;;  %11662 = vmatprep.subr.bf16.mxu1 %v13954_v21  ;;  %v1307_v16 = vld [vmem:[%s20151_s1 + $0x27b0] sm:$0xff]  ;;  %v1304_v20 = vld [vmem:[%s20151_s1 + $0x2798] sm:$0xff] }
 0x570   :  { %v1308_v21 = vld [vmem:[%s20151_s1 + $0x27b8] sm:$0xff]  ;;  %v14008_v38 = vcombine.high %v1303_v1, %v1307_v16  ;;  %v14007_v63 = vcombine.low %v1303_v1, %v1307_v16 }
 0x571   :  { %v14010_v31 = vcombine.high %v1304_v20, %v1308_v21  ;;  %v14009_v30 = vcombine.low %v1304_v20, %v1308_v21  ;;  %v1359_v20 = vld [vmem:[%s20151_s1 + $0x2950] sm:$0xff] }
 0x572   :  { %11130 = vmatpush1.bf16.msra.mxu0 %v13951_v7  ;;  %11663 = vmatpush1.bf16.msra.mxu1 %v13953_v58  ;;  %v1311_v7 = vld [vmem:[%s20151_s1 + $0x27d0] sm:$0xff] }
 0x573   :  { %11131 = vmatprep.subr.bf16.mxu0 %v13960_v47  ;;  %11664 = vmatprep.subr.bf16.mxu1 %v13962_v27  ;;  %v1315_v58 = vld [vmem:[%s20151_s1 + $0x27f0] sm:$0xff]  ;;  %v1312_v47 = vld [vmem:[%s20151_s1 + $0x27d8] sm:$0xff] }
 0x574   :  { %v1316_v27 = vld [vmem:[%s20151_s1 + $0x27f8] sm:$0xff]  ;;  %v14016_v33 = vcombine.high %v1311_v7, %v1315_v58  ;;  %v14015_v36 = vcombine.low %v1311_v7, %v1315_v58  ;;  %v1363_v21 = vld [vmem:[%s20151_s1 + $0x2970] sm:$0xff] }
 0x575   :  { %v14018_v35 = vcombine.high %v1312_v47, %v1316_v27  ;;  %v14017_v59 = vcombine.low %v1312_v47, %v1316_v27  ;;  %v14064_v7 = vcombine.high %v1359_v20, %v1363_v21  ;;  %v1367_v58 = vld [vmem:[%s20151_s1 + $0x2990] sm:$0xff] }
 0x576   :  { %11132 = vmatpush1.bf16.msra.mxu0 %v13959_v17  ;;  %11665 = vmatpush1.bf16.msra.mxu1 %v13961_v48  ;;  %v1319_v17 = vld [vmem:[%s20151_s1 + $0x2810] sm:$0xff] }
 0x577   :  { %11133 = vmatprep.subr.bf16.mxu0 %v13968_v56  ;;  %11666 = vmatprep.subr.bf16.mxu1 %v13970_v4  ;;  %v1323_v48 = vld [vmem:[%s20151_s1 + $0x2830] sm:$0xff]  ;;  %v1320_v56 = vld [vmem:[%s20151_s1 + $0x2818] sm:$0xff] }
 0x578   :  { %v1324_v4 = vld [vmem:[%s20151_s1 + $0x2838] sm:$0xff]  ;;  %v14024_v53 = vcombine.high %v1319_v17, %v1323_v48  ;;  %v14023_v41 = vcombine.low %v1319_v17, %v1323_v48  ;;  %v1371_v47 = vld [vmem:[%s20151_s1 + $0x29b0] sm:$0xff] }
 0x579   :  { %v14026_v39 = vcombine.high %v1320_v56, %v1324_v4  ;;  %v14025_v42 = vcombine.low %v1320_v56, %v1324_v4  ;;  %v14072_v48 = vcombine.high %v1367_v58, %v1371_v47  ;;  %v1379_v56 = vld [vmem:[%s20151_s1 + $0x29f0] sm:$0xff] }
 0x57a   :  { %11134 = vmatpush1.bf16.msra.mxu0 %v13967_v19  ;;  %11667 = vmatpush1.bf16.msra.mxu1 %v13969_v40  ;;  %v1327_v19 = vld [vmem:[%s20151_s1 + $0x2850] sm:$0xff] }
 0x57b   :  { %11135 = vmatprep.subr.bf16.mxu0 %v13976_v5  ;;  %11668 = vmatprep.subr.bf16.mxu1 %v13978_v51  ;;  %v1331_v40 = vld [vmem:[%s20151_s1 + $0x2870] sm:$0xff]  ;;  %v1328_v5 = vld [vmem:[%s20151_s1 + $0x2858] sm:$0xff] }
 0x57c   :  { %v1332_v51 = vld [vmem:[%s20151_s1 + $0x2878] sm:$0xff]  ;;  %v14032_v37 = vcombine.high %v1327_v19, %v1331_v40  ;;  %v14031_v62 = vcombine.low %v1327_v19, %v1331_v40 }
 0x57d   :  { %v14034_v45 = vcombine.high %v1328_v5, %v1332_v51  ;;  %v14033_v50 = vcombine.low %v1328_v5, %v1332_v51  ;;  %v1387_v5 = vld [vmem:[%s20151_s1 + $0x2a30] sm:$0xff] }
 0x57e   :  { %11136 = vmatpush1.bf16.msra.mxu0 %v13975_v34  ;;  %11669 = vmatpush1.bf16.msra.mxu1 %v13977_v46  ;;  %v1335_v34 = vld [vmem:[%s20151_s1 + $0x2890] sm:$0xff] }
 0x57f   :  { %11137 = vmatprep.subr.bf16.mxu0 %v13984_v49  ;;  %11670 = vmatprep.subr.bf16.mxu1 %v13986_v29  ;;  %v1339_v46 = vld [vmem:[%s20151_s1 + $0x28b0] sm:$0xff]  ;;  %v1336_v49 = vld [vmem:[%s20151_s1 + $0x2898] sm:$0xff] }
 0x580   :  { %v1340_v29 = vld [vmem:[%s20151_s1 + $0x28b8] sm:$0xff]  ;;  %v14040_v52 = vcombine.high %v1335_v34, %v1339_v46 }
 0x581   :  { %v14042_v54 = vcombine.high %v1336_v49, %v1340_v29  ;;  %v14041_v0 = vcombine.low %v1336_v49, %v1340_v29  ;;  %v1395_v49 = vld [vmem:[%s20151_s1 + $0x2a70] sm:$0xff] }
 0x582   :  { %11138 = vmatpush1.bf16.msra.mxu0 %v13983_v55  ;;  %11671 = vmatpush1.bf16.msra.mxu1 %v13985_v60  ;;  %v1343_v55 = vld [vmem:[%s20151_s1 + $0x28d0] sm:$0xff] }
 0x583   :  { %11139 = vmatprep.subr.bf16.mxu0 %v13992_v57  ;;  %11672 = vmatprep.subr.bf16.mxu1 %v13994_v61  ;;  %v1347_v60 = vld [vmem:[%s20151_s1 + $0x28f0] sm:$0xff]  ;;  %v1348_v57 = vld [vmem:[%s20151_s1 + $0x28f8] sm:$0xff]  ;;  %v14039_v61 = vcombine.low %v1335_v34, %v1339_v46 }
 0x584   :  { %v14048_v28 = vcombine.high %v1343_v55, %v1347_v60 }
 0x586   :  { %11140 = vmatpush1.bf16.msra.mxu0 %v13991_v10  ;;  %11673 = vmatpush1.bf16.msra.mxu1 %v13993_v11  ;;  %v1355_v10 = vld [vmem:[%s20151_s1 + $0x2930] sm:$0xff]  ;;  %v1356_v11 = vld [vmem:[%s20151_s1 + $0x2938] sm:$0xff] }
 0x587   :  { %11141 = vmatprep.subr.bf16.mxu0 %v14000_v6  ;;  %11674 = vmatprep.subr.bf16.mxu1 %v14002_v12  ;;  %v14047_v6 = vcombine.low %v1343_v55, %v1347_v60  ;;  %v14056_v1 = vcombine.high %v1351_v9, %v1355_v10 }
 0x58a   :  { %11142 = vmatpush1.bf16.msra.mxu0 %v13999_v22  ;;  %11675 = vmatpush1.bf16.msra.mxu1 %v14001_v24  ;;  %v1360_v22 = vld [vmem:[%s20151_s1 + $0x2958] sm:$0xff] }
 0x58b   :  { %11143 = vmatprep.subr.bf16.mxu0 %v14008_v38  ;;  %11676 = vmatprep.subr.bf16.mxu1 %v14010_v31  ;;  %v1364_v24 = vld [vmem:[%s20151_s1 + $0x2978] sm:$0xff]  ;;  %v14055_v38 = vcombine.low %v1351_v9, %v1355_v10 }
 0x58c   :  { %v14066_v27 = vcombine.high %v1360_v22, %v1364_v24  ;;  %v14065_v17 = vcombine.low %v1360_v22, %v1364_v24  ;;  %v1419_v22 = vld [vmem:[%s20151_s1 + $0x2b30] sm:$0xff] }
 0x58e   :  { %11144 = vmatpush1.bf16.msra.mxu0 %v14007_v63  ;;  %11677 = vmatpush1.bf16.msra.mxu1 %v14009_v30  ;;  %v1368_v63 = vld [vmem:[%s20151_s1 + $0x2998] sm:$0xff] }
 0x58f   :  { %11145 = vmatprep.subr.bf16.mxu0 %v14016_v33  ;;  %11678 = vmatprep.subr.bf16.mxu1 %v14018_v35  ;;  %v1372_v30 = vld [vmem:[%s20151_s1 + $0x29b8] sm:$0xff]  ;;  %v14063_v33 = vcombine.low %v1359_v20, %v1363_v21  ;;  %v1375_v35 = vld [vmem:[%s20151_s1 + $0x29d0] sm:$0xff] }
 0x590   :  { %v14074_v4 = vcombine.high %v1368_v63, %v1372_v30  ;;  %v14073_v19 = vcombine.low %v1368_v63, %v1372_v30  ;;  %v14080_v40 = vcombine.high %v1375_v35, %v1379_v56  ;;  %v1427_v63 = vld [vmem:[%s20151_s1 + $0x2b70] sm:$0xff] }
 0x592   :  { %11146 = vmatpush1.bf16.msra.mxu0 %v14015_v36  ;;  %11679 = vmatpush1.bf16.msra.mxu1 %v14017_v59  ;;  %v1376_v36 = vld [vmem:[%s20151_s1 + $0x29d8] sm:$0xff] }
 0x593   :  { %11156 = vmatprep.subr.bf16.mxu0 %v14024_v53  ;;  %11689 = vmatprep.subr.bf16.mxu1 %v14026_v39  ;;  %v1380_v59 = vld [vmem:[%s20151_s1 + $0x29f8] sm:$0xff]  ;;  %v14071_v53 = vcombine.low %v1367_v58, %v1371_v47  ;;  %v1383_v39 = vld [vmem:[%s20151_s1 + $0x2a10] sm:$0xff] }
 0x594   :  { %v14082_v51 = vcombine.high %v1376_v36, %v1380_v59  ;;  %v14081_v34 = vcombine.low %v1376_v36, %v1380_v59  ;;  %v14088_v46 = vcombine.high %v1383_v39, %v1387_v5  ;;  %v1423_v58 = vld [vmem:[%s20151_s1 + $0x2b50] sm:$0xff]  ;;  %v1432_v59 = vld [vmem:[%s20151_s1 + $0x2b98] sm:$0xff] }
 0x595   :  { %11148 = vmatmul.mubr.bf16.vlgmr.msra.gmra.mrb[4].mxu0 %v16989_v2  ;;  %11681 = vmatmul.mubr.bf16.vlgmr.msra.gmra.mrb[4].mxu1 %v16989_v2  ;;  %v1344_v2 = vld [vmem:[%s20151_s1 + $0x28d8] sm:$0xff]  ;;  %v14128_v36 = vcombine.high %v1423_v58, %v1427_v63 }
 0x596   :  { %11157 = vmatpush1.bf16.msra.mxu0 %v14023_v41  ;;  %11690 = vmatpush1.bf16.msra.mxu1 %v14025_v42  ;;  %v14050_v44 = vcombine.high %v1344_v2, %v1348_v57  ;;  %v14049_v12 = vcombine.low %v1344_v2, %v1348_v57  ;;  %v1384_v41 = vld [vmem:[%s20151_s1 + $0x2a18] sm:$0xff]  ;;  %v1403_v2 = vld [vmem:[%s20151_s1 + $0x2ab0] sm:$0xff] }
 0x597   :  { %11158 = vmatprep.subr.bf16.mxu0 %v14032_v37  ;;  %11691 = vmatprep.subr.bf16.mxu1 %v14034_v45  ;;  %v1388_v42 = vld [vmem:[%s20151_s1 + $0x2a38] sm:$0xff]  ;;  %v14079_v37 = vcombine.low %v1375_v35, %v1379_v56  ;;  %v1391_v45 = vld [vmem:[%s20151_s1 + $0x2a50] sm:$0xff] }
 0x598   :  { %11188 = vmatprep.mubr.bf16.mxu0 %v17004_v14  ;;  %11721 = vmatprep.mubr.bf16.mxu1 %v17004_v14  ;;  %v1352_v14 = vld [vmem:[%s20151_s1 + $0x2918] sm:$0xff]  ;;  %v14090_v29 = vcombine.high %v1384_v41, %v1388_v42  ;;  %v14089_v55 = vcombine.low %v1384_v41, %v1388_v42  ;;  %v14096_v60 = vcombine.high %v1391_v45, %v1395_v49  ;;  %v1435_v56 = vld [vmem:[%s20151_s1 + $0x2bb0] sm:$0xff] }
 0x599   :  { %v14058_v16 = vcombine.high %v1352_v14, %v1356_v11  ;;  %v14057_v31 = vcombine.low %v1352_v14, %v1356_v11  ;;  %v1411_v14 = vld [vmem:[%s20151_s1 + $0x2af0] sm:$0xff]  ;;  %v1428_v35 = vld [vmem:[%s20151_s1 + $0x2b78] sm:$0xff] }
 0x59a   :  { %11159 = vmatpush1.bf16.msra.mxu0 %v14031_v62  ;;  %11692 = vmatpush1.bf16.msra.mxu1 %v14033_v50  ;;  %v1392_v62 = vld [vmem:[%s20151_s1 + $0x2a58] sm:$0xff]  ;;  %v1443_v41 = vld [vmem:[%s20151_s1 + $0x2bf0] sm:$0xff] }
 0x59b   :  { %11160 = vmatprep.subr.bf16.mxu0 %v14040_v52  ;;  %11693 = vmatprep.subr.bf16.mxu1 %v14042_v54  ;;  %v1396_v50 = vld [vmem:[%s20151_s1 + $0x2a78] sm:$0xff]  ;;  %v14087_v52 = vcombine.low %v1383_v39, %v1387_v5  ;;  %v1399_v54 = vld [vmem:[%s20151_s1 + $0x2a90] sm:$0xff] }
 0x59c   :  { %v14098_v57 = vcombine.high %v1392_v62, %v1396_v50  ;;  %v14097_v9 = vcombine.low %v1392_v62, %v1396_v50  ;;  %v14104_v10 = vcombine.high %v1399_v54, %v1403_v2  ;;  %v1451_v62 = vld [vmem:[%s20151_s1 + $0x2c30] sm:$0xff] }
 0x59e   :  { %11161 = vmatpush1.bf16.msra.mxu0 %v14039_v61  ;;  %11694 = vmatpush1.bf16.msra.mxu1 %v14041_v0  ;;  %v1400_v61 = vld [vmem:[%s20151_s1 + $0x2a98] sm:$0xff] }
 0x59f   :  { %11162 = vmatprep.subr.bf16.mxu0 %v14048_v28  ;;  %11695 = vmatprep.subr.bf16.mxu1 %v14050_v44  ;;  %v1404_v0 = vld [vmem:[%s20151_s1 + $0x2ab8] sm:$0xff]  ;;  %v14095_v28 = vcombine.low %v1391_v45, %v1395_v49  ;;  %v1407_v44 = vld [vmem:[%s20151_s1 + $0x2ad0] sm:$0xff] }
 0x5a0   :  { %v14106_v11 = vcombine.high %v1400_v61, %v1404_v0  ;;  %v14105_v20 = vcombine.low %v1400_v61, %v1404_v0  ;;  %v14112_v21 = vcombine.high %v1407_v44, %v1411_v14  ;;  %v1444_v45 = vld [vmem:[%s20151_s1 + $0x2bf8] sm:$0xff]  ;;  %v1459_v61 = vld [vmem:[%s20151_s1 + $0x2c70] sm:$0xff] }
 0x5a2   :  { %11163 = vmatpush1.bf16.msra.mxu0 %v14047_v6  ;;  %11696 = vmatpush1.bf16.msra.mxu1 %v14049_v12  ;;  %v1408_v6 = vld [vmem:[%s20151_s1 + $0x2ad8] sm:$0xff] }
 0x5a3   :  { %11164 = vmatprep.subr.bf16.mxu0 %v14056_v1  ;;  %11697 = vmatprep.subr.bf16.mxu1 %v14058_v16  ;;  %v1412_v12 = vld [vmem:[%s20151_s1 + $0x2af8] sm:$0xff]  ;;  %v14103_v1 = vcombine.low %v1399_v54, %v1403_v2  ;;  %v1415_v16 = vld [vmem:[%s20151_s1 + $0x2b10] sm:$0xff] }
 0x5a4   :  { %v14114_v24 = vcombine.high %v1408_v6, %v1412_v12  ;;  %v14113_v47 = vcombine.low %v1408_v6, %v1412_v12  ;;  %v1452_v54 = vld [vmem:[%s20151_s1 + $0x2c38] sm:$0xff]  ;;  %v1467_v6 = vld [vmem:[%s20151_s1 + $0x2cb0] sm:$0xff] }
 0x5a6   :  { %11165 = vmatpush1.bf16.msra.mxu0 %v14055_v38  ;;  %11698 = vmatpush1.bf16.msra.mxu1 %v14057_v31  ;;  %v1416_v38 = vld [vmem:[%s20151_s1 + $0x2b18] sm:$0xff] }
 0x5a7   :  { %11166 = vmatprep.subr.bf16.mxu0 %v14064_v7  ;;  %11699 = vmatprep.subr.bf16.mxu1 %v14066_v27  ;;  %v1420_v31 = vld [vmem:[%s20151_s1 + $0x2b38] sm:$0xff]  ;;  %v14111_v7 = vcombine.low %v1407_v44, %v1411_v14  ;;  %v14120_v27 = vcombine.high %v1415_v16, %v1419_v22 }
 0x5a8   :  { %v14122_v30 = vcombine.high %v1416_v38, %v1420_v31  ;;  %v1460_v44 = vld [vmem:[%s20151_s1 + $0x2c78] sm:$0xff] }
 0x5aa   :  { %11167 = vmatpush1.bf16.msra.mxu0 %v14063_v33  ;;  %11700 = vmatpush1.bf16.msra.mxu1 %v14065_v17  ;;  %v1424_v33 = vld [vmem:[%s20151_s1 + $0x2b58] sm:$0xff]  ;;  %v14119_v17 = vcombine.low %v1415_v16, %v1419_v22 }
 0x5ab   :  { %11168 = vmatprep.subr.bf16.mxu0 %v14072_v48  ;;  %11701 = vmatprep.subr.bf16.mxu1 %v14074_v4  ;;  %v1431_v48 = vld [vmem:[%s20151_s1 + $0x2b90] sm:$0xff]  ;;  %v14121_v4 = vcombine.low %v1416_v38, %v1420_v31  ;;  %v14130_v39 = vcombine.high %v1424_v33, %v1428_v35  ;;  %v14129_v5 = vcombine.low %v1424_v33, %v1428_v35  ;;  %v1468_v16 = vld [vmem:[%s20151_s1 + $0x2cb8] sm:$0xff] }
 0x5ac   :  { %v1475_v38 = vld [vmem:[%s20151_s1 + $0x2cf0] sm:$0xff]  ;;  %v1480_v33 = vld [vmem:[%s20151_s1 + $0x2d18] sm:$0xff] }
 0x5ae   :  { %11169 = vmatpush1.bf16.msra.mxu0 %v14071_v53  ;;  %11702 = vmatpush1.bf16.msra.mxu1 %v14073_v19  ;;  %v1436_v53 = vld [vmem:[%s20151_s1 + $0x2bb8] sm:$0xff]  ;;  %v14127_v19 = vcombine.low %v1423_v58, %v1427_v63 }
 0x5af   :  { %11170 = vmatprep.subr.bf16.mxu0 %v14080_v40  ;;  %11703 = vmatprep.subr.bf16.mxu1 %v14082_v51  ;;  %v1439_v40 = vld [vmem:[%s20151_s1 + $0x2bd0] sm:$0xff]  ;;  %v14136_v51 = vcombine.high %v1431_v48, %v1435_v56  ;;  %v14138_v42 = vcombine.high %v1432_v59, %v1436_v53  ;;  %v14137_v49 = vcombine.low %v1432_v59, %v1436_v53  ;;  %v1488_v53 = vld [vmem:[%s20151_s1 + $0x2d58] sm:$0xff] }
 0x5b2   :  { %11171 = vmatpush1.bf16.msra.mxu0 %v14079_v37  ;;  %11704 = vmatpush1.bf16.msra.mxu1 %v14081_v34  ;;  %v1440_v37 = vld [vmem:[%s20151_s1 + $0x2bd8] sm:$0xff]  ;;  %v14135_v34 = vcombine.low %v1431_v48, %v1435_v56  ;;  %v1487_v48 = vld [vmem:[%s20151_s1 + $0x2d50] sm:$0xff] }
 0x5b3   :  { %11172 = vmatprep.subr.bf16.mxu0 %v14088_v46  ;;  %11705 = vmatprep.subr.bf16.mxu1 %v14090_v29  ;;  %v1447_v46 = vld [vmem:[%s20151_s1 + $0x2c10] sm:$0xff]  ;;  %v14144_v29 = vcombine.high %v1439_v40, %v1443_v41  ;;  %v14146_v50 = vcombine.high %v1440_v37, %v1444_v45  ;;  %v14145_v2 = vcombine.low %v1440_v37, %v1444_v45  ;;  %v1496_v37 = vld [vmem:[%s20151_s1 + $0x2d98] sm:$0xff] }
 0x5b4   :  { %v1491_v56 = vld [vmem:[%s20151_s1 + $0x2d70] sm:$0xff]  ;;  %v1500_v45 = vld [vmem:[%s20151_s1 + $0x2db8] sm:$0xff] }
 0x5b6   :  { %11173 = vmatpush1.bf16.msra.mxu0 %v14087_v52  ;;  %11706 = vmatpush1.bf16.msra.mxu1 %v14089_v55  ;;  %v1448_v52 = vld [vmem:[%s20151_s1 + $0x2c18] sm:$0xff]  ;;  %v14143_v55 = vcombine.low %v1439_v40, %v1443_v41  ;;  %v1495_v41 = vld [vmem:[%s20151_s1 + $0x2d90] sm:$0xff] }
 0x5b7   :  { %11174 = vmatprep.subr.bf16.mxu0 %v14096_v60  ;;  %11707 = vmatprep.subr.bf16.mxu1 %v14098_v57  ;;  %v1455_v60 = vld [vmem:[%s20151_s1 + $0x2c50] sm:$0xff]  ;;  %v14152_v57 = vcombine.high %v1447_v46, %v1451_v62  ;;  %v14154_v0 = vcombine.high %v1448_v52, %v1452_v54  ;;  %v14153_v14 = vcombine.low %v1448_v52, %v1452_v54  ;;  %v1504_v52 = vld [vmem:[%s20151_s1 + $0x2dd8] sm:$0xff] }
 0x5b8   :  { %v1508_v54 = vld [vmem:[%s20151_s1 + $0x2df8] sm:$0xff] }
 0x5ba   :  { %11175 = vmatpush1.bf16.msra.mxu0 %v14095_v28  ;;  %11708 = vmatpush1.bf16.msra.mxu1 %v14097_v9  ;;  %v1456_v28 = vld [vmem:[%s20151_s1 + $0x2c58] sm:$0xff]  ;;  %v14151_v9 = vcombine.low %v1447_v46, %v1451_v62  ;;  %v1503_v62 = vld [vmem:[%s20151_s1 + $0x2dd0] sm:$0xff] }
 0x5bb   :  { %11176 = vmatprep.subr.bf16.mxu0 %v14104_v10  ;;  %11709 = vmatprep.subr.bf16.mxu1 %v14106_v11  ;;  %v1463_v10 = vld [vmem:[%s20151_s1 + $0x2c90] sm:$0xff]  ;;  %v14160_v11 = vcombine.high %v1455_v60, %v1459_v61  ;;  %v14162_v12 = vcombine.high %v1456_v28, %v1460_v44  ;;  %v14161_v22 = vcombine.low %v1456_v28, %v1460_v44  ;;  %v1512_v28 = vld [vmem:[%s20151_s1 + $0x2e18] sm:$0xff] }
 0x5bc   :  { %v14167_v58 = vcombine.low %v1463_v10, %v1467_v6  ;;  %v1516_v44 = vld [vmem:[%s20151_s1 + $0x2e38] sm:$0xff] }
 0x5be   :  { %11177 = vmatpush1.bf16.msra.mxu0 %v14103_v1  ;;  %11710 = vmatpush1.bf16.msra.mxu1 %v14105_v20  ;;  %v1464_v1 = vld [vmem:[%s20151_s1 + $0x2c98] sm:$0xff]  ;;  %v14159_v20 = vcombine.low %v1455_v60, %v1459_v61  ;;  %v14201_v60 = vcombine.low %v1496_v37, %v1500_v45  ;;  %v1511_v61 = vld [vmem:[%s20151_s1 + $0x2e10] sm:$0xff] }
 0x5bf   :  { %11178 = vmatprep.subr.bf16.mxu0 %v14112_v21  ;;  %11711 = vmatprep.subr.bf16.mxu1 %v14114_v24  ;;  %v1471_v21 = vld [vmem:[%s20151_s1 + $0x2cd0] sm:$0xff]  ;;  %v14168_v24 = vcombine.high %v1463_v10, %v1467_v6  ;;  %v14170_v31 = vcombine.high %v1464_v1, %v1468_v16  ;;  %v14169_v63 = vcombine.low %v1464_v1, %v1468_v16  ;;  %v1520_v1 = vld [vmem:[%s20151_s1 + $0x2e58] sm:$0xff] }
 0x5c0   :  { %v14209_v10 = vcombine.low %v1504_v52, %v1508_v54  ;;  %v1519_v6 = vld [vmem:[%s20151_s1 + $0x2e50] sm:$0xff]  ;;  %v1524_v16 = vld [vmem:[%s20151_s1 + $0x2e78] sm:$0xff] }
 0x5c2   :  { %11179 = vmatpush1.bf16.msra.mxu0 %v14111_v7  ;;  %11712 = vmatpush1.bf16.msra.mxu1 %v14113_v47  ;;  %v1472_v7 = vld [vmem:[%s20151_s1 + $0x2cd8] sm:$0xff]  ;;  %v1479_v47 = vld [vmem:[%s20151_s1 + $0x2d10] sm:$0xff] }
 0x5c3   :  { %11180 = vmatprep.subr.bf16.mxu0 %v14120_v27  ;;  %11713 = vmatprep.subr.bf16.mxu1 %v14122_v30  ;;  %v1483_v27 = vld [vmem:[%s20151_s1 + $0x2d30] sm:$0xff]  ;;  %v14176_v30 = vcombine.high %v1471_v21, %v1475_v38 }
 0x5c6   :  { %11181 = vmatpush1.bf16.msra.mxu0 %v14119_v17  ;;  %11714 = vmatpush1.bf16.msra.mxu1 %v14121_v4  ;;  %v14175_v17 = vcombine.low %v1471_v21, %v1475_v38  ;;  %v14217_v21 = vcombine.low %v1512_v28, %v1516_v44  ;;  %v1527_v38 = vld [vmem:[%s20151_s1 + $0x2e90] sm:$0xff] }
 0x5c7   :  { %11182 = vmatprep.subr.bf16.mxu0 %v14128_v36  ;;  %11715 = vmatprep.subr.bf16.mxu1 %v14130_v39  ;;  %v14184_v36 = vcombine.high %v1479_v47, %v1483_v27  ;;  %v1492_v39 = vld [vmem:[%s20151_s1 + $0x2d78] sm:$0xff] }
 0x5c8   :  { %v14193_v46 = vcombine.low %v1488_v53, %v1492_v39 }
 0x5ca   :  { %11183 = vmatpush1.bf16.msra.mxu0 %v14127_v19  ;;  %11716 = vmatpush1.bf16.msra.mxu1 %v14129_v5  ;;  %v14183_v19 = vcombine.low %v1479_v47, %v1483_v27  ;;  %v14192_v5 = vcombine.high %v1487_v48, %v1491_v56  ;;  %v14225_v47 = vcombine.low %v1520_v1, %v1524_v16 }
 0x5cb   :  { %11184 = vmatprep.subr.bf16.mxu0 %v14136_v51  ;;  %11717 = vmatprep.subr.bf16.mxu1 %v14138_v42  ;;  %v14194_v51 = vcombine.high %v1488_v53, %v1492_v39  ;;  %v1499_v42 = vld [vmem:[%s20151_s1 + $0x2db0] sm:$0xff]  ;;  %v1544_v53 = vld [vmem:[%s20151_s1 + $0x2f18] sm:$0xff] }
 0x5cc   :  { %v1548_v39 = vld [vmem:[%s20151_s1 + $0x2f38] sm:$0xff] }
 0x5ce   :  { %11185 = vmatpush1.bf16.msra.mxu0 %v14135_v34  ;;  %11718 = vmatpush1.bf16.msra.mxu1 %v14137_v49  ;;  %v14191_v34 = vcombine.low %v1487_v48, %v1491_v56  ;;  %v14200_v49 = vcombine.high %v1495_v41, %v1499_v42 }
 0x5cf   :  { %11186 = vmatprep.subr.bf16.mxu0 %v14144_v29  ;;  %11719 = vmatprep.subr.bf16.mxu1 %v14146_v50  ;;  %v14202_v29 = vcombine.high %v1496_v37, %v1500_v45  ;;  %v1507_v50 = vld [vmem:[%s20151_s1 + $0x2df0] sm:$0xff]  ;;  %v1552_v37 = vld [vmem:[%s20151_s1 + $0x2f58] sm:$0xff] }
 0x5d0   :  { %v1556_v45 = vld [vmem:[%s20151_s1 + $0x2f78] sm:$0xff] }
 0x5d2   :  { %11187 = vmatpush1.bf16.msra.mxu0 %v14143_v55  ;;  %11720 = vmatpush1.bf16.msra.mxu1 %v14145_v2  ;;  %v14199_v55 = vcombine.low %v1495_v41, %v1499_v42  ;;  %v14208_v2 = vcombine.high %v1503_v62, %v1507_v50  ;;  %v1551_v41 = vld [vmem:[%s20151_s1 + $0x2f50] sm:$0xff] }
 0x5d3   :  { %11197 = vmatprep.subr.bf16.mxu0 %v14152_v57  ;;  %11730 = vmatprep.subr.bf16.mxu1 %v14154_v0  ;;  %v14210_v57 = vcombine.high %v1504_v52, %v1508_v54  ;;  %v1515_v0 = vld [vmem:[%s20151_s1 + $0x2e30] sm:$0xff]  ;;  %v1560_v52 = vld [vmem:[%s20151_s1 + $0x2f98] sm:$0xff] }
 0x5d4   :  { %v1555_v42 = vld [vmem:[%s20151_s1 + $0x2f70] sm:$0xff]  ;;  %v1564_v54 = vld [vmem:[%s20151_s1 + $0x2fb8] sm:$0xff] }
 0x5d5   :  { %11189 = vmatmul.mubr.bf16.vlgmr.msra.gmra.mrb[4].mxu0 %v17192_v15  ;;  %11722 = vmatmul.mubr.bf16.vlgmr.msra.gmra.mrb[4].mxu1 %v17192_v15  ;;  %v1476_v15 = vld [vmem:[%s20151_s1 + $0x2cf8] sm:$0xff] }
 0x5d6   :  { %11198 = vmatpush1.bf16.msra.mxu0 %v14151_v9  ;;  %11731 = vmatpush1.bf16.msra.mxu1 %v14153_v14  ;;  %v14178_v35 = vcombine.high %v1472_v7, %v1476_v15  ;;  %v14177_v4 = vcombine.low %v1472_v7, %v1476_v15  ;;  %v14207_v9 = vcombine.low %v1503_v62, %v1507_v50  ;;  %v1528_v7 = vld [vmem:[%s20151_s1 + $0x2e98] sm:$0xff]  ;;  %v1559_v62 = vld [vmem:[%s20151_s1 + $0x2f90] sm:$0xff] }
 0x5d7   :  { %11199 = vmatprep.subr.bf16.mxu0 %v14160_v11  ;;  %11732 = vmatprep.subr.bf16.mxu1 %v14162_v12  ;;  %v14216_v14 = vcombine.high %v1511_v61, %v1515_v0  ;;  %v14218_v11 = vcombine.high %v1512_v28, %v1516_v44  ;;  %v1523_v12 = vld [vmem:[%s20151_s1 + $0x2e70] sm:$0xff]  ;;  %v1532_v15 = vld [vmem:[%s20151_s1 + $0x2eb8] sm:$0xff] }
 0x5d8   :  { %11229 = vmatprep.mubr.bf16.mxu0 %v17208_v26  ;;  %11762 = vmatprep.mubr.bf16.mxu1 %v17208_v26  ;;  %v1484_v26 = vld [vmem:[%s20151_s1 + $0x2d38] sm:$0xff]  ;;  %v14233_v48 = vcombine.low %v1528_v7, %v1532_v15  ;;  %v1563_v50 = vld [vmem:[%s20151_s1 + $0x2fb0] sm:$0xff] }
 0x5d9   :  { %v14186_v59 = vcombine.high %v1480_v33, %v1484_v26  ;;  %v14185_v40 = vcombine.low %v1480_v33, %v1484_v26  ;;  %v1539_v33 = vld [vmem:[%s20151_s1 + $0x2ef0] sm:$0xff]  ;;  %v1536_v26 = vld [vmem:[%s20151_s1 + $0x2ed8] sm:$0xff] }
 0x5da   :  { %11200 = vmatpush1.bf16.msra.mxu0 %v14159_v20  ;;  %11733 = vmatpush1.bf16.msra.mxu1 %v14161_v22  ;;  %v14215_v20 = vcombine.low %v1511_v61, %v1515_v0  ;;  %v14224_v22 = vcombine.high %v1519_v6, %v1523_v12  ;;  %v1567_v61 = vld [vmem:[%s20151_s1 + $0x2fd0] sm:$0xff]  ;;  %v1568_v28 = vld [vmem:[%s20151_s1 + $0x2fd8] sm:$0xff] }
 0x5db   :  { %11201 = vmatprep.subr.bf16.mxu0 %v14168_v24  ;;  %11734 = vmatprep.subr.bf16.mxu1 %v14170_v31  ;;  %v14226_v24 = vcombine.high %v1520_v1, %v1524_v16  ;;  %v1531_v31 = vld [vmem:[%s20151_s1 + $0x2eb0] sm:$0xff]  ;;  %v1572_v44 = vld [vmem:[%s20151_s1 + $0x2ff8] sm:$0xff] }
 0x5dc   :  { %v14232_v27 = vcombine.high %v1527_v38, %v1531_v31  ;;  %v1571_v0 = vld [vmem:[%s20151_s1 + $0x2ff0] sm:$0xff]  ;;  %v1576_v1 = vld [vmem:[%s20151_s1 + $0x3018] sm:$0xff] }
 0x5dd   :  { %v1580_v16 = vld [vmem:[%s20151_s1 + $0x3038] sm:$0xff] }
 0x5de   :  { %11202 = vmatpush1.bf16.msra.mxu0 %v14167_v58  ;;  %11735 = vmatpush1.bf16.msra.mxu1 %v14169_v63  ;;  %v14223_v58 = vcombine.low %v1519_v6, %v1523_v12  ;;  %v14234_v63 = vcombine.high %v1528_v7, %v1532_v15  ;;  %v1575_v6 = vld [vmem:[%s20151_s1 + $0x3010] sm:$0xff]  ;;  %v1584_v7 = vld [vmem:[%s20151_s1 + $0x3058] sm:$0xff] }
 0x5df   :  { %11203 = vmatprep.subr.bf16.mxu0 %v14176_v30  ;;  %11736 = vmatprep.subr.bf16.mxu1 %v14178_v35  ;;  %v1535_v30 = vld [vmem:[%s20151_s1 + $0x2ed0] sm:$0xff]  ;;  %v1540_v35 = vld [vmem:[%s20151_s1 + $0x2ef8] sm:$0xff] }
 0x5e0   :  { %v14240_v56 = vcombine.high %v1535_v30, %v1539_v33  ;;  %v1579_v12 = vld [vmem:[%s20151_s1 + $0x3030] sm:$0xff]  ;;  %v1588_v15 = vld [vmem:[%s20151_s1 + $0x3078] sm:$0xff] }
 0x5e2   :  { %11204 = vmatpush1.bf16.msra.mxu0 %v14175_v17  ;;  %11737 = vmatpush1.bf16.msra.mxu1 %v14177_v4  ;;  %v14231_v17 = vcombine.low %v1527_v38, %v1531_v31  ;;  %v14242_v4 = vcombine.high %v1536_v26, %v1540_v35  ;;  %v1583_v38 = vld [vmem:[%s20151_s1 + $0x3050] sm:$0xff] }
 0x5e3   :  { %11205 = vmatprep.subr.bf16.mxu0 %v14184_v36  ;;  %11738 = vmatprep.subr.bf16.mxu1 %v14186_v59  ;;  %v1543_v36 = vld [vmem:[%s20151_s1 + $0x2f10] sm:$0xff] }
 0x5e4   :  { %v1547_v59 = vld [vmem:[%s20151_s1 + $0x2f30] sm:$0xff] }
 0x5e5   :  { %v1587_v31 = vld [vmem:[%s20151_s1 + $0x3070] sm:$0xff] }
 0x5e6   :  { %11206 = vmatpush1.bf16.msra.mxu0 %v14183_v19  ;;  %11739 = vmatpush1.bf16.msra.mxu1 %v14185_v40  ;;  %v14239_v19 = vcombine.low %v1535_v30, %v1539_v33  ;;  %v14241_v40 = vcombine.low %v1536_v26, %v1540_v35  ;;  %v1591_v30 = vld [vmem:[%s20151_s1 + $0x3090] sm:$0xff]  ;;  %v1613_v26 = vsub.s32 1, %v14947_v43  ;;  %v1592_v35 = vld [vmem:[%s20151_s1 + $0x3098] sm:$0xff] }
 0x5e7   :  { %11207 = vmatprep.subr.bf16.mxu0 %v14192_v5  ;;  %11740 = vmatprep.subr.bf16.mxu1 %v14194_v51  ;;  %v14248_v5 = vcombine.high %v1543_v36, %v1547_v59  ;;  %v14250_v51 = vcombine.high %v1544_v53, %v1548_v39  ;;  %v1595_v33 = vld [vmem:[%s20151_s1 + $0x30b0] sm:$0xff] }
 0x5ea   :  { %11208 = vmatpush1.bf16.msra.mxu0 %v14191_v34  ;;  %11741 = vmatpush1.bf16.msra.mxu1 %v14193_v46  ;;  %v14247_v34 = vcombine.low %v1543_v36, %v1547_v59  ;;  %v14249_v46 = vcombine.low %v1544_v53, %v1548_v39  ;;  %v14289_v36 = vcombine.low %v1584_v7, %v1588_v15  ;;  %v1599_v39 = vld [vmem:[%s20151_s1 + $0x30d0] sm:$0xff] }
 0x5eb   :  { %11209 = vmatprep.subr.bf16.mxu0 %v14200_v49  ;;  %11742 = vmatprep.subr.bf16.mxu1 %v14202_v29  ;;  %v14256_v49 = vcombine.high %v1551_v41, %v1555_v42  ;;  %v14258_v29 = vcombine.high %v1552_v37, %v1556_v45  ;;  %v14296_v59 = vcombine.high %v1591_v30, %v1595_v33 }
 0x5ee   :  { %11210 = vmatpush1.bf16.msra.mxu0 %v14199_v55  ;;  %11743 = vmatpush1.bf16.msra.mxu1 %v14201_v60  ;;  %v14255_v55 = vcombine.low %v1551_v41, %v1555_v42  ;;  %v14257_v60 = vcombine.low %v1552_v37, %v1556_v45  ;;  %v14295_v41 = vcombine.low %v1591_v30, %v1595_v33  ;;  %v14774_v30 = vld [vmem:[%s20153_s3 + $0xb0] sm:$0xff]   ;;  %v14775_v33 = vld [vmem:[%s20153_s3 + $0x78] sm:$0xff]  }
 0x5ef   :  { %11211 = vmatprep.subr.bf16.mxu0 %v14208_v2  ;;  %11744 = vmatprep.subr.bf16.mxu1 %v14210_v57  ;;  %v14264_v2 = vcombine.high %v1559_v62, %v1563_v50  ;;  %v14266_v57 = vcombine.high %v1560_v52, %v1564_v54 }
 0x5f2   :  { %11212 = vmatpush1.bf16.msra.mxu0 %v14207_v9  ;;  %11745 = vmatpush1.bf16.msra.mxu1 %v14209_v10  ;;  %v14263_v9 = vcombine.low %v1559_v62, %v1563_v50  ;;  %v14265_v10 = vcombine.low %v1560_v52, %v1564_v54  ;;  %v14748_v62 = vld [vmem:[%s20153_s3 + $0xc0] sm:$0xff]   ;;  %v14751_v54 = vld [vmem:[%s20153_s3 + $0x48] sm:$0xff]  }
 0x5f3   :  { %11213 = vmatprep.subr.bf16.mxu0 %v14216_v14  ;;  %11746 = vmatprep.subr.bf16.mxu1 %v14218_v11  ;;  %v14272_v14 = vcombine.high %v1567_v61, %v1571_v0  ;;  %v14274_v11 = vcombine.high %v1568_v28, %v1572_v44 }
 0x5f6   :  { %11214 = vmatpush1.bf16.msra.mxu0 %v14215_v20  ;;  %11747 = vmatpush1.bf16.msra.mxu1 %v14217_v21  ;;  %v14271_v20 = vcombine.low %v1567_v61, %v1571_v0  ;;  %v14273_v21 = vcombine.low %v1568_v28, %v1572_v44  ;;  %v14754_v61 = vld [vmem:[%s20153_s3 + $0x88] sm:$0xff]   ;;  %v14755_v0 = vld [vmem:[%s20153_s3 + $0x50] sm:$0xff]  }
 0x5f7   :  { %11215 = vmatprep.subr.bf16.mxu0 %v14224_v22  ;;  %11748 = vmatprep.subr.bf16.mxu1 %v14226_v24  ;;  %v14280_v22 = vcombine.high %v1575_v6, %v1579_v12  ;;  %v14282_v24 = vcombine.high %v1576_v1, %v1580_v16  ;;  %v14757_v28 = vld [vmem:[%s20153_s3 + $0x10] sm:$0xff]  }
 0x5f8   :  { %v14758_v44 = vld [vmem:[%s20153_s3 + $0x90] sm:$0xff]  }
 0x5fa   :  { %11216 = vmatpush1.bf16.msra.mxu0 %v14223_v58  ;;  %11749 = vmatpush1.bf16.msra.mxu1 %v14225_v47  ;;  %v14279_v58 = vcombine.low %v1575_v6, %v1579_v12  ;;  %v14281_v47 = vcombine.low %v1576_v1, %v1580_v16  ;;  %v14763_v6 = vld [vmem:[%s20153_s3 + $0x60] sm:$0xff]   ;;  %v1609_v16 = vsub.s32 0, %v14947_v43 }
 0x5fb   :  { %11217 = vmatprep.subr.bf16.mxu0 %v14232_v27  ;;  %11750 = vmatprep.subr.bf16.mxu1 %v14234_v63  ;;  %v14288_v27 = vcombine.high %v1583_v38, %v1587_v31  ;;  %v14290_v63 = vcombine.high %v1584_v7, %v1588_v15  ;;  %v14764_v12 = vld [vmem:[%s20153_s3 + $0xe0] sm:$0xff]   ;;  %v14770_v7 = vld [vmem:[%s20153_s3 + $0xa8] sm:$0xff]   ;;  %v14771_v15 = vld [vmem:[%s20153_s3 + $0x70] sm:$0xff]  }
 0x5fc   :  { %v14765_v1 = vld [vmem:[%s20153_s3 + $0x20] sm:$0xff]  }
 0x5fe   :  { %11218 = vmatpush1.bf16.msra.mxu0 %v14231_v17  ;;  %11751 = vmatpush1.bf16.msra.mxu1 %v14233_v48  ;;  %v1596_v17 = vld [vmem:[%s20151_s1 + $0x30b8] sm:$0xff]  ;;  %v19841_v48 = vld [vmem:[%s20154_s2] sm:$0xff] }
 0x5ff   :  { %11219 = vmatprep.subr.bf16.mxu0 %v14240_v56  ;;  %11752 = vmatprep.subr.bf16.mxu1 %v14242_v4  ;;  %v1621_v56 = vsub.s32 3, %v14947_v43  ;;  %v14287_v4 = vcombine.low %v1583_v38, %v1587_v31  ;;  %v14298_v53 = vcombine.high %v1592_v35, %v1596_v17  ;;  %v14297_v42 = vcombine.low %v1592_v35, %v1596_v17  ;;  %v14769_v38 = vld [vmem:[%s20153_s3 + $0x28] sm:$0xff]   ;;  %v14776_v35 = vld [vmem:[%s20153_s3 + $0xf8] sm:$0xff]  }
 0x600   :  { %v1610_v31 = vrot.slane %v19841_v48, %v1609_v16 }
 0x602   :  { %11220 = vmatpush1.bf16.msra.mxu0 %v14239_v19  ;;  %11753 = vmatpush1.bf16.msra.mxu1 %v14241_v40  ;;  %v1603_v19 = vld [vmem:[%s20151_s1 + $0x30f0] sm:$0xff]  ;;  %v1614_v40 = vrot.slane %v19841_v48, %v1613_v26 }
 0x603   :  { %11221 = vmatprep.subr.bf16.mxu0 %v14248_v5  ;;  %11754 = vmatprep.subr.bf16.mxu1 %v14250_v51  ;;  %v1604_v5 = vld [vmem:[%s20151_s1 + $0x30f8] sm:$0xff]  ;;  %v1622_v51 = vrot.slane %v19841_v48, %v1621_v56  ;;  %v14304_v37 = vcombine.high %v1599_v39, %v1603_v19 }
 0x604   :  { %v14778_v56 = vld [vmem:[%s20153_s3 + $0xb8] sm:$0xff]  }
 0x606   :  { %11222 = vmatpush1.bf16.msra.mxu0 %v14247_v34  ;;  %11755 = vmatpush1.bf16.msra.mxu1 %v14249_v46  ;;  %v14541_v34 = vadd.f32 %v18126_v23, %v1614_v40  ;;  %v14543_v46 = vadd.f32 %v18134_v18, %v1622_v51  ;;  %v14749_v23 = vld [vmem:[%s20153_s3] sm:$0xff]   ;;  %v14786_v51 = vld [vmem:[%s20153_s3 + $0x188] sm:$0xff]  }
 0x607   :  { %11223 = vmatprep.subr.bf16.mxu0 %v14256_v49  ;;  %11756 = vmatprep.subr.bf16.mxu1 %v14258_v29  ;;  %v14303_v49 = vcombine.low %v1599_v39, %v1603_v19  ;;  %v14750_v18 = vld [vmem:[%s20153_s3 + $0x80] sm:$0xff]   ;;  %v14783_v19 = vld [vmem:[%s20153_s3 + $0x148] sm:$0xff]  }
 0x608   :  { %v11813_v50 = vmax.f32 %v14541_v34, 0.0  ;;  %v11815_v52 = vmax.f32 %v14543_v46, 0.0  ;;  %v14782_v39 = vld [vmem:[%s20153_s3 + $0x180] sm:$0xff]   ;;  %v14791_v34 = vld [vmem:[%s20153_s3 + $0x158] sm:$0xff]  }
 0x609   :  { %v14792_v46 = vld [vmem:[%s20153_s3 + $0x1d8] sm:$0xff]  }
 0x60a   :  { %11224 = vmatpush1.bf16.msra.mxu0 %v14255_v55  ;;  %11757 = vmatpush1.bf16.msra.mxu1 %v14257_v60  ;;  %v11821_v55 = vpack.c.bf16 %v11813_v50, %v11813_v50  ;;  %v14752_v60 = vld [vmem:[%s20153_s3 + $0xc8] sm:$0xff]   ;;  %v14797_v50 = vld [vmem:[%s20153_s3 + $0x120] sm:$0xff]  }
 0x60b   :  { %11225 = vmatprep.subr.bf16.mxu0 %v14264_v2  ;;  %11758 = vmatprep.subr.bf16.mxu1 %v14266_v57  ;;  %v11823_v2 = vpack.c.bf16 %v11815_v52, %v11815_v52  ;;  %v14753_v57 = vld [vmem:[%s20153_s3 + $0x8] sm:$0xff]   ;;  %v14798_v52 = vld [vmem:[%s20153_s3 + $0x1a0] sm:$0xff]  }
 0x60e   :  { %11226 = vmatpush1.bf16.msra.mxu0 %v14263_v9  ;;  %11759 = vmatpush1.bf16.msra.mxu1 %v14265_v10  ;;  %v14759_v9 = vld [vmem:[%s20153_s3 + $0x58] sm:$0xff]  }
 0x60f   :  { %11227 = vmatprep.subr.bf16.mxu0 %v14272_v14  ;;  %11760 = vmatprep.subr.bf16.mxu1 %v14274_v11  ;;  %v14760_v10 = vld [vmem:[%s20153_s3 + $0xd8] sm:$0xff]  }
 0x610   :  { %v14761_v14 = vld [vmem:[%s20153_s3 + $0x18] sm:$0xff]  }
 0x611   :  { %v14762_v11 = vld [vmem:[%s20153_s3 + $0x98] sm:$0xff]  }
 0x612   :  { %11228 = vmatpush1.bf16.msra.mxu0 %v14271_v20  ;;  %11761 = vmatpush1.bf16.msra.mxu1 %v14273_v21  ;;  %v14766_v20 = vld [vmem:[%s20153_s3 + $0xa0] sm:$0xff]   ;;  %v14767_v21 = vld [vmem:[%s20153_s3 + $0x68] sm:$0xff]  }
 0x613   :  { %11238 = vmatprep.subr.bf16.mxu0 %v14280_v22  ;;  %11771 = vmatprep.subr.bf16.mxu1 %v14282_v24  ;;  %v1617_v22 = vsub.s32 2, %v14947_v43  ;;  %v14768_v24 = vld [vmem:[%s20153_s3 + $0xe8] sm:$0xff]  }
 0x615   :  { %11230 = vmatmul.mubr.bf16.vlgmr.msra.gmra.mrb[4].mxu0 %v17396_v32  ;;  %11763 = vmatmul.mubr.bf16.vlgmr.msra.gmra.mrb[4].mxu1 %v17396_v32  ;;  %v1600_v32 = vld [vmem:[%s20151_s1 + $0x30d8] sm:$0xff] }
 0x616   :  { %11239 = vmatpush1.bf16.msra.mxu0 %v14279_v58  ;;  %11772 = vmatpush1.bf16.msra.mxu1 %v14281_v47  ;;  %v14306_v45 = vcombine.high %v1600_v32, %v1604_v5  ;;  %v14305_v29 = vcombine.low %v1600_v32, %v1604_v5  ;;  %v1618_v58 = vrot.slane %v19841_v48, %v1617_v22  ;;  %v14772_v47 = vld [vmem:[%s20153_s3 + $0xf0] sm:$0xff]   ;;  %v14784_v32 = vld [vmem:[%s20153_s3 + $0x1c8] sm:$0xff]  }
 0x617   :  { %11240 = vmatprep.subr.bf16.mxu0 %v14288_v27  ;;  %11773 = vmatprep.subr.bf16.mxu1 %v14290_v63  ;;  %v14773_v27 = vld [vmem:[%s20153_s3 + $0x30] sm:$0xff]   ;;  %v14540_v63 = vadd.f32 %v18116_v3, %v1610_v31  ;;  %v14777_v3 = vld [vmem:[%s20153_s3 + $0x38] sm:$0xff]   ;;  %v14785_v5 = vld [vmem:[%s20153_s3 + $0x108] sm:$0xff]  }
 0x618   :  { %11270 = vmatprep.mubr.bf16.mxu0 %v14828_v8  ;;  %11803 = vmatprep.mubr.bf16.mxu1 %v14828_v8  ;;  %v14747_v8 = vld [vmem:[%s20153_s3 + $0x40] sm:$0xff]   ;;  %v14542_v26 = vadd.f32 %v18124_v13, %v1618_v58 }
 0x619   :  { %v11812_v17 = vmax.f32 %v14540_v63, 0.0  ;;  %v14779_v13 = vld [vmem:[%s20153_s3 + $0x140] sm:$0xff]  }
 0x61a   :  { %11241 = vmatpush1.bf16.msra.mxu0 %v14287_v4  ;;  %11774 = vmatpush1.bf16.msra.mxu1 %v14289_v36  ;;  %v11814_v4 = vmax.f32 %v14542_v26, 0.0  ;;  %v14780_v36 = vld [vmem:[%s20153_s3 + $0x1c0] sm:$0xff]  }
 0x61b   :  { %11242 = vmatprep.subr.bf16.mxu0 %v14296_v59  ;;  %11775 = vmatprep.subr.bf16.mxu1 %v14298_v53  ;;  %v14781_v59 = vld [vmem:[%s20153_s3 + $0x100] sm:$0xff]   ;;  %v11820_v53 = vpack.c.bf16 %v11812_v17, %v11812_v17 }
 0x61c   :  { %v11822_v40 = vpack.c.bf16 %v11814_v4, %v11814_v4  ;;  %v14812_v4 = vld [vmem:[%s20155_s5 + $0x8] sm:$0xff]  }
 0x61e   :  { %11243 = vmatpush1.bf16.msra.mxu0 %v14295_v41  ;;  %11776 = vmatpush1.bf16.msra.mxu1 %v14297_v42  ;;  %v14787_v41 = vld [vmem:[%s20153_s3 + $0x150] sm:$0xff]  }
 0x61f   :  { %11244 = vmatprep.subr.bf16.mxu0 %v14304_v37  ;;  %11777 = vmatprep.subr.bf16.mxu1 %v14306_v45  ;;  %v14788_v42 = vld [vmem:[%s20153_s3 + $0x1d0] sm:$0xff]  }
 0x620   :  { %v14789_v37 = vld [vmem:[%s20153_s3 + $0x110] sm:$0xff]  }
 0x621   :  { %v14790_v45 = vld [vmem:[%s20153_s3 + $0x190] sm:$0xff]  }
 0x622   :  { %11245 = vmatpush1.bf16.msra.mxu0 %v14303_v49  ;;  %11778 = vmatpush1.bf16.msra.mxu1 %v14305_v29  ;;  %v14793_v49 = vld [vmem:[%s20153_s3 + $0x118] sm:$0xff]  }
 0x623   :  { %14394 = vmatprep.subr.bf16.mxu0 %v14747_v8  ;;  %14416 = vmatprep.subr.bf16.mxu1 %v14748_v62  ;;  %v14794_v29 = vld [vmem:[%s20153_s3 + $0x198] sm:$0xff]   ;;  %v14795_v8 = vld [vmem:[%s20153_s3 + $0x160] sm:$0xff]  }
 0x624   :  { %v14796_v62 = vld [vmem:[%s20153_s3 + $0x1e0] sm:$0xff]  }
 0x625   :  { %14309 = vmatmul.mubr.msk.bf16.vlgmr.msra.gmra.mrb[4].mxu0 %vm9676_vm0, %v17454_v25  ;;  %14310 = vmatmul.mubr.msk.bf16.vlgmr.msra.gmra.mrb[4].mxu1 %vm9676_vm0, %v17454_v25  ;;  %v14756_v25 = vld [vmem:[%s20153_s3 + $0xd0] sm:$0xff]  }
 0x626   :  { %14395 = vmatpush3.bf16.msra.mxu0 %v14749_v23  ;;  %12379 = vmatprep.mubr.bf16.mxu0 %v11821_v55  ;;  %v14799_v23 = vld [vmem:[%s20153_s3 + $0x168] sm:$0xff]  }
 0x627   :  { %14417 = vmatpush3.bf16.msra.mxu1 %v14750_v18  ;;  %12419 = vmatprep.mubr.bf16.mxu1 %v11823_v2  ;;  %v14800_v18 = vld [vmem:[%s20153_s3 + $0x1e8] sm:$0xff]   ;;  %v14804_v2 = vld [vmem:[%s20153_s3 + $0x1f0] sm:$0xff]  }
 0x628   :  { %14396 = vmatprep.subr.bf16.mxu0 %v14751_v54  ;;  %14418 = vmatprep.subr.bf16.mxu1 %v14752_v60  ;;  %v14801_v54 = vld [vmem:[%s20153_s3 + $0x128] sm:$0xff]   ;;  %v14803_v60 = vld [vmem:[%s20153_s3 + $0x170] sm:$0xff]  }
 0x629   :  { %v14802_v55 = vld [vmem:[%s20153_s3 + $0x1a8] sm:$0xff]  }
 0x62a   :  { %14397 = vmatpush3.bf16.msra.mxu0 %v14753_v57  ;;  %v14805_v57 = vld [vmem:[%s20153_s3 + $0x130] sm:$0xff]  }
 0x62b   :  { %14419 = vmatpush3.bf16.msra.mxu1 %v14754_v61  ;;  %14398 = vmatprep.subr.bf16.mxu0 %v14755_v0  ;;  %v14806_v61 = vld [vmem:[%s20153_s3 + $0x1b0] sm:$0xff]   ;;  %v14807_v0 = vld [vmem:[%s20153_s3 + $0x178] sm:$0xff]  }
 0x62c   :  { %14420 = vmatprep.subr.bf16.mxu1 %v14756_v25  ;;  %v14808_v25 = vld [vmem:[%s20153_s3 + $0x1f8] sm:$0xff]  }
 0x62e   :  { %14399 = vmatpush3.bf16.msra.mxu0 %v14757_v28  ;;  %v14809_v28 = vld [vmem:[%s20153_s3 + $0x138] sm:$0xff]  }
 0x62f   :  { %14421 = vmatpush3.bf16.msra.mxu1 %v14758_v44  ;;  %14400 = vmatprep.subr.bf16.mxu0 %v14759_v9  ;;  %v14810_v44 = vld [vmem:[%s20153_s3 + $0x1b8] sm:$0xff]   ;;  %v14829_v9 = vmov 0.0  }
 0x630   :  { %14422 = vmatprep.subr.bf16.mxu1 %v14760_v10  ;;  %v1625_v10 = vsub.s32 4, %v14947_v43 }
 0x632   :  { %14401 = vmatpush3.bf16.msra.mxu0 %v14761_v14  ;;  %v1633_v14 = vsub.s32 6, %v14947_v43 }
 0x633   :  { %14423 = vmatpush3.bf16.msra.mxu1 %v14762_v11  ;;  %14402 = vmatprep.subr.bf16.mxu0 %v14763_v6  ;;  %v1629_v11 = vsub.s32 5, %v14947_v43  ;;  %v1637_v6 = vsub.s32 7, %v14947_v43 }
 0x634   :  { %14424 = vmatprep.subr.bf16.mxu1 %v14764_v12  ;;  %v1626_v12 = vrot.slane %v19841_v48, %v1625_v10 }
 0x635   :  { %v1630_v16 = vrot.slane %v19841_v48, %v1629_v11 }
 0x636   :  { %14403 = vmatpush3.bf16.msra.mxu0 %v14765_v1  ;;  %v1634_v1 = vrot.slane %v19841_v48, %v1633_v14 }
 0x637   :  { %14425 = vmatpush3.bf16.msra.mxu1 %v14766_v20  ;;  %14404 = vmatprep.subr.bf16.mxu0 %v14767_v21  ;;  %v1638_v20 = vrot.slane %v19841_v48, %v1637_v6  ;;  %v14811_v48 = vld [vmem:[%s20155_s5] sm:$0xff]  }
 0x638   :  { %14426 = vmatprep.subr.bf16.mxu1 %v14768_v24 }
 0x63a   :  { %14405 = vmatpush3.bf16.msra.mxu0 %v14769_v38 }
 0x63b   :  { %14427 = vmatpush3.bf16.msra.mxu1 %v14770_v7  ;;  %14406 = vmatprep.subr.bf16.mxu0 %v14771_v15 }
 0x63c   :  { %14428 = vmatprep.subr.bf16.mxu1 %v14772_v47 }
 0x63e   :  { %14407 = vmatpush3.bf16.msra.mxu0 %v14773_v27 }
 0x63f   :  { %14429 = vmatpush3.bf16.msra.mxu1 %v14774_v30  ;;  %14408 = vmatprep.subr.bf16.mxu0 %v14775_v33 }
 0x640   :  { %14430 = vmatprep.subr.bf16.mxu1 %v14776_v35 }
 0x642   :  { %14409 = vmatpush3.bf16.msra.mxu0 %v14777_v3 }
 0x643   :  { %14431 = vmatpush3.bf16.msra.mxu1 %v14778_v56  ;;  %14438 = vmatprep.subr.bf16.mxu0 %v14779_v13 }
 0x644   :  { %14460 = vmatprep.subr.bf16.mxu1 %v14780_v36  ;;  %v14813_v36 = vld [vmem:[%s20155_s5 + $0x10] sm:$0xff]  }
 0x645   :  { %12380 = vmatmul.mubr.bf16.vlgmr.msra.gmra.mrb[8].mxu0 %v11820_v53  ;;  %v14815_v53 = vld [vmem:[%s20155_s5 + $0x20] sm:$0xff]  }
 0x646   :  { %12420 = vmatmul.mubr.bf16.vlgmr.msra.gmra.mrb[8].mxu1 %v11822_v40  ;;  %14439 = vmatpush3.bf16.msra.mxu0 %v14781_v59  ;;  %v14814_v59 = vld [vmem:[%s20155_s5 + $0x18] sm:$0xff]   ;;  %v14311_v40 = vld [vmem:[%s20156_s4] ss:$0 sm:$0xff] }
 0x647   :  { %14461 = vmatpush3.bf16.msra.mxu1 %v14782_v39  ;;  %14440 = vmatprep.subr.bf16.mxu0 %v14783_v19 }
 0x648   :  { %14462 = vmatprep.subr.bf16.mxu1 %v14784_v32 }
 0x64a   :  { %14441 = vmatpush3.bf16.msra.mxu0 %v14785_v5 }
 0x64b   :  { %14463 = vmatpush3.bf16.msra.mxu1 %v14786_v51  ;;  %14442 = vmatprep.subr.bf16.mxu0 %v14787_v41 }
 0x64c   :  { %14464 = vmatprep.subr.bf16.mxu1 %v14788_v42 }
 0x64e   :  { %14443 = vmatpush3.bf16.msra.mxu0 %v14789_v37 }
 0x64f   :  { %14465 = vmatpush3.bf16.msra.mxu1 %v14790_v45  ;;  %14444 = vmatprep.subr.bf16.mxu0 %v14791_v34 }
 0x650   :  { %14466 = vmatprep.subr.bf16.mxu1 %v14792_v46 }
 0x652   :  { %14445 = vmatpush3.bf16.msra.mxu0 %v14793_v49 }
 0x653   :  { %14467 = vmatpush3.bf16.msra.mxu1 %v14794_v29  ;;  %14446 = vmatprep.subr.bf16.mxu0 %v14795_v8  ;;  %v14816_v29 = vld [vmem:[%s20155_s5 + $0x28] sm:$0xff]   ;;  %v14817_v8 = vld [vmem:[%s20155_s5 + $0x30] sm:$0xff]  }
 0x654   :  { %14468 = vmatprep.subr.bf16.mxu1 %v14796_v62  ;;  %v14818_v62 = vld [vmem:[%s20155_s5 + $0x38] sm:$0xff]  }
 0x656   :  { %14447 = vmatpush3.bf16.msra.mxu0 %v14797_v50  ;;  %v14819_v50 = vld [vmem:[%s20157_s7] sm:$0xff]  }
 0x657   :  { %14469 = vmatpush3.bf16.msra.mxu1 %v14798_v52  ;;  %14448 = vmatprep.subr.bf16.mxu0 %v14799_v23  ;;  %v14820_v52 = vld [vmem:[%s20157_s7 + $0x8] sm:$0xff]   ;;  %v14821_v23 = vld [vmem:[%s20157_s7 + $0x10] sm:$0xff]  }
 0x658   :  { %14470 = vmatprep.subr.bf16.mxu1 %v14800_v18  ;;  %v14822_v18 = vld [vmem:[%s20157_s7 + $0x18] sm:$0xff]  }
 0x65a   :  { %14449 = vmatpush3.bf16.msra.mxu0 %v14801_v54  ;;  %v14823_v54 = vld [vmem:[%s20157_s7 + $0x20] sm:$0xff]  }
 0x65b   :  { %14471 = vmatpush3.bf16.msra.mxu1 %v14802_v55  ;;  %14450 = vmatprep.subr.bf16.mxu0 %v14803_v60  ;;  %v14824_v55 = vld [vmem:[%s20157_s7 + $0x28] sm:$0xff]  }
 0x65c   :  { %14472 = vmatprep.subr.bf16.mxu1 %v14804_v2 }
 0x65e   :  { %14451 = vmatpush3.bf16.msra.mxu0 %v14805_v57 }
 0x65f   :  { %14473 = vmatpush3.bf16.msra.mxu1 %v14806_v61  ;;  %14452 = vmatprep.subr.bf16.mxu0 %v14807_v0 }
 0x660   :  { %14474 = vmatprep.subr.bf16.mxu1 %v14808_v25 }
 0x662   :  { %14453 = vmatpush3.bf16.msra.mxu0 %v14809_v28 }
 0x663   :  { %14475 = vmatpush3.bf16.msra.mxu1 %v14810_v44  ;;  %14500 = vmatprep.subr.bf16.mxu0 %v14829_v9 }
 0x664   :  { %14520 = vmatprep.subr.bf16.mxu1 %v14829_v9 }
 0x6f8   :  { %v11272_v21 = vpop.f32.mrb[4].mxu0  ;;  %v11805_v24 = vpop.f32.mrb[4].mxu1 }
 0x6f9   :  { %v14544_v22 = vadd.f32 %v11272_v21, %v1626_v12  ;;  %v11274_v38 = vpop.f32.mrb[5].mxu0  ;;  %v14546_v31 = vadd.f32 %v11805_v24, %v1634_v1  ;;  %v11807_v15 = vpop.f32.mrb[5].mxu1  ;;  %v14376_v21 = vld [vmem:[%s20158_s6] ss:$0 sm:$0xff] }
 0x6fa   :  { %v14545_v7 = vadd.f32 %v11274_v38, %v1630_v16  ;;  %v11276_v58 = vpop.f32.mrb[6].mxu0  ;;  %v14547_v27 = vadd.f32 %v11807_v15, %v1638_v20  ;;  %v11809_v63 = vpop.f32.mrb[6].mxu1  ;;  %v14825_v16 = vld [vmem:[%s20157_s7 + $0x30] sm:$0xff]   ;;  %v14826_v20 = vld [vmem:[%s20157_s7 + $0x38] sm:$0xff]  }
 0x6fb   :  { %v11816_v47 = vmax.f32 %v14544_v22, 0.0  ;;  %v11277_v43 = vpop.f32.mrb[7].mxu0  ;;  %v11818_v30 = vmax.f32 %v14546_v31, 0.0  ;;  %v11810_v26 = vpop.f32.mrb[7].mxu1 }
 0x6fc   :  { %v11817_v33 = vmax.f32 %v14545_v7, 0.0  ;;  %v11819_v35 = vmax.f32 %v14547_v27, 0.0 }
 0x6fd   :  { %v11824_v17 = vpack.c.bf16 %v11816_v47, %v11816_v47  ;;  %v11826_v13 = vpack.c.bf16 %v11818_v30, %v11818_v30 }
 0x6fe   :  { %v11825_v3 = vpack.c.bf16 %v11817_v33, %v11817_v33  ;;  %v11827_v56 = vpack.c.bf16 %v11819_v35, %v11819_v35 }
 0x700   :  { %12459 = vmatprep.mubr.bf16.mxu0 %v11825_v3  ;;  %12499 = vmatprep.mubr.bf16.mxu1 %v11827_v56 }
 0x701   :  { %12460 = vmatmul.mubr.bf16.vlgmr.msra.gmra.mrb[12].mxu0 %v11824_v17  ;;  %12500 = vmatmul.mubr.bf16.vlgmr.msra.gmra.mrb[12].mxu1 %v11826_v13 }
 0x702   :  { %14501 = vmatpush3.bf16.msra.mxu0 %v14811_v48  ;;  %14516 = vmatprep.mubr.msk.bf16.mxu0 %vm14830_vm1, %v14829_v9 }
 0x703   :  { %14502 = vmatprep.subr.bf16.mxu0 %v14829_v9  ;;  %14536 = vmatprep.mubr.msk.bf16.mxu1 %vm14830_vm1, %v14829_v9 }
 0x704   :  { %14521 = vmatpush3.bf16.msra.mxu1 %v14819_v50 }
 0x705   :  { %14522 = vmatprep.subr.bf16.mxu1 %v14829_v9 }
 0x706   :  { %14503 = vmatpush3.bf16.msra.mxu0 %v14812_v4 }
 0x707   :  { %14504 = vmatprep.subr.bf16.mxu0 %v14829_v9 }
 0x708   :  { %14523 = vmatpush3.bf16.msra.mxu1 %v14820_v52 }
 0x709   :  { %14524 = vmatprep.subr.bf16.mxu1 %v14829_v9 }
 0x70a   :  { %14505 = vmatpush3.bf16.msra.mxu0 %v14813_v36 }
 0x70b   :  { %14506 = vmatprep.subr.bf16.mxu0 %v14829_v9 }
 0x70c   :  { %14525 = vmatpush3.bf16.msra.mxu1 %v14821_v23 }
 0x70d   :  { %14526 = vmatprep.subr.bf16.mxu1 %v14829_v9 }
 0x70e   :  { %14507 = vmatpush3.bf16.msra.mxu0 %v14814_v59 }
 0x70f   :  { %14508 = vmatprep.subr.bf16.mxu0 %v14829_v9 }
 0x710   :  { %14527 = vmatpush3.bf16.msra.mxu1 %v14822_v18 }
 0x711   :  { %14528 = vmatprep.subr.bf16.mxu1 %v14829_v9 }
 0x712   :  { %14509 = vmatpush3.bf16.msra.mxu0 %v14815_v53 }
 0x713   :  { %14510 = vmatprep.subr.bf16.mxu0 %v14829_v9 }
 0x714   :  { %14529 = vmatpush3.bf16.msra.mxu1 %v14823_v54 }
 0x715   :  { %14530 = vmatprep.subr.bf16.mxu1 %v14829_v9 }
 0x716   :  { %14511 = vmatpush3.bf16.msra.mxu0 %v14816_v29 }
 0x717   :  { %14512 = vmatprep.subr.bf16.mxu0 %v14829_v9 }
 0x718   :  { %v14410_v39 = vpop.f32.mrb[8].mxu0  ;;  %14531 = vmatpush3.bf16.msra.mxu1 %v14824_v55 }
 0x719   :  { %v14432_v19 = vpop.f32.mrb[8].mxu1  ;;  %v14411_v32 = vpop.f32.mrb[9].mxu0  ;;  %14532 = vmatprep.subr.bf16.mxu1 %v14829_v9 }
 0x71a   :  { %v14412_v5 = vadd.f32 %v14411_v32, %v14410_v39  ;;  %v14433_v51 = vpop.f32.mrb[9].mxu1  ;;  %v14413_v41 = vpop.f32.mrb[10].mxu0  ;;  %14513 = vmatpush3.bf16.msra.mxu0 %v14817_v8 }
 0x71b   :  { %v14434_v42 = vadd.f32 %v14433_v51, %v14432_v19  ;;  %v14435_v37 = vpop.f32.mrb[10].mxu1  ;;  %v14414_v45 = vpop.f32.mrb[11].mxu0  ;;  %14514 = vmatprep.subr.bf16.mxu0 %v14829_v9 }
 0x71c   :  { %v12382_v34 = vadd.f32 %v14412_v5, %v14311_v40  ;;  %v14436_v46 = vpop.f32.mrb[11].mxu1  ;;  %14533 = vmatpush3.bf16.msra.mxu1 %v14825_v16 }
 0x71d   :  { %14534 = vmatprep.subr.bf16.mxu1 %v14829_v9  ;;  %v14385_v9 = vld [vmem:[%s20159_s8] ss:$0 sm:$0xff] }
 0x71e   :  { %v12422_v49 = vadd.f32 %v14434_v42, %v12382_v34  ;;  %14515 = vmatpush3.bf16.msra.mxu0 %v14818_v62 }
 0x720   :  { %14535 = vmatpush3.bf16.msra.mxu1 %v14826_v20 }
 0x7d4   :  { %v14454_v60 = vpop.f32.mrb[12].mxu0  ;;  %v14476_v2 = vpop.f32.mrb[12].mxu1 }
 0x7d5   :  { %v14455_v57 = vpop.f32.mrb[13].mxu0  ;;  %v14477_v0 = vpop.f32.mrb[13].mxu1 }
 0x7d6   :  { %v14456_v61 = vadd.f32 %v14455_v57, %v14454_v60  ;;  %v14457_v25 = vpop.f32.mrb[14].mxu0  ;;  %v14478_v28 = vadd.f32 %v14477_v0, %v14476_v2  ;;  %v14479_v44 = vpop.f32.mrb[14].mxu1 }
 0x7d7   :  { %v14458_v10 = vpop.f32.mrb[15].mxu0  ;;  %v14480_v11 = vpop.f32.mrb[15].mxu1 }
 0x7d8   :  { %v12462_v14 = vadd.f32 %v14456_v61, %v12422_v49 }
 0x7da   :  { %v12502_v6 = vadd.f32 %v14478_v28, %v12462_v14 }
 0x7dc   :  { %v12507_v12 = vmax.f32 %v12502_v6, 0.0 }
 0x7de   :  { %v12508_v1 = vpack.c.bf16 %v12507_v12, %v12507_v12 }
 0x7e0   :  { %14517 = vmatmul.mubr.bf16.vlgmr.msra.gmra.mrb[16].mxu0 %v12508_v1 }
 0x8b3   :  { %v12614_v22 = vpop.f32.mrb[16].mxu0 }
 0x8b4   :  { %v12615_v24 = vadd.f32 %v14376_v21, %v12614_v22  ;;  %v14518_v38 = vpop.f32.mrb[17].mxu0 }
 0x8b5   :  { %v12617_v31 = vpop.f32.mrb[18].mxu0 }
 0x8b6   :  { %v12620_v7 = vmax.f32 %v12615_v24, 0.0  ;;  %v14519_v15 = vpop.f32.mrb[19].mxu0 }
 0x8b8   :  { %v12621_v58 = vpack.c.bf16 %v12620_v7, %v12620_v7 }
 0x8ba   :  { %14537 = vmatmul.mubr.bf16.vlgmr.msra.gmra.mrb[16].mxu1 %v12621_v58 }
 0x98d   :  { %v12727_v47 = vpop.f32.mrb[16].mxu1 }
 0x98e   :  { %v12728_v27 = vadd.f32 %v14385_v9, %v12727_v47  ;;  %v14538_v63 = vpop.f32.mrb[17].mxu1 }
 0x98f   :  { %v12730_v43 = vpop.f32.mrb[18].mxu1 }
 0x990   :  { %12733 = vst [vmem:[%s20160_s9] sm:$0x3] %v12728_v27  ;;  %v14539_v30 = vpop.f32.mrb[19].mxu1 }

</bundles_post_ra>
